<compile_context>
chip_gen: v6e
topology: v6e:2x2x1
jax: 0.10.0
libtpu: 0.0.40
codegen_flags: <defaults>
</compile_context>

<pallas_src>
import functools

import jax
import jax.numpy as jnp
from jax.experimental import pallas as pl
from jax.experimental.pallas import tpu as pltpu

_F32 = jnp.float32
_BF16 = jnp.bfloat16

_GLOBAL_KEYS = ("g_scatter", "g_gather", "gn_g", "gn_b", "w_in", "b_in", "w_out", "b_out")
_LAYER_KEYS = ("ln0_g", "ln0_b", "wq0", "wk0", "wv0", "wo0", "bo0",
               "ln1_g", "ln1_b", "wq1", "wk1", "wv1", "wo1", "bo1",
               "ln2_g", "ln2_b", "w1a", "w1g", "b1a", "b1g", "w2", "b2")


# ----------------------------------------------------------------------------- kernel helpers

def _layer_norm_cm(h, gamma, beta, eps):
    """LayerNorm over the channel (sublane) axis of a channel-major (D, N) tile."""
    mu = jnp.mean(h, axis=0, keepdims=True)           # (1, N)
    d = h - mu                                        # reuse (x - mu) for the variance
    var = jnp.mean(d * d, axis=0, keepdims=True)      # (1, N)
    return d * jax.lax.rsqrt(var + eps) * gamma + beta


def _softmax_rows(s):
    """Stable softmax over the last (lane) axis; denominator on the EUP (approx recip)."""
    s = s - jnp.max(s, axis=-1, keepdims=True)
    e = jnp.exp(s)
    return e * pl.reciprocal(jnp.sum(e, axis=-1, keepdims=True), approx=True)


def _attention_cm(h, kv_b, wq, wk, wv, wo, bo, ln_g, ln_b,
                  *, n_heads, d_head, ln_eps):
    """(Cross-)attention + out-proj + residual on a channel-major residual stream.

    h     : (D, N)      f32 residual stream (channel-major)
    kv_b  : None for self-attention, else (M, d_cond) bf16 context (token-major)
    wq    : (D, D)      bf16, 1/sqrt(d_head) pre-folded
    wk,wv : (D, D) or (D, d_cond) bf16
    wo    : (D, D)      bf16 full-width output projection (torch wo transposed)
    bo    : (D, 1)      f32
    """
    hn = _layer_norm_cm(h, ln_g, ln_b, ln_eps)
    hn_b = hn.astype(_BF16)

    # Full-width Q/K/V projections (wide MXU matmuls), channel-major results.
    qT = jnp.dot(wq, hn_b, preferred_element_type=_F32)               # (D, N)
    if kv_b is None:
        kT = jnp.dot(wk, hn_b, preferred_element_type=_F32)           # (D, N)
        vT = jnp.dot(wv, hn_b, preferred_element_type=_F32)
    else:
        kT = jax.lax.dot_general(wk, kv_b, (((1,), (1,)), ((), ())),
                                 preferred_element_type=_F32)         # (D, M)
        vT = jax.lax.dot_general(wv, kv_b, (((1,), (1,)), ((), ())),
                                 preferred_element_type=_F32)

    # Per-head scores/softmax/values (static unrolled loop; 8-aligned sublane slices),
    # then ONE full-width output projection over the concatenated head outputs.
    o_parts = []
    for hh in range(n_heads):
        rows = slice(hh * d_head, (hh + 1) * d_head)
        q_h = qT[rows, :].astype(_BF16)                               # (dh, N)
        k_h = kT[rows, :].astype(_BF16)                               # (dh, M)
        v_h = vT[rows, :].astype(_BF16)                               # (dh, M)
        s = jax.lax.dot_general(q_h, k_h, (((0,), (0,)), ((), ())),
                                preferred_element_type=_F32)          # (N, M) = q^T k (scaled)
        p = _softmax_rows(s).astype(_BF16)                            # (N, M)
        o_parts.append(jax.lax.dot_general(v_h, p, (((1,), (1,)), ((), ())),
                                           preferred_element_type=_F32))  # (dh, N)
    o_all = o_parts[0] if n_heads == 1 else jnp.concatenate(o_parts, axis=0)  # (D, N) f32
    return h + bo + jnp.dot(wo, o_all.astype(_BF16), preferred_element_type=_F32)


def _geglu_ff_cm(h, w1a, w1g, b1a, b1g, w2, b2, ln_g, ln_b, *, ln_eps):
    """LayerNorm + GeGLU feed-forward + residual, channel-major."""
    hn = _layer_norm_cm(h, ln_g, ln_b, ln_eps)
    hn_b = hn.astype(_BF16)
    ua = jnp.dot(w1a, hn_b, preferred_element_type=_F32) + b1a        # (d_ff, N) value branch
    ug = jnp.dot(w1g, hn_b, preferred_element_type=_F32) + b1g        # (d_ff, N) gate branch
    gelu = 0.5 * ug * (1.0 + jax.lax.erf(ug * 0.7071067811865476))    # exact erf GELU
    return h + jnp.dot(w2, (ua * gelu).astype(_BF16),
                       preferred_element_type=_F32) + b2


# ----------------------------------------------------------------------------- fused kernel

def _spatial_transformer_kernel(x_ref, ctx_ref, *refs,
                                n_layers, n_heads, d_head,
                                gn_eps, ln_eps, inv_count):
    o_ref = refs[-1]
    g = dict(zip(_GLOBAL_KEYS, refs[:len(_GLOBAL_KEYS)]))
    lyr = dict(zip(_LAYER_KEYS, refs[len(_GLOBAL_KEYS):len(_GLOBAL_KEYS) + len(_LAYER_KEYS)]))

    x = x_ref[0]                                        # (C, HW) f32, channel-major
    ctx_b = ctx_ref[0].astype(_BF16)                    # (T, d_cond) bf16, cast once, reused

    # ---- GroupNorm(32, eps=1e-6, affine) fused with the 1x1 proj_in conv ------------
    g_scatter = g["g_scatter"][...]                     # (G, C) one-hot channel->group
    g_gather = g["g_gather"][...]                       # (C, G)
    ch_sum = jnp.sum(x, axis=1, keepdims=True)          # (C, 1) per-channel sums
    grp_sum = jnp.dot(g_scatter, ch_sum, preferred_element_type=_F32)
    mean_c = jnp.dot(g_gather, grp_sum, preferred_element_type=_F32) * inv_count
    xc = x - mean_c                                     # two-pass variance (no cancellation)
    ch_sq = jnp.sum(xc * xc, axis=1, keepdims=True)
    grp_sq = jnp.dot(g_scatter, ch_sq, preferred_element_type=_F32)
    var_c = jnp.maximum(jnp.dot(g_gather, grp_sq,
                                preferred_element_type=_F32) * inv_count, 0.0)
    xn = xc * jax.lax.rsqrt(var_c + gn_eps) * g["gn_g"][...] + g["gn_b"][...]
    h = jnp.dot(g["w_in"][...], xn.astype(_BF16),
                preferred_element_type=_F32) + g["b_in"][...]          # (D, HW)

    # ---- BasicTransformerBlocks, residual stream resident in VMEM -------------------
    for l in range(n_layers):
        h = _attention_cm(h, None,
                          lyr["wq0"][l], lyr["wk0"][l], lyr["wv0"][l], lyr["wo0"][l],
                          lyr["bo0"][l], lyr["ln0_g"][l], lyr["ln0_b"][l],
                          n_heads=n_heads, d_head=d_head, ln_eps=ln_eps)
        h = _attention_cm(h, ctx_b,
                          lyr["wq1"][l], lyr["wk1"][l], lyr["wv1"][l], lyr["wo1"][l],
                          lyr["bo1"][l], lyr["ln1_g"][l], lyr["ln1_b"][l],
                          n_heads=n_heads, d_head=d_head, ln_eps=ln_eps)
        h = _geglu_ff_cm(h, lyr["w1a"][l], lyr["w1g"][l], lyr["b1a"][l], lyr["b1g"][l],
                         lyr["w2"][l], lyr["b2"][l], lyr["ln2_g"][l], lyr["ln2_b"][l],
                         ln_eps=ln_eps)

    # ---- 1x1 proj_out + residual with the original input (still channel-major) ------
    o_ref[0] = (jnp.dot(g["w_out"][...], h.astype(_BF16), preferred_element_type=_F32)
                + g["b_out"][...] + x)


# ----------------------------------------------------------------------------- wrapper / glue

def _const_block_spec(shape):
    nd = len(shape)
    return pl.BlockSpec(tuple(shape), lambda b, _nd=nd: (0,) * _nd)


def _prepare_kernel_params(params, *, channels, n_heads, d_head, n_groups):
    """Transpose / cast / stack the torch-convention f32 params for the fused kernel."""
    C = channels
    D = n_heads * d_head
    scale = float(d_head) ** -0.5
    gidx = jnp.arange(C) // (C // n_groups)
    g_scatter = (jnp.arange(n_groups)[:, None] == gidx[None, :]).astype(_F32)   # (G, C)

    glob = dict(
        g_scatter=g_scatter,
        g_gather=g_scatter.T,
        gn_g=params["gn_g"].reshape(C, 1),
        gn_b=params["gn_b"].reshape(C, 1),
        w_in=params["w_in"].T.astype(_BF16),             # (D, C)
        b_in=params["b_in"].reshape(D, 1),
        w_out=params["w_out"].T.astype(_BF16),           # (C, D)
        b_out=params["b_out"].reshape(C, 1),
    )

    def per_layer(L):
        d_ff = L["w2"].shape[0]
        return dict(
            ln0_g=L["ln0_g"].reshape(D, 1), ln0_b=L["ln0_b"].reshape(D, 1),
            wq0=(L["wq0"] * scale).T.astype(_BF16),       # scale folded into wq
            wk0=L["wk0"].T.astype(_BF16),
            wv0=L["wv0"].T.astype(_BF16),
            wo0=L["wo0"].T.astype(_BF16),                 # (D, D) full-width out-proj
            bo0=L["bo0"].reshape(D, 1),
            ln1_g=L["ln1_g"].reshape(D, 1), ln1_b=L["ln1_b"].reshape(D, 1),
            wq1=(L["wq1"] * scale).T.astype(_BF16),
            wk1=L["wk1"].T.astype(_BF16),                 # (D, d_cond)
            wv1=L["wv1"].T.astype(_BF16),
            wo1=L["wo1"].T.astype(_BF16),                 # (D, D)
            bo1=L["bo1"].reshape(D, 1),
            ln2_g=L["ln2_g"].reshape(D, 1), ln2_b=L["ln2_b"].reshape(D, 1),
            w1a=L["w1"][:, :d_ff].T.astype(_BF16),        # (d_ff, D) value branch
            w1g=L["w1"][:, d_ff:].T.astype(_BF16),        # (d_ff, D) gate branch
            b1a=L["b1"][0, :d_ff].reshape(d_ff, 1),
            b1g=L["b1"][0, d_ff:].reshape(d_ff, 1),
            w2=L["w2"].T.astype(_BF16),                   # (D, d_ff)
            b2=L["b2"].reshape(D, 1),
        )

    per = [per_layer(L) for L in params["layers"]]
    layers = {k: jnp.stack([p[k] for p in per], axis=0) for k in _LAYER_KEYS}
    return glob, layers


def spatial_transformer_forward(x_nchw, context, params, *, n_heads, d_head, n_groups=32):
    B, C, H, W = x_nchw.shape
    HW = H * W
    n_layers = len(params["layers"])
    cpg = C // n_groups

    x_cm = x_nchw.reshape(B, C, HW)        # free metadata reshape, stays channel-major
    glob, layers = _prepare_kernel_params(params, channels=C, n_heads=n_heads,
                                          d_head=d_head, n_groups=n_groups)

    inputs = ([x_cm, context]
              + [glob[k] for k in _GLOBAL_KEYS]
              + [layers[k] for k in _LAYER_KEYS])
    in_specs = [pl.BlockSpec((1, C, HW), lambda b: (b, 0, 0)),
                pl.BlockSpec((1,) + tuple(context.shape[1:]), lambda b: (b, 0, 0))]
    in_specs += [_const_block_spec(a.shape) for a in inputs[2:]]

    kernel = functools.partial(
        _spatial_transformer_kernel,
        n_layers=n_layers, n_heads=n_heads, d_head=d_head,
        gn_eps=1e-6, ln_eps=1e-5, inv_count=1.0 / float(HW * cpg))

    y_cm = pl.pallas_call(
        kernel,
        out_shape=jax.ShapeDtypeStruct((B, C, HW), jnp.float32),
        grid=(B,),
        in_specs=in_specs,
        out_specs=pl.BlockSpec((1, C, HW), lambda b: (b, 0, 0)),
        compiler_params=pltpu.CompilerParams(
            dimension_semantics=("parallel",),
            vmem_limit_bytes=64 * 1024 * 1024),
    )(*inputs)
    return y_cm.reshape(B, C, H, W)


# ----------------------------------------------------------------------------- params

def init_params(key, channels, n_heads, d_head, n_layers, d_cond, n_groups=32):
    d_model = n_heads * d_head
    d_ff = 4 * d_model
    keys = iter(jax.random.split(key, 8 + 16 * n_layers))

    def w(shape, scale=0.05):
        return jax.random.normal(next(keys), shape, _F32) * scale

    params = dict(
        gn_g=jnp.ones((1, channels), _F32),
        gn_b=jnp.zeros((1, channels), _F32),
        w_in=w((channels, d_model)),          # proj_in 1x1 conv weight as (C, d_model)
        b_in=w((1, d_model), 0.01),
        # NOTE: reference module zero-inits proj_out; non-zero here to exercise the kernel path.
        w_out=w((d_model, channels)),
        b_out=w((1, channels), 0.01),
        layers=[],
    )
    for _ in range(n_layers):
        params["layers"].append(dict(
            ln0_g=jnp.ones((1, d_model), _F32), ln0_b=jnp.zeros((1, d_model), _F32),
            wq0=w((d_model, d_model)), wk0=w((d_model, d_model)), wv0=w((d_model, d_model)),
            wo0=w((d_model, d_model)), bo0=w((1, d_model), 0.01),
            ln1_g=jnp.ones((1, d_model), _F32), ln1_b=jnp.zeros((1, d_model), _F32),
            wq1=w((d_model, d_model)), wk1=w((d_cond, d_model)), wv1=w((d_cond, d_model)),
            wo1=w((d_model, d_model)), bo1=w((1, d_model), 0.01),
            ln2_g=jnp.ones((1, d_model), _F32), ln2_b=jnp.zeros((1, d_model), _F32),
            w1=w((d_model, 2 * d_ff)), b1=w((1, 2 * d_ff), 0.01),
            w2=w((d_ff, d_model)), b2=w((1, d_model), 0.01),
        ))
    return params


# ----------------------------------------------------------------------------- pure-JAX reference

def reference_forward(x_nchw, context, params, *, n_heads, d_head, n_groups=32):
    B, C, H, W = x_nchw.shape
    HW = H * W
    x_tok = jnp.transpose(x_nchw, (0, 2, 3, 1)).reshape(B, HW, C)
    cpg = C // n_groups
    xg = x_tok.reshape(B, HW, n_groups, cpg)
    mean = jnp.mean(xg, axis=(1, 3), keepdims=True)
    var = jnp.mean((xg - mean) ** 2, axis=(1, 3), keepdims=True)
    xn = ((xg - mean) / jnp.sqrt(var + 1e-6)).reshape(B, HW, C)
    xn = xn * params["gn_g"][0] + params["gn_b"][0]
    h = xn @ params["w_in"] + params["b_in"][0]

    def ln(z, g, b):
        mu = jnp.mean(z, -1, keepdims=True)
        v = jnp.mean((z - mu) ** 2, -1, keepdims=True)
        return (z - mu) / jnp.sqrt(v + 1e-5) * g[0] + b[0]

    def attn(xin, kv, wq, wk, wv, wo, bo):
        q = xin @ wq
        k = kv @ wk
        v = kv @ wv
        Bq, N, _ = q.shape
        M = k.shape[1]
        q = q.reshape(Bq, N, n_heads, d_head)
        k = k.reshape(Bq, M, n_heads, d_head)
        v = v.reshape(Bq, M, n_heads, d_head)
        s = jnp.einsum('bihd,bjhd->bhij', q, k) * (float(d_head) ** -0.5)
        p = jax.nn.softmax(s, axis=-1)
        o = jnp.einsum('bhij,bjhd->bihd', p, v).reshape(Bq, N, n_heads * d_head)
        return o @ wo + bo[0]

    for L in params["layers"]:
        hn = ln(h, L["ln0_g"], L["ln0_b"])
        h = attn(hn, hn, L["wq0"], L["wk0"], L["wv0"], L["wo0"], L["bo0"]) + h
        hn = ln(h, L["ln1_g"], L["ln1_b"])
        h = attn(hn, context, L["wq1"], L["wk1"], L["wv1"], L["wo1"], L["bo1"]) + h
        hn = ln(h, L["ln2_g"], L["ln2_b"])
        u = hn @ L["w1"] + L["b1"][0]
        d_ff = L["w2"].shape[0]
        a, g = u[..., :d_ff], u[..., d_ff:]
        gelu = 0.5 * g * (1.0 + jax.lax.erf(g * 0.7071067811865476))
        h = (a * gelu) @ L["w2"] + L["b2"][0] + h

    y = h @ params["w_out"] + params["b_out"][0] + x_tok
    return jnp.transpose(y.reshape(B, H, W, C), (0, 3, 1, 2))


# ----------------------------------------------------------------------------- main

if __name__ == "__main__":
    B, C, H, W = 2, 32, 8, 8           # channels divisible by 32 (GroupNorm requirement)
    n_heads, d_head = 4, 8             # d_model = 32 (d_head multiple of 8 -> aligned head slices)
    n_layers, d_cond, ctx_len = 2, 16, 8

    key = jax.random.PRNGKey(0)
    kx, kc, kp = jax.random.split(key, 3)
    x = jax.random.normal(kx, (B, C, H, W), _F32)
    context = jax.random.normal(kc, (B, ctx_len, d_cond), _F32)
    params = init_params(kp, C, n_heads, d_head, n_layers, d_cond)

    out = spatial_transformer_forward(x, context, params, n_heads=n_heads, d_head=d_head)
    out = jax.block_until_ready(out)

    ref = reference_forward(x, context, params, n_heads=n_heads, d_head=d_head)
    assert out.shape == x.shape and out.dtype == x.dtype
    max_err = float(jnp.max(jnp.abs(out - ref)))
    # Kernel uses bf16 MXU operands + approx-reciprocal softmax; reference is pure f32.
    assert max_err < 3e-2, f"Pallas vs JAX reference mismatch: {max_err}"
    print("KERNEL_OK")
</pallas_src>

<mosaic_0001>
module attributes {stable_mosaic.version = 11 : i64} {
  func.func @_spatial_transformer_kernel(%arg0: i32, %arg1: memref<1x32x64xf32, #tpu.memory_space<vmem>>, %arg2: memref<1x8x16xf32, #tpu.memory_space<vmem>>, %arg3: memref<32x32xf32, #tpu.memory_space<vmem>>, %arg4: memref<32x32xf32, #tpu.memory_space<vmem>>, %arg5: memref<32x1xf32, #tpu.memory_space<vmem>>, %arg6: memref<32x1xf32, #tpu.memory_space<vmem>>, %arg7: memref<32x32xbf16, #tpu.memory_space<vmem>>, %arg8: memref<32x1xf32, #tpu.memory_space<vmem>>, %arg9: memref<32x32xbf16, #tpu.memory_space<vmem>>, %arg10: memref<32x1xf32, #tpu.memory_space<vmem>>, %arg11: memref<2x32x1xf32, #tpu.memory_space<vmem>>, %arg12: memref<2x32x1xf32, #tpu.memory_space<vmem>>, %arg13: memref<2x32x32xbf16, #tpu.memory_space<vmem>>, %arg14: memref<2x32x32xbf16, #tpu.memory_space<vmem>>, %arg15: memref<2x32x32xbf16, #tpu.memory_space<vmem>>, %arg16: memref<2x32x32xbf16, #tpu.memory_space<vmem>>, %arg17: memref<2x32x1xf32, #tpu.memory_space<vmem>>, %arg18: memref<2x32x1xf32, #tpu.memory_space<vmem>>, %arg19: memref<2x32x1xf32, #tpu.memory_space<vmem>>, %arg20: memref<2x32x32xbf16, #tpu.memory_space<vmem>>, %arg21: memref<2x32x16xbf16, #tpu.memory_space<vmem>>, %arg22: memref<2x32x16xbf16, #tpu.memory_space<vmem>>, %arg23: memref<2x32x32xbf16, #tpu.memory_space<vmem>>, %arg24: memref<2x32x1xf32, #tpu.memory_space<vmem>>, %arg25: memref<2x32x1xf32, #tpu.memory_space<vmem>>, %arg26: memref<2x32x1xf32, #tpu.memory_space<vmem>>, %arg27: memref<2x128x32xbf16, #tpu.memory_space<vmem>>, %arg28: memref<2x128x32xbf16, #tpu.memory_space<vmem>>, %arg29: memref<2x128x1xf32, #tpu.memory_space<vmem>>, %arg30: memref<2x128x1xf32, #tpu.memory_space<vmem>>, %arg31: memref<2x32x128xbf16, #tpu.memory_space<vmem>>, %arg32: memref<2x32x1xf32, #tpu.memory_space<vmem>>, %arg33: memref<1x32x64xf32, #tpu.memory_space<vmem>>) attributes {dimension_semantics = [#tpu.dimension_semantics<parallel>], iteration_bounds = array<i64: 2>, scalar_prefetch = 0 : i64, scratch_operands = 0 : i64, tpu.core_type = #tpu.core_type<tc>, window_params = [{transform_indices = @transform_0, window_bounds = array<i64: 1, 32, 64>}, {transform_indices = @transform_1, window_bounds = array<i64: 1, 8, 16>}, {pipeline_mode = #tpu.pipeline_mode<synchronous>, transform_indices = @transform_2, window_bounds = array<i64: 32, 32>}, {pipeline_mode = #tpu.pipeline_mode<synchronous>, transform_indices = @transform_3, window_bounds = array<i64: 32, 32>}, {pipeline_mode = #tpu.pipeline_mode<synchronous>, transform_indices = @transform_4, window_bounds = array<i64: 32, 1>}, {pipeline_mode = #tpu.pipeline_mode<synchronous>, transform_indices = @transform_5, window_bounds = array<i64: 32, 1>}, {pipeline_mode = #tpu.pipeline_mode<synchronous>, transform_indices = @transform_6, window_bounds = array<i64: 32, 32>}, {pipeline_mode = #tpu.pipeline_mode<synchronous>, transform_indices = @transform_7, window_bounds = array<i64: 32, 1>}, {pipeline_mode = #tpu.pipeline_mode<synchronous>, transform_indices = @transform_8, window_bounds = array<i64: 32, 32>}, {pipeline_mode = #tpu.pipeline_mode<synchronous>, transform_indices = @transform_9, window_bounds = array<i64: 32, 1>}, {pipeline_mode = #tpu.pipeline_mode<synchronous>, transform_indices = @transform_10, window_bounds = array<i64: 2, 32, 1>}, {pipeline_mode = #tpu.pipeline_mode<synchronous>, transform_indices = @transform_11, window_bounds = array<i64: 2, 32, 1>}, {pipeline_mode = #tpu.pipeline_mode<synchronous>, transform_indices = @transform_12, window_bounds = array<i64: 2, 32, 32>}, {pipeline_mode = #tpu.pipeline_mode<synchronous>, transform_indices = @transform_13, window_bounds = array<i64: 2, 32, 32>}, {pipeline_mode = #tpu.pipeline_mode<synchronous>, transform_indices = @transform_14, window_bounds = array<i64: 2, 32, 32>}, {pipeline_mode = #tpu.pipeline_mode<synchronous>, transform_indices = @transform_15, window_bounds = array<i64: 2, 32, 32>}, {pipeline_mode = #tpu.pipeline_mode<synchronous>, transform_indices = @transform_16, window_bounds = array<i64: 2, 32, 1>}, {pipeline_mode = #tpu.pipeline_mode<synchronous>, transform_indices = @transform_17, window_bounds = array<i64: 2, 32, 1>}, {pipeline_mode = #tpu.pipeline_mode<synchronous>, transform_indices = @transform_18, window_bounds = array<i64: 2, 32, 1>}, {pipeline_mode = #tpu.pipeline_mode<synchronous>, transform_indices = @transform_19, window_bounds = array<i64: 2, 32, 32>}, {pipeline_mode = #tpu.pipeline_mode<synchronous>, transform_indices = @transform_20, window_bounds = array<i64: 2, 32, 16>}, {pipeline_mode = #tpu.pipeline_mode<synchronous>, transform_indices = @transform_21, window_bounds = array<i64: 2, 32, 16>}, {pipeline_mode = #tpu.pipeline_mode<synchronous>, transform_indices = @transform_22, window_bounds = array<i64: 2, 32, 32>}, {pipeline_mode = #tpu.pipeline_mode<synchronous>, transform_indices = @transform_23, window_bounds = array<i64: 2, 32, 1>}, {pipeline_mode = #tpu.pipeline_mode<synchronous>, transform_indices = @transform_24, window_bounds = array<i64: 2, 32, 1>}, {pipeline_mode = #tpu.pipeline_mode<synchronous>, transform_indices = @transform_25, window_bounds = array<i64: 2, 32, 1>}, {pipeline_mode = #tpu.pipeline_mode<synchronous>, transform_indices = @transform_26, window_bounds = array<i64: 2, 128, 32>}, {pipeline_mode = #tpu.pipeline_mode<synchronous>, transform_indices = @transform_27, window_bounds = array<i64: 2, 128, 32>}, {pipeline_mode = #tpu.pipeline_mode<synchronous>, transform_indices = @transform_28, window_bounds = array<i64: 2, 128, 1>}, {pipeline_mode = #tpu.pipeline_mode<synchronous>, transform_indices = @transform_29, window_bounds = array<i64: 2, 128, 1>}, {pipeline_mode = #tpu.pipeline_mode<synchronous>, transform_indices = @transform_30, window_bounds = array<i64: 2, 32, 128>}, {pipeline_mode = #tpu.pipeline_mode<synchronous>, transform_indices = @transform_31, window_bounds = array<i64: 2, 32, 1>}, {transform_indices = @transform_32, window_bounds = array<i64: 1, 32, 64>}]} {
    %c0 = arith.constant 0 : index
    %c0_0 = arith.constant 0 : index
    %c0_1 = arith.constant 0 : index
    %0 = vector.load %arg1[%c0, %c0_0, %c0_1] : memref<1x32x64xf32, #tpu.memory_space<vmem>>, vector<1x32x64xf32>
    %1 = vector.shape_cast %0 : vector<1x32x64xf32> to vector<32x64xf32>
    %c0_2 = arith.constant 0 : index
    %c0_3 = arith.constant 0 : index
    %c0_4 = arith.constant 0 : index
    %2 = vector.load %arg2[%c0_2, %c0_3, %c0_4] : memref<1x8x16xf32, #tpu.memory_space<vmem>>, vector<1x8x16xf32>
    %3 = vector.shape_cast %2 : vector<1x8x16xf32> to vector<8x16xf32>
    %4 = arith.truncf %3 : vector<8x16xf32> to vector<8x16xbf16>
    %c0_5 = arith.constant 0 : index
    %c0_6 = arith.constant 0 : index
    %5 = vector.load %arg3[%c0_5, %c0_6] : memref<32x32xf32, #tpu.memory_space<vmem>>, vector<32x32xf32>
    %c0_7 = arith.constant 0 : index
    %c0_8 = arith.constant 0 : index
    %6 = vector.load %arg4[%c0_7, %c0_8] : memref<32x32xf32, #tpu.memory_space<vmem>>, vector<32x32xf32>
    %cst = arith.constant dense<0.000000e+00> : vector<32xf32>
    %7 = vector.multi_reduction <add>, %1, %cst [1] : vector<32x64xf32> to vector<32xf32>
    %8 = vector.shape_cast %7 : vector<32xf32> to vector<32x1xf32>
    %cst_9 = arith.constant dense<0.000000e+00> : vector<32x1xf32>
    %9 = tpu.matmul %5, %8, %cst_9 {dimension_numbers = #tpu.dot_dimension_numbers<[1], [0], [0], [1], [0, 0, 1, 1], [], []>} : vector<32x32xf32>, vector<32x1xf32>, vector<32x1xf32> -> vector<32x1xf32>
    %cst_10 = arith.constant dense<0.000000e+00> : vector<32x1xf32>
    %10 = tpu.matmul %6, %9, %cst_10 {dimension_numbers = #tpu.dot_dimension_numbers<[1], [0], [0], [1], [0, 0, 1, 1], [], []>} : vector<32x32xf32>, vector<32x1xf32>, vector<32x1xf32> -> vector<32x1xf32>
    %cst_11 = arith.constant 1.562500e-02 : f32
    %11 = vector.broadcast %cst_11 : f32 to vector<32x1xf32>
    %12 = arith.mulf %10, %11 : vector<32x1xf32>
    %13 = vector.broadcast %12 : vector<32x1xf32> to vector<32x64xf32>
    %14 = arith.subf %1, %13 : vector<32x64xf32>
    %15 = arith.mulf %14, %14 : vector<32x64xf32>
    %cst_12 = arith.constant dense<0.000000e+00> : vector<32xf32>
    %16 = vector.multi_reduction <add>, %15, %cst_12 [1] : vector<32x64xf32> to vector<32xf32>
    %17 = vector.shape_cast %16 : vector<32xf32> to vector<32x1xf32>
    %cst_13 = arith.constant dense<0.000000e+00> : vector<32x1xf32>
    %18 = tpu.matmul %5, %17, %cst_13 {dimension_numbers = #tpu.dot_dimension_numbers<[1], [0], [0], [1], [0, 0, 1, 1], [], []>} : vector<32x32xf32>, vector<32x1xf32>, vector<32x1xf32> -> vector<32x1xf32>
    %cst_14 = arith.constant dense<0.000000e+00> : vector<32x1xf32>
    %19 = tpu.matmul %6, %18, %cst_14 {dimension_numbers = #tpu.dot_dimension_numbers<[1], [0], [0], [1], [0, 0, 1, 1], [], []>} : vector<32x32xf32>, vector<32x1xf32>, vector<32x1xf32> -> vector<32x1xf32>
    %cst_15 = arith.constant 1.562500e-02 : f32
    %20 = vector.broadcast %cst_15 : f32 to vector<32x1xf32>
    %21 = arith.mulf %19, %20 : vector<32x1xf32>
    %cst_16 = arith.constant 0.000000e+00 : f32
    %22 = vector.broadcast %cst_16 : f32 to vector<32x1xf32>
    %23 = arith.maximumf %21, %22 : vector<32x1xf32>
    %cst_17 = arith.constant 9.99999997E-7 : f32
    %24 = vector.broadcast %cst_17 : f32 to vector<32x1xf32>
    %25 = arith.addf %23, %24 : vector<32x1xf32>
    %26 = math.rsqrt %25 : vector<32x1xf32>
    %27 = vector.broadcast %26 : vector<32x1xf32> to vector<32x64xf32>
    %28 = arith.mulf %14, %27 : vector<32x64xf32>
    %c0_18 = arith.constant 0 : index
    %c0_19 = arith.constant 0 : index
    %29 = vector.load %arg5[%c0_18, %c0_19] : memref<32x1xf32, #tpu.memory_space<vmem>>, vector<32x1xf32>
    %30 = vector.broadcast %29 : vector<32x1xf32> to vector<32x64xf32>
    %31 = arith.mulf %28, %30 : vector<32x64xf32>
    %c0_20 = arith.constant 0 : index
    %c0_21 = arith.constant 0 : index
    %32 = vector.load %arg6[%c0_20, %c0_21] : memref<32x1xf32, #tpu.memory_space<vmem>>, vector<32x1xf32>
    %33 = vector.broadcast %32 : vector<32x1xf32> to vector<32x64xf32>
    %34 = arith.addf %31, %33 : vector<32x64xf32>
    %c0_22 = arith.constant 0 : index
    %c0_23 = arith.constant 0 : index
    %35 = vector.load %arg7[%c0_22, %c0_23] : memref<32x32xbf16, #tpu.memory_space<vmem>>, vector<32x32xbf16>
    %36 = arith.truncf %34 : vector<32x64xf32> to vector<32x64xbf16>
    %cst_24 = arith.constant dense<0.000000e+00> : vector<32x64xf32>
    %37 = tpu.matmul %35, %36, %cst_24 {dimension_numbers = #tpu.dot_dimension_numbers<[1], [0], [0], [1], [0, 0, 1, 1], [], []>} : vector<32x32xbf16>, vector<32x64xbf16>, vector<32x64xf32> -> vector<32x64xf32>
    %c0_25 = arith.constant 0 : index
    %c0_26 = arith.constant 0 : index
    %38 = vector.load %arg8[%c0_25, %c0_26] : memref<32x1xf32, #tpu.memory_space<vmem>>, vector<32x1xf32>
    %39 = vector.broadcast %38 : vector<32x1xf32> to vector<32x64xf32>
    %40 = arith.addf %37, %39 : vector<32x64xf32>
    %c0_27 = arith.constant 0 : index
    %c0_28 = arith.constant 0 : index
    %c0_29 = arith.constant 0 : index
    %41 = vector.load %arg13[%c0_27, %c0_28, %c0_29] : memref<2x32x32xbf16, #tpu.memory_space<vmem>>, vector<1x32x32xbf16>
    %42 = vector.shape_cast %41 : vector<1x32x32xbf16> to vector<32x32xbf16>
    %c0_30 = arith.constant 0 : index
    %c0_31 = arith.constant 0 : index
    %c0_32 = arith.constant 0 : index
    %43 = vector.load %arg14[%c0_30, %c0_31, %c0_32] : memref<2x32x32xbf16, #tpu.memory_space<vmem>>, vector<1x32x32xbf16>
    %44 = vector.shape_cast %43 : vector<1x32x32xbf16> to vector<32x32xbf16>
    %c0_33 = arith.constant 0 : index
    %c0_34 = arith.constant 0 : index
    %c0_35 = arith.constant 0 : index
    %45 = vector.load %arg15[%c0_33, %c0_34, %c0_35] : memref<2x32x32xbf16, #tpu.memory_space<vmem>>, vector<1x32x32xbf16>
    %46 = vector.shape_cast %45 : vector<1x32x32xbf16> to vector<32x32xbf16>
    %c0_36 = arith.constant 0 : index
    %c0_37 = arith.constant 0 : index
    %c0_38 = arith.constant 0 : index
    %47 = vector.load %arg16[%c0_36, %c0_37, %c0_38] : memref<2x32x32xbf16, #tpu.memory_space<vmem>>, vector<1x32x32xbf16>
    %48 = vector.shape_cast %47 : vector<1x32x32xbf16> to vector<32x32xbf16>
    %c0_39 = arith.constant 0 : index
    %c0_40 = arith.constant 0 : index
    %c0_41 = arith.constant 0 : index
    %49 = vector.load %arg17[%c0_39, %c0_40, %c0_41] : memref<2x32x1xf32, #tpu.memory_space<vmem>>, vector<1x32x1xf32>
    %50 = vector.shape_cast %49 : vector<1x32x1xf32> to vector<32x1xf32>
    %c0_42 = arith.constant 0 : index
    %c0_43 = arith.constant 0 : index
    %c0_44 = arith.constant 0 : index
    %51 = vector.load %arg11[%c0_42, %c0_43, %c0_44] : memref<2x32x1xf32, #tpu.memory_space<vmem>>, vector<1x32x1xf32>
    %52 = vector.shape_cast %51 : vector<1x32x1xf32> to vector<32x1xf32>
    %c0_45 = arith.constant 0 : index
    %c0_46 = arith.constant 0 : index
    %c0_47 = arith.constant 0 : index
    %53 = vector.load %arg12[%c0_45, %c0_46, %c0_47] : memref<2x32x1xf32, #tpu.memory_space<vmem>>, vector<1x32x1xf32>
    %54 = vector.shape_cast %53 : vector<1x32x1xf32> to vector<32x1xf32>
    %cst_48 = arith.constant dense<0.000000e+00> : vector<64xf32>
    %55 = vector.multi_reduction <add>, %40, %cst_48 [0] : vector<32x64xf32> to vector<64xf32>
    %56 = vector.shape_cast %55 : vector<64xf32> to vector<1x64xf32>
    %cst_49 = arith.constant 3.200000e+01 : f32
    %57 = vector.broadcast %cst_49 : f32 to vector<1x64xf32>
    %58 = arith.divf %56, %57 : vector<1x64xf32>
    %59 = vector.broadcast %58 : vector<1x64xf32> to vector<32x64xf32>
    %60 = arith.subf %40, %59 : vector<32x64xf32>
    %61 = arith.mulf %60, %60 : vector<32x64xf32>
    %cst_50 = arith.constant dense<0.000000e+00> : vector<64xf32>
    %62 = vector.multi_reduction <add>, %61, %cst_50 [0] : vector<32x64xf32> to vector<64xf32>
    %63 = vector.shape_cast %62 : vector<64xf32> to vector<1x64xf32>
    %cst_51 = arith.constant 3.200000e+01 : f32
    %64 = vector.broadcast %cst_51 : f32 to vector<1x64xf32>
    %65 = arith.divf %63, %64 : vector<1x64xf32>
    %cst_52 = arith.constant 9.99999974E-6 : f32
    %66 = vector.broadcast %cst_52 : f32 to vector<1x64xf32>
    %67 = arith.addf %65, %66 : vector<1x64xf32>
    %68 = math.rsqrt %67 : vector<1x64xf32>
    %69 = vector.broadcast %68 : vector<1x64xf32> to vector<32x64xf32>
    %70 = arith.mulf %60, %69 : vector<32x64xf32>
    %71 = vector.broadcast %52 : vector<32x1xf32> to vector<32x64xf32>
    %72 = arith.mulf %70, %71 : vector<32x64xf32>
    %73 = vector.broadcast %54 : vector<32x1xf32> to vector<32x64xf32>
    %74 = arith.addf %72, %73 : vector<32x64xf32>
    %75 = arith.truncf %74 : vector<32x64xf32> to vector<32x64xbf16>
    %cst_53 = arith.constant dense<0.000000e+00> : vector<32x64xf32>
    %76 = tpu.matmul %42, %75, %cst_53 {dimension_numbers = #tpu.dot_dimension_numbers<[1], [0], [0], [1], [0, 0, 1, 1], [], []>} : vector<32x32xbf16>, vector<32x64xbf16>, vector<32x64xf32> -> vector<32x64xf32>
    %cst_54 = arith.constant dense<0.000000e+00> : vector<32x64xf32>
    %77 = tpu.matmul %44, %75, %cst_54 {dimension_numbers = #tpu.dot_dimension_numbers<[1], [0], [0], [1], [0, 0, 1, 1], [], []>} : vector<32x32xbf16>, vector<32x64xbf16>, vector<32x64xf32> -> vector<32x64xf32>
    %cst_55 = arith.constant dense<0.000000e+00> : vector<32x64xf32>
    %78 = tpu.matmul %46, %75, %cst_55 {dimension_numbers = #tpu.dot_dimension_numbers<[1], [0], [0], [1], [0, 0, 1, 1], [], []>} : vector<32x32xbf16>, vector<32x64xbf16>, vector<32x64xf32> -> vector<32x64xf32>
    %79 = vector.extract_strided_slice %76 {offsets = [0, 0], sizes = [8, 64], strides = [1, 1]} : vector<32x64xf32> to vector<8x64xf32>
    %80 = arith.truncf %79 : vector<8x64xf32> to vector<8x64xbf16>
    %81 = vector.extract_strided_slice %77 {offsets = [0, 0], sizes = [8, 64], strides = [1, 1]} : vector<32x64xf32> to vector<8x64xf32>
    %82 = arith.truncf %81 : vector<8x64xf32> to vector<8x64xbf16>
    %83 = vector.extract_strided_slice %78 {offsets = [0, 0], sizes = [8, 64], strides = [1, 1]} : vector<32x64xf32> to vector<8x64xf32>
    %84 = arith.truncf %83 : vector<8x64xf32> to vector<8x64xbf16>
    %cst_56 = arith.constant dense<0.000000e+00> : vector<64x64xf32>
    %85 = tpu.matmul %80, %82, %cst_56 {dimension_numbers = #tpu.dot_dimension_numbers<[0], [0], [1], [1], [0, 1, 1, 1], [], []>} : vector<8x64xbf16>, vector<8x64xbf16>, vector<64x64xf32> -> vector<64x64xf32>
    %cst_57 = arith.constant dense<0xFF800000> : vector<64xf32>
    %86 = vector.multi_reduction <maximumf>, %85, %cst_57 [1] : vector<64x64xf32> to vector<64xf32>
    %87 = vector.shape_cast %86 : vector<64xf32> to vector<64x1xf32>
    %88 = vector.broadcast %87 : vector<64x1xf32> to vector<64x64xf32>
    %89 = arith.subf %85, %88 : vector<64x64xf32>
    %90 = math.exp %89 : vector<64x64xf32>
    %cst_58 = arith.constant dense<0.000000e+00> : vector<64xf32>
    %91 = vector.multi_reduction <add>, %90, %cst_58 [1] : vector<64x64xf32> to vector<64xf32>
    %92 = vector.shape_cast %91 : vector<64xf32> to vector<64x1xf32>
    %93 = tpu.reciprocal %92 {approx = true} : vector<64x1xf32> -> vector<64x1xf32>
    %94 = vector.broadcast %93 : vector<64x1xf32> to vector<64x64xf32>
    %95 = arith.mulf %90, %94 : vector<64x64xf32>
    %96 = arith.truncf %95 : vector<64x64xf32> to vector<64x64xbf16>
    %cst_59 = arith.constant dense<0.000000e+00> : vector<8x64xf32>
    %97 = tpu.matmul %84, %96, %cst_59 {dimension_numbers = #tpu.dot_dimension_numbers<[1], [1], [0], [0], [0, 0, 1, 0], [], []>} : vector<8x64xbf16>, vector<64x64xbf16>, vector<8x64xf32> -> vector<8x64xf32>
    %98 = vector.extract_strided_slice %76 {offsets = [8, 0], sizes = [8, 64], strides = [1, 1]} : vector<32x64xf32> to vector<8x64xf32>
    %99 = arith.truncf %98 : vector<8x64xf32> to vector<8x64xbf16>
    %100 = vector.extract_strided_slice %77 {offsets = [8, 0], sizes = [8, 64], strides = [1, 1]} : vector<32x64xf32> to vector<8x64xf32>
    %101 = arith.truncf %100 : vector<8x64xf32> to vector<8x64xbf16>
    %102 = vector.extract_strided_slice %78 {offsets = [8, 0], sizes = [8, 64], strides = [1, 1]} : vector<32x64xf32> to vector<8x64xf32>
    %103 = arith.truncf %102 : vector<8x64xf32> to vector<8x64xbf16>
    %cst_60 = arith.constant dense<0.000000e+00> : vector<64x64xf32>
    %104 = tpu.matmul %99, %101, %cst_60 {dimension_numbers = #tpu.dot_dimension_numbers<[0], [0], [1], [1], [0, 1, 1, 1], [], []>} : vector<8x64xbf16>, vector<8x64xbf16>, vector<64x64xf32> -> vector<64x64xf32>
    %cst_61 = arith.constant dense<0xFF800000> : vector<64xf32>
    %105 = vector.multi_reduction <maximumf>, %104, %cst_61 [1] : vector<64x64xf32> to vector<64xf32>
    %106 = vector.shape_cast %105 : vector<64xf32> to vector<64x1xf32>
    %107 = vector.broadcast %106 : vector<64x1xf32> to vector<64x64xf32>
    %108 = arith.subf %104, %107 : vector<64x64xf32>
    %109 = math.exp %108 : vector<64x64xf32>
    %cst_62 = arith.constant dense<0.000000e+00> : vector<64xf32>
    %110 = vector.multi_reduction <add>, %109, %cst_62 [1] : vector<64x64xf32> to vector<64xf32>
    %111 = vector.shape_cast %110 : vector<64xf32> to vector<64x1xf32>
    %112 = tpu.reciprocal %111 {approx = true} : vector<64x1xf32> -> vector<64x1xf32>
    %113 = vector.broadcast %112 : vector<64x1xf32> to vector<64x64xf32>
    %114 = arith.mulf %109, %113 : vector<64x64xf32>
    %115 = arith.truncf %114 : vector<64x64xf32> to vector<64x64xbf16>
    %cst_63 = arith.constant dense<0.000000e+00> : vector<8x64xf32>
    %116 = tpu.matmul %103, %115, %cst_63 {dimension_numbers = #tpu.dot_dimension_numbers<[1], [1], [0], [0], [0, 0, 1, 0], [], []>} : vector<8x64xbf16>, vector<64x64xbf16>, vector<8x64xf32> -> vector<8x64xf32>
    %117 = vector.extract_strided_slice %76 {offsets = [16, 0], sizes = [8, 64], strides = [1, 1]} : vector<32x64xf32> to vector<8x64xf32>
    %118 = arith.truncf %117 : vector<8x64xf32> to vector<8x64xbf16>
    %119 = vector.extract_strided_slice %77 {offsets = [16, 0], sizes = [8, 64], strides = [1, 1]} : vector<32x64xf32> to vector<8x64xf32>
    %120 = arith.truncf %119 : vector<8x64xf32> to vector<8x64xbf16>
    %121 = vector.extract_strided_slice %78 {offsets = [16, 0], sizes = [8, 64], strides = [1, 1]} : vector<32x64xf32> to vector<8x64xf32>
    %122 = arith.truncf %121 : vector<8x64xf32> to vector<8x64xbf16>
    %cst_64 = arith.constant dense<0.000000e+00> : vector<64x64xf32>
    %123 = tpu.matmul %118, %120, %cst_64 {dimension_numbers = #tpu.dot_dimension_numbers<[0], [0], [1], [1], [0, 1, 1, 1], [], []>} : vector<8x64xbf16>, vector<8x64xbf16>, vector<64x64xf32> -> vector<64x64xf32>
    %cst_65 = arith.constant dense<0xFF800000> : vector<64xf32>
    %124 = vector.multi_reduction <maximumf>, %123, %cst_65 [1] : vector<64x64xf32> to vector<64xf32>
    %125 = vector.shape_cast %124 : vector<64xf32> to vector<64x1xf32>
    %126 = vector.broadcast %125 : vector<64x1xf32> to vector<64x64xf32>
    %127 = arith.subf %123, %126 : vector<64x64xf32>
    %128 = math.exp %127 : vector<64x64xf32>
    %cst_66 = arith.constant dense<0.000000e+00> : vector<64xf32>
    %129 = vector.multi_reduction <add>, %128, %cst_66 [1] : vector<64x64xf32> to vector<64xf32>
    %130 = vector.shape_cast %129 : vector<64xf32> to vector<64x1xf32>
    %131 = tpu.reciprocal %130 {approx = true} : vector<64x1xf32> -> vector<64x1xf32>
    %132 = vector.broadcast %131 : vector<64x1xf32> to vector<64x64xf32>
    %133 = arith.mulf %128, %132 : vector<64x64xf32>
    %134 = arith.truncf %133 : vector<64x64xf32> to vector<64x64xbf16>
    %cst_67 = arith.constant dense<0.000000e+00> : vector<8x64xf32>
    %135 = tpu.matmul %122, %134, %cst_67 {dimension_numbers = #tpu.dot_dimension_numbers<[1], [1], [0], [0], [0, 0, 1, 0], [], []>} : vector<8x64xbf16>, vector<64x64xbf16>, vector<8x64xf32> -> vector<8x64xf32>
    %136 = vector.extract_strided_slice %76 {offsets = [24, 0], sizes = [8, 64], strides = [1, 1]} : vector<32x64xf32> to vector<8x64xf32>
    %137 = arith.truncf %136 : vector<8x64xf32> to vector<8x64xbf16>
    %138 = vector.extract_strided_slice %77 {offsets = [24, 0], sizes = [8, 64], strides = [1, 1]} : vector<32x64xf32> to vector<8x64xf32>
    %139 = arith.truncf %138 : vector<8x64xf32> to vector<8x64xbf16>
    %140 = vector.extract_strided_slice %78 {offsets = [24, 0], sizes = [8, 64], strides = [1, 1]} : vector<32x64xf32> to vector<8x64xf32>
    %141 = arith.truncf %140 : vector<8x64xf32> to vector<8x64xbf16>
    %cst_68 = arith.constant dense<0.000000e+00> : vector<64x64xf32>
    %142 = tpu.matmul %137, %139, %cst_68 {dimension_numbers = #tpu.dot_dimension_numbers<[0], [0], [1], [1], [0, 1, 1, 1], [], []>} : vector<8x64xbf16>, vector<8x64xbf16>, vector<64x64xf32> -> vector<64x64xf32>
    %cst_69 = arith.constant dense<0xFF800000> : vector<64xf32>
    %143 = vector.multi_reduction <maximumf>, %142, %cst_69 [1] : vector<64x64xf32> to vector<64xf32>
    %144 = vector.shape_cast %143 : vector<64xf32> to vector<64x1xf32>
    %145 = vector.broadcast %144 : vector<64x1xf32> to vector<64x64xf32>
    %146 = arith.subf %142, %145 : vector<64x64xf32>
    %147 = math.exp %146 : vector<64x64xf32>
    %cst_70 = arith.constant dense<0.000000e+00> : vector<64xf32>
    %148 = vector.multi_reduction <add>, %147, %cst_70 [1] : vector<64x64xf32> to vector<64xf32>
    %149 = vector.shape_cast %148 : vector<64xf32> to vector<64x1xf32>
    %150 = tpu.reciprocal %149 {approx = true} : vector<64x1xf32> -> vector<64x1xf32>
    %151 = vector.broadcast %150 : vector<64x1xf32> to vector<64x64xf32>
    %152 = arith.mulf %147, %151 : vector<64x64xf32>
    %153 = arith.truncf %152 : vector<64x64xf32> to vector<64x64xbf16>
    %cst_71 = arith.constant dense<0.000000e+00> : vector<8x64xf32>
    %154 = tpu.matmul %141, %153, %cst_71 {dimension_numbers = #tpu.dot_dimension_numbers<[1], [1], [0], [0], [0, 0, 1, 0], [], []>} : vector<8x64xbf16>, vector<64x64xbf16>, vector<8x64xf32> -> vector<8x64xf32>
    %155 = tpu.concatenate %97, %116, %135, %154 in 0 : vector<8x64xf32>, vector<8x64xf32>, vector<8x64xf32>, vector<8x64xf32> -> vector<32x64xf32>
    %156 = vector.broadcast %50 : vector<32x1xf32> to vector<32x64xf32>
    %157 = arith.addf %40, %156 : vector<32x64xf32>
    %158 = arith.truncf %155 : vector<32x64xf32> to vector<32x64xbf16>
    %cst_72 = arith.constant dense<0.000000e+00> : vector<32x64xf32>
    %159 = tpu.matmul %48, %158, %cst_72 {dimension_numbers = #tpu.dot_dimension_numbers<[1], [0], [0], [1], [0, 0, 1, 1], [], []>} : vector<32x32xbf16>, vector<32x64xbf16>, vector<32x64xf32> -> vector<32x64xf32>
    %160 = arith.addf %157, %159 : vector<32x64xf32>
    %c0_73 = arith.constant 0 : index
    %c0_74 = arith.constant 0 : index
    %c0_75 = arith.constant 0 : index
    %161 = vector.load %arg20[%c0_73, %c0_74, %c0_75] : memref<2x32x32xbf16, #tpu.memory_space<vmem>>, vector<1x32x32xbf16>
    %162 = vector.shape_cast %161 : vector<1x32x32xbf16> to vector<32x32xbf16>
    %c0_76 = arith.constant 0 : index
    %c0_77 = arith.constant 0 : index
    %c0_78 = arith.constant 0 : index
    %163 = vector.load %arg21[%c0_76, %c0_77, %c0_78] : memref<2x32x16xbf16, #tpu.memory_space<vmem>>, vector<1x32x16xbf16>
    %164 = vector.shape_cast %163 : vector<1x32x16xbf16> to vector<32x16xbf16>
    %c0_79 = arith.constant 0 : index
    %c0_80 = arith.constant 0 : index
    %c0_81 = arith.constant 0 : index
    %165 = vector.load %arg22[%c0_79, %c0_80, %c0_81] : memref<2x32x16xbf16, #tpu.memory_space<vmem>>, vector<1x32x16xbf16>
    %166 = vector.shape_cast %165 : vector<1x32x16xbf16> to vector<32x16xbf16>
    %c0_82 = arith.constant 0 : index
    %c0_83 = arith.constant 0 : index
    %c0_84 = arith.constant 0 : index
    %167 = vector.load %arg23[%c0_82, %c0_83, %c0_84] : memref<2x32x32xbf16, #tpu.memory_space<vmem>>, vector<1x32x32xbf16>
    %168 = vector.shape_cast %167 : vector<1x32x32xbf16> to vector<32x32xbf16>
    %c0_85 = arith.constant 0 : index
    %c0_86 = arith.constant 0 : index
    %c0_87 = arith.constant 0 : index
    %169 = vector.load %arg24[%c0_85, %c0_86, %c0_87] : memref<2x32x1xf32, #tpu.memory_space<vmem>>, vector<1x32x1xf32>
    %170 = vector.shape_cast %169 : vector<1x32x1xf32> to vector<32x1xf32>
    %c0_88 = arith.constant 0 : index
    %c0_89 = arith.constant 0 : index
    %c0_90 = arith.constant 0 : index
    %171 = vector.load %arg18[%c0_88, %c0_89, %c0_90] : memref<2x32x1xf32, #tpu.memory_space<vmem>>, vector<1x32x1xf32>
    %172 = vector.shape_cast %171 : vector<1x32x1xf32> to vector<32x1xf32>
    %c0_91 = arith.constant 0 : index
    %c0_92 = arith.constant 0 : index
    %c0_93 = arith.constant 0 : index
    %173 = vector.load %arg19[%c0_91, %c0_92, %c0_93] : memref<2x32x1xf32, #tpu.memory_space<vmem>>, vector<1x32x1xf32>
    %174 = vector.shape_cast %173 : vector<1x32x1xf32> to vector<32x1xf32>
    %cst_94 = arith.constant dense<0.000000e+00> : vector<64xf32>
    %175 = vector.multi_reduction <add>, %160, %cst_94 [0] : vector<32x64xf32> to vector<64xf32>
    %176 = vector.shape_cast %175 : vector<64xf32> to vector<1x64xf32>
    %cst_95 = arith.constant 3.200000e+01 : f32
    %177 = vector.broadcast %cst_95 : f32 to vector<1x64xf32>
    %178 = arith.divf %176, %177 : vector<1x64xf32>
    %179 = vector.broadcast %178 : vector<1x64xf32> to vector<32x64xf32>
    %180 = arith.subf %160, %179 : vector<32x64xf32>
    %181 = arith.mulf %180, %180 : vector<32x64xf32>
    %cst_96 = arith.constant dense<0.000000e+00> : vector<64xf32>
    %182 = vector.multi_reduction <add>, %181, %cst_96 [0] : vector<32x64xf32> to vector<64xf32>
    %183 = vector.shape_cast %182 : vector<64xf32> to vector<1x64xf32>
    %cst_97 = arith.constant 3.200000e+01 : f32
    %184 = vector.broadcast %cst_97 : f32 to vector<1x64xf32>
    %185 = arith.divf %183, %184 : vector<1x64xf32>
    %cst_98 = arith.constant 9.99999974E-6 : f32
    %186 = vector.broadcast %cst_98 : f32 to vector<1x64xf32>
    %187 = arith.addf %185, %186 : vector<1x64xf32>
    %188 = math.rsqrt %187 : vector<1x64xf32>
    %189 = vector.broadcast %188 : vector<1x64xf32> to vector<32x64xf32>
    %190 = arith.mulf %180, %189 : vector<32x64xf32>
    %191 = vector.broadcast %172 : vector<32x1xf32> to vector<32x64xf32>
    %192 = arith.mulf %190, %191 : vector<32x64xf32>
    %193 = vector.broadcast %174 : vector<32x1xf32> to vector<32x64xf32>
    %194 = arith.addf %192, %193 : vector<32x64xf32>
    %195 = arith.truncf %194 : vector<32x64xf32> to vector<32x64xbf16>
    %cst_99 = arith.constant dense<0.000000e+00> : vector<32x64xf32>
    %196 = tpu.matmul %162, %195, %cst_99 {dimension_numbers = #tpu.dot_dimension_numbers<[1], [0], [0], [1], [0, 0, 1, 1], [], []>} : vector<32x32xbf16>, vector<32x64xbf16>, vector<32x64xf32> -> vector<32x64xf32>
    %cst_100 = arith.constant dense<0.000000e+00> : vector<32x8xf32>
    %197 = tpu.matmul %164, %4, %cst_100 {dimension_numbers = #tpu.dot_dimension_numbers<[1], [1], [0], [0], [0, 0, 1, 0], [], []>} : vector<32x16xbf16>, vector<8x16xbf16>, vector<32x8xf32> -> vector<32x8xf32>
    %cst_101 = arith.constant dense<0.000000e+00> : vector<32x8xf32>
    %198 = tpu.matmul %166, %4, %cst_101 {dimension_numbers = #tpu.dot_dimension_numbers<[1], [1], [0], [0], [0, 0, 1, 0], [], []>} : vector<32x16xbf16>, vector<8x16xbf16>, vector<32x8xf32> -> vector<32x8xf32>
    %199 = vector.extract_strided_slice %196 {offsets = [0, 0], sizes = [8, 64], strides = [1, 1]} : vector<32x64xf32> to vector<8x64xf32>
    %200 = arith.truncf %199 : vector<8x64xf32> to vector<8x64xbf16>
    %201 = vector.extract_strided_slice %197 {offsets = [0, 0], sizes = [8, 8], strides = [1, 1]} : vector<32x8xf32> to vector<8x8xf32>
    %202 = arith.truncf %201 : vector<8x8xf32> to vector<8x8xbf16>
    %203 = vector.extract_strided_slice %198 {offsets = [0, 0], sizes = [8, 8], strides = [1, 1]} : vector<32x8xf32> to vector<8x8xf32>
    %204 = arith.truncf %203 : vector<8x8xf32> to vector<8x8xbf16>
    %cst_102 = arith.constant dense<0.000000e+00> : vector<64x8xf32>
    %205 = tpu.matmul %200, %202, %cst_102 {dimension_numbers = #tpu.dot_dimension_numbers<[0], [0], [1], [1], [0, 1, 1, 1], [], []>} : vector<8x64xbf16>, vector<8x8xbf16>, vector<64x8xf32> -> vector<64x8xf32>
    %cst_103 = arith.constant dense<0xFF800000> : vector<64xf32>
    %206 = vector.multi_reduction <maximumf>, %205, %cst_103 [1] : vector<64x8xf32> to vector<64xf32>
    %207 = vector.shape_cast %206 : vector<64xf32> to vector<64x1xf32>
    %208 = vector.broadcast %207 : vector<64x1xf32> to vector<64x8xf32>
    %209 = arith.subf %205, %208 : vector<64x8xf32>
    %210 = math.exp %209 : vector<64x8xf32>
    %cst_104 = arith.constant dense<0.000000e+00> : vector<64xf32>
    %211 = vector.multi_reduction <add>, %210, %cst_104 [1] : vector<64x8xf32> to vector<64xf32>
    %212 = vector.shape_cast %211 : vector<64xf32> to vector<64x1xf32>
    %213 = tpu.reciprocal %212 {approx = true} : vector<64x1xf32> -> vector<64x1xf32>
    %214 = vector.broadcast %213 : vector<64x1xf32> to vector<64x8xf32>
    %215 = arith.mulf %210, %214 : vector<64x8xf32>
    %216 = arith.truncf %215 : vector<64x8xf32> to vector<64x8xbf16>
    %cst_105 = arith.constant dense<0.000000e+00> : vector<8x64xf32>
    %217 = tpu.matmul %204, %216, %cst_105 {dimension_numbers = #tpu.dot_dimension_numbers<[1], [1], [0], [0], [0, 0, 1, 0], [], []>} : vector<8x8xbf16>, vector<64x8xbf16>, vector<8x64xf32> -> vector<8x64xf32>
    %218 = vector.extract_strided_slice %196 {offsets = [8, 0], sizes = [8, 64], strides = [1, 1]} : vector<32x64xf32> to vector<8x64xf32>
    %219 = arith.truncf %218 : vector<8x64xf32> to vector<8x64xbf16>
    %220 = vector.extract_strided_slice %197 {offsets = [8, 0], sizes = [8, 8], strides = [1, 1]} : vector<32x8xf32> to vector<8x8xf32>
    %221 = arith.truncf %220 : vector<8x8xf32> to vector<8x8xbf16>
    %222 = vector.extract_strided_slice %198 {offsets = [8, 0], sizes = [8, 8], strides = [1, 1]} : vector<32x8xf32> to vector<8x8xf32>
    %223 = arith.truncf %222 : vector<8x8xf32> to vector<8x8xbf16>
    %cst_106 = arith.constant dense<0.000000e+00> : vector<64x8xf32>
    %224 = tpu.matmul %219, %221, %cst_106 {dimension_numbers = #tpu.dot_dimension_numbers<[0], [0], [1], [1], [0, 1, 1, 1], [], []>} : vector<8x64xbf16>, vector<8x8xbf16>, vector<64x8xf32> -> vector<64x8xf32>
    %cst_107 = arith.constant dense<0xFF800000> : vector<64xf32>
    %225 = vector.multi_reduction <maximumf>, %224, %cst_107 [1] : vector<64x8xf32> to vector<64xf32>
    %226 = vector.shape_cast %225 : vector<64xf32> to vector<64x1xf32>
    %227 = vector.broadcast %226 : vector<64x1xf32> to vector<64x8xf32>
    %228 = arith.subf %224, %227 : vector<64x8xf32>
    %229 = math.exp %228 : vector<64x8xf32>
    %cst_108 = arith.constant dense<0.000000e+00> : vector<64xf32>
    %230 = vector.multi_reduction <add>, %229, %cst_108 [1] : vector<64x8xf32> to vector<64xf32>
    %231 = vector.shape_cast %230 : vector<64xf32> to vector<64x1xf32>
    %232 = tpu.reciprocal %231 {approx = true} : vector<64x1xf32> -> vector<64x1xf32>
    %233 = vector.broadcast %232 : vector<64x1xf32> to vector<64x8xf32>
    %234 = arith.mulf %229, %233 : vector<64x8xf32>
    %235 = arith.truncf %234 : vector<64x8xf32> to vector<64x8xbf16>
    %cst_109 = arith.constant dense<0.000000e+00> : vector<8x64xf32>
    %236 = tpu.matmul %223, %235, %cst_109 {dimension_numbers = #tpu.dot_dimension_numbers<[1], [1], [0], [0], [0, 0, 1, 0], [], []>} : vector<8x8xbf16>, vector<64x8xbf16>, vector<8x64xf32> -> vector<8x64xf32>
    %237 = vector.extract_strided_slice %196 {offsets = [16, 0], sizes = [8, 64], strides = [1, 1]} : vector<32x64xf32> to vector<8x64xf32>
    %238 = arith.truncf %237 : vector<8x64xf32> to vector<8x64xbf16>
    %239 = vector.extract_strided_slice %197 {offsets = [16, 0], sizes = [8, 8], strides = [1, 1]} : vector<32x8xf32> to vector<8x8xf32>
    %240 = arith.truncf %239 : vector<8x8xf32> to vector<8x8xbf16>
    %241 = vector.extract_strided_slice %198 {offsets = [16, 0], sizes = [8, 8], strides = [1, 1]} : vector<32x8xf32> to vector<8x8xf32>
    %242 = arith.truncf %241 : vector<8x8xf32> to vector<8x8xbf16>
    %cst_110 = arith.constant dense<0.000000e+00> : vector<64x8xf32>
    %243 = tpu.matmul %238, %240, %cst_110 {dimension_numbers = #tpu.dot_dimension_numbers<[0], [0], [1], [1], [0, 1, 1, 1], [], []>} : vector<8x64xbf16>, vector<8x8xbf16>, vector<64x8xf32> -> vector<64x8xf32>
    %cst_111 = arith.constant dense<0xFF800000> : vector<64xf32>
    %244 = vector.multi_reduction <maximumf>, %243, %cst_111 [1] : vector<64x8xf32> to vector<64xf32>
    %245 = vector.shape_cast %244 : vector<64xf32> to vector<64x1xf32>
    %246 = vector.broadcast %245 : vector<64x1xf32> to vector<64x8xf32>
    %247 = arith.subf %243, %246 : vector<64x8xf32>
    %248 = math.exp %247 : vector<64x8xf32>
    %cst_112 = arith.constant dense<0.000000e+00> : vector<64xf32>
    %249 = vector.multi_reduction <add>, %248, %cst_112 [1] : vector<64x8xf32> to vector<64xf32>
    %250 = vector.shape_cast %249 : vector<64xf32> to vector<64x1xf32>
    %251 = tpu.reciprocal %250 {approx = true} : vector<64x1xf32> -> vector<64x1xf32>
    %252 = vector.broadcast %251 : vector<64x1xf32> to vector<64x8xf32>
    %253 = arith.mulf %248, %252 : vector<64x8xf32>
    %254 = arith.truncf %253 : vector<64x8xf32> to vector<64x8xbf16>
    %cst_113 = arith.constant dense<0.000000e+00> : vector<8x64xf32>
    %255 = tpu.matmul %242, %254, %cst_113 {dimension_numbers = #tpu.dot_dimension_numbers<[1], [1], [0], [0], [0, 0, 1, 0], [], []>} : vector<8x8xbf16>, vector<64x8xbf16>, vector<8x64xf32> -> vector<8x64xf32>
    %256 = vector.extract_strided_slice %196 {offsets = [24, 0], sizes = [8, 64], strides = [1, 1]} : vector<32x64xf32> to vector<8x64xf32>
    %257 = arith.truncf %256 : vector<8x64xf32> to vector<8x64xbf16>
    %258 = vector.extract_strided_slice %197 {offsets = [24, 0], sizes = [8, 8], strides = [1, 1]} : vector<32x8xf32> to vector<8x8xf32>
    %259 = arith.truncf %258 : vector<8x8xf32> to vector<8x8xbf16>
    %260 = vector.extract_strided_slice %198 {offsets = [24, 0], sizes = [8, 8], strides = [1, 1]} : vector<32x8xf32> to vector<8x8xf32>
    %261 = arith.truncf %260 : vector<8x8xf32> to vector<8x8xbf16>
    %cst_114 = arith.constant dense<0.000000e+00> : vector<64x8xf32>
    %262 = tpu.matmul %257, %259, %cst_114 {dimension_numbers = #tpu.dot_dimension_numbers<[0], [0], [1], [1], [0, 1, 1, 1], [], []>} : vector<8x64xbf16>, vector<8x8xbf16>, vector<64x8xf32> -> vector<64x8xf32>
    %cst_115 = arith.constant dense<0xFF800000> : vector<64xf32>
    %263 = vector.multi_reduction <maximumf>, %262, %cst_115 [1] : vector<64x8xf32> to vector<64xf32>
    %264 = vector.shape_cast %263 : vector<64xf32> to vector<64x1xf32>
    %265 = vector.broadcast %264 : vector<64x1xf32> to vector<64x8xf32>
    %266 = arith.subf %262, %265 : vector<64x8xf32>
    %267 = math.exp %266 : vector<64x8xf32>
    %cst_116 = arith.constant dense<0.000000e+00> : vector<64xf32>
    %268 = vector.multi_reduction <add>, %267, %cst_116 [1] : vector<64x8xf32> to vector<64xf32>
    %269 = vector.shape_cast %268 : vector<64xf32> to vector<64x1xf32>
    %270 = tpu.reciprocal %269 {approx = true} : vector<64x1xf32> -> vector<64x1xf32>
    %271 = vector.broadcast %270 : vector<64x1xf32> to vector<64x8xf32>
    %272 = arith.mulf %267, %271 : vector<64x8xf32>
    %273 = arith.truncf %272 : vector<64x8xf32> to vector<64x8xbf16>
    %cst_117 = arith.constant dense<0.000000e+00> : vector<8x64xf32>
    %274 = tpu.matmul %261, %273, %cst_117 {dimension_numbers = #tpu.dot_dimension_numbers<[1], [1], [0], [0], [0, 0, 1, 0], [], []>} : vector<8x8xbf16>, vector<64x8xbf16>, vector<8x64xf32> -> vector<8x64xf32>
    %275 = tpu.concatenate %217, %236, %255, %274 in 0 : vector<8x64xf32>, vector<8x64xf32>, vector<8x64xf32>, vector<8x64xf32> -> vector<32x64xf32>
    %276 = vector.broadcast %170 : vector<32x1xf32> to vector<32x64xf32>
    %277 = arith.addf %160, %276 : vector<32x64xf32>
    %278 = arith.truncf %275 : vector<32x64xf32> to vector<32x64xbf16>
    %cst_118 = arith.constant dense<0.000000e+00> : vector<32x64xf32>
    %279 = tpu.matmul %168, %278, %cst_118 {dimension_numbers = #tpu.dot_dimension_numbers<[1], [0], [0], [1], [0, 0, 1, 1], [], []>} : vector<32x32xbf16>, vector<32x64xbf16>, vector<32x64xf32> -> vector<32x64xf32>
    %280 = arith.addf %277, %279 : vector<32x64xf32>
    %c0_119 = arith.constant 0 : index
    %c0_120 = arith.constant 0 : index
    %c0_121 = arith.constant 0 : index
    %281 = vector.load %arg27[%c0_119, %c0_120, %c0_121] : memref<2x128x32xbf16, #tpu.memory_space<vmem>>, vector<1x128x32xbf16>
    %282 = vector.shape_cast %281 : vector<1x128x32xbf16> to vector<128x32xbf16>
    %c0_122 = arith.constant 0 : index
    %c0_123 = arith.constant 0 : index
    %c0_124 = arith.constant 0 : index
    %283 = vector.load %arg28[%c0_122, %c0_123, %c0_124] : memref<2x128x32xbf16, #tpu.memory_space<vmem>>, vector<1x128x32xbf16>
    %284 = vector.shape_cast %283 : vector<1x128x32xbf16> to vector<128x32xbf16>
    %c0_125 = arith.constant 0 : index
    %c0_126 = arith.constant 0 : index
    %c0_127 = arith.constant 0 : index
    %285 = vector.load %arg29[%c0_125, %c0_126, %c0_127] : memref<2x128x1xf32, #tpu.memory_space<vmem>>, vector<1x128x1xf32>
    %286 = vector.shape_cast %285 : vector<1x128x1xf32> to vector<128x1xf32>
    %c0_128 = arith.constant 0 : index
    %c0_129 = arith.constant 0 : index
    %c0_130 = arith.constant 0 : index
    %287 = vector.load %arg30[%c0_128, %c0_129, %c0_130] : memref<2x128x1xf32, #tpu.memory_space<vmem>>, vector<1x128x1xf32>
    %288 = vector.shape_cast %287 : vector<1x128x1xf32> to vector<128x1xf32>
    %c0_131 = arith.constant 0 : index
    %c0_132 = arith.constant 0 : index
    %c0_133 = arith.constant 0 : index
    %289 = vector.load %arg31[%c0_131, %c0_132, %c0_133] : memref<2x32x128xbf16, #tpu.memory_space<vmem>>, vector<1x32x128xbf16>
    %290 = vector.shape_cast %289 : vector<1x32x128xbf16> to vector<32x128xbf16>
    %c0_134 = arith.constant 0 : index
    %c0_135 = arith.constant 0 : index
    %c0_136 = arith.constant 0 : index
    %291 = vector.load %arg32[%c0_134, %c0_135, %c0_136] : memref<2x32x1xf32, #tpu.memory_space<vmem>>, vector<1x32x1xf32>
    %292 = vector.shape_cast %291 : vector<1x32x1xf32> to vector<32x1xf32>
    %c0_137 = arith.constant 0 : index
    %c0_138 = arith.constant 0 : index
    %c0_139 = arith.constant 0 : index
    %293 = vector.load %arg25[%c0_137, %c0_138, %c0_139] : memref<2x32x1xf32, #tpu.memory_space<vmem>>, vector<1x32x1xf32>
    %294 = vector.shape_cast %293 : vector<1x32x1xf32> to vector<32x1xf32>
    %c0_140 = arith.constant 0 : index
    %c0_141 = arith.constant 0 : index
    %c0_142 = arith.constant 0 : index
    %295 = vector.load %arg26[%c0_140, %c0_141, %c0_142] : memref<2x32x1xf32, #tpu.memory_space<vmem>>, vector<1x32x1xf32>
    %296 = vector.shape_cast %295 : vector<1x32x1xf32> to vector<32x1xf32>
    %cst_143 = arith.constant dense<0.000000e+00> : vector<64xf32>
    %297 = vector.multi_reduction <add>, %280, %cst_143 [0] : vector<32x64xf32> to vector<64xf32>
    %298 = vector.shape_cast %297 : vector<64xf32> to vector<1x64xf32>
    %cst_144 = arith.constant 3.200000e+01 : f32
    %299 = vector.broadcast %cst_144 : f32 to vector<1x64xf32>
    %300 = arith.divf %298, %299 : vector<1x64xf32>
    %301 = vector.broadcast %300 : vector<1x64xf32> to vector<32x64xf32>
    %302 = arith.subf %280, %301 : vector<32x64xf32>
    %303 = arith.mulf %302, %302 : vector<32x64xf32>
    %cst_145 = arith.constant dense<0.000000e+00> : vector<64xf32>
    %304 = vector.multi_reduction <add>, %303, %cst_145 [0] : vector<32x64xf32> to vector<64xf32>
    %305 = vector.shape_cast %304 : vector<64xf32> to vector<1x64xf32>
    %cst_146 = arith.constant 3.200000e+01 : f32
    %306 = vector.broadcast %cst_146 : f32 to vector<1x64xf32>
    %307 = arith.divf %305, %306 : vector<1x64xf32>
    %cst_147 = arith.constant 9.99999974E-6 : f32
    %308 = vector.broadcast %cst_147 : f32 to vector<1x64xf32>
    %309 = arith.addf %307, %308 : vector<1x64xf32>
    %310 = math.rsqrt %309 : vector<1x64xf32>
    %311 = vector.broadcast %310 : vector<1x64xf32> to vector<32x64xf32>
    %312 = arith.mulf %302, %311 : vector<32x64xf32>
    %313 = vector.broadcast %294 : vector<32x1xf32> to vector<32x64xf32>
    %314 = arith.mulf %312, %313 : vector<32x64xf32>
    %315 = vector.broadcast %296 : vector<32x1xf32> to vector<32x64xf32>
    %316 = arith.addf %314, %315 : vector<32x64xf32>
    %317 = arith.truncf %316 : vector<32x64xf32> to vector<32x64xbf16>
    %cst_148 = arith.constant dense<0.000000e+00> : vector<128x64xf32>
    %318 = tpu.matmul %282, %317, %cst_148 {dimension_numbers = #tpu.dot_dimension_numbers<[1], [0], [0], [1], [0, 0, 1, 1], [], []>} : vector<128x32xbf16>, vector<32x64xbf16>, vector<128x64xf32> -> vector<128x64xf32>
    %319 = vector.broadcast %286 : vector<128x1xf32> to vector<128x64xf32>
    %320 = arith.addf %318, %319 : vector<128x64xf32>
    %cst_149 = arith.constant dense<0.000000e+00> : vector<128x64xf32>
    %321 = tpu.matmul %284, %317, %cst_149 {dimension_numbers = #tpu.dot_dimension_numbers<[1], [0], [0], [1], [0, 0, 1, 1], [], []>} : vector<128x32xbf16>, vector<32x64xbf16>, vector<128x64xf32> -> vector<128x64xf32>
    %322 = vector.broadcast %288 : vector<128x1xf32> to vector<128x64xf32>
    %323 = arith.addf %321, %322 : vector<128x64xf32>
    %cst_150 = arith.constant 5.000000e-01 : f32
    %324 = vector.broadcast %cst_150 : f32 to vector<128x64xf32>
    %325 = arith.mulf %324, %323 : vector<128x64xf32>
    %cst_151 = arith.constant 0.707106769 : f32
    %326 = vector.broadcast %cst_151 : f32 to vector<128x64xf32>
    %327 = arith.mulf %323, %326 : vector<128x64xf32>
    %328 = math.erf %327 : vector<128x64xf32>
    %cst_152 = arith.constant 1.000000e+00 : f32
    %329 = vector.broadcast %cst_152 : f32 to vector<128x64xf32>
    %330 = arith.addf %329, %328 : vector<128x64xf32>
    %331 = arith.mulf %325, %330 : vector<128x64xf32>
    %332 = arith.mulf %320, %331 : vector<128x64xf32>
    %333 = arith.truncf %332 : vector<128x64xf32> to vector<128x64xbf16>
    %cst_153 = arith.constant dense<0.000000e+00> : vector<32x64xf32>
    %334 = tpu.matmul %290, %333, %cst_153 {dimension_numbers = #tpu.dot_dimension_numbers<[1], [0], [0], [1], [0, 0, 1, 1], [], []>} : vector<32x128xbf16>, vector<128x64xbf16>, vector<32x64xf32> -> vector<32x64xf32>
    %335 = arith.addf %280, %334 : vector<32x64xf32>
    %336 = vector.broadcast %292 : vector<32x1xf32> to vector<32x64xf32>
    %337 = arith.addf %335, %336 : vector<32x64xf32>
    %c1 = arith.constant 1 : index
    %c0_154 = arith.constant 0 : index
    %c0_155 = arith.constant 0 : index
    %338 = vector.load %arg13[%c1, %c0_154, %c0_155] : memref<2x32x32xbf16, #tpu.memory_space<vmem>>, vector<1x32x32xbf16>
    %339 = vector.shape_cast %338 : vector<1x32x32xbf16> to vector<32x32xbf16>
    %c1_156 = arith.constant 1 : index
    %c0_157 = arith.constant 0 : index
    %c0_158 = arith.constant 0 : index
    %340 = vector.load %arg14[%c1_156, %c0_157, %c0_158] : memref<2x32x32xbf16, #tpu.memory_space<vmem>>, vector<1x32x32xbf16>
    %341 = vector.shape_cast %340 : vector<1x32x32xbf16> to vector<32x32xbf16>
    %c1_159 = arith.constant 1 : index
    %c0_160 = arith.constant 0 : index
    %c0_161 = arith.constant 0 : index
    %342 = vector.load %arg15[%c1_159, %c0_160, %c0_161] : memref<2x32x32xbf16, #tpu.memory_space<vmem>>, vector<1x32x32xbf16>
    %343 = vector.shape_cast %342 : vector<1x32x32xbf16> to vector<32x32xbf16>
    %c1_162 = arith.constant 1 : index
    %c0_163 = arith.constant 0 : index
    %c0_164 = arith.constant 0 : index
    %344 = vector.load %arg16[%c1_162, %c0_163, %c0_164] : memref<2x32x32xbf16, #tpu.memory_space<vmem>>, vector<1x32x32xbf16>
    %345 = vector.shape_cast %344 : vector<1x32x32xbf16> to vector<32x32xbf16>
    %c1_165 = arith.constant 1 : index
    %c0_166 = arith.constant 0 : index
    %c0_167 = arith.constant 0 : index
    %346 = vector.load %arg17[%c1_165, %c0_166, %c0_167] : memref<2x32x1xf32, #tpu.memory_space<vmem>>, vector<1x32x1xf32>
    %347 = vector.shape_cast %346 : vector<1x32x1xf32> to vector<32x1xf32>
    %c1_168 = arith.constant 1 : index
    %c0_169 = arith.constant 0 : index
    %c0_170 = arith.constant 0 : index
    %348 = vector.load %arg11[%c1_168, %c0_169, %c0_170] : memref<2x32x1xf32, #tpu.memory_space<vmem>>, vector<1x32x1xf32>
    %349 = vector.shape_cast %348 : vector<1x32x1xf32> to vector<32x1xf32>
    %c1_171 = arith.constant 1 : index
    %c0_172 = arith.constant 0 : index
    %c0_173 = arith.constant 0 : index
    %350 = vector.load %arg12[%c1_171, %c0_172, %c0_173] : memref<2x32x1xf32, #tpu.memory_space<vmem>>, vector<1x32x1xf32>
    %351 = vector.shape_cast %350 : vector<1x32x1xf32> to vector<32x1xf32>
    %cst_174 = arith.constant dense<0.000000e+00> : vector<64xf32>
    %352 = vector.multi_reduction <add>, %337, %cst_174 [0] : vector<32x64xf32> to vector<64xf32>
    %353 = vector.shape_cast %352 : vector<64xf32> to vector<1x64xf32>
    %cst_175 = arith.constant 3.200000e+01 : f32
    %354 = vector.broadcast %cst_175 : f32 to vector<1x64xf32>
    %355 = arith.divf %353, %354 : vector<1x64xf32>
    %356 = vector.broadcast %355 : vector<1x64xf32> to vector<32x64xf32>
    %357 = arith.subf %337, %356 : vector<32x64xf32>
    %358 = arith.mulf %357, %357 : vector<32x64xf32>
    %cst_176 = arith.constant dense<0.000000e+00> : vector<64xf32>
    %359 = vector.multi_reduction <add>, %358, %cst_176 [0] : vector<32x64xf32> to vector<64xf32>
    %360 = vector.shape_cast %359 : vector<64xf32> to vector<1x64xf32>
    %cst_177 = arith.constant 3.200000e+01 : f32
    %361 = vector.broadcast %cst_177 : f32 to vector<1x64xf32>
    %362 = arith.divf %360, %361 : vector<1x64xf32>
    %cst_178 = arith.constant 9.99999974E-6 : f32
    %363 = vector.broadcast %cst_178 : f32 to vector<1x64xf32>
    %364 = arith.addf %362, %363 : vector<1x64xf32>
    %365 = math.rsqrt %364 : vector<1x64xf32>
    %366 = vector.broadcast %365 : vector<1x64xf32> to vector<32x64xf32>
    %367 = arith.mulf %357, %366 : vector<32x64xf32>
    %368 = vector.broadcast %349 : vector<32x1xf32> to vector<32x64xf32>
    %369 = arith.mulf %367, %368 : vector<32x64xf32>
    %370 = vector.broadcast %351 : vector<32x1xf32> to vector<32x64xf32>
    %371 = arith.addf %369, %370 : vector<32x64xf32>
    %372 = arith.truncf %371 : vector<32x64xf32> to vector<32x64xbf16>
    %cst_179 = arith.constant dense<0.000000e+00> : vector<32x64xf32>
    %373 = tpu.matmul %339, %372, %cst_179 {dimension_numbers = #tpu.dot_dimension_numbers<[1], [0], [0], [1], [0, 0, 1, 1], [], []>} : vector<32x32xbf16>, vector<32x64xbf16>, vector<32x64xf32> -> vector<32x64xf32>
    %cst_180 = arith.constant dense<0.000000e+00> : vector<32x64xf32>
    %374 = tpu.matmul %341, %372, %cst_180 {dimension_numbers = #tpu.dot_dimension_numbers<[1], [0], [0], [1], [0, 0, 1, 1], [], []>} : vector<32x32xbf16>, vector<32x64xbf16>, vector<32x64xf32> -> vector<32x64xf32>
    %cst_181 = arith.constant dense<0.000000e+00> : vector<32x64xf32>
    %375 = tpu.matmul %343, %372, %cst_181 {dimension_numbers = #tpu.dot_dimension_numbers<[1], [0], [0], [1], [0, 0, 1, 1], [], []>} : vector<32x32xbf16>, vector<32x64xbf16>, vector<32x64xf32> -> vector<32x64xf32>
    %376 = vector.extract_strided_slice %373 {offsets = [0, 0], sizes = [8, 64], strides = [1, 1]} : vector<32x64xf32> to vector<8x64xf32>
    %377 = arith.truncf %376 : vector<8x64xf32> to vector<8x64xbf16>
    %378 = vector.extract_strided_slice %374 {offsets = [0, 0], sizes = [8, 64], strides = [1, 1]} : vector<32x64xf32> to vector<8x64xf32>
    %379 = arith.truncf %378 : vector<8x64xf32> to vector<8x64xbf16>
    %380 = vector.extract_strided_slice %375 {offsets = [0, 0], sizes = [8, 64], strides = [1, 1]} : vector<32x64xf32> to vector<8x64xf32>
    %381 = arith.truncf %380 : vector<8x64xf32> to vector<8x64xbf16>
    %cst_182 = arith.constant dense<0.000000e+00> : vector<64x64xf32>
    %382 = tpu.matmul %377, %379, %cst_182 {dimension_numbers = #tpu.dot_dimension_numbers<[0], [0], [1], [1], [0, 1, 1, 1], [], []>} : vector<8x64xbf16>, vector<8x64xbf16>, vector<64x64xf32> -> vector<64x64xf32>
    %cst_183 = arith.constant dense<0xFF800000> : vector<64xf32>
    %383 = vector.multi_reduction <maximumf>, %382, %cst_183 [1] : vector<64x64xf32> to vector<64xf32>
    %384 = vector.shape_cast %383 : vector<64xf32> to vector<64x1xf32>
    %385 = vector.broadcast %384 : vector<64x1xf32> to vector<64x64xf32>
    %386 = arith.subf %382, %385 : vector<64x64xf32>
    %387 = math.exp %386 : vector<64x64xf32>
    %cst_184 = arith.constant dense<0.000000e+00> : vector<64xf32>
    %388 = vector.multi_reduction <add>, %387, %cst_184 [1] : vector<64x64xf32> to vector<64xf32>
    %389 = vector.shape_cast %388 : vector<64xf32> to vector<64x1xf32>
    %390 = tpu.reciprocal %389 {approx = true} : vector<64x1xf32> -> vector<64x1xf32>
    %391 = vector.broadcast %390 : vector<64x1xf32> to vector<64x64xf32>
    %392 = arith.mulf %387, %391 : vector<64x64xf32>
    %393 = arith.truncf %392 : vector<64x64xf32> to vector<64x64xbf16>
    %cst_185 = arith.constant dense<0.000000e+00> : vector<8x64xf32>
    %394 = tpu.matmul %381, %393, %cst_185 {dimension_numbers = #tpu.dot_dimension_numbers<[1], [1], [0], [0], [0, 0, 1, 0], [], []>} : vector<8x64xbf16>, vector<64x64xbf16>, vector<8x64xf32> -> vector<8x64xf32>
    %395 = vector.extract_strided_slice %373 {offsets = [8, 0], sizes = [8, 64], strides = [1, 1]} : vector<32x64xf32> to vector<8x64xf32>
    %396 = arith.truncf %395 : vector<8x64xf32> to vector<8x64xbf16>
    %397 = vector.extract_strided_slice %374 {offsets = [8, 0], sizes = [8, 64], strides = [1, 1]} : vector<32x64xf32> to vector<8x64xf32>
    %398 = arith.truncf %397 : vector<8x64xf32> to vector<8x64xbf16>
    %399 = vector.extract_strided_slice %375 {offsets = [8, 0], sizes = [8, 64], strides = [1, 1]} : vector<32x64xf32> to vector<8x64xf32>
    %400 = arith.truncf %399 : vector<8x64xf32> to vector<8x64xbf16>
    %cst_186 = arith.constant dense<0.000000e+00> : vector<64x64xf32>
    %401 = tpu.matmul %396, %398, %cst_186 {dimension_numbers = #tpu.dot_dimension_numbers<[0], [0], [1], [1], [0, 1, 1, 1], [], []>} : vector<8x64xbf16>, vector<8x64xbf16>, vector<64x64xf32> -> vector<64x64xf32>
    %cst_187 = arith.constant dense<0xFF800000> : vector<64xf32>
    %402 = vector.multi_reduction <maximumf>, %401, %cst_187 [1] : vector<64x64xf32> to vector<64xf32>
    %403 = vector.shape_cast %402 : vector<64xf32> to vector<64x1xf32>
    %404 = vector.broadcast %403 : vector<64x1xf32> to vector<64x64xf32>
    %405 = arith.subf %401, %404 : vector<64x64xf32>
    %406 = math.exp %405 : vector<64x64xf32>
    %cst_188 = arith.constant dense<0.000000e+00> : vector<64xf32>
    %407 = vector.multi_reduction <add>, %406, %cst_188 [1] : vector<64x64xf32> to vector<64xf32>
    %408 = vector.shape_cast %407 : vector<64xf32> to vector<64x1xf32>
    %409 = tpu.reciprocal %408 {approx = true} : vector<64x1xf32> -> vector<64x1xf32>
    %410 = vector.broadcast %409 : vector<64x1xf32> to vector<64x64xf32>
    %411 = arith.mulf %406, %410 : vector<64x64xf32>
    %412 = arith.truncf %411 : vector<64x64xf32> to vector<64x64xbf16>
    %cst_189 = arith.constant dense<0.000000e+00> : vector<8x64xf32>
    %413 = tpu.matmul %400, %412, %cst_189 {dimension_numbers = #tpu.dot_dimension_numbers<[1], [1], [0], [0], [0, 0, 1, 0], [], []>} : vector<8x64xbf16>, vector<64x64xbf16>, vector<8x64xf32> -> vector<8x64xf32>
    %414 = vector.extract_strided_slice %373 {offsets = [16, 0], sizes = [8, 64], strides = [1, 1]} : vector<32x64xf32> to vector<8x64xf32>
    %415 = arith.truncf %414 : vector<8x64xf32> to vector<8x64xbf16>
    %416 = vector.extract_strided_slice %374 {offsets = [16, 0], sizes = [8, 64], strides = [1, 1]} : vector<32x64xf32> to vector<8x64xf32>
    %417 = arith.truncf %416 : vector<8x64xf32> to vector<8x64xbf16>
    %418 = vector.extract_strided_slice %375 {offsets = [16, 0], sizes = [8, 64], strides = [1, 1]} : vector<32x64xf32> to vector<8x64xf32>
    %419 = arith.truncf %418 : vector<8x64xf32> to vector<8x64xbf16>
    %cst_190 = arith.constant dense<0.000000e+00> : vector<64x64xf32>
    %420 = tpu.matmul %415, %417, %cst_190 {dimension_numbers = #tpu.dot_dimension_numbers<[0], [0], [1], [1], [0, 1, 1, 1], [], []>} : vector<8x64xbf16>, vector<8x64xbf16>, vector<64x64xf32> -> vector<64x64xf32>
    %cst_191 = arith.constant dense<0xFF800000> : vector<64xf32>
    %421 = vector.multi_reduction <maximumf>, %420, %cst_191 [1] : vector<64x64xf32> to vector<64xf32>
    %422 = vector.shape_cast %421 : vector<64xf32> to vector<64x1xf32>
    %423 = vector.broadcast %422 : vector<64x1xf32> to vector<64x64xf32>
    %424 = arith.subf %420, %423 : vector<64x64xf32>
    %425 = math.exp %424 : vector<64x64xf32>
    %cst_192 = arith.constant dense<0.000000e+00> : vector<64xf32>
    %426 = vector.multi_reduction <add>, %425, %cst_192 [1] : vector<64x64xf32> to vector<64xf32>
    %427 = vector.shape_cast %426 : vector<64xf32> to vector<64x1xf32>
    %428 = tpu.reciprocal %427 {approx = true} : vector<64x1xf32> -> vector<64x1xf32>
    %429 = vector.broadcast %428 : vector<64x1xf32> to vector<64x64xf32>
    %430 = arith.mulf %425, %429 : vector<64x64xf32>
    %431 = arith.truncf %430 : vector<64x64xf32> to vector<64x64xbf16>
    %cst_193 = arith.constant dense<0.000000e+00> : vector<8x64xf32>
    %432 = tpu.matmul %419, %431, %cst_193 {dimension_numbers = #tpu.dot_dimension_numbers<[1], [1], [0], [0], [0, 0, 1, 0], [], []>} : vector<8x64xbf16>, vector<64x64xbf16>, vector<8x64xf32> -> vector<8x64xf32>
    %433 = vector.extract_strided_slice %373 {offsets = [24, 0], sizes = [8, 64], strides = [1, 1]} : vector<32x64xf32> to vector<8x64xf32>
    %434 = arith.truncf %433 : vector<8x64xf32> to vector<8x64xbf16>
    %435 = vector.extract_strided_slice %374 {offsets = [24, 0], sizes = [8, 64], strides = [1, 1]} : vector<32x64xf32> to vector<8x64xf32>
    %436 = arith.truncf %435 : vector<8x64xf32> to vector<8x64xbf16>
    %437 = vector.extract_strided_slice %375 {offsets = [24, 0], sizes = [8, 64], strides = [1, 1]} : vector<32x64xf32> to vector<8x64xf32>
    %438 = arith.truncf %437 : vector<8x64xf32> to vector<8x64xbf16>
    %cst_194 = arith.constant dense<0.000000e+00> : vector<64x64xf32>
    %439 = tpu.matmul %434, %436, %cst_194 {dimension_numbers = #tpu.dot_dimension_numbers<[0], [0], [1], [1], [0, 1, 1, 1], [], []>} : vector<8x64xbf16>, vector<8x64xbf16>, vector<64x64xf32> -> vector<64x64xf32>
    %cst_195 = arith.constant dense<0xFF800000> : vector<64xf32>
    %440 = vector.multi_reduction <maximumf>, %439, %cst_195 [1] : vector<64x64xf32> to vector<64xf32>
    %441 = vector.shape_cast %440 : vector<64xf32> to vector<64x1xf32>
    %442 = vector.broadcast %441 : vector<64x1xf32> to vector<64x64xf32>
    %443 = arith.subf %439, %442 : vector<64x64xf32>
    %444 = math.exp %443 : vector<64x64xf32>
    %cst_196 = arith.constant dense<0.000000e+00> : vector<64xf32>
    %445 = vector.multi_reduction <add>, %444, %cst_196 [1] : vector<64x64xf32> to vector<64xf32>
    %446 = vector.shape_cast %445 : vector<64xf32> to vector<64x1xf32>
    %447 = tpu.reciprocal %446 {approx = true} : vector<64x1xf32> -> vector<64x1xf32>
    %448 = vector.broadcast %447 : vector<64x1xf32> to vector<64x64xf32>
    %449 = arith.mulf %444, %448 : vector<64x64xf32>
    %450 = arith.truncf %449 : vector<64x64xf32> to vector<64x64xbf16>
    %cst_197 = arith.constant dense<0.000000e+00> : vector<8x64xf32>
    %451 = tpu.matmul %438, %450, %cst_197 {dimension_numbers = #tpu.dot_dimension_numbers<[1], [1], [0], [0], [0, 0, 1, 0], [], []>} : vector<8x64xbf16>, vector<64x64xbf16>, vector<8x64xf32> -> vector<8x64xf32>
    %452 = tpu.concatenate %394, %413, %432, %451 in 0 : vector<8x64xf32>, vector<8x64xf32>, vector<8x64xf32>, vector<8x64xf32> -> vector<32x64xf32>
    %453 = vector.broadcast %347 : vector<32x1xf32> to vector<32x64xf32>
    %454 = arith.addf %337, %453 : vector<32x64xf32>
    %455 = arith.truncf %452 : vector<32x64xf32> to vector<32x64xbf16>
    %cst_198 = arith.constant dense<0.000000e+00> : vector<32x64xf32>
    %456 = tpu.matmul %345, %455, %cst_198 {dimension_numbers = #tpu.dot_dimension_numbers<[1], [0], [0], [1], [0, 0, 1, 1], [], []>} : vector<32x32xbf16>, vector<32x64xbf16>, vector<32x64xf32> -> vector<32x64xf32>
    %457 = arith.addf %454, %456 : vector<32x64xf32>
    %c1_199 = arith.constant 1 : index
    %c0_200 = arith.constant 0 : index
    %c0_201 = arith.constant 0 : index
    %458 = vector.load %arg20[%c1_199, %c0_200, %c0_201] : memref<2x32x32xbf16, #tpu.memory_space<vmem>>, vector<1x32x32xbf16>
    %459 = vector.shape_cast %458 : vector<1x32x32xbf16> to vector<32x32xbf16>
    %c1_202 = arith.constant 1 : index
    %c0_203 = arith.constant 0 : index
    %c0_204 = arith.constant 0 : index
    %460 = vector.load %arg21[%c1_202, %c0_203, %c0_204] : memref<2x32x16xbf16, #tpu.memory_space<vmem>>, vector<1x32x16xbf16>
    %461 = vector.shape_cast %460 : vector<1x32x16xbf16> to vector<32x16xbf16>
    %c1_205 = arith.constant 1 : index
    %c0_206 = arith.constant 0 : index
    %c0_207 = arith.constant 0 : index
    %462 = vector.load %arg22[%c1_205, %c0_206, %c0_207] : memref<2x32x16xbf16, #tpu.memory_space<vmem>>, vector<1x32x16xbf16>
    %463 = vector.shape_cast %462 : vector<1x32x16xbf16> to vector<32x16xbf16>
    %c1_208 = arith.constant 1 : index
    %c0_209 = arith.constant 0 : index
    %c0_210 = arith.constant 0 : index
    %464 = vector.load %arg23[%c1_208, %c0_209, %c0_210] : memref<2x32x32xbf16, #tpu.memory_space<vmem>>, vector<1x32x32xbf16>
    %465 = vector.shape_cast %464 : vector<1x32x32xbf16> to vector<32x32xbf16>
    %c1_211 = arith.constant 1 : index
    %c0_212 = arith.constant 0 : index
    %c0_213 = arith.constant 0 : index
    %466 = vector.load %arg24[%c1_211, %c0_212, %c0_213] : memref<2x32x1xf32, #tpu.memory_space<vmem>>, vector<1x32x1xf32>
    %467 = vector.shape_cast %466 : vector<1x32x1xf32> to vector<32x1xf32>
    %c1_214 = arith.constant 1 : index
    %c0_215 = arith.constant 0 : index
    %c0_216 = arith.constant 0 : index
    %468 = vector.load %arg18[%c1_214, %c0_215, %c0_216] : memref<2x32x1xf32, #tpu.memory_space<vmem>>, vector<1x32x1xf32>
    %469 = vector.shape_cast %468 : vector<1x32x1xf32> to vector<32x1xf32>
    %c1_217 = arith.constant 1 : index
    %c0_218 = arith.constant 0 : index
    %c0_219 = arith.constant 0 : index
    %470 = vector.load %arg19[%c1_217, %c0_218, %c0_219] : memref<2x32x1xf32, #tpu.memory_space<vmem>>, vector<1x32x1xf32>
    %471 = vector.shape_cast %470 : vector<1x32x1xf32> to vector<32x1xf32>
    %cst_220 = arith.constant dense<0.000000e+00> : vector<64xf32>
    %472 = vector.multi_reduction <add>, %457, %cst_220 [0] : vector<32x64xf32> to vector<64xf32>
    %473 = vector.shape_cast %472 : vector<64xf32> to vector<1x64xf32>
    %cst_221 = arith.constant 3.200000e+01 : f32
    %474 = vector.broadcast %cst_221 : f32 to vector<1x64xf32>
    %475 = arith.divf %473, %474 : vector<1x64xf32>
    %476 = vector.broadcast %475 : vector<1x64xf32> to vector<32x64xf32>
    %477 = arith.subf %457, %476 : vector<32x64xf32>
    %478 = arith.mulf %477, %477 : vector<32x64xf32>
    %cst_222 = arith.constant dense<0.000000e+00> : vector<64xf32>
    %479 = vector.multi_reduction <add>, %478, %cst_222 [0] : vector<32x64xf32> to vector<64xf32>
    %480 = vector.shape_cast %479 : vector<64xf32> to vector<1x64xf32>
    %cst_223 = arith.constant 3.200000e+01 : f32
    %481 = vector.broadcast %cst_223 : f32 to vector<1x64xf32>
    %482 = arith.divf %480, %481 : vector<1x64xf32>
    %cst_224 = arith.constant 9.99999974E-6 : f32
    %483 = vector.broadcast %cst_224 : f32 to vector<1x64xf32>
    %484 = arith.addf %482, %483 : vector<1x64xf32>
    %485 = math.rsqrt %484 : vector<1x64xf32>
    %486 = vector.broadcast %485 : vector<1x64xf32> to vector<32x64xf32>
    %487 = arith.mulf %477, %486 : vector<32x64xf32>
    %488 = vector.broadcast %469 : vector<32x1xf32> to vector<32x64xf32>
    %489 = arith.mulf %487, %488 : vector<32x64xf32>
    %490 = vector.broadcast %471 : vector<32x1xf32> to vector<32x64xf32>
    %491 = arith.addf %489, %490 : vector<32x64xf32>
    %492 = arith.truncf %491 : vector<32x64xf32> to vector<32x64xbf16>
    %cst_225 = arith.constant dense<0.000000e+00> : vector<32x64xf32>
    %493 = tpu.matmul %459, %492, %cst_225 {dimension_numbers = #tpu.dot_dimension_numbers<[1], [0], [0], [1], [0, 0, 1, 1], [], []>} : vector<32x32xbf16>, vector<32x64xbf16>, vector<32x64xf32> -> vector<32x64xf32>
    %cst_226 = arith.constant dense<0.000000e+00> : vector<32x8xf32>
    %494 = tpu.matmul %461, %4, %cst_226 {dimension_numbers = #tpu.dot_dimension_numbers<[1], [1], [0], [0], [0, 0, 1, 0], [], []>} : vector<32x16xbf16>, vector<8x16xbf16>, vector<32x8xf32> -> vector<32x8xf32>
    %cst_227 = arith.constant dense<0.000000e+00> : vector<32x8xf32>
    %495 = tpu.matmul %463, %4, %cst_227 {dimension_numbers = #tpu.dot_dimension_numbers<[1], [1], [0], [0], [0, 0, 1, 0], [], []>} : vector<32x16xbf16>, vector<8x16xbf16>, vector<32x8xf32> -> vector<32x8xf32>
    %496 = vector.extract_strided_slice %493 {offsets = [0, 0], sizes = [8, 64], strides = [1, 1]} : vector<32x64xf32> to vector<8x64xf32>
    %497 = arith.truncf %496 : vector<8x64xf32> to vector<8x64xbf16>
    %498 = vector.extract_strided_slice %494 {offsets = [0, 0], sizes = [8, 8], strides = [1, 1]} : vector<32x8xf32> to vector<8x8xf32>
    %499 = arith.truncf %498 : vector<8x8xf32> to vector<8x8xbf16>
    %500 = vector.extract_strided_slice %495 {offsets = [0, 0], sizes = [8, 8], strides = [1, 1]} : vector<32x8xf32> to vector<8x8xf32>
    %501 = arith.truncf %500 : vector<8x8xf32> to vector<8x8xbf16>
    %cst_228 = arith.constant dense<0.000000e+00> : vector<64x8xf32>
    %502 = tpu.matmul %497, %499, %cst_228 {dimension_numbers = #tpu.dot_dimension_numbers<[0], [0], [1], [1], [0, 1, 1, 1], [], []>} : vector<8x64xbf16>, vector<8x8xbf16>, vector<64x8xf32> -> vector<64x8xf32>
    %cst_229 = arith.constant dense<0xFF800000> : vector<64xf32>
    %503 = vector.multi_reduction <maximumf>, %502, %cst_229 [1] : vector<64x8xf32> to vector<64xf32>
    %504 = vector.shape_cast %503 : vector<64xf32> to vector<64x1xf32>
    %505 = vector.broadcast %504 : vector<64x1xf32> to vector<64x8xf32>
    %506 = arith.subf %502, %505 : vector<64x8xf32>
    %507 = math.exp %506 : vector<64x8xf32>
    %cst_230 = arith.constant dense<0.000000e+00> : vector<64xf32>
    %508 = vector.multi_reduction <add>, %507, %cst_230 [1] : vector<64x8xf32> to vector<64xf32>
    %509 = vector.shape_cast %508 : vector<64xf32> to vector<64x1xf32>
    %510 = tpu.reciprocal %509 {approx = true} : vector<64x1xf32> -> vector<64x1xf32>
    %511 = vector.broadcast %510 : vector<64x1xf32> to vector<64x8xf32>
    %512 = arith.mulf %507, %511 : vector<64x8xf32>
    %513 = arith.truncf %512 : vector<64x8xf32> to vector<64x8xbf16>
    %cst_231 = arith.constant dense<0.000000e+00> : vector<8x64xf32>
    %514 = tpu.matmul %501, %513, %cst_231 {dimension_numbers = #tpu.dot_dimension_numbers<[1], [1], [0], [0], [0, 0, 1, 0], [], []>} : vector<8x8xbf16>, vector<64x8xbf16>, vector<8x64xf32> -> vector<8x64xf32>
    %515 = vector.extract_strided_slice %493 {offsets = [8, 0], sizes = [8, 64], strides = [1, 1]} : vector<32x64xf32> to vector<8x64xf32>
    %516 = arith.truncf %515 : vector<8x64xf32> to vector<8x64xbf16>
    %517 = vector.extract_strided_slice %494 {offsets = [8, 0], sizes = [8, 8], strides = [1, 1]} : vector<32x8xf32> to vector<8x8xf32>
    %518 = arith.truncf %517 : vector<8x8xf32> to vector<8x8xbf16>
    %519 = vector.extract_strided_slice %495 {offsets = [8, 0], sizes = [8, 8], strides = [1, 1]} : vector<32x8xf32> to vector<8x8xf32>
    %520 = arith.truncf %519 : vector<8x8xf32> to vector<8x8xbf16>
    %cst_232 = arith.constant dense<0.000000e+00> : vector<64x8xf32>
    %521 = tpu.matmul %516, %518, %cst_232 {dimension_numbers = #tpu.dot_dimension_numbers<[0], [0], [1], [1], [0, 1, 1, 1], [], []>} : vector<8x64xbf16>, vector<8x8xbf16>, vector<64x8xf32> -> vector<64x8xf32>
    %cst_233 = arith.constant dense<0xFF800000> : vector<64xf32>
    %522 = vector.multi_reduction <maximumf>, %521, %cst_233 [1] : vector<64x8xf32> to vector<64xf32>
    %523 = vector.shape_cast %522 : vector<64xf32> to vector<64x1xf32>
    %524 = vector.broadcast %523 : vector<64x1xf32> to vector<64x8xf32>
    %525 = arith.subf %521, %524 : vector<64x8xf32>
    %526 = math.exp %525 : vector<64x8xf32>
    %cst_234 = arith.constant dense<0.000000e+00> : vector<64xf32>
    %527 = vector.multi_reduction <add>, %526, %cst_234 [1] : vector<64x8xf32> to vector<64xf32>
    %528 = vector.shape_cast %527 : vector<64xf32> to vector<64x1xf32>
    %529 = tpu.reciprocal %528 {approx = true} : vector<64x1xf32> -> vector<64x1xf32>
    %530 = vector.broadcast %529 : vector<64x1xf32> to vector<64x8xf32>
    %531 = arith.mulf %526, %530 : vector<64x8xf32>
    %532 = arith.truncf %531 : vector<64x8xf32> to vector<64x8xbf16>
    %cst_235 = arith.constant dense<0.000000e+00> : vector<8x64xf32>
    %533 = tpu.matmul %520, %532, %cst_235 {dimension_numbers = #tpu.dot_dimension_numbers<[1], [1], [0], [0], [0, 0, 1, 0], [], []>} : vector<8x8xbf16>, vector<64x8xbf16>, vector<8x64xf32> -> vector<8x64xf32>
    %534 = vector.extract_strided_slice %493 {offsets = [16, 0], sizes = [8, 64], strides = [1, 1]} : vector<32x64xf32> to vector<8x64xf32>
    %535 = arith.truncf %534 : vector<8x64xf32> to vector<8x64xbf16>
    %536 = vector.extract_strided_slice %494 {offsets = [16, 0], sizes = [8, 8], strides = [1, 1]} : vector<32x8xf32> to vector<8x8xf32>
    %537 = arith.truncf %536 : vector<8x8xf32> to vector<8x8xbf16>
    %538 = vector.extract_strided_slice %495 {offsets = [16, 0], sizes = [8, 8], strides = [1, 1]} : vector<32x8xf32> to vector<8x8xf32>
    %539 = arith.truncf %538 : vector<8x8xf32> to vector<8x8xbf16>
    %cst_236 = arith.constant dense<0.000000e+00> : vector<64x8xf32>
    %540 = tpu.matmul %535, %537, %cst_236 {dimension_numbers = #tpu.dot_dimension_numbers<[0], [0], [1], [1], [0, 1, 1, 1], [], []>} : vector<8x64xbf16>, vector<8x8xbf16>, vector<64x8xf32> -> vector<64x8xf32>
    %cst_237 = arith.constant dense<0xFF800000> : vector<64xf32>
    %541 = vector.multi_reduction <maximumf>, %540, %cst_237 [1] : vector<64x8xf32> to vector<64xf32>
    %542 = vector.shape_cast %541 : vector<64xf32> to vector<64x1xf32>
    %543 = vector.broadcast %542 : vector<64x1xf32> to vector<64x8xf32>
    %544 = arith.subf %540, %543 : vector<64x8xf32>
    %545 = math.exp %544 : vector<64x8xf32>
    %cst_238 = arith.constant dense<0.000000e+00> : vector<64xf32>
    %546 = vector.multi_reduction <add>, %545, %cst_238 [1] : vector<64x8xf32> to vector<64xf32>
    %547 = vector.shape_cast %546 : vector<64xf32> to vector<64x1xf32>
    %548 = tpu.reciprocal %547 {approx = true} : vector<64x1xf32> -> vector<64x1xf32>
    %549 = vector.broadcast %548 : vector<64x1xf32> to vector<64x8xf32>
    %550 = arith.mulf %545, %549 : vector<64x8xf32>
    %551 = arith.truncf %550 : vector<64x8xf32> to vector<64x8xbf16>
    %cst_239 = arith.constant dense<0.000000e+00> : vector<8x64xf32>
    %552 = tpu.matmul %539, %551, %cst_239 {dimension_numbers = #tpu.dot_dimension_numbers<[1], [1], [0], [0], [0, 0, 1, 0], [], []>} : vector<8x8xbf16>, vector<64x8xbf16>, vector<8x64xf32> -> vector<8x64xf32>
    %553 = vector.extract_strided_slice %493 {offsets = [24, 0], sizes = [8, 64], strides = [1, 1]} : vector<32x64xf32> to vector<8x64xf32>
    %554 = arith.truncf %553 : vector<8x64xf32> to vector<8x64xbf16>
    %555 = vector.extract_strided_slice %494 {offsets = [24, 0], sizes = [8, 8], strides = [1, 1]} : vector<32x8xf32> to vector<8x8xf32>
    %556 = arith.truncf %555 : vector<8x8xf32> to vector<8x8xbf16>
    %557 = vector.extract_strided_slice %495 {offsets = [24, 0], sizes = [8, 8], strides = [1, 1]} : vector<32x8xf32> to vector<8x8xf32>
    %558 = arith.truncf %557 : vector<8x8xf32> to vector<8x8xbf16>
    %cst_240 = arith.constant dense<0.000000e+00> : vector<64x8xf32>
    %559 = tpu.matmul %554, %556, %cst_240 {dimension_numbers = #tpu.dot_dimension_numbers<[0], [0], [1], [1], [0, 1, 1, 1], [], []>} : vector<8x64xbf16>, vector<8x8xbf16>, vector<64x8xf32> -> vector<64x8xf32>
    %cst_241 = arith.constant dense<0xFF800000> : vector<64xf32>
    %560 = vector.multi_reduction <maximumf>, %559, %cst_241 [1] : vector<64x8xf32> to vector<64xf32>
    %561 = vector.shape_cast %560 : vector<64xf32> to vector<64x1xf32>
    %562 = vector.broadcast %561 : vector<64x1xf32> to vector<64x8xf32>
    %563 = arith.subf %559, %562 : vector<64x8xf32>
    %564 = math.exp %563 : vector<64x8xf32>
    %cst_242 = arith.constant dense<0.000000e+00> : vector<64xf32>
    %565 = vector.multi_reduction <add>, %564, %cst_242 [1] : vector<64x8xf32> to vector<64xf32>
    %566 = vector.shape_cast %565 : vector<64xf32> to vector<64x1xf32>
    %567 = tpu.reciprocal %566 {approx = true} : vector<64x1xf32> -> vector<64x1xf32>
    %568 = vector.broadcast %567 : vector<64x1xf32> to vector<64x8xf32>
    %569 = arith.mulf %564, %568 : vector<64x8xf32>
    %570 = arith.truncf %569 : vector<64x8xf32> to vector<64x8xbf16>
    %cst_243 = arith.constant dense<0.000000e+00> : vector<8x64xf32>
    %571 = tpu.matmul %558, %570, %cst_243 {dimension_numbers = #tpu.dot_dimension_numbers<[1], [1], [0], [0], [0, 0, 1, 0], [], []>} : vector<8x8xbf16>, vector<64x8xbf16>, vector<8x64xf32> -> vector<8x64xf32>
    %572 = tpu.concatenate %514, %533, %552, %571 in 0 : vector<8x64xf32>, vector<8x64xf32>, vector<8x64xf32>, vector<8x64xf32> -> vector<32x64xf32>
    %573 = vector.broadcast %467 : vector<32x1xf32> to vector<32x64xf32>
    %574 = arith.addf %457, %573 : vector<32x64xf32>
    %575 = arith.truncf %572 : vector<32x64xf32> to vector<32x64xbf16>
    %cst_244 = arith.constant dense<0.000000e+00> : vector<32x64xf32>
    %576 = tpu.matmul %465, %575, %cst_244 {dimension_numbers = #tpu.dot_dimension_numbers<[1], [0], [0], [1], [0, 0, 1, 1], [], []>} : vector<32x32xbf16>, vector<32x64xbf16>, vector<32x64xf32> -> vector<32x64xf32>
    %577 = arith.addf %574, %576 : vector<32x64xf32>
    %c1_245 = arith.constant 1 : index
    %c0_246 = arith.constant 0 : index
    %c0_247 = arith.constant 0 : index
    %578 = vector.load %arg27[%c1_245, %c0_246, %c0_247] : memref<2x128x32xbf16, #tpu.memory_space<vmem>>, vector<1x128x32xbf16>
    %579 = vector.shape_cast %578 : vector<1x128x32xbf16> to vector<128x32xbf16>
    %c1_248 = arith.constant 1 : index
    %c0_249 = arith.constant 0 : index
    %c0_250 = arith.constant 0 : index
    %580 = vector.load %arg28[%c1_248, %c0_249, %c0_250] : memref<2x128x32xbf16, #tpu.memory_space<vmem>>, vector<1x128x32xbf16>
    %581 = vector.shape_cast %580 : vector<1x128x32xbf16> to vector<128x32xbf16>
    %c1_251 = arith.constant 1 : index
    %c0_252 = arith.constant 0 : index
    %c0_253 = arith.constant 0 : index
    %582 = vector.load %arg29[%c1_251, %c0_252, %c0_253] : memref<2x128x1xf32, #tpu.memory_space<vmem>>, vector<1x128x1xf32>
    %583 = vector.shape_cast %582 : vector<1x128x1xf32> to vector<128x1xf32>
    %c1_254 = arith.constant 1 : index
    %c0_255 = arith.constant 0 : index
    %c0_256 = arith.constant 0 : index
    %584 = vector.load %arg30[%c1_254, %c0_255, %c0_256] : memref<2x128x1xf32, #tpu.memory_space<vmem>>, vector<1x128x1xf32>
    %585 = vector.shape_cast %584 : vector<1x128x1xf32> to vector<128x1xf32>
    %c1_257 = arith.constant 1 : index
    %c0_258 = arith.constant 0 : index
    %c0_259 = arith.constant 0 : index
    %586 = vector.load %arg31[%c1_257, %c0_258, %c0_259] : memref<2x32x128xbf16, #tpu.memory_space<vmem>>, vector<1x32x128xbf16>
    %587 = vector.shape_cast %586 : vector<1x32x128xbf16> to vector<32x128xbf16>
    %c1_260 = arith.constant 1 : index
    %c0_261 = arith.constant 0 : index
    %c0_262 = arith.constant 0 : index
    %588 = vector.load %arg32[%c1_260, %c0_261, %c0_262] : memref<2x32x1xf32, #tpu.memory_space<vmem>>, vector<1x32x1xf32>
    %589 = vector.shape_cast %588 : vector<1x32x1xf32> to vector<32x1xf32>
    %c1_263 = arith.constant 1 : index
    %c0_264 = arith.constant 0 : index
    %c0_265 = arith.constant 0 : index
    %590 = vector.load %arg25[%c1_263, %c0_264, %c0_265] : memref<2x32x1xf32, #tpu.memory_space<vmem>>, vector<1x32x1xf32>
    %591 = vector.shape_cast %590 : vector<1x32x1xf32> to vector<32x1xf32>
    %c1_266 = arith.constant 1 : index
    %c0_267 = arith.constant 0 : index
    %c0_268 = arith.constant 0 : index
    %592 = vector.load %arg26[%c1_266, %c0_267, %c0_268] : memref<2x32x1xf32, #tpu.memory_space<vmem>>, vector<1x32x1xf32>
    %593 = vector.shape_cast %592 : vector<1x32x1xf32> to vector<32x1xf32>
    %cst_269 = arith.constant dense<0.000000e+00> : vector<64xf32>
    %594 = vector.multi_reduction <add>, %577, %cst_269 [0] : vector<32x64xf32> to vector<64xf32>
    %595 = vector.shape_cast %594 : vector<64xf32> to vector<1x64xf32>
    %cst_270 = arith.constant 3.200000e+01 : f32
    %596 = vector.broadcast %cst_270 : f32 to vector<1x64xf32>
    %597 = arith.divf %595, %596 : vector<1x64xf32>
    %598 = vector.broadcast %597 : vector<1x64xf32> to vector<32x64xf32>
    %599 = arith.subf %577, %598 : vector<32x64xf32>
    %600 = arith.mulf %599, %599 : vector<32x64xf32>
    %cst_271 = arith.constant dense<0.000000e+00> : vector<64xf32>
    %601 = vector.multi_reduction <add>, %600, %cst_271 [0] : vector<32x64xf32> to vector<64xf32>
    %602 = vector.shape_cast %601 : vector<64xf32> to vector<1x64xf32>
    %cst_272 = arith.constant 3.200000e+01 : f32
    %603 = vector.broadcast %cst_272 : f32 to vector<1x64xf32>
    %604 = arith.divf %602, %603 : vector<1x64xf32>
    %cst_273 = arith.constant 9.99999974E-6 : f32
    %605 = vector.broadcast %cst_273 : f32 to vector<1x64xf32>
    %606 = arith.addf %604, %605 : vector<1x64xf32>
    %607 = math.rsqrt %606 : vector<1x64xf32>
    %608 = vector.broadcast %607 : vector<1x64xf32> to vector<32x64xf32>
    %609 = arith.mulf %599, %608 : vector<32x64xf32>
    %610 = vector.broadcast %591 : vector<32x1xf32> to vector<32x64xf32>
    %611 = arith.mulf %609, %610 : vector<32x64xf32>
    %612 = vector.broadcast %593 : vector<32x1xf32> to vector<32x64xf32>
    %613 = arith.addf %611, %612 : vector<32x64xf32>
    %614 = arith.truncf %613 : vector<32x64xf32> to vector<32x64xbf16>
    %cst_274 = arith.constant dense<0.000000e+00> : vector<128x64xf32>
    %615 = tpu.matmul %579, %614, %cst_274 {dimension_numbers = #tpu.dot_dimension_numbers<[1], [0], [0], [1], [0, 0, 1, 1], [], []>} : vector<128x32xbf16>, vector<32x64xbf16>, vector<128x64xf32> -> vector<128x64xf32>
    %616 = vector.broadcast %583 : vector<128x1xf32> to vector<128x64xf32>
    %617 = arith.addf %615, %616 : vector<128x64xf32>
    %cst_275 = arith.constant dense<0.000000e+00> : vector<128x64xf32>
    %618 = tpu.matmul %581, %614, %cst_275 {dimension_numbers = #tpu.dot_dimension_numbers<[1], [0], [0], [1], [0, 0, 1, 1], [], []>} : vector<128x32xbf16>, vector<32x64xbf16>, vector<128x64xf32> -> vector<128x64xf32>
    %619 = vector.broadcast %585 : vector<128x1xf32> to vector<128x64xf32>
    %620 = arith.addf %618, %619 : vector<128x64xf32>
    %cst_276 = arith.constant 5.000000e-01 : f32
    %621 = vector.broadcast %cst_276 : f32 to vector<128x64xf32>
    %622 = arith.mulf %621, %620 : vector<128x64xf32>
    %cst_277 = arith.constant 0.707106769 : f32
    %623 = vector.broadcast %cst_277 : f32 to vector<128x64xf32>
    %624 = arith.mulf %620, %623 : vector<128x64xf32>
    %625 = math.erf %624 : vector<128x64xf32>
    %cst_278 = arith.constant 1.000000e+00 : f32
    %626 = vector.broadcast %cst_278 : f32 to vector<128x64xf32>
    %627 = arith.addf %626, %625 : vector<128x64xf32>
    %628 = arith.mulf %622, %627 : vector<128x64xf32>
    %629 = arith.mulf %617, %628 : vector<128x64xf32>
    %630 = arith.truncf %629 : vector<128x64xf32> to vector<128x64xbf16>
    %cst_279 = arith.constant dense<0.000000e+00> : vector<32x64xf32>
    %631 = tpu.matmul %587, %630, %cst_279 {dimension_numbers = #tpu.dot_dimension_numbers<[1], [0], [0], [1], [0, 0, 1, 1], [], []>} : vector<32x128xbf16>, vector<128x64xbf16>, vector<32x64xf32> -> vector<32x64xf32>
    %632 = arith.addf %577, %631 : vector<32x64xf32>
    %633 = vector.broadcast %589 : vector<32x1xf32> to vector<32x64xf32>
    %634 = arith.addf %632, %633 : vector<32x64xf32>
    %c0_280 = arith.constant 0 : index
    %c0_281 = arith.constant 0 : index
    %635 = vector.load %arg9[%c0_280, %c0_281] : memref<32x32xbf16, #tpu.memory_space<vmem>>, vector<32x32xbf16>
    %636 = arith.truncf %634 : vector<32x64xf32> to vector<32x64xbf16>
    %cst_282 = arith.constant dense<0.000000e+00> : vector<32x64xf32>
    %637 = tpu.matmul %635, %636, %cst_282 {dimension_numbers = #tpu.dot_dimension_numbers<[1], [0], [0], [1], [0, 0, 1, 1], [], []>} : vector<32x32xbf16>, vector<32x64xbf16>, vector<32x64xf32> -> vector<32x64xf32>
    %c0_283 = arith.constant 0 : index
    %c0_284 = arith.constant 0 : index
    %638 = vector.load %arg10[%c0_283, %c0_284] : memref<32x1xf32, #tpu.memory_space<vmem>>, vector<32x1xf32>
    %639 = vector.broadcast %638 : vector<32x1xf32> to vector<32x64xf32>
    %640 = arith.addf %637, %639 : vector<32x64xf32>
    %641 = arith.addf %640, %1 : vector<32x64xf32>
    %c0_285 = arith.constant 0 : index
    %c0_286 = arith.constant 0 : index
    %c0_287 = arith.constant 0 : index
    %642 = vector.load %arg33[%c0_285, %c0_286, %c0_287] : memref<1x32x64xf32, #tpu.memory_space<vmem>>, vector<1x32x64xf32>
    %643 = vector.shape_cast %642 : vector<1x32x64xf32> to vector<32x64xf32>
    %644 = vector.shape_cast %641 : vector<32x64xf32> to vector<1x32x64xf32>
    tpu.vector_store %arg33[%c0_285, %c0_286, %c0_287], %644 {strides = array<i32>} : memref<1x32x64xf32, #tpu.memory_space<vmem>>, vector<1x32x64xf32>,
    return
  }
  func.func @transform_0(%arg0: i32) -> (i32, i32, i32) {
    %c0_i32 = arith.constant 0 : i32
    %c0_i32_0 = arith.constant 0 : i32
    %c0_i32_1 = arith.constant 0 : i32
    return %arg0, %c0_i32, %c0_i32_0 : i32, i32, i32
  }
  func.func @transform_1(%arg0: i32) -> (i32, i32, i32) {
    %c0_i32 = arith.constant 0 : i32
    %c0_i32_0 = arith.constant 0 : i32
    %c0_i32_1 = arith.constant 0 : i32
    return %arg0, %c0_i32, %c0_i32_0 : i32, i32, i32
  }
  func.func @transform_2(%arg0: i32) -> (i32, i32) {
    %c0_i32 = arith.constant 0 : i32
    %c0_i32_0 = arith.constant 0 : i32
    %c0_i32_1 = arith.constant 0 : i32
    return %c0_i32, %c0_i32_0 : i32, i32
  }
  func.func @transform_3(%arg0: i32) -> (i32, i32) {
    %c0_i32 = arith.constant 0 : i32
    %c0_i32_0 = arith.constant 0 : i32
    %c0_i32_1 = arith.constant 0 : i32
    return %c0_i32, %c0_i32_0 : i32, i32
  }
  func.func @transform_4(%arg0: i32) -> (i32, i32) {
    %c0_i32 = arith.constant 0 : i32
    %c0_i32_0 = arith.constant 0 : i32
    %c0_i32_1 = arith.constant 0 : i32
    return %c0_i32, %c0_i32_0 : i32, i32
  }
  func.func @transform_5(%arg0: i32) -> (i32, i32) {
    %c0_i32 = arith.constant 0 : i32
    %c0_i32_0 = arith.constant 0 : i32
    %c0_i32_1 = arith.constant 0 : i32
    return %c0_i32, %c0_i32_0 : i32, i32
  }
  func.func @transform_6(%arg0: i32) -> (i32, i32) {
    %c0_i32 = arith.constant 0 : i32
    %c0_i32_0 = arith.constant 0 : i32
    %c0_i32_1 = arith.constant 0 : i32
    return %c0_i32, %c0_i32_0 : i32, i32
  }
  func.func @transform_7(%arg0: i32) -> (i32, i32) {
    %c0_i32 = arith.constant 0 : i32
    %c0_i32_0 = arith.constant 0 : i32
    %c0_i32_1 = arith.constant 0 : i32
    return %c0_i32, %c0_i32_0 : i32, i32
  }
  func.func @transform_8(%arg0: i32) -> (i32, i32) {
    %c0_i32 = arith.constant 0 : i32
    %c0_i32_0 = arith.constant 0 : i32
    %c0_i32_1 = arith.constant 0 : i32
    return %c0_i32, %c0_i32_0 : i32, i32
  }
  func.func @transform_9(%arg0: i32) -> (i32, i32) {
    %c0_i32 = arith.constant 0 : i32
    %c0_i32_0 = arith.constant 0 : i32
    %c0_i32_1 = arith.constant 0 : i32
    return %c0_i32, %c0_i32_0 : i32, i32
  }
  func.func @transform_10(%arg0: i32) -> (i32, i32, i32) {
    %c0_i32 = arith.constant 0 : i32
    %c0_i32_0 = arith.constant 0 : i32
    %c0_i32_1 = arith.constant 0 : i32
    %c0_i32_2 = arith.constant 0 : i32
    return %c0_i32, %c0_i32_0, %c0_i32_1 : i32, i32, i32
  }
  func.func @transform_11(%arg0: i32) -> (i32, i32, i32) {
    %c0_i32 = arith.constant 0 : i32
    %c0_i32_0 = arith.constant 0 : i32
    %c0_i32_1 = arith.constant 0 : i32
    %c0_i32_2 = arith.constant 0 : i32
    return %c0_i32, %c0_i32_0, %c0_i32_1 : i32, i32, i32
  }
  func.func @transform_12(%arg0: i32) -> (i32, i32, i32) {
    %c0_i32 = arith.constant 0 : i32
    %c0_i32_0 = arith.constant 0 : i32
    %c0_i32_1 = arith.constant 0 : i32
    %c0_i32_2 = arith.constant 0 : i32
    return %c0_i32, %c0_i32_0, %c0_i32_1 : i32, i32, i32
  }
  func.func @transform_13(%arg0: i32) -> (i32, i32, i32) {
    %c0_i32 = arith.constant 0 : i32
    %c0_i32_0 = arith.constant 0 : i32
    %c0_i32_1 = arith.constant 0 : i32
    %c0_i32_2 = arith.constant 0 : i32
    return %c0_i32, %c0_i32_0, %c0_i32_1 : i32, i32, i32
  }
  func.func @transform_14(%arg0: i32) -> (i32, i32, i32) {
    %c0_i32 = arith.constant 0 : i32
    %c0_i32_0 = arith.constant 0 : i32
    %c0_i32_1 = arith.constant 0 : i32
    %c0_i32_2 = arith.constant 0 : i32
    return %c0_i32, %c0_i32_0, %c0_i32_1 : i32, i32, i32
  }
  func.func @transform_15(%arg0: i32) -> (i32, i32, i32) {
    %c0_i32 = arith.constant 0 : i32
    %c0_i32_0 = arith.constant 0 : i32
    %c0_i32_1 = arith.constant 0 : i32
    %c0_i32_2 = arith.constant 0 : i32
    return %c0_i32, %c0_i32_0, %c0_i32_1 : i32, i32, i32
  }
  func.func @transform_16(%arg0: i32) -> (i32, i32, i32) {
    %c0_i32 = arith.constant 0 : i32
    %c0_i32_0 = arith.constant 0 : i32
    %c0_i32_1 = arith.constant 0 : i32
    %c0_i32_2 = arith.constant 0 : i32
    return %c0_i32, %c0_i32_0, %c0_i32_1 : i32, i32, i32
  }
  func.func @transform_17(%arg0: i32) -> (i32, i32, i32) {
    %c0_i32 = arith.constant 0 : i32
    %c0_i32_0 = arith.constant 0 : i32
    %c0_i32_1 = arith.constant 0 : i32
    %c0_i32_2 = arith.constant 0 : i32
    return %c0_i32, %c0_i32_0, %c0_i32_1 : i32, i32, i32
  }
  func.func @transform_18(%arg0: i32) -> (i32, i32, i32) {
    %c0_i32 = arith.constant 0 : i32
    %c0_i32_0 = arith.constant 0 : i32
    %c0_i32_1 = arith.constant 0 : i32
    %c0_i32_2 = arith.constant 0 : i32
    return %c0_i32, %c0_i32_0, %c0_i32_1 : i32, i32, i32
  }
  func.func @transform_19(%arg0: i32) -> (i32, i32, i32) {
    %c0_i32 = arith.constant 0 : i32
    %c0_i32_0 = arith.constant 0 : i32
    %c0_i32_1 = arith.constant 0 : i32
    %c0_i32_2 = arith.constant 0 : i32
    return %c0_i32, %c0_i32_0, %c0_i32_1 : i32, i32, i32
  }
  func.func @transform_20(%arg0: i32) -> (i32, i32, i32) {
    %c0_i32 = arith.constant 0 : i32
    %c0_i32_0 = arith.constant 0 : i32
    %c0_i32_1 = arith.constant 0 : i32
    %c0_i32_2 = arith.constant 0 : i32
    return %c0_i32, %c0_i32_0, %c0_i32_1 : i32, i32, i32
  }
  func.func @transform_21(%arg0: i32) -> (i32, i32, i32) {
    %c0_i32 = arith.constant 0 : i32
    %c0_i32_0 = arith.constant 0 : i32
    %c0_i32_1 = arith.constant 0 : i32
    %c0_i32_2 = arith.constant 0 : i32
    return %c0_i32, %c0_i32_0, %c0_i32_1 : i32, i32, i32
  }
  func.func @transform_22(%arg0: i32) -> (i32, i32, i32) {
    %c0_i32 = arith.constant 0 : i32
    %c0_i32_0 = arith.constant 0 : i32
    %c0_i32_1 = arith.constant 0 : i32
    %c0_i32_2 = arith.constant 0 : i32
    return %c0_i32, %c0_i32_0, %c0_i32_1 : i32, i32, i32
  }
  func.func @transform_23(%arg0: i32) -> (i32, i32, i32) {
    %c0_i32 = arith.constant 0 : i32
    %c0_i32_0 = arith.constant 0 : i32
    %c0_i32_1 = arith.constant 0 : i32
    %c0_i32_2 = arith.constant 0 : i32
    return %c0_i32, %c0_i32_0, %c0_i32_1 : i32, i32, i32
  }
  func.func @transform_24(%arg0: i32) -> (i32, i32, i32) {
    %c0_i32 = arith.constant 0 : i32
    %c0_i32_0 = arith.constant 0 : i32
    %c0_i32_1 = arith.constant 0 : i32
    %c0_i32_2 = arith.constant 0 : i32
    return %c0_i32, %c0_i32_0, %c0_i32_1 : i32, i32, i32
  }
  func.func @transform_25(%arg0: i32) -> (i32, i32, i32) {
    %c0_i32 = arith.constant 0 : i32
    %c0_i32_0 = arith.constant 0 : i32
    %c0_i32_1 = arith.constant 0 : i32
    %c0_i32_2 = arith.constant 0 : i32
    return %c0_i32, %c0_i32_0, %c0_i32_1 : i32, i32, i32
  }
  func.func @transform_26(%arg0: i32) -> (i32, i32, i32) {
    %c0_i32 = arith.constant 0 : i32
    %c0_i32_0 = arith.constant 0 : i32
    %c0_i32_1 = arith.constant 0 : i32
    %c0_i32_2 = arith.constant 0 : i32
    return %c0_i32, %c0_i32_0, %c0_i32_1 : i32, i32, i32
  }
  func.func @transform_27(%arg0: i32) -> (i32, i32, i32) {
    %c0_i32 = arith.constant 0 : i32
    %c0_i32_0 = arith.constant 0 : i32
    %c0_i32_1 = arith.constant 0 : i32
    %c0_i32_2 = arith.constant 0 : i32
    return %c0_i32, %c0_i32_0, %c0_i32_1 : i32, i32, i32
  }
  func.func @transform_28(%arg0: i32) -> (i32, i32, i32) {
    %c0_i32 = arith.constant 0 : i32
    %c0_i32_0 = arith.constant 0 : i32
    %c0_i32_1 = arith.constant 0 : i32
    %c0_i32_2 = arith.constant 0 : i32
    return %c0_i32, %c0_i32_0, %c0_i32_1 : i32, i32, i32
  }
  func.func @transform_29(%arg0: i32) -> (i32, i32, i32) {
    %c0_i32 = arith.constant 0 : i32
    %c0_i32_0 = arith.constant 0 : i32
    %c0_i32_1 = arith.constant 0 : i32
    %c0_i32_2 = arith.constant 0 : i32
    return %c0_i32, %c0_i32_0, %c0_i32_1 : i32, i32, i32
  }
  func.func @transform_30(%arg0: i32) -> (i32, i32, i32) {
    %c0_i32 = arith.constant 0 : i32
    %c0_i32_0 = arith.constant 0 : i32
    %c0_i32_1 = arith.constant 0 : i32
    %c0_i32_2 = arith.constant 0 : i32
    return %c0_i32, %c0_i32_0, %c0_i32_1 : i32, i32, i32
  }
  func.func @transform_31(%arg0: i32) -> (i32, i32, i32) {
    %c0_i32 = arith.constant 0 : i32
    %c0_i32_0 = arith.constant 0 : i32
    %c0_i32_1 = arith.constant 0 : i32
    %c0_i32_2 = arith.constant 0 : i32
    return %c0_i32, %c0_i32_0, %c0_i32_1 : i32, i32, i32
  }
  func.func @transform_32(%arg0: i32) -> (i32, i32, i32) {
    %c0_i32 = arith.constant 0 : i32
    %c0_i32_0 = arith.constant 0 : i32
    %c0_i32_1 = arith.constant 0 : i32
    return %arg0, %c0_i32, %c0_i32_0 : i32, i32, i32
  }
}

</mosaic_0001>

<bundles_post_ra>
// kernel: tpu_custom_call.1
= control target key start
LH: loop header
LB: loop body
LE: loop exit
PB: predicated region body
PF: predicated region fallthrough
CT: control target
= control target key end

     0   :  { %s11355_s6 = smov 1   ;;  %s11356_s10 = smov 2   ;;  %s13960_s0 = inlined_call_operand.smem [shape: u32[33], index: -1, kind: input, shape index: {}] }
   0x1   :  { %s11401_s5 = sld [smem:[%s13960_s0]]   ;;  %s11357_s14 = smov 3  }
   0x2   :  { %s11406_s9 = sld [smem:[%s13960_s0 + %s11355_s6]]   ;;  %s11358_s18 = smov 4  }
   0x3   :  { %s11411_s13 = sld [smem:[%s13960_s0 + %s11356_s10]]   ;;  %s11359_s22 = smov 5  }
   0x4   :  { %s11416_s17 = sld [smem:[%s13960_s0 + %s11357_s14]]   ;;  %s11360_s26 = smov 6  }
   0x5   :  { %s11421_s21 = sld [smem:[%s13960_s0 + %s11358_s18]]   ;;  %s11361_s30 = smov 7  }
   0x6   :  { %s11426_s25 = sld [smem:[%s13960_s0 + %s11359_s22]]   ;;  %s11362_s4 = smov 8  }
   0x7   :  { %14000 = sst [smem:[#allocation5_spill]] %s11401_s5  ;;  %s11363_s10 = smov 9  }
   0x8   :  { %14001 = sst [smem:[#allocation6_spill]] %s11406_s9  ;;  %s11364_s15 = smov 10  }
   0x9   :  { %14002 = sst [smem:[#allocation7_spill]] %s11411_s13  ;;  %s11365_s20 = smov 11  }
   0xa   :  { %14003 = sst [smem:[#allocation8_spill]] %s11416_s17  ;;  %s11367_s1 = smov 13  }
   0xb   :  { %14004 = sst [smem:[#allocation9_spill]] %s11421_s21  ;;  %s11368_s7 = smov 14  }
   0xc   :  { %14005 = sst [smem:[#allocation10_spill]] %s11426_s25  ;;  %s11370_s22 = smov 16  }
   0xd   :  { %s11431_s29 = sld [smem:[%s13960_s0 + %s11360_s26]]   ;;  %s11366_s26 = smov 12  }
   0xe   :  { %s11436_s3 = sld [smem:[%s13960_s0 + %s11361_s30]]   ;;  %s11371_s28 = smov 17  }
   0xf   :  { %s11441_s8 = sld [smem:[%s13960_s0 + %s11362_s4]]  }
  0x10   :  { %s11446_s14 = sld [smem:[%s13960_s0 + %s11363_s10]]  }
  0x11   :  { %s11451_s19 = sld [smem:[%s13960_s0 + %s11364_s15]]   ;;  %s11369_s15 = smov 15  }
  0x12   :  { %s11456_s24 = sld [smem:[%s13960_s0 + %s11365_s20]]  }
  0x13   :  { %14006 = sst [smem:[#allocation11_spill]] %s11431_s29 }
  0x14   :  { %14007 = sst [smem:[#allocation12_spill]] %s11436_s3 }
  0x15   :  { %14008 = sst [smem:[#allocation13_spill]] %s11441_s8 }
  0x16   :  { %14009 = sst [smem:[#allocation14_spill]] %s11446_s14 }
  0x17   :  { %14010 = sst [smem:[#allocation15_spill]] %s11451_s19 }
  0x18   :  { %14011 = sst [smem:[#allocation16_spill]] %s11456_s24 }
  0x19   :  { %s11461_s30 = sld [smem:[%s13960_s0 + %s11366_s26]]  }
  0x1a   :  { %s11466_s6 = sld [smem:[%s13960_s0 + %s11367_s1]]  }
  0x1b   :  { %s11471_s12 = sld [smem:[%s13960_s0 + %s11368_s7]]   ;;  %s11372_s7 = smov 18  }
  0x1c   :  { %s11476_s20 = sld [smem:[%s13960_s0 + %s11369_s15]]   ;;  %s11373_s15 = smov 19  }
  0x1d   :  { %s11481_s27 = sld [smem:[%s13960_s0 + %s11370_s22]]   ;;  %s11374_s22 = smov 20  }
  0x1e   :  { %s11486_s4 = sld [smem:[%s13960_s0 + %s11371_s28]]   ;;  %s11375_s28 = smov 21  }
  0x1f   :  { %s11491_s8 = sld [smem:[%s13960_s0 + %s11372_s7]]   ;;  %s11376_s7 = smov 22  }
  0x20   :  { %14012 = sst [smem:[#allocation17_spill]] %s11466_s6 }
  0x21   :  { %14013 = sst [smem:[#allocation18_spill]] %s11471_s12 }
  0x22   :  { %14014 = sst [smem:[#allocation19_spill]] %s11476_s20 }
  0x23   :  { %s11496_s14 = sld [smem:[%s13960_s0 + %s11373_s15]]   ;;  %s11377_s15 = smov 23  }
  0x24   :  { %14015 = sst [smem:[#allocation20_spill]] %s11486_s4 }
  0x25   :  { %14016 = sst [smem:[#allocation21_spill]] %s11491_s8 }
  0x26   :  { %s11501_s9 = sld [smem:[%s13960_s0 + %s11374_s22]]   ;;  %s11378_s22 = smov 24  }
  0x27   :  { %s11506_s20 = sld [smem:[%s13960_s0 + %s11375_s28]]   ;;  %s11379_s28 = smov 25  }
  0x28   :  { %s11511_s8 = sld [smem:[%s13960_s0 + %s11376_s7]]   ;;  %s11380_s7 = smov 26  }
  0x29   :  { %14017 = sst [smem:[#allocation22_spill]] %s11496_s14 }
  0x2a   :  { %s11516_s14 = sld [smem:[%s13960_s0 + %s11377_s15]]   ;;  %s11381_s15 = smov 27  }
  0x2c   :  { %14018 = sst [smem:[#allocation23_spill]] %s11501_s9 }
  0x2d   :  { %14019 = sst [smem:[#allocation24_spill]] %s11506_s20 }
  0x2e   :  { %14020 = sst [smem:[#allocation25_spill]] %s11511_s8 }
  0x2f   :  { %s11521_s9 = sld [smem:[%s13960_s0 + %s11378_s22]]   ;;  %s11382_s22 = smov 28  }
  0x30   :  { %14021 = sst [smem:[#allocation26_spill]] %s11516_s14 }
  0x31   :  { %s11526_s20 = sld [smem:[%s13960_s0 + %s11379_s28]]   ;;  %s11383_s28 = smov 29  }
  0x32   :  { %s11531_s8 = sld [smem:[%s13960_s0 + %s11380_s7]]   ;;  %s11384_s7 = smov 30  }
  0x33   :  { %s11536_s14 = sld [smem:[%s13960_s0 + %s11381_s15]]   ;;  %s11385_s15 = smov 31  }
  0x35   :  { %14022 = sst [smem:[#allocation27_spill]] %s11521_s9 }
  0x36   :  { %s11541_s9 = sld [smem:[%s13960_s0 + %s11382_s22]]   ;;  %s11386_s22 = smov 32  }
  0x37   :  { %14023 = sst [smem:[#allocation28_spill]] %s11526_s20 }
  0x38   :  { %14024 = sst [smem:[#allocation29_spill]] %s11531_s8 }
  0x39   :  { %14025 = sst [smem:[#allocation30_spill]] %s11536_s14 }
  0x3a   :  { %s11546_s20 = sld [smem:[%s13960_s0 + %s11383_s28]]  }
  0x3b   :  { %s11551_s8 = sld [smem:[%s13960_s0 + %s11384_s7]]  }
  0x3c   :  { %14026 = sst [smem:[#allocation31_spill]] %s11541_s9 }
  0x3d   :  { %s11556_s14 = sld [smem:[%s13960_s0 + %s11385_s15]]  }
  0x3e   :  { %s11561_s9 = sld [smem:[%s13960_s0 + %s11386_s22]]  }
  0x41   :  { %14027 = sst [smem:[#allocation32_spill]] %s11551_s8 }
  0x42   :  { %70 = vsyncpa [#allocation3], 0 }
  0x43   :  { %72 = vsyncpa [#allocation3 + $0x1], 0  ;;  %s11563_s28 = smov 0   ;;  %s11565_s1 = smov 0  }
  0x44   :  { %s11567_s2 = smov 0   ;;  %s11569_s7 = smov 0  }
  0x45 LB: > { %s14028_s12 = sld [smem:[#allocation18_spill]]  ;;  %s11584_s0 = sadd.s32 4294967295, %s11353_s7   ;;  %s11353_s7 = sphi %s11569_s7, %s14067_s7   ;;  %s11349_s2 = sphi %s11567_s2, %s14066_s2   ;;  %s11345_s1 = sphi %s11565_s1, %s14065_s1   ;;  %s11341_s28 = sphi %s11563_s28, %s14064_s28  }
  0x46   : > { %s14029_s8 = sld [smem:[#allocation32_spill]]  ;;  %s9152_s10 = sadd.s32 4294967294, %s11353_s7  }
  0x47   : > { %s14030_s6 = sld [smem:[#allocation17_spill]]  ;;  %s11588_s11 = sadd.s32 1, %s11353_s7  }
  0x48   : > { %s14031_s4 = sld [smem:[#allocation20_spill]]  ;;  %s767_s15 = sadd.s32 1, %s11349_s2 }
  0x49   : > { %s14032_s29 = sld [smem:[#allocation11_spill]]  ;;  %s764_s16 = ssub.s32 %s11353_s7, %s11588_s11 }
  0x4a   : > { %s14033_s24 = sld [smem:[#allocation16_spill]]  ;;  %p777_p0 = scmp.ne.s32.totalorder %s11349_s2, %s11345_s1 }
  0x4b   : > { %s14034_s19 = sld [smem:[#allocation15_spill]]  ;;  %p765_p1 = scmp.eq.s32.totalorder %s764_s16, 0 }
  0x4c   : > { %s14035_s25 = sld [smem:[#allocation10_spill]]  ;;  %p778_p2 = scmp.eq.s32.totalorder %s11584_s0, 1 }
  0x4d   : > { %s14036_s21 = sld [smem:[#allocation9_spill]]  ;;  %p783_p3 = scmp.ne.s32.totalorder %s11345_s1, %s11341_s28 }
  0x4e   : > { %s14037_s17 = sld [smem:[#allocation8_spill]]  ;;  %p784_p4 = scmp.eq.s32.totalorder %s9152_s10, 1 }
  0x4f   : > { %s14038_s13 = sld [smem:[#allocation7_spill]]  ;;  %p11601_p5 = por %p778_p2, %p777_p0 }
  0x50   : > { %s14039_s3 = sld [smem:[#allocation12_spill]]  ;;  %p11605_p6 = por %p784_p4, %p783_p3 }
  0x51   : > { %s11599_s18 = scalar_select %p765_p1, %s11349_s2, %s767_s15  }
  0x52   : > { %p9155_p7 = scmp.ge.s32.totalorder %s11353_s7, 1  ;;  %p907_p8 = scmp.lt.s32.totalorder %s11353_s7, 3 }
  0x54   : > { %p908_p9 = pnand %p9155_p7, %p907_p8 }
  0x56   : > { %911 = sbr.rel (%p908_p9) target bundleno = 10677 (0x29b5), region = 148 }
  0x5b   : > { %s14042_s5 = sld [smem:[#allocation5_spill]]  ;;  %p993_p10 = scmp.lt.s32.totalorder %s11584_s0, 1  ;;  %vm1017_vm0 = vcmask 523264   ;;  %v1009_v8 = vld [vmem:[%s14038_s13] sm:$0xff]  ;;  %vm1030_vm1 = vcmask 261120   ;;  %v11642_v13 = vld [vmem:[%s14038_s13 + $0x8] sm:$0xff] }
  0x5c   : > { %9867 = vmatprep.mubr.msk.f32.mxu0 %vm1030_vm1, %v1009_v8  ;;  %v11645_v14 = vld [vmem:[%s14038_s13 + $0x10] sm:$0xff]  ;;  %v11652_v15 = vld [vmem:[%s14038_s13 + $0x18] sm:$0xff]  ;;  %v1013_v16 = vld [vmem:[%s14037_s17] sm:$0xff]  ;;  %v11387_v24 = vmov 0   ;;  %vm1978_vm2 = vcmask 1043456   ;;  %vm1965_vm3 = vcmask 64512  }
  0x5d   : > { %s11613_s26 = scalar_select %p993_p10, %s11584_s0, 1  ;;  %9881 = vmatprep.mubr.msk.f32.mxu1 %vm1030_vm1, %v1013_v16  ;;  %v11660_v21 = vld [vmem:[%s14037_s17 + $0x8] sm:$0xff]  ;;  %v11663_v22 = vld [vmem:[%s14037_s17 + $0x10] sm:$0xff]  ;;  %v11670_v23 = vld [vmem:[%s14037_s17 + $0x18] sm:$0xff]  ;;  %10620 = vset.pattern.permute.xlu1 %v11387_v24  ;;  %vm11389_vm4 = vmmov 0   ;;  %vm3222_vm5 = vcmask 130048  }
  0x5e   : > { %10619 = vset.pattern.permute.xlu0 %v11387_v24  ;;  %v1510_v49 = vld [vmem:[%s14035_s25 + $0x18] sm:$0xff]  ;;  %v1481_v50 = vld [vmem:[%s14036_s21 + $0x10] sm:$0xff]  ;;  %s14043_s16 = sld [smem:[#allocation21_spill]] }
  0x5f   : > { %s9537_s10 = sshll.u32 %s11613_s26, 5  ;;  %v1482_v51 = vld [vmem:[%s14036_s21 + $0x18] sm:$0xff]  ;;  %v1509_v52 = vld [vmem:[%s14035_s25 + $0x10] sm:$0xff]  ;;  %s9159_s13 = sshll.u32 %s11613_s26, 3 }
  0x60   : > { %v1544_v24 = vld [vmem:[%s14039_s3 + $0x18] sm:$0xff]  ;;  %s14052_s26 = sld [smem:[#allocation27_spill]] }
  0x61   : > { %s11617_s15 = scalar_lea.vmem %s14042_s5, %s9537_s10  ;;  %s14044_s10 = sld [smem:[#allocation19_spill]] }
  0x62   : > { %v11620_v0 = vld [vmem:[%s11617_s15 + $0x18] sm:$0xff]  ;;  %v11623_v1 = vld [vmem:[%s11617_s15 + $0x10] sm:$0xff]  ;;  %v11630_v4 = vld [vmem:[%s11617_s15 + $0x8] sm:$0xff]  ;;  %s14046_s5 = sld [smem:[#allocation22_spill]] }
  0x63   : > { %v1027_v2 = vsel %vm1017_vm0, %v11620_v0, 0.0  ;;  %v1024_v3 = vsel %vm1017_vm0, %v11623_v1, 0.0  ;;  %v11633_v5 = vld [vmem:[%s11617_s15] sm:$0xff]  ;;  %v1021_v6 = vsel %vm1017_vm0, %v11630_v4, 0.0 }
  0x64   : > { %1028 = vadd.xlane.f32.xlu0 %v1027_v2  ;;  %v1018_v7 = vsel %vm1017_vm0, %v11633_v5, 0.0  ;;  %1022 = vadd.xlane.f32.xlu1 %v1021_v6 }
  0x68   : > { %1025 = vadd.xlane.f32.xlu0 %v1024_v3  ;;  %1019 = vadd.xlane.f32.xlu1 %v1018_v7 }
  0xed   : > { %v1029_v9 = vpop.xlane.xlu0 %1028  ;;  %v1023_v10 = vpop.xlane.xlu1 %1022 }
  0xee   : > { %9859 = vmatprep.subr.mxu0 %v1029_v9 }
  0xef   : > { %9860 = vmatpush3.msra.mxu0 %v1029_v9 }
  0xf1   : > { %v1026_v11 = vpop.xlane.xlu0 %1025  ;;  %v1020_v12 = vpop.xlane.xlu1 %1019 }
  0xf2   : > { %9861 = vmatprep.subr.mxu0 %v1026_v11 }
  0xf3   : > { %9862 = vmatpush3.msra.mxu0 %v1026_v11 }
  0xf4   : > { %9863 = vmatprep.subr.mxu0 %v1023_v10 }
  0xf5   : > { %9864 = vmatpush3.msra.mxu0 %v1023_v10 }
  0xf6   : > { %9865 = vmatprep.subr.mxu0 %v1020_v12 }
  0xf7   : > { %9866 = vmatpush3.msra.mxu0 %v1020_v12 }
  0xf8   : > { %9868 = vmatmul.mubr.msk.f32.vlgmr.msra.gmra.mxu0 %vm1030_vm1, %v11642_v13 }
  0xf9   : > { %9870 = vmatprep.mubr.msk.f32.mxu0 %vm1030_vm1, %v11645_v14 }
  0xfc   : > { %9871 = vmatmul.mubr.msk.f32.gmra.mxu0 %vm1030_vm1, %v11652_v15 }
  0xfd   : > { %9895 = vmatprep.mubr.msk.f32.mxu0 %vm1030_vm1, %v1009_v8 }
 0x1b8   : > { %v9869_v17 = vpop.f32.mrf.mxu0 }
 0x1ba   : > { %v1109_v18 = vpop.f32.mrf.mxu0 }
 0x1bc   : > { %v9872_v19 = vpop.f32.mrf.mxu0 }
 0x1bd   : > { %9873 = vmatprep.subr.mxu1 %v9872_v19 }
 0x1be   : > { %v1119_v20 = vpop.f32.mrf.mxu0  ;;  %9874 = vmatpush3.msra.mxu1 %v9872_v19  ;;  %v1508_v19 = vld [vmem:[%s14035_s25 + $0x8] sm:$0xff] }
 0x1bf   : > { %9875 = vmatprep.subr.mxu1 %v1119_v20 }
 0x1c0   : > { %9876 = vmatpush3.msra.mxu1 %v1119_v20  ;;  %v1507_v20 = vld [vmem:[%s14035_s25] sm:$0xff]  ;;  %s14054_s25 = sld [smem:[#allocation31_spill]] }
 0x1c1   : > { %9877 = vmatprep.subr.mxu1 %v9869_v17 }
 0x1c2   : > { %9878 = vmatpush3.msra.mxu1 %v9869_v17  ;;  %v1480_v17 = vld [vmem:[%s14036_s21 + $0x8] sm:$0xff] }
 0x1c3   : > { %9879 = vmatprep.subr.mxu1 %v1109_v18 }
 0x1c4   : > { %9880 = vmatpush3.msra.mxu1 %v1109_v18  ;;  %v1479_v18 = vld [vmem:[%s14036_s21] sm:$0xff]  ;;  %s14053_s21 = sld [smem:[#allocation28_spill]] }
 0x1c5   : > { %9882 = vmatmul.mubr.msk.f32.vlgmr.msra.gmra.mxu1 %vm1030_vm1, %v11660_v21 }
 0x1c6   : > { %9884 = vmatprep.mubr.msk.f32.mxu1 %vm1030_vm1, %v11663_v22 }
 0x1c9   : > { %9885 = vmatmul.mubr.msk.f32.gmra.mxu1 %vm1030_vm1, %v11670_v23 }
 0x1ca   : > { %9909 = vmatprep.mubr.msk.f32.mxu1 %vm1030_vm1, %v1013_v16 }
 0x285   : > { %v9883_v25 = vpop.f32.mrf.mxu1 }
 0x286   : > { %v1226_v26 = vmul.f32 0.015625, %v9883_v25  ;;  %v1543_v25 = vld [vmem:[%s14039_s3 + $0x10] sm:$0xff] }
 0x287   : > { %v1206_v27 = vpop.f32.mrf.mxu1 }
 0x288   : > { %1236 = vperm.xlu1 %10620, %v1226_v26   ;;  %v1225_v32 = vmul.f32 0.015625, %v1206_v27  ;;  %v1653_v26 = vld [vmem:[%s14034_s19 + $0x18] sm:$0xff]  ;;  %v1652_v27 = vld [vmem:[%s14034_s19 + $0x10] sm:$0xff] }
 0x289   : > { %v9886_v28 = vpop.f32.mrf.mxu1 }
 0x28a   : > { %v1228_v29 = vmul.f32 0.015625, %v9886_v28  ;;  %v1657_v28 = vld [vmem:[%s14033_s24 + $0x18] sm:$0xff] }
 0x28b   : > { %v1216_v30 = vpop.f32.mrf.mxu1 }
 0x28c   : > { %v1227_v31 = vmul.f32 0.015625, %v1216_v30  ;;  %1246 = vperm.xlu0 %10619, %v1228_v29   ;;  %v1656_v29 = vld [vmem:[%s14033_s24 + $0x10] sm:$0xff]  ;;  %v1651_v30 = vld [vmem:[%s14034_s19 + $0x8] sm:$0xff] }
 0x28e   : > { %1241 = vperm.xlu1 %10620, %v1227_v31   ;;  %v1650_v31 = vld [vmem:[%s14034_s19] sm:$0xff] }
 0x292   : > { %1231 = vperm.xlu1 %10620, %v1225_v32   ;;  %v1655_v32 = vld [vmem:[%s14033_s24 + $0x8] sm:$0xff] }
 0x303   : > { %v1237_v33 = vpop.permute.xlu1 %1236 }
 0x304   : > { %v11676_v35 = vsub.f32 %v11630_v4, %v1237_v33  ;;  %v1654_v33 = vld [vmem:[%s14033_s24] sm:$0xff] }
 0x306   : > { %v1254_v42 = vmul.f32 %v11676_v35, %v11676_v35 }
 0x307   : > { %v1247_v34 = vpop.permute.xlu0 %1246 }
 0x308   : > { %v11679_v36 = vsub.f32 %v11620_v0, %v1247_v34  ;;  %v1260_v46 = vsel %vm1017_vm0, %v1254_v42, 0.0 }
 0x309   : > { %v1242_v37 = vpop.permute.xlu1 %1241 }
 0x30a   : > { %v11682_v38 = vsub.f32 %v11623_v1, %v1242_v37  ;;  %v1256_v39 = vmul.f32 %v11679_v36, %v11679_v36 }
 0x30c   : > { %v1266_v40 = vsel %vm1017_vm0, %v1256_v39, 0.0  ;;  %v1255_v41 = vmul.f32 %v11682_v38, %v11682_v38 }
 0x30d   : > { %1267 = vadd.xlane.f32.xlu1 %v1266_v40  ;;  %v1232_v43 = vpop.permute.xlu1 %1231 }
 0x30e   : > { %v11692_v44 = vsub.f32 %v11633_v5, %v1232_v43  ;;  %v1263_v45 = vsel %vm1017_vm0, %v1255_v41, 0.0 }
 0x30f   : > { %1264 = vadd.xlane.f32.xlu0 %v1263_v45 }
 0x310   : > { %v1253_v47 = vmul.f32 %v11692_v44, %v11692_v44 }
 0x311   : > { %1261 = vadd.xlane.f32.xlu1 %v1260_v46 }
 0x312   : > { %v1257_v48 = vsel %vm1017_vm0, %v1253_v47, 0.0 }
 0x315   : > { %1258 = vadd.xlane.f32.xlu1 %v1257_v48 }
 0x325   : > { %1528 = vperm.xlu0 %10619, %v1510_v49  }
 0x326   : > { %1495 = vperm.xlu1 %10620, %v1481_v50  }
 0x32a   : > { %1500 = vperm.xlu1 %10620, %v1482_v51  }
 0x32e   : > { %1523 = vperm.xlu1 %10620, %v1509_v52  }
 0x396   : > { %v1268_v53 = vpop.xlane.xlu1 %1267 }
 0x397   : > { %9887 = vmatprep.subr.mxu0 %v1268_v53 }
 0x398   : > { %v1265_v54 = vpop.xlane.xlu0 %1264  ;;  %9888 = vmatpush3.msra.mxu0 %v1268_v53 }
 0x399   : > { %9889 = vmatprep.subr.mxu0 %v1265_v54 }
 0x39a   : > { %9890 = vmatpush3.msra.mxu0 %v1265_v54  ;;  %v1262_v55 = vpop.xlane.xlu1 %1261 }
 0x39b   : > { %9891 = vmatprep.subr.mxu0 %v1262_v55 }
 0x39c   : > { %9892 = vmatpush3.msra.mxu0 %v1262_v55 }
 0x39e   : > { %v1259_v56 = vpop.xlane.xlu1 %1258 }
 0x39f   : > { %9893 = vmatprep.subr.mxu0 %v1259_v56 }
 0x3a0   : > { %9894 = vmatpush3.msra.mxu0 %v1259_v56  ;;  %v1529_v39 = vpop.permute.xlu0 %1528 }
 0x3a1   : > { %9896 = vmatmul.mubr.msk.f32.vlgmr.msra.gmra.mxu0 %vm1030_vm1, %v11642_v13 }
 0x3a2   : > { %9898 = vmatprep.mubr.msk.f32.mxu0 %vm1030_vm1, %v11645_v14  ;;  %v1496_v34 = vpop.permute.xlu1 %1495 }
 0x3a5   : > { %9899 = vmatmul.mubr.msk.f32.gmra.mxu0 %vm1030_vm1, %v11652_v15 }
 0x3a6   : > { %v1501_v37 = vpop.permute.xlu1 %1500 }
 0x3aa   : > { %v1524_v40 = vpop.permute.xlu1 %1523 }
 0x461   : > { %v9897_v57 = vpop.f32.mrf.mxu0 }
 0x463   : > { %v1335_v58 = vpop.f32.mrf.mxu0 }
 0x465   : > { %v9900_v59 = vpop.f32.mrf.mxu0 }
 0x466   : > { %9901 = vmatprep.subr.mxu1 %v9900_v59 }
 0x467   : > { %v1345_v60 = vpop.f32.mrf.mxu0  ;;  %9902 = vmatpush3.msra.mxu1 %v9900_v59 }
 0x468   : > { %9903 = vmatprep.subr.mxu1 %v1345_v60 }
 0x469   : > { %9904 = vmatpush3.msra.mxu1 %v1345_v60 }
 0x46a   : > { %9905 = vmatprep.subr.mxu1 %v9897_v57 }
 0x46b   : > { %9906 = vmatpush3.msra.mxu1 %v9897_v57 }
 0x46c   : > { %9907 = vmatprep.subr.mxu1 %v1335_v58 }
 0x46d   : > { %9908 = vmatpush3.msra.mxu1 %v1335_v58 }
 0x46e   : > { %9910 = vmatmul.mubr.msk.f32.vlgmr.msra.gmra.mxu1 %vm1030_vm1, %v11660_v21  ;;  %v1542_v21 = vld [vmem:[%s14039_s3 + $0x8] sm:$0xff] }
 0x46f   : > { %9912 = vmatprep.mubr.msk.f32.mxu1 %vm1030_vm1, %v11663_v22  ;;  %v1541_v22 = vld [vmem:[%s14039_s3] sm:$0xff]  ;;  %s14045_s3 = sld [smem:[#allocation6_spill]] }
 0x472   : > { %9913 = vmatmul.mubr.msk.f32.gmra.mxu1 %vm1030_vm1, %v11670_v23  ;;  %v10621_v23 = vld [vmem:[%s14032_s29] sm:$0xff]  }
 0x473   : > { %9919 = vmatprep.mubr.msk.bf16.mxu0 %vm1030_vm1, %v10621_v23 }
 0x475   : > { %s1001_s17 = scalar_lea.vmem %s14045_s3, %s9159_s13  ;;  %s14049_s13 = sld [smem:[#allocation23_spill]] }
 0x476   : > { %s14051_s3 = sld [smem:[#allocation26_spill]] }
 0x52e   : > { %v9911_v61 = vpop.f32.mrf.mxu1 }
 0x52f   : > { %v1440_v62 = vmul.f32 0.015625, %v9911_v61 }
 0x530   : > { %v1420_v63 = vpop.f32.mrf.mxu1 }
 0x531   : > { %v1444_v0 = vmax.f32 %v1440_v62, 0.0  ;;  %v1439_v1 = vmul.f32 0.015625, %v1420_v63  ;;  %v10622_v62 = vld [vmem:[%s14032_s29 + $0x8] sm:$0xff]   ;;  %s14057_s29 = sld [smem:[#allocation30_spill]] }
 0x532   : > { %v9914_v2 = vpop.f32.mrf.mxu1 }
 0x533   : > { %v1448_v3 = vadd.f32 1e-06, %v1444_v0  ;;  %v1443_v4 = vmax.f32 %v1439_v1, 0.0  ;;  %v1442_v5 = vmul.f32 0.015625, %v9914_v2 }
 0x534   : > { %v1430_v6 = vpop.f32.mrf.mxu1 }
 0x535   : > { %10693 = vrsqrt.f32 %v1448_v3  ;;  %v1447_v7 = vadd.f32 1e-06, %v1443_v4  ;;  %v1446_v8 = vmax.f32 %v1442_v5, 0.0  ;;  %v1441_v9 = vmul.f32 0.015625, %v1430_v6 }
 0x537   : > { %10695 = vrsqrt.f32 %v1447_v7  ;;  %v1450_v10 = vadd.f32 1e-06, %v1446_v8  ;;  %v1445_v11 = vmax.f32 %v1441_v9, 0.0 }
 0x539   : > { %10697 = vrsqrt.f32 %v1450_v10  ;;  %v1449_v12 = vadd.f32 1e-06, %v1445_v11 }
 0x53b   : > { %10699 = vrsqrt.f32 %v1449_v12 }
 0x542   : > { %v10694_v13 = vpop.eup %10693 }
 0x543   : > { %1462 = vperm.xlu0 %10619, %v10694_v13  }
 0x544   : > { %v10696_v14 = vpop.eup %10695 }
 0x545   : > { %1457 = vperm.xlu1 %10620, %v10696_v14  }
 0x546   : > { %v10698_v15 = vpop.eup %10697 }
 0x547   : > { %1472 = vperm.xlu0 %10619, %v10698_v15  }
 0x548   : > { %v10700_v16 = vpop.eup %10699 }
 0x549   : > { %1467 = vperm.xlu1 %10620, %v10700_v16  }
 0x54b   : > { %1490 = vperm.xlu0 %10619, %v1480_v17  }
 0x54d   : > { %1485 = vperm.xlu1 %10620, %v1479_v18  }
 0x54f   : > { %1518 = vperm.xlu0 %10619, %v1508_v19  }
 0x551   : > { %1513 = vperm.xlu1 %10620, %v1507_v20  }
 0x553   : > { %1552 = vperm.xlu0 %10619, %v1542_v21  }
 0x555   : > { %1547 = vperm.xlu1 %10620, %v1541_v22  }
 0x557   : > { %1562 = vperm.xlu0 %10619, %v1544_v24  }
 0x559   : > { %1557 = vperm.xlu1 %10620, %v1543_v25  }
 0x55b   : > { %1718 = vperm.xlu0 %10619, %v1653_v26  }
 0x55d   : > { %1713 = vperm.xlu1 %10620, %v1652_v27  }
 0x55f   : > { %1742 = vperm.xlu0 %10619, %v1657_v28  }
 0x561   : > { %1737 = vperm.xlu1 %10620, %v1656_v29  }
 0x563   : > { %1708 = vperm.xlu0 %10619, %v1651_v30  }
 0x565   : > { %1703 = vperm.xlu1 %10620, %v1650_v31  }
 0x567   : > { %1732 = vperm.xlu0 %10619, %v1655_v32  }
 0x569   : > { %1727 = vperm.xlu1 %10620, %v1654_v33  }
 0x5be   : > { %v1463_v41 = vpop.permute.xlu0 %1462 }
 0x5bf   : > { %v1476_v52 = vmul.f32 %v1463_v41, %v11676_v35  ;;  %v10623_v35 = vld [vmem:[%s11461_s30] sm:$0xff]  }
 0x5c0   : > { %v1458_v42 = vpop.permute.xlu1 %1457  ;;  %9927 = vmatprep.mubr.msk.bf16.mxu1 %vm1030_vm1, %v10623_v35 }
 0x5c1   : > { %v1475_v53 = vmul.f32 %v1458_v42, %v11692_v44  ;;  %v10625_v44 = vld [vmem:[%s14030_s6] sm:$0xff]  }
 0x5c2   : > { %v1473_v43 = vpop.permute.xlu0 %1472 }
 0x5c3   : > { %v1478_v45 = vmul.f32 %v1473_v43, %v11679_v36 }
 0x5c4   : > { %v1468_v46 = vpop.permute.xlu1 %1467 }
 0x5c5   : > { %v1506_v47 = vmul.f32 %v1501_v37, %v1478_v45  ;;  %v1477_v48 = vmul.f32 %v1468_v46, %v11682_v38 }
 0x5c6   : > { %v1491_v49 = vpop.permute.xlu0 %1490 }
 0x5c7   : > { %v1505_v50 = vmul.f32 %v1496_v34, %v1477_v48  ;;  %v1534_v54 = vadd.f32 %v1529_v39, %v1506_v47  ;;  %v1504_v57 = vmul.f32 %v1491_v49, %v1476_v52 }
 0x5c8   : > { %v1486_v51 = vpop.permute.xlu1 %1485 }
 0x5c9   : > { %v1533_v55 = vadd.f32 %v1524_v40, %v1505_v50  ;;  %v1503_v58 = vmul.f32 %v1486_v51, %v1475_v53 }
 0x5ca   : > { %v1519_v56 = vpop.permute.xlu0 %1518 }
 0x5cb   : > { %v1540_v36 = vpack.c.bf16 %v1534_v54, %v1533_v55  ;;  %v1532_v60 = vadd.f32 %v1519_v56, %v1504_v57 }
 0x5cc   : > { %v1514_v59 = vpop.permute.xlu1 %1513 }
 0x5cd   : > { %v1531_v61 = vadd.f32 %v1514_v59, %v1503_v58  ;;  %9915 = vmatprep.subr.bf16.mxu0 %v1540_v36 }
 0x5ce   : > { %9916 = vmatpush3.bf16.msra.mxu0 %v1540_v36  ;;  %v1553_v1 = vpop.permute.xlu0 %1552 }
 0x5cf   : > { %v1539_v38 = vpack.c.bf16 %v1532_v60, %v1531_v61 }
 0x5d0   : > { %v1548_v63 = vpop.permute.xlu1 %1547 }
 0x5d1   : > { %9917 = vmatprep.subr.bf16.mxu0 %v1539_v38 }
 0x5d2   : > { %9918 = vmatpush3.bf16.msra.mxu0 %v1539_v38  ;;  %v1563_v9 = vpop.permute.xlu0 %1562 }
 0x5d4   : > { %v1558_v5 = vpop.permute.xlu1 %1557 }
 0x5d5   : > { %9920 = vmatmul.mubr.msk.bf16.vlgmr.msra.gmra.mxu0 %vm1030_vm1, %v10622_v62 }
 0x5d6   : > { %9935 = vmatprep.mubr.msk.bf16.mxu0 %vm1030_vm1, %v10625_v44  ;;  %v1719_v52 = vpop.permute.xlu0 %1718 }
 0x5d8   : > { %v1714_v53 = vpop.permute.xlu1 %1713 }
 0x5da   : > { %v1743_v54 = vpop.permute.xlu0 %1742 }
 0x5dc   : > { %v1738_v55 = vpop.permute.xlu1 %1737 }
 0x5de   : > { %v1709_v56 = vpop.permute.xlu0 %1708 }
 0x5e0   : > { %v1704_v57 = vpop.permute.xlu1 %1703 }
 0x695   : > { %v9921_v0 = vpop.f32.mrf.mxu0 }
 0x696   : > { %v11745_v7 = vadd.f32 %v9921_v0, %v1558_v5  ;;  %v1728_v0 = vpop.permute.xlu1 %1727 }
 0x697   : > { %v1615_v2 = vpop.f32.mrf.mxu0 }
 0x698   : > { %v11743_v4 = vadd.f32 %v1615_v2, %v1548_v63  ;;  %v1661_v14 = vsel %vm1017_vm0, %v11745_v7, 0.0  ;;  %v1733_v63 = vpop.permute.xlu0 %1732 }
 0x699   : > { %v9922_v3 = vpop.f32.mrf.mxu0 }
 0x69a   : > { %v1658_v10 = vsel %vm1017_vm0, %v11743_v4, 0.0  ;;  %v11751_v11 = vadd.f32 %v9922_v3, %v1563_v9 }
 0x69b   : > { %v1618_v6 = vpop.f32.mrf.mxu0 }
 0x69c   : > { %v11747_v8 = vadd.f32 %v1618_v6, %v1553_v1  ;;  %v1663_v16 = vsel %vm1017_vm0, %v11751_v11, 0.0 }
 0x69e   : > { %v1659_v12 = vsel %vm1017_vm0, %v11747_v8, 0.0 }
 0x69f   : > { %v1660_v13 = vadd.f32 %v1659_v12, %v1658_v10  ;;  %v10624_v10 = vld [vmem:[%s11461_s30 + $0x8] sm:$0xff]  }
 0x6a0   : > { %v10626_v12 = vld [vmem:[%s14030_s6 + $0x8] sm:$0xff]  }
 0x6a1   : > { %v1662_v15 = vadd.f32 %v1661_v14, %v1660_v13 }
 0x6a3   : > { %v1664_v17 = vadd.f32 %v1663_v16, %v1662_v15 }
 0x6a5   : > { %v1665_v18 = vrot.slane %v1664_v17, 4 }
 0x6a7   : > { %v1666_v19 = vadd.f32 %v1665_v18, %v1664_v17 }
 0x6a9   : > { %v1667_v20 = vrot.slane %v1666_v19, 2 }
 0x6ab   : > { %v1668_v21 = vadd.f32 %v1667_v20, %v1666_v19 }
 0x6ad   : > { %v1669_v22 = vrot.slane %v1668_v21, 1 }
 0x6af   : > { %v1670_v23 = vadd.f32 %v1669_v22, %v1668_v21 }
 0x6b1   : > { %v1672_v24 = vmul.f32 0.03125, %v1670_v23 }
 0x6b3   : > { %v1673_v25 = vsub.f32 %v11743_v4, %v1672_v24  ;;  %v1674_v26 = vsub.f32 %v11747_v8, %v1672_v24  ;;  %v1675_v27 = vsub.f32 %v11745_v7, %v1672_v24  ;;  %v1676_v28 = vsub.f32 %v11751_v11, %v1672_v24 }
 0x6b5   : > { %v1677_v29 = vmul.f32 %v1673_v25, %v1673_v25  ;;  %v1678_v30 = vmul.f32 %v1674_v26, %v1674_v26  ;;  %v1679_v31 = vmul.f32 %v1675_v27, %v1675_v27  ;;  %v1680_v32 = vmul.f32 %v1676_v28, %v1676_v28 }
 0x6b7   : > { %v1681_v33 = vsel %vm1017_vm0, %v1677_v29, 0.0  ;;  %v1682_v34 = vsel %vm1017_vm0, %v1678_v30, 0.0  ;;  %v1684_v39 = vsel %vm1017_vm0, %v1679_v31, 0.0  ;;  %v1686_v41 = vsel %vm1017_vm0, %v1680_v32, 0.0 }
 0x6b8   : > { %v1683_v37 = vadd.f32 %v1682_v34, %v1681_v33 }
 0x6ba   : > { %v1685_v40 = vadd.f32 %v1684_v39, %v1683_v37 }
 0x6bc   : > { %v1687_v42 = vadd.f32 %v1686_v41, %v1685_v40 }
 0x6be   : > { %v1688_v43 = vrot.slane %v1687_v42, 4 }
 0x6c0   : > { %v1689_v45 = vadd.f32 %v1688_v43, %v1687_v42 }
 0x6c2   : > { %v1690_v46 = vrot.slane %v1689_v45, 2 }
 0x6c4   : > { %v1691_v47 = vadd.f32 %v1690_v46, %v1689_v45 }
 0x6c6   : > { %v1692_v48 = vrot.slane %v1691_v47, 1 }
 0x6c8   : > { %v1693_v49 = vadd.f32 %v1692_v48, %v1691_v47 }
 0x6ca   : > { %v1694_v50 = vmul.f32 0.03125, %v1693_v49 }
 0x6cc   : > { %v1695_v51 = vadd.f32 1e-05, %v1694_v50 }
 0x6ce   : > { %10701 = vrsqrt.f32 %v1695_v51 }
 0x6db   : > { %v10702_v58 = vpop.eup %10701 }
 0x6dc   : > { %v1697_v36 = vmul.f32 %v10702_v58, %v1673_v25  ;;  %v1698_v59 = vmul.f32 %v10702_v58, %v1674_v26  ;;  %v1699_v60 = vmul.f32 %v10702_v58, %v1675_v27  ;;  %v1700_v61 = vmul.f32 %v10702_v58, %v1676_v28 }
 0x6de   : > { %v1721_v38 = vmul.f32 %v1704_v57, %v1697_v36  ;;  %v1722_v62 = vmul.f32 %v1709_v56, %v1698_v59  ;;  %v1723_v35 = vmul.f32 %v1714_v53, %v1699_v60  ;;  %v1724_v44 = vmul.f32 %v1719_v52, %v1700_v61 }
 0x6e0   : > { %v1745_v1 = vadd.f32 %v1728_v0, %v1721_v38  ;;  %v1746_v2 = vadd.f32 %v1733_v63, %v1722_v62  ;;  %v1747_v3 = vadd.f32 %v1738_v55, %v1723_v35  ;;  %v1748_v5 = vadd.f32 %v1743_v54, %v1724_v44  ;;  %v10627_v62 = vld [vmem:[%s14028_s12] sm:$0xff]   ;;  %v10628_v35 = vld [vmem:[%s14028_s12 + $0x8] sm:$0xff]  }
 0x6e2   : > { %v1750_v6 = vpack.c.bf16 %v1748_v5, %v1747_v3  ;;  %v1749_v9 = vpack.c.bf16 %v1746_v2, %v1745_v1 }
 0x6e4   : > { %9923 = vmatprep.subr.bf16.mxu1 %v1750_v6  ;;  %9931 = vmatprep.subr.bf16.mxu0 %v1750_v6 }
 0x6e5   : > { %9924 = vmatpush3.bf16.msra.mxu1 %v1750_v6  ;;  %9932 = vmatpush3.bf16.msra.mxu0 %v1750_v6 }
 0x6e6   : > { %9925 = vmatprep.subr.bf16.mxu1 %v1749_v9  ;;  %9933 = vmatprep.subr.bf16.mxu0 %v1749_v9 }
 0x6e9   : > { %9926 = vmatpush3.bf16.msra.mxu1 %v1749_v9  ;;  %9934 = vmatpush3.bf16.msra.mxu0 %v1749_v9 }
 0x6ea   : > { %9939 = vmatprep.subr.bf16.mxu1 %v1750_v6 }
 0x6ec   : > { %9928 = vmatmul.mubr.msk.bf16.vlgmr.msra.gmra.mxu1 %vm1030_vm1, %v10624_v10  ;;  %9936 = vmatmul.mubr.msk.bf16.vlgmr.msra.gmra.mxu0 %vm1030_vm1, %v10626_v12 }
 0x6ed   : > { %9940 = vmatpush3.bf16.msra.mxu1 %v1750_v6  ;;  %9943 = vmatprep.mubr.msk.bf16.mxu1 %vm1030_vm1, %v10627_v62 }
 0x6ee   : > { %9941 = vmatprep.subr.bf16.mxu1 %v1749_v9 }
 0x6f1   : > { %9942 = vmatpush3.bf16.msra.mxu1 %v1749_v9 }
 0x6f4   : > { %9944 = vmatmul.mubr.msk.bf16.vlgmr.msra.gmra.mxu1 %vm1030_vm1, %v10628_v35 }
 0x7ac   : > { %v11771_v13 = vpop.f32.mrf.mxu1  ;;  %v11773_v14 = vpop.f32.mrf.mxu0 }
 0x7ae   : > { %v1801_v15 = vpop.f32.mrf.mxu1  ;;  %v1866_v16 = vpop.f32.mrf.mxu0 }
 0x7af   : > { %v1946_v17 = vpack.c.bf16 %v1801_v15, %v1801_v15  ;;  %v1947_v18 = vpack.c.bf16 %v1866_v16, %v1866_v16 }
 0x7b0   : > { %v11775_v19 = vpop.f32.mrf.mxu1  ;;  %v11777_v20 = vpop.f32.mrf.mxu0 }
 0x7b1   : > { %1949 = vxpose.xlu1.c.b16.start.end [1/1] (short) (narrow) %v1946_v17, 64  ;;  %v1980_v21 = vsel %vm1978_vm2, %v1947_v18, 0  ;;  %10523 = vmatprep.subr.msk.bf16.mxu0 %vm1978_vm2, %v1947_v18 }
 0x7b2   : > { %v1804_v22 = vpop.f32.mrf.mxu1  ;;  %v1869_v23 = vpop.f32.mrf.mxu0  ;;  %9948 = vmatpush3.bf16.msra.mxu0 %v1980_v21 }
 0x7b3   : > { %v2194_v24 = vpack.c.bf16 %v1804_v22, %v1804_v22  ;;  %v2195_v25 = vpack.c.bf16 %v1869_v23, %v1869_v23 }
 0x7b5   : > { %2197 = vxpose.xlu0.c.b16.start.end [1/1] (short) (narrow) %v2194_v24, 64  ;;  %10524 = vmatprep.subr.msk.bf16.mxu0 %vm1978_vm2, %v2195_v25  ;;  %v2226_v28 = vsel %vm1978_vm2, %v2195_v25, 0 }
 0x813   : > { %v1957_v26 = vpop.trf.xlu1 }
 0x814   : > { %9949 = vmatprep.mubr.msk.bf16.mxu0 %vm1965_vm3, %v1957_v26 }
 0x817   : > { %v1958_v27 = vpop.trf.xlu1  ;;  %v2205_v29 = vpop.trf.xlu0 }
 0x818   : > { %9950 = vmatmul.mubr.msk.bf16.vlgmr.msra.gmra.mxu0 %vm1965_vm3, %v1958_v27 }
 0x819   : > { %9970 = vmatpush3.bf16.msra.mxu0 %v2226_v28 }
 0x81b   : > { %v1959_v30 = vpop.trf.xlu1  ;;  %v2206_v32 = vpop.trf.xlu0 }
 0x81c   : > { %9953 = vmatprep.mubr.msk.bf16.mxu0 %vm1965_vm3, %v1959_v30 }
 0x81f   : > { %v1960_v31 = vpop.trf.xlu1  ;;  %v2207_v33 = vpop.trf.xlu0 }
 0x820   : > { %9954 = vmatmul.mubr.msk.bf16.gmra.mxu0 %vm1965_vm3, %v1960_v31 }
 0x821   : > { %9971 = vmatprep.mubr.msk.bf16.mxu0 %vm1965_vm3, %v2205_v29 }
 0x823   : > { %v2208_v34 = vpop.trf.xlu0 }
 0x828   : > { %9972 = vmatmul.mubr.msk.bf16.vlgmr.msra.gmra.mxu0 %vm1965_vm3, %v2206_v32 }
 0x829   : > { %9975 = vmatprep.mubr.msk.bf16.mxu0 %vm1965_vm3, %v2207_v33 }
 0x830   : > { %9976 = vmatmul.mubr.msk.bf16.gmra.mxu0 %vm1965_vm3, %v2208_v34 }
 0x8d8   : > { %v11791_v37 = vpop.f32.mrf.mxu0 }
 0x8d9   : > { %v2053_v61 = vsel %vm1017_vm0, %v11791_v37, -inf }
 0x8da   : > { %v11793_v39 = vpop.f32.mrf.mxu0 }
 0x8db   : > { %v2047_v0 = vsel %vm1017_vm0, %v11793_v39, -inf }
 0x8dc   : > { %v11795_v40 = vpop.f32.mrf.mxu0 }
 0x8dd   : > { %v2056_v63 = vsel %vm1017_vm0, %v11795_v40, -inf }
 0x8de   : > { %v11797_v41 = vpop.f32.mrf.mxu0 }
 0x8df   : > { %v2050_v3 = vsel %vm1017_vm0, %v11797_v41, -inf }
 0x8e0   : > { %v9955_v42 = vpop.f32.mrf.mxu0 }
 0x8e1   : > { %v2065_v43 = vsel %vm1017_vm0, %v9955_v42, -inf }
 0x8e2   : > { %v11800_v45 = vpop.f32.mrf.mxu0  ;;  %2066 = vmax.xlane.f32.xlu0 %v2065_v43 }
 0x8e3   : > { %v2059_v57 = vsel %vm1017_vm0, %v11800_v45, -inf }
 0x8e4   : > { %v9956_v46 = vpop.f32.mrf.mxu0 }
 0x8e5   : > { %v2068_v47 = vsel %vm1017_vm0, %v9956_v46, -inf }
 0x8e6   : > { %2069 = vmax.xlane.f32.xlu1 %v2068_v47  ;;  %v11803_v48 = vpop.f32.mrf.mxu0 }
 0x8e7   : > { %v2062_v59 = vsel %vm1017_vm0, %v11803_v48, -inf }
 0x8e8   : > { %v11805_v49 = vpop.f32.mrf.mxu0 }
 0x8e9   : > { %v2299_v44 = vsel %vm1017_vm0, %v11805_v49, -inf }
 0x8ea   : > { %v11807_v50 = vpop.f32.mrf.mxu0 }
 0x8eb   : > { %v2293_v2 = vsel %vm1017_vm0, %v11807_v50, -inf }
 0x8ec   : > { %v11809_v51 = vpop.f32.mrf.mxu0 }
 0x8ed   : > { %v2302_v1 = vsel %vm1017_vm0, %v11809_v51, -inf }
 0x8ee   : > { %v11811_v52 = vpop.f32.mrf.mxu0 }
 0x8ef   : > { %v2296_v5 = vsel %vm1017_vm0, %v11811_v52, -inf }
 0x8f0   : > { %v9977_v53 = vpop.f32.mrf.mxu0 }
 0x8f1   : > { %v2311_v54 = vsel %vm1017_vm0, %v9977_v53, -inf }
 0x8f2   : > { %2312 = vmax.xlane.f32.xlu0 %v2311_v54  ;;  %v11814_v55 = vpop.f32.mrf.mxu0 }
 0x8f3   : > { %v2305_v36 = vsel %vm1017_vm0, %v11814_v55, -inf }
 0x8f4   : > { %v9978_v56 = vpop.f32.mrf.mxu0 }
 0x8f5   : > { %v2314_v58 = vsel %vm1017_vm0, %v9978_v56, -inf }
 0x8f6   : > { %2060 = vmax.xlane.f32.xlu0 %v2059_v57  ;;  %2315 = vmax.xlane.f32.xlu1 %v2314_v58  ;;  %v11823_v60 = vpop.f32.mrf.mxu0 }
 0x8f7   : > { %v2308_v38 = vsel %vm1017_vm0, %v11823_v60, -inf }
 0x8fa   : > { %2306 = vmax.xlane.f32.xlu0 %v2305_v36  ;;  %2063 = vmax.xlane.f32.xlu1 %v2062_v59 }
 0x8fe   : > { %2054 = vmax.xlane.f32.xlu0 %v2053_v61  ;;  %2309 = vmax.xlane.f32.xlu1 %v2308_v38 }
 0x902   : > { %2300 = vmax.xlane.f32.xlu0 %v2299_v44  ;;  %2057 = vmax.xlane.f32.xlu1 %v2056_v63 }
 0x906   : > { %2048 = vmax.xlane.f32.xlu0 %v2047_v0  ;;  %2303 = vmax.xlane.f32.xlu1 %v2302_v1 }
 0x90a   : > { %2294 = vmax.xlane.f32.xlu0 %v2293_v2  ;;  %2051 = vmax.xlane.f32.xlu1 %v2050_v3 }
 0x90e   : > { %2297 = vmax.xlane.f32.xlu1 %v2296_v5 }
 0x96b   : > { %v2067_v6 = vpop.xlane.xlu0 %2066 }
 0x96c   : > { %v2077_v9 = vsub.f32 %v9955_v42, %v2067_v6 }
 0x96e   : > { %v2091_v10 = vmul.f32 1.442695, %v2077_v9 }
 0x96f   : > { %v2070_v12 = vpop.xlane.xlu1 %2069 }
 0x970   : > { %10703 = vpow2.f32 %v2091_v10  ;;  %v2078_v15 = vsub.f32 %v9956_v46, %v2070_v12 }
 0x972   : > { %v2093_v16 = vmul.f32 1.442695, %v2078_v15 }
 0x974   : > { %10705 = vpow2.f32 %v2093_v16 }
 0x97b   : > { %v2313_v17 = vpop.xlane.xlu0 %2312 }
 0x97c   : > { %v2323_v18 = vsub.f32 %v9977_v53, %v2313_v17 }
 0x97d   : > { %v11847_v21 = vpop.eup %10703 }
 0x97e   : > { %v2337_v22 = vmul.f32 1.442695, %v2323_v18  ;;  %v2113_v23 = vsel %vm1017_vm0, %v11847_v21, 0.0 }
 0x97f   : > { %v2316_v24 = vpop.xlane.xlu1 %2315  ;;  %2114 = vadd.xlane.f32.xlu0 %v2113_v23  ;;  %v2061_v25 = vpop.xlane.xlu0 %2060 }
 0x980   : > { %10707 = vpow2.f32 %v2337_v22  ;;  %v2324_v26 = vsub.f32 %v9978_v56, %v2316_v24  ;;  %v2075_v27 = vsub.f32 %v11800_v45, %v2061_v25 }
 0x981   : > { %v11852_v28 = vpop.eup %10705 }
 0x982   : > { %v2339_v29 = vmul.f32 1.442695, %v2324_v26  ;;  %v2087_v30 = vmul.f32 1.442695, %v2075_v27  ;;  %v2116_v31 = vsel %vm1017_vm0, %v11852_v28, 0.0 }
 0x983   : > { %v2064_v32 = vpop.xlane.xlu1 %2063  ;;  %2117 = vadd.xlane.f32.xlu1 %v2116_v31  ;;  %v2307_v33 = vpop.xlane.xlu0 %2306 }
 0x984   : > { %10709 = vpow2.f32 %v2339_v29  ;;  %v2076_v34 = vsub.f32 %v11803_v48, %v2064_v32  ;;  %v2321_v42 = vsub.f32 %v11814_v55, %v2307_v33  ;;  %v13983_v29 = vmov 0.0  }
 0x985   : > { %10711 = vpow2.f32 %v2087_v30  ;;  %9957 = vmatprep.subr.bf16.mxu1 %v13983_v29  ;;  %9979 = vmatprep.subr.bf16.mxu0 %v13983_v29 }
 0x986   : > { %v2089_v43 = vmul.f32 1.442695, %v2076_v34  ;;  %v2333_v46 = vmul.f32 1.442695, %v2321_v42  ;;  %9965 = vmatprep.mubr.msk.bf16.mxu1 %vm11389_vm4, %v13983_v29  ;;  %9987 = vmatprep.mubr.msk.bf16.mxu0 %vm11389_vm4, %v13983_v29 }
 0x987   : > { %v2310_v47 = vpop.xlane.xlu1 %2309  ;;  %v2055_v45 = vpop.xlane.xlu0 %2054 }
 0x988   : > { %10713 = vpow2.f32 %v2089_v43  ;;  %v2322_v53 = vsub.f32 %v11823_v60, %v2310_v47  ;;  %v2073_v54 = vsub.f32 %v11791_v37, %v2055_v45 }
 0x989   : > { %10715 = vpow2.f32 %v2333_v46 }
 0x98a   : > { %v2335_v56 = vmul.f32 1.442695, %v2322_v53  ;;  %v2083_v57 = vmul.f32 1.442695, %v2073_v54  ;;  %v2440_v53 = vpack.c.bf16 %v11771_v13, %v11771_v13  ;;  %v2686_v54 = vpack.c.bf16 %v11775_v19, %v11775_v19 }
 0x98b   : > { %v2058_v58 = vpop.xlane.xlu1 %2057  ;;  %v2301_v36 = vpop.xlane.xlu0 %2300 }
 0x98c   : > { %10717 = vpow2.f32 %v2335_v56  ;;  %v2074_v48 = vsub.f32 %v11795_v40, %v2058_v58  ;;  %v2319_v55 = vsub.f32 %v11805_v49, %v2301_v36 }
 0x98d   : > { %v11862_v59 = vpop.eup %10707  ;;  %10719 = vpow2.f32 %v2083_v57 }
 0x98e   : > { %v2085_v61 = vmul.f32 1.442695, %v2074_v48  ;;  %v2329_v38 = vmul.f32 1.442695, %v2319_v55  ;;  %v2359_v60 = vsel %vm1017_vm0, %v11862_v59, 0.0 }
 0x98f   : > { %v2304_v62 = vpop.xlane.xlu1 %2303  ;;  %2360 = vadd.xlane.f32.xlu0 %v2359_v60  ;;  %v2049_v37 = vpop.xlane.xlu0 %2048 }
 0x990   : > { %10721 = vpow2.f32 %v2085_v61  ;;  %v2320_v35 = vsub.f32 %v11809_v51, %v2304_v62  ;;  %v2071_v44 = vsub.f32 %v11793_v39, %v2049_v37 }
 0x991   : > { %v11868_v63 = vpop.eup %10709  ;;  %10723 = vpow2.f32 %v2329_v38 }
 0x992   : > { %v11870_v40 = vpop.eup %10711  ;;  %v2331_v49 = vmul.f32 1.442695, %v2320_v35  ;;  %v2079_v0 = vmul.f32 1.442695, %v2071_v44  ;;  %v2362_v1 = vsel %vm1017_vm0, %v11868_v63, 0.0 }
 0x993   : > { %2363 = vadd.xlane.f32.xlu1 %v2362_v1  ;;  %v2052_v2 = vpop.xlane.xlu1 %2051  ;;  %v2107_v3 = vsel %vm1017_vm0, %v11870_v40, 0.0  ;;  %v2295_v5 = vpop.xlane.xlu0 %2294 }
 0x994   : > { %10725 = vpow2.f32 %v2331_v49  ;;  %v2072_v51 = vsub.f32 %v11797_v41, %v2052_v2  ;;  %2108 = vadd.xlane.f32.xlu0 %v2107_v3  ;;  %v2317_v39 = vsub.f32 %v11807_v50, %v2295_v5 }
 0x995   : > { %v11878_v6 = vpop.eup %10713  ;;  %10727 = vpow2.f32 %v2079_v0 }
 0x996   : > { %v11880_v9 = vpop.eup %10715  ;;  %v2081_v10 = vmul.f32 1.442695, %v2072_v51  ;;  %v2325_v12 = vmul.f32 1.442695, %v2317_v39  ;;  %v2110_v15 = vsel %vm1017_vm0, %v11878_v6, 0.0 }
 0x997   : > { %2111 = vadd.xlane.f32.xlu1 %v2110_v15  ;;  %v2298_v16 = vpop.xlane.xlu1 %2297  ;;  %v2353_v17 = vsel %vm1017_vm0, %v11880_v9, 0.0 }
 0x998   : > { %10729 = vpow2.f32 %v2081_v10  ;;  %v2318_v41 = vsub.f32 %v11811_v52, %v2298_v16  ;;  %2354 = vadd.xlane.f32.xlu0 %v2353_v17 }
 0x999   : > { %v11887_v50 = vpop.eup %10717  ;;  %10731 = vpow2.f32 %v2325_v12 }
 0x99a   : > { %v11889_v18 = vpop.eup %10719  ;;  %v2327_v22 = vmul.f32 1.442695, %v2318_v41  ;;  %v2356_v23 = vsel %vm1017_vm0, %v11887_v50, 0.0 }
 0x99b   : > { %2357 = vadd.xlane.f32.xlu1 %v2356_v23  ;;  %v2101_v24 = vsel %vm1017_vm0, %v11889_v18, 0.0 }
 0x99c   : > { %10733 = vpow2.f32 %v2327_v22  ;;  %2102 = vadd.xlane.f32.xlu0 %v2101_v24 }
 0x99d   : > { %v11895_v25 = vpop.eup %10721 }
 0x99e   : > { %v11897_v26 = vpop.eup %10723  ;;  %v2104_v52 = vsel %vm1017_vm0, %v11895_v25, 0.0 }
 0x99f   : > { %2105 = vadd.xlane.f32.xlu1 %v2104_v52  ;;  %v2347_v27 = vsel %vm1017_vm0, %v11897_v26, 0.0 }
 0x9a0   : > { %2348 = vadd.xlane.f32.xlu0 %v2347_v27 }
 0x9a1   : > { %v11905_v30 = vpop.eup %10725 }
 0x9a2   : > { %v11907_v31 = vpop.eup %10727  ;;  %v2350_v32 = vsel %vm1017_vm0, %v11905_v30, 0.0 }
 0x9a3   : > { %2351 = vadd.xlane.f32.xlu1 %v2350_v32  ;;  %v2095_v33 = vsel %vm1017_vm0, %v11907_v31, 0.0 }
 0x9a4   : > { %2096 = vadd.xlane.f32.xlu0 %v2095_v33 }
 0x9a5   : > { %v11913_v34 = vpop.eup %10729 }
 0x9a6   : > { %v11915_v42 = vpop.eup %10731  ;;  %v2098_v43 = vsel %vm1017_vm0, %v11913_v34, 0.0 }
 0x9a7   : > { %2099 = vadd.xlane.f32.xlu1 %v2098_v43  ;;  %v2341_v46 = vsel %vm1017_vm0, %v11915_v42, 0.0 }
 0x9a8   : > { %2342 = vadd.xlane.f32.xlu0 %v2341_v46 }
 0x9a9   : > { %v11921_v47 = vpop.eup %10733 }
 0x9aa   : > { %v2344_v45 = vsel %vm1017_vm0, %v11921_v47, 0.0 }
 0x9ab   : > { %2345 = vadd.xlane.f32.xlu1 %v2344_v45 }
 0x9d5   : > { %2443 = vxpose.xlu0.c.b16.start.end [1/1] (short) (narrow) %v2440_v53, 64 }
 0x9d8   : > { %2689 = vxpose.xlu1.c.b16.start.end [1/1] (short) (narrow) %v2686_v54, 64 }
 0xa08   : > { %v2115_v56 = vpop.xlane.xlu0 %2114 }
 0xa09   : > { %10735 = vrcp.f32 %v2115_v56 }
 0xa0c   : > { %v2118_v57 = vpop.xlane.xlu1 %2117 }
 0xa0d   : > { %10737 = vrcp.f32 %v2118_v57 }
 0xa16   : > { %v10736_v58 = vpop.eup %10735 }
 0xa17   : > { %v2133_v55 = vmul.f32 %v10736_v58, %v11847_v21 }
 0xa18   : > { %v2361_v36 = vpop.xlane.xlu0 %2360 }
 0xa19   : > { %10739 = vrcp.f32 %v2361_v36  ;;  %v11955_v36 = vpop.f32.mrf.mxu1 }
 0xa1a   : > { %v10738_v48 = vpop.eup %10737 }
 0xa1b   : > { %v2134_v61 = vmul.f32 %v10738_v48, %v11852_v28 }
 0xa1c   : > { %v2364_v38 = vpop.xlane.xlu1 %2363 }
 0xa1d   : > { %10741 = vrcp.f32 %v2364_v38  ;;  %v2109_v13 = vpop.xlane.xlu0 %2108  ;;  %v2138_v60 = vpack.c.bf16 %v2134_v61, %v2133_v55 }
 0xa1e   : > { %10743 = vrcp.f32 %v2109_v13  ;;  %v2441_v13 = vpack.c.bf16 %v11773_v14, %v11773_v14 }
 0xa1f   : > { %v2152_v19 = vsel %vm1017_vm0, %v2138_v60, 0 }
 0xa20   : > { %v2112_v62 = vpop.xlane.xlu1 %2111  ;;  %9958 = vmatpush3.bf16.xpose.msra.mxu1 %v2152_v19 }
 0xa21   : > { %10745 = vrcp.f32 %v2112_v62  ;;  %v2355_v37 = vpop.xlane.xlu0 %2354  ;;  %9959 = vmatprep.subr.bf16.mxu1 %v13983_v29 }
 0xa22   : > { %10747 = vrcp.f32 %v2355_v37 }
 0xa24   : > { %v2358_v35 = vpop.xlane.xlu1 %2357 }
 0xa25   : > { %10749 = vrcp.f32 %v2358_v35  ;;  %v2103_v44 = vpop.xlane.xlu0 %2102  ;;  %v2687_v35 = vpack.c.bf16 %v11777_v20, %v11777_v20 }
 0xa26   : > { %10751 = vrcp.f32 %v2103_v44  ;;  %v10740_v21 = vpop.eup %10739 }
 0xa27   : > { %v2379_v1 = vmul.f32 %v10740_v21, %v11862_v59  ;;  %v2718_v20 = vsel %vm1978_vm2, %v2687_v35, 0 }
 0xa28   : > { %v2106_v28 = vpop.xlane.xlu1 %2105 }
 0xa29   : > { %10753 = vrcp.f32 %v2106_v28  ;;  %v2349_v49 = vpop.xlane.xlu0 %2348 }
 0xa2a   : > { %v10742_v0 = vpop.eup %10741  ;;  %10755 = vrcp.f32 %v2349_v49 }
 0xa2b   : > { %v2380_v2 = vmul.f32 %v10742_v0, %v11868_v63  ;;  %v10744_v3 = vpop.eup %10743 }
 0xa2c   : > { %v2352_v5 = vpop.xlane.xlu1 %2351  ;;  %v2131_v15 = vmul.f32 %v10744_v3, %v11870_v40 }
 0xa2d   : > { %10757 = vrcp.f32 %v2352_v5  ;;  %v2097_v51 = vpop.xlane.xlu0 %2096  ;;  %v2384_v39 = vpack.c.bf16 %v2380_v2, %v2379_v1 }
 0xa2e   : > { %v10746_v10 = vpop.eup %10745  ;;  %10759 = vrcp.f32 %v2097_v51 }
 0xa2f   : > { %v2398_v12 = vsel %vm1017_vm0, %v2384_v39, 0  ;;  %v2132_v16 = vmul.f32 %v10746_v10, %v11878_v6  ;;  %v10748_v17 = vpop.eup %10747 }
 0xa30   : > { %v2100_v41 = vpop.xlane.xlu1 %2099  ;;  %9980 = vmatpush3.bf16.xpose.msra.mxu0 %v2398_v12  ;;  %v2377_v24 = vmul.f32 %v10748_v17, %v11880_v9 }
 0xa31   : > { %10761 = vrcp.f32 %v2100_v41  ;;  %v2343_v59 = vpop.xlane.xlu0 %2342  ;;  %v2137_v22 = vpack.c.bf16 %v2132_v16, %v2131_v15  ;;  %9981 = vmatprep.subr.bf16.mxu0 %v13983_v29 }
 0xa32   : > { %v10750_v63 = vpop.eup %10749  ;;  %10763 = vrcp.f32 %v2343_v59 }
 0xa33   : > { %v2149_v23 = vsel %vm1017_vm0, %v2137_v22, 0  ;;  %v2378_v52 = vmul.f32 %v10750_v63, %v11887_v50  ;;  %v10752_v27 = vpop.eup %10751 }
 0xa34   : > { %v2346_v40 = vpop.xlane.xlu1 %2345  ;;  %9960 = vmatpush3.bf16.xpose.msra.mxu1 %v2149_v23  ;;  %v2129_v43 = vmul.f32 %v10752_v27, %v11889_v18 }
 0xa35   : > { %10765 = vrcp.f32 %v2346_v40  ;;  %v2383_v6 = vpack.c.bf16 %v2378_v52, %v2377_v24  ;;  %9961 = vmatprep.subr.bf16.mxu1 %v13983_v29 }
 0xa36   : > { %v10754_v32 = vpop.eup %10753 }
 0xa37   : > { %v2395_v33 = vsel %vm1017_vm0, %v2383_v6, 0  ;;  %v2130_v46 = vmul.f32 %v10754_v32, %v11895_v25  ;;  %v10756_v45 = vpop.eup %10755 }
 0xa38   : > { %9982 = vmatpush3.bf16.xpose.msra.mxu0 %v2395_v33  ;;  %v2375_v54 = vmul.f32 %v10756_v45, %v11897_v26 }
 0xa39   : > { %v2136_v53 = vpack.c.bf16 %v2130_v46, %v2129_v43  ;;  %9983 = vmatprep.subr.bf16.mxu0 %v13983_v29 }
 0xa3a   : > { %v10758_v9 = vpop.eup %10757  ;;  %v2697_v21 = vpop.trf.xlu1 }
 0xa3b   : > { %v2146_v50 = vsel %vm1017_vm0, %v2136_v53, 0  ;;  %v2376_v56 = vmul.f32 %v10758_v9, %v11905_v30  ;;  %v10760_v57 = vpop.eup %10759  ;;  %v1931_v30 = vpop.f32.mrf.mxu1 }
 0xa3c   : > { %9962 = vmatpush3.bf16.xpose.msra.mxu1 %v2146_v50  ;;  %v2127_v48 = vmul.f32 %v10760_v57, %v11907_v31  ;;  %v1948_v14 = vpack.c.bf16 %v1931_v30, %v1931_v30 }
 0xa3d   : > { %v2382_v58 = vpack.c.bf16 %v2376_v56, %v2375_v54  ;;  %9963 = vmatprep.subr.bf16.mxu1 %v13983_v29  ;;  %v11967_v37 = vpop.f32.mrf.mxu1 }
 0xa3e   : > { %v10762_v18 = vpop.eup %10761  ;;  %v2698_v0 = vpop.trf.xlu1 }
 0xa3f   : > { %v2392_v25 = vsel %vm1017_vm0, %v2382_v58, 0  ;;  %v2128_v55 = vmul.f32 %v10762_v18, %v11913_v34  ;;  %v10764_v61 = vpop.eup %10763  ;;  %v2451_v34 = vpop.trf.xlu0 }
 0xa40   : > { %9984 = vmatpush3.bf16.xpose.msra.mxu0 %v2392_v25  ;;  %v2373_v19 = vmul.f32 %v10764_v61, %v11915_v42  ;;  %v1934_v42 = vpop.f32.mrf.mxu1 }
 0xa41   : > { %v2135_v38 = vpack.c.bf16 %v2128_v55, %v2127_v48  ;;  %9985 = vmatprep.subr.bf16.mxu0 %v13983_v29  ;;  %v2196_v49 = vpack.c.bf16 %v1934_v42, %v1934_v42 }
 0xa42   : > { %v10766_v26 = vpop.eup %10765  ;;  %v2699_v2 = vpop.trf.xlu1 }
 0xa43   : > { %v2143_v60 = vsel %vm1017_vm0, %v2135_v38, 0  ;;  %v2374_v62 = vmul.f32 %v10766_v26, %v11921_v47  ;;  %v2472_v47 = vsel %vm1978_vm2, %v2441_v13, 0  ;;  %v2452_v28 = vpop.trf.xlu0 }
 0xa44   : > { %9964 = vmatpush3.bf16.xpose.msra.mxu1 %v2143_v60 }
 0xa45   : > { %10525 = vmatprep.subr.msk.bf16.mxu1 %vm1978_vm2, %v2441_v13  ;;  %v2381_v31 = vpack.c.bf16 %v2374_v62, %v2373_v19 }
 0xa46   : > { %v2700_v5 = vpop.trf.xlu1 }
 0xa47   : > { %v2389_v44 = vsel %vm1017_vm0, %v2381_v31, 0  ;;  %v2453_v1 = vpop.trf.xlu0 }
 0xa48   : > { %9986 = vmatpush3.bf16.xpose.msra.mxu0 %v2389_v44 }
 0xa49   : > { %10526 = vmatprep.subr.msk.bf16.mxu0 %vm1978_vm2, %v2687_v35 }
 0xa4b   : > { %9966 = vmatmul.mubr.msk.bf16.vlgmr.msra.gmra.mxu1 %vm1017_vm0, %v1948_v14  ;;  %v2454_v3 = vpop.trf.xlu0 }
 0xa4c   : > { %9992 = vmatpush3.bf16.msra.mxu1 %v2472_v47  ;;  %9993 = vmatprep.mubr.msk.bf16.mxu1 %vm1965_vm3, %v2451_v34 }
 0xa4d   : > { %10001 = vmatprep.subr.bf16.mxu1 %v13983_v29 }
 0xa4f   : > { %9988 = vmatmul.mubr.msk.bf16.vlgmr.msra.gmra.mxu0 %vm1017_vm0, %v2196_v49 }
 0xa50   : > { %10014 = vmatpush3.bf16.msra.mxu0 %v2718_v20  ;;  %10015 = vmatprep.mubr.msk.bf16.mxu0 %vm1965_vm3, %v2697_v21 }
 0xa51   : > { %10023 = vmatprep.subr.bf16.mxu0 %v13983_v29 }
 0xa53   : > { %9994 = vmatmul.mubr.msk.bf16.vlgmr.msra.gmra.mxu1 %vm1965_vm3, %v2452_v28 }
 0xa54   : > { %9997 = vmatprep.mubr.msk.bf16.mxu1 %vm1965_vm3, %v2453_v1 }
 0xa57   : > { %10016 = vmatmul.mubr.msk.bf16.vlgmr.msra.gmra.mxu0 %vm1965_vm3, %v2698_v0 }
 0xa58   : > { %10019 = vmatprep.mubr.msk.bf16.mxu0 %vm1965_vm3, %v2699_v2 }
 0xa5b   : > { %9998 = vmatmul.mubr.msk.bf16.gmra.mxu1 %vm1965_vm3, %v2454_v3 }
 0xa5c   : > { %10009 = vmatprep.mubr.msk.bf16.mxu1 %vm11389_vm4, %v13983_v29 }
 0xa5f   : > { %10020 = vmatmul.mubr.msk.bf16.gmra.mxu0 %vm1965_vm3, %v2700_v5 }
 0xa60   : > { %10031 = vmatprep.mubr.msk.bf16.mxu0 %vm11389_vm4, %v13983_v29 }
 0xb0b   : > { %v2188_v51 = vpop.f32.mrf.mxu1 }
 0xb0d   : > { %v9967_v39 = vpop.f32.mrf.mxu1 }
 0xb0f   : > { %v2191_v10 = vpop.f32.mrf.mxu1  ;;  %v2434_v12 = vpop.f32.mrf.mxu0 }
 0xb10   : > { %v11991_v15 = vpack.c.bf16 %v2434_v12, %v2188_v51 }
 0xb11   : > { %v9968_v16 = vpop.f32.mrf.mxu1  ;;  %v9989_v17 = vpop.f32.mrf.mxu0 }
 0xb13   : > { %v2437_v41 = vpop.f32.mrf.mxu0  ;;  %v11993_v59 = vpop.f32.mrf.mxu1 }
 0xb14   : > { %v2545_v55 = vsel %vm1017_vm0, %v11993_v59, -inf }
 0xb15   : > { %v9990_v22 = vpop.f32.mrf.mxu0  ;;  %v11995_v63 = vpop.f32.mrf.mxu1 }
 0xb16   : > { %v2539_v30 = vsel %vm1017_vm0, %v11995_v63, -inf }
 0xb17   : > { %v11997_v23 = vpop.f32.mrf.mxu1  ;;  %v11999_v24 = vpop.f32.mrf.mxu0 }
 0xb18   : > { %v2791_v38 = vsel %vm1017_vm0, %v11999_v24, -inf  ;;  %v2548_v26 = vsel %vm1017_vm0, %v11997_v23, -inf }
 0xb19   : > { %v12001_v52 = vpop.f32.mrf.mxu1  ;;  %v12003_v27 = vpop.f32.mrf.mxu0 }
 0xb1a   : > { %v2785_v60 = vsel %vm1017_vm0, %v12003_v27, -inf  ;;  %v2542_v19 = vsel %vm1017_vm0, %v12001_v52, -inf }
 0xb1b   : > { %v9999_v40 = vpop.f32.mrf.mxu1  ;;  %v12005_v6 = vpop.f32.mrf.mxu0 }
 0xb1c   : > { %v2557_v32 = vsel %vm1017_vm0, %v9999_v40, -inf  ;;  %v2794_v13 = vsel %vm1017_vm0, %v12005_v6, -inf }
 0xb1d   : > { %v12008_v33 = vpop.f32.mrf.mxu0  ;;  %2558 = vmax.xlane.f32.xlu0 %v2557_v32  ;;  %v2524_v43 = vpop.f32.mrf.mxu1 }
 0xb1e   : > { %v2551_v56 = vsel %vm1017_vm0, %v2524_v43, -inf  ;;  %v2788_v62 = vsel %vm1017_vm0, %v12008_v33, -inf }
 0xb1f   : > { %v10000_v46 = vpop.f32.mrf.mxu1  ;;  %v10021_v45 = vpop.f32.mrf.mxu0 }
 0xb20   : > { %v2803_v53 = vsel %vm1017_vm0, %v10021_v45, -inf  ;;  %v2560_v9 = vsel %vm1017_vm0, %v10000_v46, -inf }
 0xb21   : > { %v2770_v50 = vpop.f32.mrf.mxu0  ;;  %2804 = vmax.xlane.f32.xlu0 %v2803_v53  ;;  %2561 = vmax.xlane.f32.xlu1 %v2560_v9  ;;  %v2527_v58 = vpop.f32.mrf.mxu1 }
 0xb22   : > { %v2797_v18 = vsel %vm1017_vm0, %v2770_v50, -inf  ;;  %v2554_v25 = vsel %vm1017_vm0, %v2527_v58, -inf }
 0xb23   : > { %v10022_v54 = vpop.f32.mrf.mxu0 }
 0xb24   : > { %v2806_v57 = vsel %vm1017_vm0, %v10022_v54, -inf }
 0xb25   : > { %2552 = vmax.xlane.f32.xlu0 %v2551_v56  ;;  %2807 = vmax.xlane.f32.xlu1 %v2806_v57  ;;  %v2773_v48 = vpop.f32.mrf.mxu0 }
 0xb26   : > { %v2800_v61 = vsel %vm1017_vm0, %v2773_v48, -inf }
 0xb29   : > { %2798 = vmax.xlane.f32.xlu0 %v2797_v18  ;;  %2555 = vmax.xlane.f32.xlu1 %v2554_v25 }
 0xb2d   : > { %2546 = vmax.xlane.f32.xlu0 %v2545_v55  ;;  %2801 = vmax.xlane.f32.xlu1 %v2800_v61 }
 0xb31   : > { %2792 = vmax.xlane.f32.xlu0 %v2791_v38  ;;  %2549 = vmax.xlane.f32.xlu1 %v2548_v26 }
 0xb35   : > { %2540 = vmax.xlane.f32.xlu0 %v2539_v30  ;;  %2795 = vmax.xlane.f32.xlu1 %v2794_v13 }
 0xb39   : > { %2786 = vmax.xlane.f32.xlu0 %v2785_v60  ;;  %2543 = vmax.xlane.f32.xlu1 %v2542_v19 }
 0xb3d   : > { %2789 = vmax.xlane.f32.xlu1 %v2788_v62 }
 0xba6   : > { %v2559_v31 = vpop.xlane.xlu0 %2558 }
 0xba7   : > { %v2569_v34 = vsub.f32 %v9999_v40, %v2559_v31 }
 0xba9   : > { %v2583_v35 = vmul.f32 1.442695, %v2569_v34 }
 0xbaa   : > { %v2805_v44 = vpop.xlane.xlu0 %2804  ;;  %v2562_v14 = vpop.xlane.xlu1 %2561 }
 0xbab   : > { %10767 = vpow2.f32 %v2583_v35  ;;  %v2815_v21 = vsub.f32 %v10021_v45, %v2805_v44  ;;  %v2570_v42 = vsub.f32 %v10000_v46, %v2562_v14 }
 0xbad   : > { %v2829_v47 = vmul.f32 1.442695, %v2815_v21  ;;  %v2585_v28 = vmul.f32 1.442695, %v2570_v42 }
 0xbae   : > { %v2553_v49 = vpop.xlane.xlu0 %2552  ;;  %v2808_v20 = vpop.xlane.xlu1 %2807 }
 0xbaf   : > { %10769 = vpow2.f32 %v2829_v47  ;;  %v2567_v0 = vsub.f32 %v2524_v43, %v2553_v49  ;;  %v2816_v1 = vsub.f32 %v10022_v54, %v2808_v20 }
 0xbb0   : > { %10771 = vpow2.f32 %v2585_v28 }
 0xbb1   : > { %v2579_v2 = vmul.f32 1.442695, %v2567_v0  ;;  %v2831_v3 = vmul.f32 1.442695, %v2816_v1 }
 0xbb2   : > { %v2799_v5 = vpop.xlane.xlu0 %2798  ;;  %v2556_v51 = vpop.xlane.xlu1 %2555 }
 0xbb3   : > { %10773 = vpow2.f32 %v2579_v2  ;;  %v2813_v39 = vsub.f32 %v2770_v50, %v2799_v5  ;;  %v2568_v10 = vsub.f32 %v2527_v58, %v2556_v51 }
 0xbb4   : > { %10775 = vpow2.f32 %v2831_v3 }
 0xbb5   : > { %v2825_v12 = vmul.f32 1.442695, %v2813_v39  ;;  %v2581_v16 = vmul.f32 1.442695, %v2568_v10 }
 0xbb6   : > { %v2547_v17 = vpop.xlane.xlu0 %2546  ;;  %v2802_v41 = vpop.xlane.xlu1 %2801 }
 0xbb7   : > { %10777 = vpow2.f32 %v2825_v12  ;;  %v2565_v22 = vsub.f32 %v11993_v59, %v2547_v17  ;;  %v2814_v40 = vsub.f32 %v2773_v48, %v2802_v41 }
 0xbb8   : > { %v12034_v32 = vpop.eup %10767  ;;  %10779 = vpow2.f32 %v2581_v16 }
 0xbb9   : > { %v2575_v43 = vmul.f32 1.442695, %v2565_v22  ;;  %v2827_v46 = vmul.f32 1.442695, %v2814_v40  ;;  %v2605_v45 = vsel %vm1017_vm0, %v12034_v32, 0.0  ;;  %v1647_v40 = vld [vmem:[%s11481_s27 + $0x8] sm:$0xff] }
 0xbba   : > { %2606 = vadd.xlane.f32.xlu0 %v2605_v45  ;;  %v2793_v53 = vpop.xlane.xlu0 %2792  ;;  %v2550_v9 = vpop.xlane.xlu1 %2549  ;;  %v1649_v45 = vld [vmem:[%s11481_s27 + $0x18] sm:$0xff] }
 0xbbb   : > { %10781 = vpow2.f32 %v2575_v43  ;;  %v2811_v50 = vsub.f32 %v11999_v24, %v2793_v53  ;;  %v2566_v54 = vsub.f32 %v11997_v23, %v2550_v9  ;;  %v1646_v43 = vld [vmem:[%s11481_s27] sm:$0xff]  ;;  %v3049_v53 = vld [vmem:[%s14031_s4 + $0x10] sm:$0xff]  ;;  %v3050_v9 = vld [vmem:[%s14031_s4 + $0x18] sm:$0xff] }
 0xbbc   : > { %v12040_v56 = vpop.eup %10769  ;;  %10783 = vpow2.f32 %v2827_v46  ;;  %v1648_v46 = vld [vmem:[%s11481_s27 + $0x10] sm:$0xff] }
 0xbbd   : > { %v12042_v59 = vpop.eup %10771  ;;  %v2821_v57 = vmul.f32 1.442695, %v2811_v50  ;;  %v2577_v58 = vmul.f32 1.442695, %v2566_v54  ;;  %v2851_v18 = vsel %vm1017_vm0, %v12040_v56, 0.0  ;;  %v3053_v50 = vld [vmem:[%s14043_s16 + $0x10] sm:$0xff] }
 0xbbe   : > { %2852 = vadd.xlane.f32.xlu0 %v2851_v18  ;;  %v2541_v25 = vpop.xlane.xlu0 %2540  ;;  %v2608_v48 = vsel %vm1017_vm0, %v12042_v59, 0.0  ;;  %v2796_v55 = vpop.xlane.xlu1 %2795  ;;  %v3054_v54 = vld [vmem:[%s14043_s16 + $0x18] sm:$0xff]  ;;  %v3051_v18 = vld [vmem:[%s14043_s16] sm:$0xff] }
 0xbbf   : > { %10785 = vpow2.f32 %v2821_v57  ;;  %v2563_v24 = vsub.f32 %v11995_v63, %v2541_v25  ;;  %2609 = vadd.xlane.f32.xlu1 %v2608_v48  ;;  %v2812_v23 = vsub.f32 %v12005_v6, %v2796_v55  ;;  %v3047_v57 = vld [vmem:[%s14031_s4] sm:$0xff]  ;;  %v3052_v25 = vld [vmem:[%s14043_s16 + $0x8] sm:$0xff] }
 0xbc0   : > { %v12050_v61 = vpop.eup %10773  ;;  %10787 = vpow2.f32 %v2577_v58  ;;  %v3048_v58 = vld [vmem:[%s14031_s4 + $0x8] sm:$0xff] }
 0xbc1   : > { %v12052_v38 = vpop.eup %10775  ;;  %v2571_v26 = vmul.f32 1.442695, %v2563_v24  ;;  %v2823_v30 = vmul.f32 1.442695, %v2812_v23  ;;  %v2599_v13 = vsel %vm1017_vm0, %v12050_v61, 0.0 }
 0xbc2   : > { %2600 = vadd.xlane.f32.xlu0 %v2599_v13  ;;  %v2787_v60 = vpop.xlane.xlu0 %2786  ;;  %v2854_v19 = vsel %vm1017_vm0, %v12052_v38, 0.0  ;;  %v2544_v62 = vpop.xlane.xlu1 %2543 }
 0xbc3   : > { %10789 = vpow2.f32 %v2571_v26  ;;  %v2809_v63 = vsub.f32 %v12003_v27, %v2787_v60  ;;  %2855 = vadd.xlane.f32.xlu1 %v2854_v19  ;;  %v2564_v6 = vsub.f32 %v12001_v52, %v2544_v62 }
 0xbc4   : > { %v12060_v31 = vpop.eup %10777  ;;  %10791 = vpow2.f32 %v2823_v30 }
 0xbc5   : > { %v12062_v34 = vpop.eup %10779  ;;  %v2817_v35 = vmul.f32 1.442695, %v2809_v63  ;;  %v2573_v44 = vmul.f32 1.442695, %v2564_v6  ;;  %v2845_v14 = vsel %vm1017_vm0, %v12060_v31, 0.0 }
 0xbc6   : > { %2846 = vadd.xlane.f32.xlu0 %v2845_v14  ;;  %v2602_v21 = vsel %vm1017_vm0, %v12062_v34, 0.0  ;;  %v2790_v42 = vpop.xlane.xlu1 %2789 }
 0xbc7   : > { %10793 = vpow2.f32 %v2817_v35  ;;  %2603 = vadd.xlane.f32.xlu1 %v2602_v21  ;;  %v2810_v27 = vsub.f32 %v12008_v33, %v2790_v42 }
 0xbc8   : > { %v12069_v52 = vpop.eup %10781  ;;  %10795 = vpow2.f32 %v2573_v44 }
 0xbc9   : > { %v12071_v47 = vpop.eup %10783  ;;  %v2819_v28 = vmul.f32 1.442695, %v2810_v27  ;;  %v2593_v49 = vsel %vm1017_vm0, %v12069_v52, 0.0 }
 0xbca   : > { %2594 = vadd.xlane.f32.xlu0 %v2593_v49  ;;  %v2848_v20 = vsel %vm1017_vm0, %v12071_v47, 0.0 }
 0xbcb   : > { %10797 = vpow2.f32 %v2819_v28  ;;  %2849 = vadd.xlane.f32.xlu1 %v2848_v20 }
 0xbcc   : > { %v12077_v0 = vpop.eup %10785 }
 0xbcd   : > { %v12079_v1 = vpop.eup %10787  ;;  %v2839_v33 = vsel %vm1017_vm0, %v12077_v0, 0.0 }
 0xbce   : > { %2840 = vadd.xlane.f32.xlu0 %v2839_v33  ;;  %v2596_v2 = vsel %vm1017_vm0, %v12079_v1, 0.0 }
 0xbcf   : > { %2597 = vadd.xlane.f32.xlu1 %v2596_v2 }
 0xbd0   : > { %v12085_v3 = vpop.eup %10789 }
 0xbd1   : > { %v12087_v5 = vpop.eup %10791  ;;  %v2587_v51 = vsel %vm1017_vm0, %v12085_v3, 0.0 }
 0xbd2   : > { %2588 = vadd.xlane.f32.xlu0 %v2587_v51  ;;  %v2842_v39 = vsel %vm1017_vm0, %v12087_v5, 0.0 }
 0xbd3   : > { %2843 = vadd.xlane.f32.xlu1 %v2842_v39 }
 0xbd4   : > { %v12093_v10 = vpop.eup %10793 }
 0xbd5   : > { %v12095_v12 = vpop.eup %10795  ;;  %v2833_v16 = vsel %vm1017_vm0, %v12093_v10, 0.0 }
 0xbd6   : > { %2834 = vadd.xlane.f32.xlu0 %v2833_v16  ;;  %v2590_v17 = vsel %vm1017_vm0, %v12095_v12, 0.0 }
 0xbd7   : > { %2591 = vadd.xlane.f32.xlu1 %v2590_v17 }
 0xbd8   : > { %v12101_v41 = vpop.eup %10797 }
 0xbd9   : > { %v2836_v22 = vsel %vm1017_vm0, %v12101_v41, 0.0 }
 0xbdb   : > { %2837 = vadd.xlane.f32.xlu1 %v2836_v22 }
 0xbec   : > { %2939 = vperm.xlu1 %10620, %v1647_v40   ;;  %2934 = vperm.xlu0 %10619, %v1646_v43  }
 0xbf0   : > { %2944 = vperm.xlu1 %10620, %v1648_v46   ;;  %2949 = vperm.xlu0 %10619, %v1649_v45  }
 0xbf4   : > { %3109 = vperm.xlu1 %10620, %v3049_v53   ;;  %3114 = vperm.xlu0 %10619, %v3050_v9  }
 0xbf8   : > { %3133 = vperm.xlu1 %10620, %v3053_v50   ;;  %3138 = vperm.xlu0 %10619, %v3054_v54  }
 0xbfc   : > { %3099 = vperm.xlu1 %10620, %v3047_v57   ;;  %3104 = vperm.xlu0 %10619, %v3048_v58  }
 0xc00   : > { %3123 = vperm.xlu1 %10620, %v3051_v18   ;;  %3128 = vperm.xlu0 %10619, %v3052_v25  }
 0xc43   : > { %v2607_v48 = vpop.xlane.xlu0 %2606 }
 0xc44   : > { %10799 = vrcp.f32 %v2607_v48 }
 0xc47   : > { %v2853_v55 = vpop.xlane.xlu0 %2852 }
 0xc48   : > { %v2610_v24 = vpop.xlane.xlu1 %2609 }
 0xc49   : > { %10801 = vrcp.f32 %v2610_v24 }
 0xc4a   : > { %10803 = vrcp.f32 %v2853_v55 }
 0xc4b   : > { %v2601_v23 = vpop.xlane.xlu0 %2600 }
 0xc4c   : > { %v2856_v26 = vpop.xlane.xlu1 %2855 }
 0xc4d   : > { %10805 = vrcp.f32 %v2856_v26 }
 0xc4e   : > { %10807 = vrcp.f32 %v2601_v23 }
 0xc4f   : > { %v2847_v30 = vpop.xlane.xlu0 %2846 }
 0xc50   : > { %v2604_v13 = vpop.xlane.xlu1 %2603 }
 0xc51   : > { %10809 = vrcp.f32 %v2604_v13  ;;  %v10800_v19 = vpop.eup %10799 }
 0xc52   : > { %10811 = vrcp.f32 %v2847_v30  ;;  %v2625_v35 = vmul.f32 %v10800_v19, %v12034_v32 }
 0xc53   : > { %v2595_v60 = vpop.xlane.xlu0 %2594 }
 0xc54   : > { %v2850_v62 = vpop.xlane.xlu1 %2849 }
 0xc55   : > { %10813 = vrcp.f32 %v2850_v62 }
 0xc56   : > { %v10802_v63 = vpop.eup %10801  ;;  %10815 = vrcp.f32 %v2595_v60 }
 0xc57   : > { %v2841_v6 = vpop.xlane.xlu0 %2840  ;;  %v2626_v44 = vmul.f32 %v10802_v63, %v12042_v59  ;;  %v10804_v14 = vpop.eup %10803 }
 0xc58   : > { %v2598_v21 = vpop.xlane.xlu1 %2597  ;;  %v2871_v20 = vmul.f32 %v10804_v14, %v12040_v56 }
 0xc59   : > { %10817 = vrcp.f32 %v2598_v21  ;;  %v2630_v42 = vpack.c.bf16 %v2626_v44, %v2625_v35  ;;  %v10629_v35 = vld [vmem:[%s14044_s10] sm:$0xff]  }
 0xc5a   : > { %v10806_v27 = vpop.eup %10805  ;;  %10819 = vrcp.f32 %v2841_v6 }
 0xc5b   : > { %v2589_v28 = vpop.xlane.xlu0 %2588  ;;  %v2644_v49 = vsel %vm1017_vm0, %v2630_v42, 0  ;;  %v2872_v33 = vmul.f32 %v10806_v27, %v12052_v38  ;;  %v10808_v2 = vpop.eup %10807 }
 0xc5c   : > { %10002 = vmatpush3.bf16.xpose.msra.mxu1 %v2644_v49  ;;  %v2844_v51 = vpop.xlane.xlu1 %2843  ;;  %v2623_v16 = vmul.f32 %v10808_v2, %v12050_v61  ;;  %v1007_v49 = vld [vmem:[%s1001_s17] sm:$0xff]  ;;  %s14050_s17 = sld [smem:[#allocation24_spill]] }
 0xc5d   : > { %10821 = vrcp.f32 %v2844_v51  ;;  %v2876_v32 = vpack.c.bf16 %v2872_v33, %v2871_v20  ;;  %10003 = vmatprep.subr.bf16.mxu1 %v13983_v29  ;;  %v12161_v20 = vpack.c.bf16 %v1007_v49, %v1007_v49  ;;  %v10631_v33 = vld [vmem:[%s14046_s5] sm:$0xff]  }
 0xc5e   : > { %v10810_v59 = vpop.eup %10809  ;;  %10823 = vrcp.f32 %v2589_v28  ;;  %v10630_v28 = vld [vmem:[%s14044_s10 + $0x8] sm:$0xff]  }
 0xc5f   : > { %v2890_v39 = vsel %vm1017_vm0, %v2876_v32, 0  ;;  %v2624_v17 = vmul.f32 %v10810_v59, %v12062_v34  ;;  %v10812_v22 = vpop.eup %10811  ;;  %v2835_v40 = vpop.xlane.xlu0 %2834  ;;  %14047 = vst [vmem:[#allocation33_spill] sm:$0xff] %v12161_v20  ;;  %v12167_v2 = vsel %vm3222_vm5, %v12161_v20, 0 }
 0xc60   : > { %10024 = vmatpush3.bf16.xpose.msra.mxu0 %v2890_v39  ;;  %v2592_v56 = vpop.xlane.xlu1 %2591  ;;  %v2869_v45 = vmul.f32 %v10812_v22, %v12060_v31  ;;  %14048 = vst [vmem:[#allocation34_spill] sm:$0xff] %v12167_v2 }
 0xc61   : > { %10825 = vrcp.f32 %v2592_v56  ;;  %v2629_v38 = vpack.c.bf16 %v2624_v17, %v2623_v16  ;;  %10025 = vmatprep.subr.bf16.mxu0 %v13983_v29 }
 0xc62   : > { %v10814_v43 = vpop.eup %10813  ;;  %10827 = vrcp.f32 %v2835_v40 }
 0xc63   : > { %v2641_v46 = vsel %vm1017_vm0, %v2629_v38, 0  ;;  %v2870_v53 = vmul.f32 %v10814_v43, %v12071_v47  ;;  %v10816_v9 = vpop.eup %10815 }
 0xc64   : > { %10004 = vmatpush3.bf16.xpose.msra.mxu1 %v2641_v46  ;;  %v2838_v61 = vpop.xlane.xlu1 %2837  ;;  %v2621_v57 = vmul.f32 %v10816_v9, %v12069_v52 }
 0xc65   : > { %10829 = vrcp.f32 %v2838_v61  ;;  %v2875_v34 = vpack.c.bf16 %v2870_v53, %v2869_v45  ;;  %10005 = vmatprep.subr.bf16.mxu1 %v13983_v29 }
 0xc66   : > { %v10818_v50 = vpop.eup %10817 }
 0xc67   : > { %v2887_v54 = vsel %vm1017_vm0, %v2875_v34, 0  ;;  %v2622_v58 = vmul.f32 %v10818_v50, %v12079_v1  ;;  %v10820_v18 = vpop.eup %10819  ;;  %v2935_v51 = vpop.permute.xlu0 %2934 }
 0xc68   : > { %10026 = vmatpush3.bf16.xpose.msra.mxu0 %v2887_v54  ;;  %v2867_v48 = vmul.f32 %v10820_v18, %v12077_v0  ;;  %v2952_v16 = vadd.f32 %v2935_v51, %v11743_v4 }
 0xc69   : > { %v2628_v25 = vpack.c.bf16 %v2622_v58, %v2621_v57  ;;  %10027 = vmatprep.subr.bf16.mxu0 %v13983_v29 }
 0xc6a   : > { %v10822_v31 = vpop.eup %10821 }
 0xc6b   : > { %v2638_v47 = vsel %vm1017_vm0, %v2628_v25, 0  ;;  %v2868_v55 = vmul.f32 %v10822_v31, %v12087_v5  ;;  %v10824_v24 = vpop.eup %10823  ;;  %v2950_v17 = vpop.permute.xlu0 %2949 }
 0xc6c   : > { %10006 = vmatpush3.bf16.xpose.msra.mxu1 %v2638_v47  ;;  %v2619_v26 = vmul.f32 %v10824_v24, %v12085_v3  ;;  %v2442_v3 = vpack.c.bf16 %v11955_v36, %v11955_v36  ;;  %v2955_v46 = vadd.f32 %v2950_v17, %v11751_v11 }
 0xc6d   : > { %v2874_v23 = vpack.c.bf16 %v2868_v55, %v2867_v48  ;;  %10007 = vmatprep.subr.bf16.mxu1 %v13983_v29 }
 0xc6e   : > { %v10826_v52 = vpop.eup %10825 }
 0xc6f   : > { %v2884_v1 = vsel %vm1017_vm0, %v2874_v23, 0  ;;  %v2620_v30 = vmul.f32 %v10826_v52, %v12095_v12  ;;  %v10828_v13 = vpop.eup %10827  ;;  %v2688_v12 = vpack.c.bf16 %v11967_v37, %v11967_v37 }
 0xc70   : > { %10028 = vmatpush3.bf16.xpose.msra.mxu0 %v2884_v1  ;;  %v2865_v19 = vmul.f32 %v10828_v13, %v12093_v10 }
 0xc71   : > { %v2627_v60 = vpack.c.bf16 %v2620_v30, %v2619_v26  ;;  %10029 = vmatprep.subr.bf16.mxu0 %v13983_v29 }
 0xc72   : > { %v10830_v0 = vpop.eup %10829 }
 0xc73   : > { %v2635_v5 = vsel %vm1017_vm0, %v2627_v60, 0  ;;  %v2866_v62 = vmul.f32 %v10830_v0, %v12101_v41 }
 0xc74   : > { %10008 = vmatpush3.bf16.xpose.msra.mxu1 %v2635_v5 }
 0xc75   : > { %v2873_v63 = vpack.c.bf16 %v2866_v62, %v2865_v19 }
 0xc77   : > { %v2881_v6 = vsel %vm1017_vm0, %v2873_v63, 0 }
 0xc78   : > { %10030 = vmatpush3.bf16.xpose.msra.mxu0 %v2881_v6 }
 0xc79   : > { %10528 = vmatprep.subr.msk.bf16.mxu0 %vm3222_vm5, %v12161_v20 }
 0xc7b   : > { %10010 = vmatmul.mubr.msk.bf16.vlgmr.msra.gmra.mxu1 %vm1017_vm0, %v2442_v3 }
 0xc7c   : > { %10039 = vmatprep.mubr.msk.bf16.mxu1 %vm1030_vm1, %v10629_v35 }
 0xc7f   : > { %10032 = vmatmul.mubr.msk.bf16.vlgmr.msra.gmra.mxu0 %vm1017_vm0, %v2688_v12 }
 0xc80   : > { %10058 = vmatpush3.bf16.xpose.msra.mxu0 %v12167_v2 }
 0xc81   : > { %10073 = vmatprep.subr.bf16.mxu0 %v13983_v29 }
 0xd3b   : > { %v2680_v10 = vpop.f32.mrf.mxu1 }
 0xd3d   : > { %v10011_v41 = vpop.f32.mrf.mxu1 }
 0xd3f   : > { %v2683_v44 = vpop.f32.mrf.mxu1  ;;  %v2926_v14 = vpop.f32.mrf.mxu0 }
 0xd40   : > { %v2957_v21 = vpack.c.bf16 %v2926_v14, %v2680_v10 }
 0xd41   : > { %v10012_v36 = vpop.f32.mrf.mxu1  ;;  %v10033_v42 = vpop.f32.mrf.mxu0 }
 0xd42   : > { %10035 = vmatprep.subr.bf16.mxu1 %v2957_v21 }
 0xd43   : > { %v2929_v27 = vpop.f32.mrf.mxu0  ;;  %10036 = vmatpush3.bf16.msra.mxu1 %v2957_v21  ;;  %v3115_v21 = vpop.permute.xlu0 %3114 }
 0xd44   : > { %10037 = vmatprep.subr.bf16.mxu1 %v11991_v15 }
 0xd45   : > { %v10034_v37 = vpop.f32.mrf.mxu0 }
 0xd47   : > { %10038 = vmatpush3.bf16.msra.mxu1 %v11991_v15  ;;  %v2940_v15 = vpop.permute.xlu1 %2939  ;;  %v3139_v42 = vpop.permute.xlu0 %3138 }
 0xd48   : > { %v2953_v40 = vadd.f32 %v2940_v15, %v11747_v8 }
 0xd4a   : > { %10040 = vmatmul.mubr.msk.bf16.vlgmr.msra.gmra.mxu1 %vm1030_vm1, %v10630_v28 }
 0xd4b   : > { %10047 = vmatprep.mubr.msk.bf16.mxu1 %vm1030_vm1, %v10631_v33  ;;  %v2945_v59 = vpop.permute.xlu1 %2944  ;;  %v3105_v37 = vpop.permute.xlu0 %3104 }
 0xd4c   : > { %v2954_v56 = vadd.f32 %v2945_v59, %v11745_v7 }
 0xd4f   : > { %v3110_v36 = vpop.permute.xlu1 %3109 }
 0xd53   : > { %v3134_v27 = vpop.permute.xlu1 %3133 }
 0xd57   : > { %v3100_v28 = vpop.permute.xlu1 %3099 }
 0xe0a   : > { %v10041_v32 = vpop.f32.mrf.mxu1 }
 0xe0b   : > { %v12179_v45 = vadd.f32 %v10041_v32, %v2954_v56 }
 0xe0c   : > { %v3008_v39 = vpop.f32.mrf.mxu1 }
 0xe0d   : > { %v12176_v38 = vadd.f32 %v3008_v39, %v2952_v16  ;;  %v3058_v7 = vsel %vm1017_vm0, %v12179_v45, 0.0 }
 0xe0e   : > { %v10042_v22 = vpop.f32.mrf.mxu1 }
 0xe0f   : > { %v3055_v9 = vsel %vm1017_vm0, %v12176_v38, 0.0  ;;  %v12185_v61 = vadd.f32 %v10042_v22, %v2955_v46  ;;  %v3129_v22 = vpop.permute.xlu0 %3128 }
 0xe10   : > { %v3011_v43 = vpop.f32.mrf.mxu1 }
 0xe11   : > { %v12181_v53 = vadd.f32 %v3011_v43, %v2953_v40  ;;  %v3060_v11 = vsel %vm1017_vm0, %v12185_v61, 0.0  ;;  %v3124_v40 = vpop.permute.xlu1 %3123 }
 0xe13   : > { %v3056_v4 = vsel %vm1017_vm0, %v12181_v53, 0.0 }
 0xe14   : > { %v3057_v8 = vadd.f32 %v3056_v4, %v3055_v9 }
 0xe16   : > { %v3059_v34 = vadd.f32 %v3058_v7, %v3057_v8  ;;  %v10632_v7 = vld [vmem:[%s14046_s5 + $0x8] sm:$0xff]  }
 0xe18   : > { %v3061_v50 = vadd.f32 %v3060_v11, %v3059_v34  ;;  %v10633_v34 = vld [vmem:[%s14049_s13] sm:$0xff]   ;;  %v10634_v11 = vld [vmem:[%s14049_s13 + $0x8] sm:$0xff]  }
 0xe1a   : > { %v3062_v54 = vrot.slane %v3061_v50, 4 }
 0xe1c   : > { %v3063_v57 = vadd.f32 %v3062_v54, %v3061_v50 }
 0xe1e   : > { %v3064_v58 = vrot.slane %v3063_v57, 2 }
 0xe20   : > { %v3065_v18 = vadd.f32 %v3064_v58, %v3063_v57 }
 0xe22   : > { %v3066_v25 = vrot.slane %v3065_v18, 1 }
 0xe24   : > { %v3067_v31 = vadd.f32 %v3066_v25, %v3065_v18 }
 0xe26   : > { %v3068_v47 = vmul.f32 0.03125, %v3067_v31 }
 0xe28   : > { %v3069_v48 = vsub.f32 %v12176_v38, %v3068_v47  ;;  %v3070_v55 = vsub.f32 %v12181_v53, %v3068_v47  ;;  %v3071_v24 = vsub.f32 %v12179_v45, %v3068_v47  ;;  %v3072_v23 = vsub.f32 %v12185_v61, %v3068_v47 }
 0xe2a   : > { %v3073_v52 = vmul.f32 %v3069_v48, %v3069_v48  ;;  %v3074_v1 = vmul.f32 %v3070_v55, %v3070_v55  ;;  %v3075_v26 = vmul.f32 %v3071_v24, %v3071_v24  ;;  %v3076_v30 = vmul.f32 %v3072_v23, %v3072_v23 }
 0xe2c   : > { %v3077_v13 = vsel %vm1017_vm0, %v3073_v52, 0.0  ;;  %v3078_v60 = vsel %vm1017_vm0, %v3074_v1, 0.0  ;;  %v3080_v5 = vsel %vm1017_vm0, %v3075_v26, 0.0  ;;  %v3082_v62 = vsel %vm1017_vm0, %v3076_v30, 0.0 }
 0xe2d   : > { %v3079_v0 = vadd.f32 %v3078_v60, %v3077_v13 }
 0xe2f   : > { %v3081_v19 = vadd.f32 %v3080_v5, %v3079_v0 }
 0xe31   : > { %v3083_v63 = vadd.f32 %v3082_v62, %v3081_v19 }
 0xe33   : > { %v3084_v6 = vrot.slane %v3083_v63, 4 }
 0xe35   : > { %v3085_v3 = vadd.f32 %v3084_v6, %v3083_v63 }
 0xe37   : > { %v3086_v12 = vrot.slane %v3085_v3, 2 }
 0xe39   : > { %v3087_v35 = vadd.f32 %v3086_v12, %v3085_v3 }
 0xe3b   : > { %v3088_v10 = vrot.slane %v3087_v35, 1 }
 0xe3d   : > { %v3089_v41 = vadd.f32 %v3088_v10, %v3087_v35 }
 0xe3f   : > { %v3090_v44 = vmul.f32 0.03125, %v3089_v41 }
 0xe41   : > { %v3091_v14 = vadd.f32 1e-05, %v3090_v44 }
 0xe43   : > { %10831 = vrsqrt.f32 %v3091_v14 }
 0xe50   : > { %v10832_v49 = vpop.eup %10831 }
 0xe51   : > { %v3094_v33 = vmul.f32 %v10832_v49, %v3070_v55  ;;  %v3095_v15 = vmul.f32 %v10832_v49, %v3071_v24  ;;  %v3096_v51 = vmul.f32 %v10832_v49, %v3072_v23  ;;  %v3093_v32 = vmul.f32 %v10832_v49, %v3069_v48 }
 0xe53   : > { %v3119_v59 = vmul.f32 %v3110_v36, %v3095_v15  ;;  %v3120_v39 = vmul.f32 %v3115_v21, %v3096_v51  ;;  %v3117_v16 = vmul.f32 %v3100_v28, %v3093_v32  ;;  %v3118_v17 = vmul.f32 %v3105_v37, %v3094_v33 }
 0xe55   : > { %v3143_v56 = vadd.f32 %v3134_v27, %v3119_v59  ;;  %v3144_v43 = vadd.f32 %v3139_v42, %v3120_v39  ;;  %v3141_v46 = vadd.f32 %v3124_v40, %v3117_v16  ;;  %v3142_v9 = vadd.f32 %v3129_v22, %v3118_v17  ;;  %v10635_v40 = vld [vmem:[%s14050_s17] sm:$0xff]  }
 0xe56   : > { %10059 = vmatprep.mubr.msk.bf16.mxu0 %vm3222_vm5, %v10635_v40 }
 0xe57   : > { %v3146_v4 = vpack.c.bf16 %v3144_v43, %v3143_v56  ;;  %v3145_v8 = vpack.c.bf16 %v3142_v9, %v3141_v46  ;;  %v10636_v56 = vld [vmem:[%s14050_s17 + $0x8] sm:$0xff]  }
 0xe58   : > { %10060 = vmatmul.mubr.msk.bf16.vlgmr.msra.gmra.mxu0 %vm3222_vm5, %v10636_v56 }
 0xe59   : > { %10043 = vmatprep.subr.bf16.mxu1 %v3146_v4  ;;  %10081 = vmatprep.mubr.msk.bf16.mxu0 %vm11389_vm4, %v13983_v29 }
 0xe5a   : > { %10044 = vmatpush3.bf16.msra.mxu1 %v3146_v4 }
 0xe5b   : > { %10045 = vmatprep.subr.bf16.mxu1 %v3145_v8 }
 0xe5e   : > { %10046 = vmatpush3.bf16.msra.mxu1 %v3145_v8 }
 0xe5f   : > { %10527 = vmatprep.subr.msk.bf16.mxu1 %vm3222_vm5, %v12161_v20 }
 0xe61   : > { %10048 = vmatmul.mubr.msk.bf16.vlgmr.msra.gmra.mxu1 %vm1030_vm1, %v10632_v7 }
 0xe62   : > { %10052 = vmatpush3.bf16.xpose.msra.mxu1 %v12167_v2  ;;  %10053 = vmatprep.mubr.msk.bf16.mxu1 %vm3222_vm5, %v10633_v34 }
 0xe69   : > { %10054 = vmatmul.mubr.msk.bf16.vlgmr.msra.gmra.mxu1 %vm3222_vm5, %v10634_v11 }
 0xf21   : > { %v12210_v50 = vpop.f32.mrf.mxu1 }
 0xf23   : > { %v3197_v54 = vpop.f32.mrf.mxu1 }
 0xf24   : > { %v3346_v57 = vpack.c.bf16 %v3197_v54, %v3197_v54 }
 0xf25   : > { %v12212_v58 = vpop.f32.mrf.mxu1 }
 0xf26   : > { %3349 = vxpose.xlu1.c.b16.start.end [1/1] (short) (narrow) %v3346_v57, 64 }
 0xf27   : > { %v3200_v18 = vpop.f32.mrf.mxu1 }
 0xf28   : > { %v3592_v25 = vpack.c.bf16 %v3200_v18, %v3200_v18 }
 0xf29   : > { %v12214_v31 = vpop.f32.mrf.mxu1 }
 0xf2a   : > { %3595 = vxpose.xlu0.c.b16.start.end [1/1] (short) (narrow) %v3592_v25, 64 }
 0xf2b   : > { %v3266_v47 = vpop.f32.mrf.mxu1 }
 0xf2c   : > { %v3347_v48 = vpack.c.bf16 %v3266_v47, %v3266_v47 }
 0xf2d   : > { %v12216_v55 = vpop.f32.mrf.mxu1 }
 0xf2e   : > { %v3378_v24 = vsel %vm1978_vm2, %v3347_v48, 0  ;;  %10529 = vmatprep.subr.msk.bf16.mxu1 %vm1978_vm2, %v3347_v48 }
 0xf2f   : > { %v3269_v23 = vpop.f32.mrf.mxu1  ;;  %10064 = vmatpush3.bf16.msra.mxu1 %v3378_v24 }
 0xf30   : > { %v3593_v52 = vpack.c.bf16 %v3269_v23, %v3269_v23 }
 0xf32   : > { %10530 = vmatprep.subr.msk.bf16.mxu1 %vm1978_vm2, %v3593_v52  ;;  %v3624_v30 = vsel %vm1978_vm2, %v3593_v52, 0 }
 0xf88   : > { %v3357_v1 = vpop.trf.xlu1 }
 0xf89   : > { %10065 = vmatprep.mubr.msk.bf16.mxu1 %vm1965_vm3, %v3357_v1 }
 0xf8c   : > { %v3358_v26 = vpop.trf.xlu1  ;;  %v3603_v13 = vpop.trf.xlu0 }
 0xf8d   : > { %10066 = vmatmul.mubr.msk.bf16.vlgmr.msra.gmra.mxu1 %vm1965_vm3, %v3358_v26 }
 0xf8e   : > { %10086 = vmatpush3.bf16.msra.mxu1 %v3624_v30 }
 0xf8f   : > { %10095 = vmatprep.subr.bf16.mxu1 %v13983_v29 }
 0xf90   : > { %v3359_v60 = vpop.trf.xlu1  ;;  %v3604_v5 = vpop.trf.xlu0 }
 0xf91   : > { %10069 = vmatprep.mubr.msk.bf16.mxu1 %vm1965_vm3, %v3359_v60 }
 0xf94   : > { %v3360_v0 = vpop.trf.xlu1  ;;  %v3605_v19 = vpop.trf.xlu0 }
 0xf95   : > { %10070 = vmatmul.mubr.msk.bf16.gmra.mxu1 %vm1965_vm3, %v3360_v0 }
 0xf96   : > { %10087 = vmatprep.mubr.msk.bf16.mxu1 %vm1965_vm3, %v3603_v13 }
 0xf98   : > { %v3606_v62 = vpop.trf.xlu0 }
 0xf9d   : > { %10088 = vmatmul.mubr.msk.bf16.vlgmr.msra.gmra.mxu1 %vm1965_vm3, %v3604_v5 }
 0xf9e   : > { %10091 = vmatprep.mubr.msk.bf16.mxu1 %vm1965_vm3, %v3605_v19 }
 0xfa5   : > { %10092 = vmatmul.mubr.msk.bf16.gmra.mxu1 %vm1965_vm3, %v3606_v62 }
 0xfa6   : > { %10103 = vmatprep.mubr.msk.bf16.mxu1 %vm11389_vm4, %v13983_v29 }
0x104d   : > { %v12233_v63 = vpop.f32.mrf.mxu1 }
0x104e   : > { %v3451_v17 = vsel %vm1965_vm3, %v12233_v63, -inf }
0x104f   : > { %v12235_v6 = vpop.f32.mrf.mxu1 }
0x1050   : > { %v3445_v9 = vsel %vm1965_vm3, %v12235_v6, -inf }
0x1051   : > { %v12237_v3 = vpop.f32.mrf.mxu1 }
0x1052   : > { %v3454_v46 = vsel %vm1965_vm3, %v12237_v3, -inf }
0x1053   : > { %v12239_v12 = vpop.f32.mrf.mxu1 }
0x1054   : > { %v3448_v7 = vsel %vm1965_vm3, %v12239_v12, -inf }
0x1055   : > { %v10071_v35 = vpop.f32.mrf.mxu1 }
0x1056   : > { %v3463_v10 = vsel %vm1965_vm3, %v10071_v35, -inf }
0x1057   : > { %3464 = vmax.xlane.f32.xlu0 %v3463_v10  ;;  %v12242_v41 = vpop.f32.mrf.mxu1 }
0x1058   : > { %v3457_v51 = vsel %vm1965_vm3, %v12242_v41, -inf }
0x1059   : > { %v10072_v44 = vpop.f32.mrf.mxu1 }
0x105a   : > { %v3466_v14 = vsel %vm1965_vm3, %v10072_v44, -inf }
0x105b   : > { %3467 = vmax.xlane.f32.xlu1 %v3466_v14  ;;  %v12245_v21 = vpop.f32.mrf.mxu1 }
0x105c   : > { %v3460_v39 = vsel %vm1965_vm3, %v12245_v21, -inf }
0x105d   : > { %v12247_v36 = vpop.f32.mrf.mxu1 }
0x105e   : > { %v3697_v43 = vsel %vm1965_vm3, %v12247_v36, -inf }
0x105f   : > { %v12249_v42 = vpop.f32.mrf.mxu1 }
0x1060   : > { %v3691_v8 = vsel %vm1965_vm3, %v12249_v42, -inf }
0x1061   : > { %v12251_v27 = vpop.f32.mrf.mxu1 }
0x1062   : > { %v3700_v4 = vsel %vm1965_vm3, %v12251_v27, -inf }
0x1063   : > { %v12253_v37 = vpop.f32.mrf.mxu1 }
0x1064   : > { %v3694_v34 = vsel %vm1965_vm3, %v12253_v37, -inf }
0x1065   : > { %v10093_v28 = vpop.f32.mrf.mxu1 }
0x1066   : > { %v3709_v49 = vsel %vm1965_vm3, %v10093_v28, -inf }
0x1067   : > { %3710 = vmax.xlane.f32.xlu0 %v3709_v49  ;;  %v12256_v33 = vpop.f32.mrf.mxu1 }
0x1068   : > { %v3703_v59 = vsel %vm1965_vm3, %v12256_v33, -inf }
0x1069   : > { %v10094_v15 = vpop.f32.mrf.mxu1 }
0x106a   : > { %v3712_v32 = vsel %vm1965_vm3, %v10094_v15, -inf }
0x106b   : > { %3458 = vmax.xlane.f32.xlu0 %v3457_v51  ;;  %3713 = vmax.xlane.f32.xlu1 %v3712_v32  ;;  %v12265_v16 = vpop.f32.mrf.mxu1 }
0x106c   : > { %v3706_v22 = vsel %vm1965_vm3, %v12265_v16, -inf }
0x106f   : > { %3704 = vmax.xlane.f32.xlu0 %v3703_v59  ;;  %3461 = vmax.xlane.f32.xlu1 %v3460_v39 }
0x1073   : > { %3452 = vmax.xlane.f32.xlu0 %v3451_v17  ;;  %3707 = vmax.xlane.f32.xlu1 %v3706_v22 }
0x1077   : > { %3698 = vmax.xlane.f32.xlu0 %v3697_v43  ;;  %3455 = vmax.xlane.f32.xlu1 %v3454_v46 }
0x107b   : > { %3446 = vmax.xlane.f32.xlu0 %v3445_v9  ;;  %3701 = vmax.xlane.f32.xlu1 %v3700_v4 }
0x107f   : > { %3692 = vmax.xlane.f32.xlu0 %v3691_v8  ;;  %3449 = vmax.xlane.f32.xlu1 %v3448_v7 }
0x1083   : > { %3695 = vmax.xlane.f32.xlu1 %v3694_v34 }
0x10e0   : > { %v3465_v11 = vpop.xlane.xlu0 %3464 }
0x10e1   : > { %v3475_v54 = vsub.f32 %v10071_v35, %v3465_v11 }
0x10e3   : > { %v3489_v57 = vmul.f32 1.442695, %v3475_v54 }
0x10e4   : > { %v3468_v18 = vpop.xlane.xlu1 %3467 }
0x10e5   : > { %10833 = vpow2.f32 %v3489_v57  ;;  %v3476_v25 = vsub.f32 %v10072_v44, %v3468_v18 }
0x10e7   : > { %v3491_v47 = vmul.f32 1.442695, %v3476_v25 }
0x10e9   : > { %10835 = vpow2.f32 %v3491_v47 }
0x10f0   : > { %v3711_v48 = vpop.xlane.xlu0 %3710 }
0x10f1   : > { %v3721_v24 = vsub.f32 %v10093_v28, %v3711_v48 }
0x10f2   : > { %v12291_v23 = vpop.eup %10833 }
0x10f3   : > { %v3735_v52 = vmul.f32 1.442695, %v3721_v24  ;;  %v3511_v1 = vsel %vm1965_vm3, %v12291_v23, 0.0 }
0x10f4   : > { %v3459_v26 = vpop.xlane.xlu0 %3458  ;;  %3512 = vadd.xlane.f32.xlu0 %v3511_v1  ;;  %v3714_v30 = vpop.xlane.xlu1 %3713 }
0x10f5   : > { %10837 = vpow2.f32 %v3735_v52  ;;  %v3473_v13 = vsub.f32 %v12242_v41, %v3459_v26  ;;  %v3722_v60 = vsub.f32 %v10094_v15, %v3714_v30 }
0x10f6   : > { %v12296_v0 = vpop.eup %10835 }
0x10f7   : > { %v3485_v5 = vmul.f32 1.442695, %v3473_v13  ;;  %v3737_v19 = vmul.f32 1.442695, %v3722_v60  ;;  %v3514_v62 = vsel %vm1965_vm3, %v12296_v0, 0.0 }
0x10f8   : > { %v3705_v35 = vpop.xlane.xlu0 %3704  ;;  %3515 = vadd.xlane.f32.xlu1 %v3514_v62  ;;  %v3462_v10 = vpop.xlane.xlu1 %3461 }
0x10f9   : > { %10839 = vpow2.f32 %v3485_v5  ;;  %v3719_v44 = vsub.f32 %v12256_v33, %v3705_v35  ;;  %v3474_v14 = vsub.f32 %v12245_v21, %v3462_v10 }
0x10fa   : > { %10841 = vpow2.f32 %v3737_v19 }
0x10fb   : > { %v3731_v28 = vmul.f32 1.442695, %v3719_v44  ;;  %v3487_v49 = vmul.f32 1.442695, %v3474_v14 }
0x10fc   : > { %v3453_v41 = vpop.xlane.xlu0 %3452  ;;  %v3708_v15 = vpop.xlane.xlu1 %3707 }
0x10fd   : > { %10843 = vpow2.f32 %v3731_v28  ;;  %v3471_v51 = vsub.f32 %v12233_v63, %v3453_v41  ;;  %v3720_v32 = vsub.f32 %v12265_v16, %v3708_v15 }
0x10fe   : > { %10845 = vpow2.f32 %v3487_v49 }
0x10ff   : > { %v3481_v59 = vmul.f32 1.442695, %v3471_v51  ;;  %v3733_v39 = vmul.f32 1.442695, %v3720_v32 }
0x1100   : > { %v3699_v17 = vpop.xlane.xlu0 %3698  ;;  %v3456_v22 = vpop.xlane.xlu1 %3455 }
0x1101   : > { %10847 = vpow2.f32 %v3481_v59  ;;  %v3717_v33 = vsub.f32 %v12247_v36, %v3699_v17  ;;  %v3472_v21 = vsub.f32 %v12237_v3, %v3456_v22  ;;  %v3838_v59 = vpack.c.bf16 %v12210_v50, %v12210_v50 }
0x1102   : > { %v12306_v40 = vpop.eup %10837  ;;  %10849 = vpow2.f32 %v3733_v39  ;;  %v4084_v39 = vpack.c.bf16 %v12212_v58, %v12212_v58 }
0x1103   : > { %v3727_v56 = vmul.f32 1.442695, %v3717_v33  ;;  %v3483_v43 = vmul.f32 1.442695, %v3472_v21  ;;  %v3757_v63 = vsel %vm1965_vm3, %v12306_v40, 0.0 }
0x1104   : > { %3758 = vadd.xlane.f32.xlu0 %v3757_v63  ;;  %v3447_v16 = vpop.xlane.xlu0 %3446  ;;  %v3702_v46 = vpop.xlane.xlu1 %3701 }
0x1105   : > { %10851 = vpow2.f32 %v3727_v56  ;;  %v3469_v9 = vsub.f32 %v12235_v6, %v3447_v16  ;;  %v3718_v4 = vsub.f32 %v12251_v27, %v3702_v46 }
0x1106   : > { %v12312_v8 = vpop.eup %10839  ;;  %10853 = vpow2.f32 %v3483_v43 }
0x1107   : > { %v12314_v3 = vpop.eup %10841  ;;  %v3477_v36 = vmul.f32 1.442695, %v3469_v9  ;;  %v3729_v7 = vmul.f32 1.442695, %v3718_v4  ;;  %v3505_v34 = vsel %vm1965_vm3, %v12312_v8, 0.0 }
0x1108   : > { %3506 = vadd.xlane.f32.xlu0 %v3505_v34  ;;  %v3693_v11 = vpop.xlane.xlu0 %3692  ;;  %v3760_v54 = vsel %vm1965_vm3, %v12314_v3, 0.0  ;;  %v3450_v57 = vpop.xlane.xlu1 %3449 }
0x1109   : > { %10855 = vpow2.f32 %v3477_v36  ;;  %v3715_v6 = vsub.f32 %v12249_v42, %v3693_v11  ;;  %3761 = vadd.xlane.f32.xlu1 %v3760_v54  ;;  %v3470_v27 = vsub.f32 %v12239_v12, %v3450_v57 }
0x110a   : > { %v12322_v18 = vpop.eup %10843  ;;  %10857 = vpow2.f32 %v3729_v7 }
0x110b   : > { %v12324_v25 = vpop.eup %10845  ;;  %v3723_v47 = vmul.f32 1.442695, %v3715_v6  ;;  %v3479_v48 = vmul.f32 1.442695, %v3470_v27  ;;  %v3751_v24 = vsel %vm1965_vm3, %v12322_v18, 0.0 }
0x110c   : > { %3752 = vadd.xlane.f32.xlu0 %v3751_v24  ;;  %v3508_v52 = vsel %vm1965_vm3, %v12324_v25, 0.0  ;;  %v3696_v1 = vpop.xlane.xlu1 %3695 }
0x110d   : > { %10859 = vpow2.f32 %v3723_v47  ;;  %3509 = vadd.xlane.f32.xlu1 %v3508_v52  ;;  %v3716_v42 = vsub.f32 %v12253_v37, %v3696_v1 }
0x110e   : > { %v12331_v12 = vpop.eup %10847  ;;  %10861 = vpow2.f32 %v3479_v48 }
0x110f   : > { %v12333_v26 = vpop.eup %10849  ;;  %v3725_v30 = vmul.f32 1.442695, %v3716_v42  ;;  %v3499_v13 = vsel %vm1965_vm3, %v12331_v12, 0.0 }
0x1110   : > { %3500 = vadd.xlane.f32.xlu0 %v3499_v13  ;;  %v3754_v60 = vsel %vm1965_vm3, %v12333_v26, 0.0 }
0x1111   : > { %10863 = vpow2.f32 %v3725_v30  ;;  %3755 = vadd.xlane.f32.xlu1 %v3754_v60 }
0x1112   : > { %v12339_v5 = vpop.eup %10851 }
0x1113   : > { %v12341_v19 = vpop.eup %10853  ;;  %v3745_v37 = vsel %vm1965_vm3, %v12339_v5, 0.0 }
0x1114   : > { %3746 = vadd.xlane.f32.xlu0 %v3745_v37  ;;  %v3502_v62 = vsel %vm1965_vm3, %v12341_v19, 0.0 }
0x1115   : > { %3503 = vadd.xlane.f32.xlu1 %v3502_v62 }
0x1116   : > { %v12347_v35 = vpop.eup %10855 }
0x1117   : > { %v12349_v10 = vpop.eup %10857  ;;  %v3493_v44 = vsel %vm1965_vm3, %v12347_v35, 0.0 }
0x1118   : > { %3494 = vadd.xlane.f32.xlu0 %v3493_v44  ;;  %v3748_v14 = vsel %vm1965_vm3, %v12349_v10, 0.0 }
0x1119   : > { %3749 = vadd.xlane.f32.xlu1 %v3748_v14 }
0x111a   : > { %v12355_v28 = vpop.eup %10859 }
0x111b   : > { %v12357_v49 = vpop.eup %10861  ;;  %v3739_v41 = vsel %vm1965_vm3, %v12355_v28, 0.0 }
0x111c   : > { %3740 = vadd.xlane.f32.xlu0 %v3739_v41  ;;  %v3496_v15 = vsel %vm1965_vm3, %v12357_v49, 0.0 }
0x111d   : > { %3497 = vadd.xlane.f32.xlu1 %v3496_v15 }
0x111e   : > { %v12363_v51 = vpop.eup %10863 }
0x111f   : > { %v3742_v32 = vsel %vm1965_vm3, %v12363_v51, 0.0 }
0x1121   : > { %3743 = vadd.xlane.f32.xlu1 %v3742_v32 }
0x1149   : > { %3841 = vxpose.xlu0.c.b16.start.end [1/1] (short) (narrow) %v3838_v59, 64 }
0x114e   : > { %4087 = vxpose.xlu1.c.b16.start.end [1/1] (short) (narrow) %v4084_v39, 64 }
0x117d   : > { %v3513_v17 = vpop.xlane.xlu0 %3512 }
0x117e   : > { %10865 = vrcp.f32 %v3513_v17 }
0x1181   : > { %v3516_v22 = vpop.xlane.xlu1 %3515 }
0x1182   : > { %10867 = vrcp.f32 %v3516_v22 }
0x118b   : > { %v10866_v33 = vpop.eup %10865 }
0x118c   : > { %v3531_v43 = vmul.f32 %v10866_v33, %v12291_v23 }
0x118d   : > { %v3759_v21 = vpop.xlane.xlu0 %3758 }
0x118e   : > { %10869 = vrcp.f32 %v3759_v21 }
0x118f   : > { %v10868_v56 = vpop.eup %10867 }
0x1190   : > { %v3532_v63 = vmul.f32 %v10868_v56, %v12296_v0 }
0x1191   : > { %v3507_v16 = vpop.xlane.xlu0 %3506 }
0x1192   : > { %v3762_v46 = vpop.xlane.xlu1 %3761  ;;  %v3536_v50 = vpack.c.bf16 %v3532_v63, %v3531_v43  ;;  %v12393_v43 = vpop.f32.mrf.mxu0 }
0x1193   : > { %10871 = vrcp.f32 %v3762_v46 }
0x1194   : > { %v3550_v9 = vsel %vm1965_vm3, %v3536_v50, 0  ;;  %10873 = vrcp.f32 %v3507_v16 }
0x1195   : > { %v3753_v58 = vpop.xlane.xlu0 %3752  ;;  %10074 = vmatpush3.bf16.xpose.msra.mxu0 %v3550_v9  ;;  %v3839_v9 = vpack.c.bf16 %v12214_v31, %v12214_v31 }
0x1196   : > { %v3510_v4 = vpop.xlane.xlu1 %3509  ;;  %10075 = vmatprep.subr.bf16.mxu0 %v13983_v29 }
0x1197   : > { %10875 = vrcp.f32 %v3510_v4 }
0x1198   : > { %10877 = vrcp.f32 %v3753_v58 }
0x1199   : > { %v3501_v36 = vpop.xlane.xlu0 %3500 }
0x119a   : > { %v3756_v7 = vpop.xlane.xlu1 %3755 }
0x119b   : > { %10879 = vrcp.f32 %v3756_v7  ;;  %v10870_v0 = vpop.eup %10869 }
0x119c   : > { %10881 = vrcp.f32 %v3501_v36  ;;  %v3777_v57 = vmul.f32 %v10870_v0, %v12306_v40 }
0x119d   : > { %v3747_v23 = vpop.xlane.xlu0 %3746 }
0x119e   : > { %v3504_v34 = vpop.xlane.xlu1 %3503 }
0x119f   : > { %10883 = vrcp.f32 %v3504_v34 }
0x11a0   : > { %v10872_v11 = vpop.eup %10871  ;;  %10885 = vrcp.f32 %v3747_v23  ;;  %v4085_v23 = vpack.c.bf16 %v12216_v55, %v12216_v55 }
0x11a1   : > { %v3495_v54 = vpop.xlane.xlu0 %3494  ;;  %v3778_v6 = vmul.f32 %v10872_v11, %v12314_v3  ;;  %v10874_v27 = vpop.eup %10873 }
0x11a2   : > { %v3750_v47 = vpop.xlane.xlu1 %3749  ;;  %v3529_v1 = vmul.f32 %v10874_v27, %v12312_v8  ;;  %v4116_v55 = vsel %vm1978_vm2, %v4085_v23, 0 }
0x11a3   : > { %10887 = vrcp.f32 %v3750_v47  ;;  %v3782_v48 = vpack.c.bf16 %v3778_v6, %v3777_v57 }
0x11a4   : > { %v10876_v24 = vpop.eup %10875  ;;  %10889 = vrcp.f32 %v3495_v54 }
0x11a5   : > { %v3796_v52 = vsel %vm1965_vm3, %v3782_v48, 0  ;;  %v3530_v42 = vmul.f32 %v10876_v24, %v12324_v25  ;;  %v10878_v30 = vpop.eup %10877  ;;  %v3741_v13 = vpop.xlane.xlu0 %3740 }
0x11a6   : > { %10096 = vmatpush3.bf16.xpose.msra.mxu1 %v3796_v52  ;;  %v3498_v60 = vpop.xlane.xlu1 %3497  ;;  %v3775_v62 = vmul.f32 %v10878_v30, %v12322_v18 }
0x11a7   : > { %10891 = vrcp.f32 %v3498_v60  ;;  %v3535_v40 = vpack.c.bf16 %v3530_v42, %v3529_v1  ;;  %10097 = vmatprep.subr.bf16.mxu1 %v13983_v29 }
0x11a8   : > { %v10880_v3 = vpop.eup %10879  ;;  %10893 = vrcp.f32 %v3741_v13 }
0x11a9   : > { %v3547_v37 = vsel %vm1965_vm3, %v3535_v40, 0  ;;  %v3776_v44 = vmul.f32 %v10880_v3, %v12333_v26  ;;  %v10882_v14 = vpop.eup %10881 }
0x11aa   : > { %10076 = vmatpush3.bf16.xpose.msra.mxu0 %v3547_v37  ;;  %v3744_v8 = vpop.xlane.xlu1 %3743  ;;  %v3527_v32 = vmul.f32 %v10882_v14, %v12331_v12 }
0x11ab   : > { %10895 = vrcp.f32 %v3744_v8  ;;  %v3781_v25 = vpack.c.bf16 %v3776_v44, %v3775_v62  ;;  %10077 = vmatprep.subr.bf16.mxu0 %v13983_v29 }
0x11ac   : > { %v10884_v41 = vpop.eup %10883 }
0x11ad   : > { %v3793_v15 = vsel %vm1965_vm3, %v3781_v25, 0  ;;  %v3528_v59 = vmul.f32 %v10884_v41, %v12341_v19  ;;  %v10886_v39 = vpop.eup %10885 }
0x11ae   : > { %10098 = vmatpush3.bf16.xpose.msra.mxu1 %v3793_v15  ;;  %v3773_v22 = vmul.f32 %v10886_v39, %v12339_v5 }
0x11af   : > { %v3534_v17 = vpack.c.bf16 %v3528_v59, %v3527_v32  ;;  %10099 = vmatprep.subr.bf16.mxu1 %v13983_v29 }
0x11b0   : > { %v10888_v18 = vpop.eup %10887  ;;  %v4095_v34 = vpop.trf.xlu1 }
0x11b1   : > { %v3544_v26 = vsel %vm1965_vm3, %v3534_v17, 0  ;;  %v3774_v33 = vmul.f32 %v10888_v18, %v12349_v10  ;;  %v10890_v21 = vpop.eup %10889  ;;  %v3331_v10 = vpop.f32.mrf.mxu0 }
0x11b2   : > { %10078 = vmatpush3.bf16.xpose.msra.mxu0 %v3544_v26  ;;  %v3525_v63 = vmul.f32 %v10890_v21, %v12347_v35  ;;  %v3348_v31 = vpack.c.bf16 %v3331_v10, %v3331_v10 }
0x11b3   : > { %v3780_v56 = vpack.c.bf16 %v3774_v33, %v3773_v22  ;;  %10079 = vmatprep.subr.bf16.mxu0 %v13983_v29  ;;  %v12405_v7 = vpop.f32.mrf.mxu0 }
0x11b4   : > { %v10892_v12 = vpop.eup %10891  ;;  %v4096_v57 = vpop.trf.xlu1 }
0x11b5   : > { %v3790_v19 = vsel %vm1965_vm3, %v3780_v56, 0  ;;  %v3526_v16 = vmul.f32 %v10892_v12, %v12357_v49  ;;  %v10894_v46 = vpop.eup %10893  ;;  %v3849_v49 = vpop.trf.xlu0 }
0x11b6   : > { %10100 = vmatpush3.bf16.xpose.msra.mxu1 %v3790_v19  ;;  %v3771_v4 = vmul.f32 %v10894_v46, %v12355_v28  ;;  %v3334_v28 = vpop.f32.mrf.mxu0 }
0x11b7   : > { %v3533_v50 = vpack.c.bf16 %v3526_v16, %v3525_v63  ;;  %10101 = vmatprep.subr.bf16.mxu1 %v13983_v29  ;;  %v3594_v54 = vpack.c.bf16 %v3334_v28, %v3334_v28 }
0x11b8   : > { %v10896_v5 = vpop.eup %10895  ;;  %v4097_v27 = vpop.trf.xlu1 }
0x11b9   : > { %v3541_v58 = vsel %vm1965_vm3, %v3533_v50, 0  ;;  %v3772_v36 = vmul.f32 %v10896_v5, %v12363_v51  ;;  %v3870_v51 = vsel %vm1978_vm2, %v3839_v9, 0  ;;  %v3850_v11 = vpop.trf.xlu0 }
0x11ba   : > { %10080 = vmatpush3.bf16.xpose.msra.mxu0 %v3541_v58 }
0x11bb   : > { %10531 = vmatprep.subr.msk.bf16.mxu0 %vm1978_vm2, %v3839_v9  ;;  %v3779_v35 = vpack.c.bf16 %v3772_v36, %v3771_v4 }
0x11bc   : > { %v4098_v48 = vpop.trf.xlu1 }
0x11bd   : > { %v3787_v0 = vsel %vm1965_vm3, %v3779_v35, 0  ;;  %v3851_v6 = vpop.trf.xlu0 }
0x11be   : > { %10102 = vmatpush3.bf16.xpose.msra.mxu1 %v3787_v0 }
0x11bf   : > { %10532 = vmatprep.subr.msk.bf16.mxu1 %vm1978_vm2, %v4085_v23 }
0x11c1   : > { %10082 = vmatmul.mubr.msk.bf16.vlgmr.msra.gmra.mxu0 %vm1965_vm3, %v3348_v31  ;;  %v3852_v47 = vpop.trf.xlu0 }
0x11c2   : > { %10108 = vmatpush3.bf16.msra.mxu0 %v3870_v51  ;;  %10109 = vmatprep.mubr.msk.bf16.mxu0 %vm1965_vm3, %v3849_v49 }
0x11c3   : > { %10117 = vmatprep.subr.bf16.mxu0 %v13983_v29 }
0x11c5   : > { %10104 = vmatmul.mubr.msk.bf16.vlgmr.msra.gmra.mxu1 %vm1965_vm3, %v3594_v54 }
0x11c6   : > { %10130 = vmatpush3.bf16.msra.mxu1 %v4116_v55  ;;  %10131 = vmatprep.mubr.msk.bf16.mxu1 %vm1965_vm3, %v4095_v34 }
0x11c7   : > { %10139 = vmatprep.subr.bf16.mxu1 %v13983_v29 }
0x11c9   : > { %10110 = vmatmul.mubr.msk.bf16.vlgmr.msra.gmra.mxu0 %vm1965_vm3, %v3850_v11 }
0x11ca   : > { %10113 = vmatprep.mubr.msk.bf16.mxu0 %vm1965_vm3, %v3851_v6 }
0x11cd   : > { %10132 = vmatmul.mubr.msk.bf16.vlgmr.msra.gmra.mxu1 %vm1965_vm3, %v4096_v57 }
0x11ce   : > { %10135 = vmatprep.mubr.msk.bf16.mxu1 %vm1965_vm3, %v4097_v27 }
0x11d1   : > { %10114 = vmatmul.mubr.msk.bf16.gmra.mxu0 %vm1965_vm3, %v3852_v47 }
0x11d2   : > { %10125 = vmatprep.mubr.msk.bf16.mxu0 %vm11389_vm4, %v13983_v29 }
0x11d5   : > { %10136 = vmatmul.mubr.msk.bf16.gmra.mxu1 %vm1965_vm3, %v4098_v48 }
0x11d6   : > { %10147 = vmatprep.mubr.msk.bf16.mxu1 %vm11389_vm4, %v13983_v29 }
0x1281   : > { %v3586_v24 = vpop.f32.mrf.mxu0 }
0x1283   : > { %v10083_v52 = vpop.f32.mrf.mxu0 }
0x1285   : > { %v3589_v1 = vpop.f32.mrf.mxu0  ;;  %v3832_v42 = vpop.f32.mrf.mxu1 }
0x1286   : > { %v12429_v30 = vpack.c.bf16 %v3832_v42, %v3586_v24 }
0x1287   : > { %v10084_v13 = vpop.f32.mrf.mxu0  ;;  %v10105_v60 = vpop.f32.mrf.mxu1 }
0x1289   : > { %v3835_v40 = vpop.f32.mrf.mxu1  ;;  %v12431_v3 = vpop.f32.mrf.mxu0 }
0x128a   : > { %v3943_v50 = vsel %vm1965_vm3, %v12431_v3, -inf }
0x128b   : > { %v10106_v37 = vpop.f32.mrf.mxu1  ;;  %v12433_v62 = vpop.f32.mrf.mxu0 }
0x128c   : > { %v3937_v58 = vsel %vm1965_vm3, %v12433_v62, -inf }
0x128d   : > { %v12435_v44 = vpop.f32.mrf.mxu0  ;;  %v12437_v14 = vpop.f32.mrf.mxu1 }
0x128e   : > { %v4189_v10 = vsel %vm1965_vm3, %v12437_v14, -inf  ;;  %v3946_v9 = vsel %vm1965_vm3, %v12435_v44, -inf }
0x128f   : > { %v12439_v8 = vpop.f32.mrf.mxu0  ;;  %v12441_v25 = vpop.f32.mrf.mxu1 }
0x1290   : > { %v4183_v36 = vsel %vm1965_vm3, %v12441_v25, -inf  ;;  %v3940_v35 = vsel %vm1965_vm3, %v12439_v8, -inf }
0x1291   : > { %v10115_v41 = vpop.f32.mrf.mxu0  ;;  %v12443_v15 = vpop.f32.mrf.mxu1 }
0x1292   : > { %v3955_v32 = vsel %vm1965_vm3, %v10115_v41, -inf  ;;  %v4192_v4 = vsel %vm1965_vm3, %v12443_v15, -inf }
0x1293   : > { %3956 = vmax.xlane.f32.xlu0 %v3955_v32  ;;  %v3922_v59 = vpop.f32.mrf.mxu0  ;;  %v12446_v39 = vpop.f32.mrf.mxu1 }
0x1294   : > { %v3949_v56 = vsel %vm1965_vm3, %v3922_v59, -inf  ;;  %v4186_v49 = vsel %vm1965_vm3, %v12446_v39, -inf }
0x1295   : > { %v10116_v17 = vpop.f32.mrf.mxu0  ;;  %v10137_v18 = vpop.f32.mrf.mxu1 }
0x1296   : > { %v3958_v26 = vsel %vm1965_vm3, %v10116_v17, -inf  ;;  %v4201_v22 = vsel %vm1965_vm3, %v10137_v18, -inf }
0x1297   : > { %3959 = vmax.xlane.f32.xlu1 %v3958_v26  ;;  %4202 = vmax.xlane.f32.xlu0 %v4201_v22  ;;  %v4168_v33 = vpop.f32.mrf.mxu1  ;;  %v3925_v19 = vpop.f32.mrf.mxu0 }
0x1298   : > { %v4195_v63 = vsel %vm1965_vm3, %v4168_v33, -inf  ;;  %v3952_v16 = vsel %vm1965_vm3, %v3925_v19, -inf }
0x1299   : > { %v10138_v21 = vpop.f32.mrf.mxu1 }
0x129a   : > { %v4204_v12 = vsel %vm1965_vm3, %v10138_v21, -inf }
0x129b   : > { %3950 = vmax.xlane.f32.xlu0 %v3949_v56  ;;  %4205 = vmax.xlane.f32.xlu1 %v4204_v12  ;;  %v4171_v46 = vpop.f32.mrf.mxu1 }
0x129c   : > { %v4198_v5 = vsel %vm1965_vm3, %v4171_v46, -inf }
0x129f   : > { %4196 = vmax.xlane.f32.xlu0 %v4195_v63  ;;  %3953 = vmax.xlane.f32.xlu1 %v3952_v16 }
0x12a3   : > { %3944 = vmax.xlane.f32.xlu0 %v3943_v50  ;;  %4199 = vmax.xlane.f32.xlu1 %v4198_v5 }
0x12a7   : > { %4190 = vmax.xlane.f32.xlu0 %v4189_v10  ;;  %3947 = vmax.xlane.f32.xlu1 %v3946_v9 }
0x12ab   : > { %3938 = vmax.xlane.f32.xlu0 %v3937_v58  ;;  %4193 = vmax.xlane.f32.xlu1 %v4192_v4 }
0x12af   : > { %4184 = vmax.xlane.f32.xlu0 %v4183_v36  ;;  %3941 = vmax.xlane.f32.xlu1 %v3940_v35 }
0x12b3   : > { %4187 = vmax.xlane.f32.xlu1 %v4186_v49 }
0x131c   : > { %v3957_v23 = vpop.xlane.xlu0 %3956 }
0x131d   : > { %v3967_v0 = vsub.f32 %v10115_v41, %v3957_v23 }
0x131f   : > { %v3981_v31 = vmul.f32 1.442695, %v3967_v0 }
0x1320   : > { %v4203_v34 = vpop.xlane.xlu0 %4202  ;;  %v3960_v28 = vpop.xlane.xlu1 %3959 }
0x1321   : > { %10897 = vpow2.f32 %v3981_v31  ;;  %v4213_v51 = vsub.f32 %v10137_v18, %v4203_v34  ;;  %v3968_v11 = vsub.f32 %v10116_v17, %v3960_v28 }
0x1323   : > { %v4227_v54 = vmul.f32 1.442695, %v4213_v51  ;;  %v3983_v55 = vmul.f32 1.442695, %v3968_v11 }
0x1324   : > { %v3951_v57 = vpop.xlane.xlu0 %3950  ;;  %v4206_v6 = vpop.xlane.xlu1 %4205 }
0x1325   : > { %10899 = vpow2.f32 %v4227_v54  ;;  %v3965_v27 = vsub.f32 %v3922_v59, %v3951_v57  ;;  %v4214_v47 = vsub.f32 %v10138_v21, %v4206_v6 }
0x1326   : > { %10901 = vpow2.f32 %v3983_v55 }
0x1327   : > { %v3977_v48 = vmul.f32 1.442695, %v3965_v27  ;;  %v4229_v24 = vmul.f32 1.442695, %v4214_v47 }
0x1328   : > { %v4197_v52 = vpop.xlane.xlu0 %4196  ;;  %v3954_v1 = vpop.xlane.xlu1 %3953 }
0x1329   : > { %10903 = vpow2.f32 %v3977_v48  ;;  %v4211_v42 = vsub.f32 %v4168_v33, %v4197_v52  ;;  %v3966_v13 = vsub.f32 %v3925_v19, %v3954_v1 }
0x132a   : > { %10905 = vpow2.f32 %v4229_v24 }
0x132b   : > { %v4223_v60 = vmul.f32 1.442695, %v4211_v42  ;;  %v3979_v40 = vmul.f32 1.442695, %v3966_v13 }
0x132c   : > { %v3945_v37 = vpop.xlane.xlu0 %3944  ;;  %v4200_v41 = vpop.xlane.xlu1 %4199 }
0x132d   : > { %10907 = vpow2.f32 %v4223_v60  ;;  %v3963_v32 = vsub.f32 %v12431_v3, %v3945_v37  ;;  %v4212_v17 = vsub.f32 %v4171_v46, %v4200_v41 }
0x132e   : > { %v12472_v18 = vpop.eup %10897  ;;  %10909 = vpow2.f32 %v3979_v40 }
0x132f   : > { %v3973_v59 = vmul.f32 1.442695, %v3963_v32  ;;  %v4225_v26 = vmul.f32 1.442695, %v4212_v17  ;;  %v4003_v22 = vsel %vm1965_vm3, %v12472_v18, 0.0 }
0x1330   : > { %4004 = vadd.xlane.f32.xlu0 %v4003_v22  ;;  %v4191_v33 = vpop.xlane.xlu0 %4190  ;;  %v3948_v21 = vpop.xlane.xlu1 %3947  ;;  %v3043_v22 = vld [vmem:[%s14051_s3] sm:$0xff] }
0x1331   : > { %10911 = vpow2.f32 %v3973_v59  ;;  %v4209_v56 = vsub.f32 %v12437_v14, %v4191_v33  ;;  %v3964_v12 = vsub.f32 %v12435_v44, %v3948_v21  ;;  %v3045_v33 = vld [vmem:[%s14051_s3 + $0x10] sm:$0xff]  ;;  %v3046_v21 = vld [vmem:[%s14051_s3 + $0x18] sm:$0xff] }
0x1332   : > { %v12478_v19 = vpop.eup %10899  ;;  %10913 = vpow2.f32 %v4225_v26  ;;  %v3044_v26 = vld [vmem:[%s14051_s3 + $0x8] sm:$0xff] }
0x1333   : > { %v12480_v3 = vpop.eup %10901  ;;  %v4219_v63 = vmul.f32 1.442695, %v4209_v56  ;;  %v3975_v16 = vmul.f32 1.442695, %v3964_v12  ;;  %v4249_v46 = vsel %vm1965_vm3, %v12478_v19, 0.0  ;;  %v4499_v56 = vld [vmem:[%s14052_s26 + $0x10] sm:$0xff] }
0x1334   : > { %4250 = vadd.xlane.f32.xlu0 %v4249_v46  ;;  %v3939_v50 = vpop.xlane.xlu0 %3938  ;;  %v4006_v5 = vsel %vm1965_vm3, %v12480_v3, 0.0  ;;  %v4194_v10 = vpop.xlane.xlu1 %4193  ;;  %v4500_v12 = vld [vmem:[%s14052_s26 + $0x18] sm:$0xff]  ;;  %v4497_v46 = vld [vmem:[%s14052_s26] sm:$0xff] }
0x1335   : > { %10915 = vpow2.f32 %v4219_v63  ;;  %v3961_v14 = vsub.f32 %v12433_v62, %v3939_v50  ;;  %4007 = vadd.xlane.f32.xlu1 %v4006_v5  ;;  %v4210_v44 = vsub.f32 %v12443_v15, %v4194_v10  ;;  %v4503_v63 = vld [vmem:[%s14053_s21 + $0x10] sm:$0xff]  ;;  %v4498_v50 = vld [vmem:[%s14052_s26 + $0x8] sm:$0xff]  ;;  %v4501_v5 = vld [vmem:[%s14053_s21] sm:$0xff] }
0x1336   : > { %v12488_v9 = vpop.eup %10903  ;;  %10917 = vpow2.f32 %v3975_v16  ;;  %v4504_v16 = vld [vmem:[%s14053_s21 + $0x18] sm:$0xff]  ;;  %v4502_v10 = vld [vmem:[%s14053_s21 + $0x8] sm:$0xff] }
0x1337   : > { %v12490_v58 = vpop.eup %10905  ;;  %v3969_v4 = vmul.f32 1.442695, %v3961_v14  ;;  %v4221_v36 = vmul.f32 1.442695, %v4210_v44  ;;  %v3997_v35 = vsel %vm1965_vm3, %v12488_v9, 0.0  ;;  %v4487_v14 = vld [vmem:[%s11546_s20 + $0x70] sm:$0xff] }
0x1338   : > { %3998 = vadd.xlane.f32.xlu0 %v3997_v35  ;;  %v4185_v49 = vpop.xlane.xlu0 %4184  ;;  %v4252_v23 = vsel %vm1965_vm3, %v12490_v58, 0.0  ;;  %v3942_v0 = vpop.xlane.xlu1 %3941  ;;  %v4488_v44 = vld [vmem:[%s11546_s20 + $0x78] sm:$0xff]  ;;  %v4483_v35 = vld [vmem:[%s11546_s20 + $0x50] sm:$0xff] }
0x1339   : > { %10919 = vpow2.f32 %v3969_v4  ;;  %v4207_v62 = vsub.f32 %v12441_v25, %v4185_v49  ;;  %4253 = vadd.xlane.f32.xlu1 %v4252_v23  ;;  %v3962_v15 = vsub.f32 %v12439_v8, %v3942_v0  ;;  %v4485_v4 = vld [vmem:[%s11546_s20 + $0x60] sm:$0xff]  ;;  %v4484_v49 = vld [vmem:[%s11546_s20 + $0x58] sm:$0xff]  ;;  %v4482_v0 = vld [vmem:[%s11546_s20 + $0x48] sm:$0xff] }
0x133a   : > { %v12498_v31 = vpop.eup %10907  ;;  %10921 = vpow2.f32 %v4221_v36  ;;  %v4486_v36 = vld [vmem:[%s11546_s20 + $0x68] sm:$0xff]  ;;  %v4481_v23 = vld [vmem:[%s11546_s20 + $0x40] sm:$0xff] }
0x133b   : > { %v12500_v34 = vpop.eup %10909  ;;  %v4215_v28 = vmul.f32 1.442695, %v4207_v62  ;;  %v3971_v51 = vmul.f32 1.442695, %v3962_v15  ;;  %v4243_v11 = vsel %vm1965_vm3, %v12498_v31, 0.0  ;;  %v4479_v62 = vld [vmem:[%s11546_s20 + $0x30] sm:$0xff] }
0x133c   : > { %4244 = vadd.xlane.f32.xlu0 %v4243_v11  ;;  %v4000_v54 = vsel %vm1965_vm3, %v12500_v34, 0.0  ;;  %v4188_v55 = vpop.xlane.xlu1 %4187  ;;  %v4480_v15 = vld [vmem:[%s11546_s20 + $0x38] sm:$0xff]  ;;  %v4477_v11 = vld [vmem:[%s11546_s20 + $0x20] sm:$0xff] }
0x133d   : > { %10923 = vpow2.f32 %v4215_v28  ;;  %4001 = vadd.xlane.f32.xlu1 %v4000_v54  ;;  %v4208_v25 = vsub.f32 %v12446_v39, %v4188_v55  ;;  %v4471_v28 = vld [vmem:[%s14054_s25 + $0x70] sm:$0xff]  ;;  %v4478_v54 = vld [vmem:[%s11546_s20 + $0x28] sm:$0xff]  ;;  %v4469_v55 = vld [vmem:[%s14054_s25 + $0x60] sm:$0xff] }
0x133e   : > { %v12507_v8 = vpop.eup %10911  ;;  %10925 = vpow2.f32 %v3971_v51  ;;  %v4472_v51 = vld [vmem:[%s14054_s25 + $0x78] sm:$0xff] }
0x133f   : > { %v12509_v57 = vpop.eup %10913  ;;  %v4217_v6 = vmul.f32 1.442695, %v4208_v25  ;;  %v3991_v27 = vsel %vm1965_vm3, %v12507_v8, 0.0  ;;  %v4470_v25 = vld [vmem:[%s14054_s25 + $0x68] sm:$0xff] }
0x1340   : > { %3992 = vadd.xlane.f32.xlu0 %v3991_v27  ;;  %v4246_v47 = vsel %vm1965_vm3, %v12509_v57, 0.0  ;;  %v4476_v27 = vld [vmem:[%s11546_s20 + $0x18] sm:$0xff] }
0x1341   : > { %10927 = vpow2.f32 %v4217_v6  ;;  %4247 = vadd.xlane.f32.xlu1 %v4246_v47  ;;  %v4475_v6 = vld [vmem:[%s11546_s20 + $0x10] sm:$0xff] }
0x1342   : > { %v12515_v48 = vpop.eup %10915  ;;  %v4467_v47 = vld [vmem:[%s14054_s25 + $0x50] sm:$0xff] }
0x1343   : > { %v12517_v24 = vpop.eup %10917  ;;  %v4237_v39 = vsel %vm1965_vm3, %v12515_v48, 0.0 }
0x1344   : > { %4238 = vadd.xlane.f32.xlu0 %v4237_v39  ;;  %v3994_v52 = vsel %vm1965_vm3, %v12517_v24, 0.0  ;;  %v4468_v39 = vld [vmem:[%s14054_s25 + $0x58] sm:$0xff] }
0x1345   : > { %3995 = vadd.xlane.f32.xlu1 %v3994_v52  ;;  %v4473_v52 = vld [vmem:[%s11546_s20] sm:$0xff] }
0x1346   : > { %v12523_v1 = vpop.eup %10919 }
0x1347   : > { %v12525_v42 = vpop.eup %10921  ;;  %v3985_v13 = vsel %vm1965_vm3, %v12523_v1, 0.0 }
0x1348   : > { %3986 = vadd.xlane.f32.xlu0 %v3985_v13  ;;  %v4240_v60 = vsel %vm1965_vm3, %v12525_v42, 0.0  ;;  %v4474_v13 = vld [vmem:[%s11546_s20 + $0x8] sm:$0xff] }
0x1349   : > { %4241 = vadd.xlane.f32.xlu1 %v4240_v60  ;;  %v4465_v60 = vld [vmem:[%s14054_s25 + $0x40] sm:$0xff] }
0x134a   : > { %v12531_v40 = vpop.eup %10923 }
0x134b   : > { %v12533_v37 = vpop.eup %10925  ;;  %v4231_v41 = vsel %vm1965_vm3, %v12531_v40, 0.0 }
0x134c   : > { %4232 = vadd.xlane.f32.xlu0 %v4231_v41  ;;  %v3988_v32 = vsel %vm1965_vm3, %v12533_v37, 0.0  ;;  %v4466_v41 = vld [vmem:[%s14054_s25 + $0x48] sm:$0xff] }
0x134d   : > { %3989 = vadd.xlane.f32.xlu1 %v3988_v32  ;;  %v4463_v32 = vld [vmem:[%s14054_s25 + $0x30] sm:$0xff] }
0x134e   : > { %v12539_v17 = vpop.eup %10927 }
0x134f   : > { %v4234_v59 = vsel %vm1965_vm3, %v12539_v17, 0.0 }
0x1351   : > { %4235 = vadd.xlane.f32.xlu1 %v4234_v59  ;;  %v4464_v59 = vld [vmem:[%s14054_s25 + $0x38] sm:$0xff] }
0x1362   : > { %4337 = vperm.xlu1 %10620, %v3044_v26   ;;  %4332 = vperm.xlu0 %10619, %v3043_v22   ;;  %v4461_v26 = vld [vmem:[%s14054_s25 + $0x20] sm:$0xff]  ;;  %v4462_v22 = vld [vmem:[%s14054_s25 + $0x28] sm:$0xff] }
0x1366   : > { %4342 = vperm.xlu1 %10620, %v3045_v33   ;;  %4347 = vperm.xlu0 %10619, %v3046_v21   ;;  %v4459_v33 = vld [vmem:[%s14054_s25 + $0x10] sm:$0xff]  ;;  %v4460_v21 = vld [vmem:[%s14054_s25 + $0x18] sm:$0xff] }
0x136a   : > { %4559 = vperm.xlu1 %10620, %v4499_v56   ;;  %4564 = vperm.xlu0 %10619, %v4500_v12   ;;  %v4457_v56 = vld [vmem:[%s14054_s25] sm:$0xff]  ;;  %v4458_v12 = vld [vmem:[%s14054_s25 + $0x8] sm:$0xff] }
0x136e   : > { %4583 = vperm.xlu1 %10620, %v4503_v63   ;;  %4588 = vperm.xlu0 %10619, %v4504_v16   ;;  %v4493_v63 = vld [vmem:[%s11556_s14] sm:$0xff]  ;;  %v4494_v16 = vld [vmem:[%s11556_s14 + $0x8] sm:$0xff] }
0x1372   : > { %4549 = vperm.xlu1 %10620, %v4497_v46   ;;  %4554 = vperm.xlu0 %10619, %v4498_v50   ;;  %v4495_v50 = vld [vmem:[%s11556_s14 + $0x10] sm:$0xff] }
0x1376   : > { %4573 = vperm.xlu1 %10620, %v4501_v5   ;;  %4578 = vperm.xlu0 %10619, %v4502_v10   ;;  %v4496_v5 = vld [vmem:[%s11556_s14 + $0x18] sm:$0xff] }
0x137a   : > { %4910 = vperm.xlu1 %10620, %v4487_v14   ;;  %4915 = vperm.xlu0 %10619, %v4488_v44   ;;  %v9308_v44 = vld [vmem:[%s14034_s19 + $0x30] sm:$0xff] }
0x137e   : > { %4900 = vperm.xlu1 %10620, %v4485_v4   ;;  %4905 = vperm.xlu0 %10619, %v4486_v36   ;;  %v9309_v4 = vld [vmem:[%s14034_s19 + $0x38] sm:$0xff] }
0x1382   : > { %4890 = vperm.xlu1 %10620, %v4483_v35   ;;  %4895 = vperm.xlu0 %10619, %v4484_v49   ;;  %v9312_v49 = vld [vmem:[%s14033_s24 + $0x30] sm:$0xff] }
0x1386   : > { %4880 = vperm.xlu1 %10620, %v4481_v23   ;;  %4885 = vperm.xlu0 %10619, %v4482_v0   ;;  %v9313_v23 = vld [vmem:[%s14033_s24 + $0x38] sm:$0xff] }
0x138a   : > { %4870 = vperm.xlu1 %10620, %v4479_v62   ;;  %4875 = vperm.xlu0 %10619, %v4480_v15   ;;  %v9306_v15 = vld [vmem:[%s14034_s19 + $0x20] sm:$0xff] }
0x138e   : > { %4669 = vperm.xlu1 %10620, %v4471_v28   ;;  %4674 = vperm.xlu0 %10619, %v4472_v51   ;;  %v9307_v28 = vld [vmem:[%s14034_s19 + $0x28] sm:$0xff]  ;;  %s14055_s19 = sld [smem:[#allocation25_spill]] }
0x1392   : > { %4860 = vperm.xlu1 %10620, %v4477_v11   ;;  %4865 = vperm.xlu0 %10619, %v4478_v54  }
0x1396   : > { %4659 = vperm.xlu1 %10620, %v4469_v55   ;;  %4664 = vperm.xlu0 %10619, %v4470_v25   ;;  %v9310_v55 = vld [vmem:[%s14033_s24 + $0x20] sm:$0xff]  ;;  %v9311_v25 = vld [vmem:[%s14033_s24 + $0x28] sm:$0xff]  ;;  %s14056_s24 = sld [smem:[#allocation29_spill]] }
0x139a   : > { %4850 = vperm.xlu1 %10620, %v4475_v6   ;;  %4855 = vperm.xlu0 %10619, %v4476_v27  }
0x139e   : > { %4649 = vperm.xlu1 %10620, %v4467_v47   ;;  %4654 = vperm.xlu0 %10619, %v4468_v39  }
0x13a2   : > { %4840 = vperm.xlu1 %10620, %v4473_v52   ;;  %4845 = vperm.xlu0 %10619, %v4474_v13  }
0x13a6   : > { %4639 = vperm.xlu1 %10620, %v4465_v60   ;;  %4644 = vperm.xlu0 %10619, %v4466_v41  }
0x13aa   : > { %4629 = vperm.xlu1 %10620, %v4463_v32   ;;  %4634 = vperm.xlu0 %10619, %v4464_v59  }
0x13ae   : > { %4619 = vperm.xlu1 %10620, %v4461_v26   ;;  %4624 = vperm.xlu0 %10619, %v4462_v22  }
0x13b2   : > { %4609 = vperm.xlu1 %10620, %v4459_v33   ;;  %4614 = vperm.xlu0 %10619, %v4460_v21  }
0x13b6   : > { %4599 = vperm.xlu1 %10620, %v4457_v56   ;;  %4604 = vperm.xlu0 %10619, %v4458_v12  }
0x13b9   : > { %v4005_v46 = vpop.xlane.xlu0 %4004 }
0x13ba   : > { %5250 = vperm.xlu1 %10620, %v4493_v63   ;;  %5255 = vperm.xlu0 %10619, %v4494_v16   ;;  %10929 = vrcp.f32 %v4005_v46 }
0x13bd   : > { %v4251_v10 = vpop.xlane.xlu0 %4250 }
0x13be   : > { %5260 = vperm.xlu1 %10620, %v4495_v50   ;;  %v4008_v14 = vpop.xlane.xlu1 %4007  ;;  %5265 = vperm.xlu0 %10619, %v4496_v5  }
0x13bf   : > { %10931 = vrcp.f32 %v4008_v14 }
0x13c0   : > { %10933 = vrcp.f32 %v4251_v10 }
0x13c1   : > { %v3999_v36 = vpop.xlane.xlu0 %3998 }
0x13c2   : > { %5361 = vperm.xlu1 %10620, %v9308_v44   ;;  %v4254_v35 = vpop.xlane.xlu1 %4253  ;;  %5366 = vperm.xlu0 %10619, %v9309_v4  }
0x13c3   : > { %10935 = vrcp.f32 %v4254_v35 }
0x13c4   : > { %10937 = vrcp.f32 %v3999_v36 }
0x13c5   : > { %v4245_v0 = vpop.xlane.xlu0 %4244 }
0x13c6   : > { %5385 = vperm.xlu1 %10620, %v9312_v49   ;;  %v4002_v62 = vpop.xlane.xlu1 %4001  ;;  %5390 = vperm.xlu0 %10619, %v9313_v23  }
0x13c7   : > { %10939 = vrcp.f32 %v4002_v62  ;;  %v10930_v11 = vpop.eup %10929 }
0x13c8   : > { %10941 = vrcp.f32 %v4245_v0  ;;  %v4023_v47 = vmul.f32 %v10930_v11, %v12472_v18 }
0x13c9   : > { %v3993_v51 = vpop.xlane.xlu0 %3992 }
0x13ca   : > { %5351 = vperm.xlu1 %10620, %v9306_v15   ;;  %v4248_v54 = vpop.xlane.xlu1 %4247  ;;  %5356 = vperm.xlu0 %10619, %v9307_v28  }
0x13cb   : > { %10943 = vrcp.f32 %v4248_v54 }
0x13cc   : > { %v10932_v6 = vpop.eup %10931  ;;  %10945 = vrcp.f32 %v3993_v51 }
0x13cd   : > { %v4239_v27 = vpop.xlane.xlu0 %4238  ;;  %v4024_v39 = vmul.f32 %v10932_v6, %v12480_v3  ;;  %v10934_v52 = vpop.eup %10933 }
0x13ce   : > { %5375 = vperm.xlu1 %10620, %v9310_v55   ;;  %v3996_v13 = vpop.xlane.xlu1 %3995  ;;  %5380 = vperm.xlu0 %10619, %v9311_v25   ;;  %v4269_v26 = vmul.f32 %v10934_v52, %v12478_v19  ;;  %v10637_v52 = vld [vmem:[%s14055_s19] sm:$0xff]  }
0x13cf   : > { %10947 = vrcp.f32 %v3996_v13  ;;  %v4028_v60 = vpack.c.bf16 %v4024_v39, %v4023_v47 }
0x13d0   : > { %v10936_v41 = vpop.eup %10935  ;;  %10949 = vrcp.f32 %v4239_v27 }
0x13d1   : > { %v3987_v32 = vpop.xlane.xlu0 %3986  ;;  %v4042_v59 = vsel %vm1965_vm3, %v4028_v60, 0  ;;  %v4270_v22 = vmul.f32 %v10936_v41, %v12490_v58  ;;  %v10938_v33 = vpop.eup %10937 }
0x13d2   : > { %10118 = vmatpush3.bf16.xpose.msra.mxu0 %v4042_v59  ;;  %v4242_v18 = vpop.xlane.xlu1 %4241  ;;  %v4021_v12 = vmul.f32 %v10938_v33, %v12488_v9  ;;  %v10640_v33 = vld [vmem:[%s14057_s29] sm:$0xff]  }
0x13d3   : > { %10951 = vrcp.f32 %v4242_v18  ;;  %v4274_v3 = vpack.c.bf16 %v4270_v22, %v4269_v26  ;;  %10119 = vmatprep.subr.bf16.mxu0 %v13983_v29  ;;  %v10638_v26 = vld [vmem:[%s14055_s19 + $0x8] sm:$0xff]   ;;  %v10639_v22 = vld [vmem:[%s14056_s24] sm:$0xff]  }
0x13d4   : > { %v10940_v21 = vpop.eup %10939  ;;  %10953 = vrcp.f32 %v3987_v32 }
0x13d5   : > { %v4288_v56 = vsel %vm1965_vm3, %v4274_v3, 0  ;;  %v4022_v63 = vmul.f32 %v10940_v21, %v12500_v34  ;;  %v10942_v16 = vpop.eup %10941  ;;  %v4233_v46 = vpop.xlane.xlu0 %4232 }
0x13d6   : > { %10140 = vmatpush3.bf16.xpose.msra.mxu1 %v4288_v56  ;;  %v3990_v19 = vpop.xlane.xlu1 %3989  ;;  %v4267_v10 = vmul.f32 %v10942_v16, %v12498_v31 }
0x13d7   : > { %10955 = vrcp.f32 %v3990_v19  ;;  %v4027_v58 = vpack.c.bf16 %v4022_v63, %v4021_v12  ;;  %10141 = vmatprep.subr.bf16.mxu1 %v13983_v29 }
0x13d8   : > { %v10944_v50 = vpop.eup %10943  ;;  %10957 = vrcp.f32 %v4233_v46 }
0x13d9   : > { %v4039_v5 = vsel %vm1965_vm3, %v4027_v58, 0  ;;  %v4268_v14 = vmul.f32 %v10944_v50, %v12509_v57  ;;  %v10946_v44 = vpop.eup %10945 }
0x13da   : > { %10120 = vmatpush3.bf16.xpose.msra.mxu0 %v4039_v5  ;;  %v4236_v9 = vpop.xlane.xlu1 %4235  ;;  %v4019_v35 = vmul.f32 %v10946_v44, %v12507_v8 }
0x13db   : > { %10959 = vrcp.f32 %v4236_v9  ;;  %v4273_v34 = vpack.c.bf16 %v4268_v14, %v4267_v10  ;;  %10121 = vmatprep.subr.bf16.mxu0 %v13983_v29 }
0x13dc   : > { %v10948_v4 = vpop.eup %10947 }
0x13dd   : > { %v4285_v36 = vsel %vm1965_vm3, %v4273_v34, 0  ;;  %v4020_v49 = vmul.f32 %v10948_v4, %v12517_v24  ;;  %v10950_v23 = vpop.eup %10949  ;;  %v4333_v3 = vpop.permute.xlu0 %4332 }
0x13de   : > { %10142 = vmatpush3.bf16.xpose.msra.mxu1 %v4285_v36  ;;  %v4265_v62 = vmul.f32 %v10950_v23, %v12515_v48  ;;  %v4338_v18 = vpop.permute.xlu1 %4337  ;;  %v4350_v63 = vadd.f32 %v4333_v3, %v12176_v38 }
0x13df   : > { %v4026_v0 = vpack.c.bf16 %v4020_v49, %v4019_v35  ;;  %10143 = vmatprep.subr.bf16.mxu1 %v13983_v29  ;;  %v4351_v19 = vadd.f32 %v4338_v18, %v12181_v53 }
0x13e0   : > { %v10952_v31 = vpop.eup %10951 }
0x13e1   : > { %v4036_v57 = vsel %vm1965_vm3, %v4026_v0, 0  ;;  %v4266_v15 = vmul.f32 %v10952_v31, %v12525_v42  ;;  %v10954_v28 = vpop.eup %10953  ;;  %v4348_v16 = vpop.permute.xlu0 %4347 }
0x13e2   : > { %10122 = vmatpush3.bf16.xpose.msra.mxu0 %v4036_v57  ;;  %v4017_v11 = vmul.f32 %v10954_v28, %v12523_v1  ;;  %v3840_v1 = vpack.c.bf16 %v12393_v43, %v12393_v43  ;;  %v4343_v56 = vpop.permute.xlu1 %4342  ;;  %v4353_v5 = vadd.f32 %v4348_v16, %v12185_v61 }
0x13e3   : > { %v4272_v51 = vpack.c.bf16 %v4266_v15, %v4265_v62  ;;  %10123 = vmatprep.subr.bf16.mxu0 %v13983_v29 }
0x13e4   : > { %v10956_v8 = vpop.eup %10955 }
0x13e5   : > { %v4282_v24 = vsel %vm1965_vm3, %v4272_v51, 0  ;;  %v4018_v54 = vmul.f32 %v10956_v8, %v12533_v37  ;;  %v10958_v55 = vpop.eup %10957  ;;  %v4086_v37 = vpack.c.bf16 %v12405_v7, %v12405_v7 }
0x13e6   : > { %10144 = vmatpush3.bf16.xpose.msra.mxu1 %v4282_v24  ;;  %v4263_v6 = vmul.f32 %v10958_v55, %v12531_v40 }
0x13e7   : > { %v4025_v25 = vpack.c.bf16 %v4018_v54, %v4017_v11  ;;  %10145 = vmatprep.subr.bf16.mxu1 %v13983_v29 }
0x13e8   : > { %v10960_v48 = vpop.eup %10959 }
0x13e9   : > { %v4033_v42 = vsel %vm1965_vm3, %v4025_v25, 0  ;;  %v4264_v27 = vmul.f32 %v10960_v48, %v12539_v17 }
0x13ea   : > { %10124 = vmatpush3.bf16.xpose.msra.mxu0 %v4033_v42 }
0x13eb   : > { %v4271_v47 = vpack.c.bf16 %v4264_v27, %v4263_v6 }
0x13ed   : > { %v4279_v39 = vsel %vm1965_vm3, %v4271_v47, 0 }
0x13ee   : > { %10146 = vmatpush3.bf16.xpose.msra.mxu1 %v4279_v39 }
0x13f1   : > { %10126 = vmatmul.mubr.msk.bf16.vlgmr.msra.gmra.mxu0 %vm1965_vm3, %v3840_v1 }
0x13f2   : > { %10155 = vmatprep.mubr.msk.bf16.mxu0 %vm1030_vm1, %v10637_v52 }
0x13f5   : > { %10148 = vmatmul.mubr.msk.bf16.vlgmr.msra.gmra.mxu1 %vm1965_vm3, %v4086_v37 }
0x13f6   : > { %10183 = vmatprep.mubr.msk.bf16.mxu1 %vm1030_vm1, %v10640_v33 }
0x14b1   : > { %v4078_v40 = vpop.f32.mrf.mxu0 }
0x14b3   : > { %v10127_v17 = vpop.f32.mrf.mxu0 }
0x14b5   : > { %v4081_v13 = vpop.f32.mrf.mxu0  ;;  %v4324_v60 = vpop.f32.mrf.mxu1 }
0x14b6   : > { %v4355_v41 = vpack.c.bf16 %v4324_v60, %v4078_v40 }
0x14b7   : > { %v10128_v32 = vpop.f32.mrf.mxu0  ;;  %v10149_v43 = vpop.f32.mrf.mxu1 }
0x14b8   : > { %10151 = vmatprep.subr.bf16.mxu0 %v4355_v41  ;;  %v4560_v32 = vpop.permute.xlu1 %4559 }
0x14b9   : > { %v4327_v59 = vpop.f32.mrf.mxu1  ;;  %10152 = vmatpush3.bf16.msra.mxu0 %v4355_v41  ;;  %v4565_v41 = vpop.permute.xlu0 %4564 }
0x14ba   : > { %10153 = vmatprep.subr.bf16.mxu0 %v12429_v30 }
0x14bb   : > { %v10150_v7 = vpop.f32.mrf.mxu1 }
0x14bc   : > { %v4584_v59 = vpop.permute.xlu1 %4583 }
0x14bd   : > { %10154 = vmatpush3.bf16.msra.mxu0 %v12429_v30  ;;  %v4352_v30 = vadd.f32 %v4343_v56, %v12179_v45  ;;  %v4589_v43 = vpop.permute.xlu0 %4588 }
0x14c0   : > { %10156 = vmatmul.mubr.msk.bf16.vlgmr.msra.gmra.mxu0 %vm1030_vm1, %v10638_v26  ;;  %v4550_v26 = vpop.permute.xlu1 %4549 }
0x14c1   : > { %10163 = vmatprep.mubr.msk.bf16.mxu0 %vm1030_vm1, %v10639_v22  ;;  %v4555_v7 = vpop.permute.xlu0 %4554 }
0x1580   : > { %v10157_v21 = vpop.f32.mrf.mxu0 }
0x1581   : > { %v12651_v10 = vadd.f32 %v10157_v21, %v4352_v30 }
0x1582   : > { %v4406_v12 = vpop.f32.mrf.mxu0 }
0x1583   : > { %v12648_v58 = vadd.f32 %v4406_v12, %v4350_v63  ;;  %v4508_v45 = vsel %vm1017_vm0, %v12651_v10, 0.0 }
0x1584   : > { %v10158_v46 = vpop.f32.mrf.mxu0 }
0x1585   : > { %v4505_v44 = vsel %vm1017_vm0, %v12648_v58, 0.0  ;;  %v12657_v9 = vadd.f32 %v10158_v46, %v4353_v5  ;;  %v4579_v46 = vpop.permute.xlu0 %4578 }
0x1586   : > { %v4409_v50 = vpop.f32.mrf.mxu0 }
0x1587   : > { %v12653_v14 = vadd.f32 %v4409_v50, %v4351_v19  ;;  %v4510_v61 = vsel %vm1017_vm0, %v12657_v9, 0.0  ;;  %v4574_v19 = vpop.permute.xlu1 %4573 }
0x1589   : > { %v4506_v38 = vsel %vm1017_vm0, %v12653_v14, 0.0 }
0x158a   : > { %v4507_v53 = vadd.f32 %v4506_v38, %v4505_v44 }
0x158c   : > { %v4509_v34 = vadd.f32 %v4508_v45, %v4507_v53  ;;  %v10641_v45 = vld [vmem:[%s14056_s24 + $0x8] sm:$0xff]  }
0x158e   : > { %v4511_v4 = vadd.f32 %v4510_v61, %v4509_v34  ;;  %v10642_v34 = vld [vmem:[%s14057_s29 + $0x8] sm:$0xff]   ;;  %v10643_v61 = vld [vmem:[%s14056_s24 + $0x10] sm:$0xff]  }
0x1590   : > { %v4512_v36 = vrot.slane %v4511_v4, 4 }
0x1592   : > { %v4513_v35 = vadd.f32 %v4512_v36, %v4511_v4  ;;  %v10644_v4 = vld [vmem:[%s14057_s29 + $0x10] sm:$0xff]   ;;  %v10645_v36 = vld [vmem:[%s14056_s24 + $0x18] sm:$0xff]  }
0x1594   : > { %v4514_v49 = vrot.slane %v4513_v35, 2 }
0x1596   : > { %v4515_v23 = vadd.f32 %v4514_v49, %v4513_v35  ;;  %v10646_v35 = vld [vmem:[%s14057_s29 + $0x18] sm:$0xff]   ;;  %v10647_v49 = vld [vmem:[%s14056_s24 + $0x20] sm:$0xff]  }
0x1598   : > { %v4516_v0 = vrot.slane %v4515_v23, 1 }
0x159a   : > { %v4517_v31 = vadd.f32 %v4516_v0, %v4515_v23  ;;  %v10648_v23 = vld [vmem:[%s14057_s29 + $0x20] sm:$0xff]   ;;  %v10649_v0 = vld [vmem:[%s14056_s24 + $0x28] sm:$0xff]  }
0x159c   : > { %v4518_v57 = vmul.f32 0.03125, %v4517_v31  ;;  %v10650_v31 = vld [vmem:[%s14057_s29 + $0x28] sm:$0xff]  }
0x159e   : > { %v4519_v62 = vsub.f32 %v12648_v58, %v4518_v57  ;;  %v4520_v15 = vsub.f32 %v12653_v14, %v4518_v57  ;;  %v4521_v28 = vsub.f32 %v12651_v10, %v4518_v57  ;;  %v4522_v51 = vsub.f32 %v12657_v9, %v4518_v57  ;;  %v10651_v57 = vld [vmem:[%s14056_s24 + $0x30] sm:$0xff]  }
0x15a0   : > { %v4523_v8 = vmul.f32 %v4519_v62, %v4519_v62  ;;  %v4524_v24 = vmul.f32 %v4520_v15, %v4520_v15  ;;  %v4525_v11 = vmul.f32 %v4521_v28, %v4521_v28  ;;  %v4526_v54 = vmul.f32 %v4522_v51, %v4522_v51 }
0x15a2   : > { %v4527_v55 = vsel %vm1017_vm0, %v4523_v8, 0.0  ;;  %v4528_v25 = vsel %vm1017_vm0, %v4524_v24, 0.0  ;;  %v4530_v42 = vsel %vm1017_vm0, %v4525_v11, 0.0  ;;  %v4532_v27 = vsel %vm1017_vm0, %v4526_v54, 0.0  ;;  %v4911_v8 = vpop.permute.xlu1 %4910  ;;  %v4916_v24 = vpop.permute.xlu0 %4915 }
0x15a3   : > { %v4529_v48 = vadd.f32 %v4528_v25, %v4527_v55 }
0x15a5   : > { %v4531_v6 = vadd.f32 %v4530_v42, %v4529_v48 }
0x15a6   : > { %v4901_v11 = vpop.permute.xlu1 %4900  ;;  %v4906_v54 = vpop.permute.xlu0 %4905 }
0x15a7   : > { %v4533_v47 = vadd.f32 %v4532_v27, %v4531_v6 }
0x15a9   : > { %v4534_v39 = vrot.slane %v4533_v47, 4 }
0x15aa   : > { %v4891_v55 = vpop.permute.xlu1 %4890  ;;  %v4896_v25 = vpop.permute.xlu0 %4895 }
0x15ab   : > { %v4535_v1 = vadd.f32 %v4534_v39, %v4533_v47 }
0x15ad   : > { %v4536_v37 = vrot.slane %v4535_v1, 2 }
0x15ae   : > { %v4881_v48 = vpop.permute.xlu1 %4880  ;;  %v4886_v42 = vpop.permute.xlu0 %4885 }
0x15af   : > { %v4537_v52 = vadd.f32 %v4536_v37, %v4535_v1 }
0x15b1   : > { %v4538_v40 = vrot.slane %v4537_v52, 1 }
0x15b2   : > { %v4871_v6 = vpop.permute.xlu1 %4870  ;;  %v4876_v37 = vpop.permute.xlu0 %4875 }
0x15b3   : > { %v4539_v17 = vadd.f32 %v4538_v40, %v4537_v52 }
0x15b5   : > { %v4540_v13 = vmul.f32 0.03125, %v4539_v17 }
0x15b6   : > { %v12712_v17 = vpop.permute.xlu1 %4669 }
0x15b7   : > { %v4541_v60 = vadd.f32 1e-05, %v4540_v13 }
0x15b9   : > { %10961 = vrsqrt.f32 %v4541_v60 }
0x15c6   : > { %v10962_v22 = vpop.eup %10961 }
0x15c7   : > { %v4544_v33 = vmul.f32 %v10962_v22, %v4520_v15  ;;  %v4545_v18 = vmul.f32 %v10962_v22, %v4521_v28  ;;  %v4546_v3 = vmul.f32 %v10962_v22, %v4522_v51  ;;  %v4543_v21 = vmul.f32 %v10962_v22, %v4519_v62  ;;  %v10652_v62 = vld [vmem:[%s14057_s29 + $0x30] sm:$0xff]   ;;  %v10653_v15 = vld [vmem:[%s14056_s24 + $0x38] sm:$0xff]   ;;  %v10655_v51 = vld [vmem:[%s14029_s8] sm:$0xff]  }
0x15c8   : > { %v10654_v28 = vld [vmem:[%s14057_s29 + $0x38] sm:$0xff]  }
0x15c9   : > { %v4568_v56 = vmul.f32 %v4555_v7, %v4544_v33  ;;  %v4569_v12 = vmul.f32 %v4560_v32, %v4545_v18  ;;  %v4570_v63 = vmul.f32 %v4565_v41, %v4546_v3  ;;  %v4567_v16 = vmul.f32 %v4550_v26, %v4543_v21  ;;  %v4861_v26 = vpop.permute.xlu1 %4860 }
0x15cb   : > { %v4593_v30 = vadd.f32 %v4584_v59, %v4569_v12  ;;  %v4594_v50 = vadd.f32 %v4589_v43, %v4570_v63  ;;  %v4591_v5 = vadd.f32 %v4574_v19, %v4567_v16  ;;  %v4592_v44 = vadd.f32 %v4579_v46, %v4568_v56  ;;  %v12720_v43 = vpop.permute.xlu0 %4674 }
0x15cd   : > { %v4596_v38 = vpack.c.bf16 %v4594_v50, %v4593_v30  ;;  %v4595_v53 = vpack.c.bf16 %v4592_v44, %v4591_v5  ;;  %v12726_v56 = vpop.permute.xlu1 %4659 }
0x15cf   : > { %10159 = vmatprep.subr.bf16.mxu0 %v4596_v38  ;;  %10179 = vmatprep.subr.bf16.mxu1 %v4596_v38  ;;  %v4866_v3 = vpop.permute.xlu0 %4865 }
0x15d0   : > { %10160 = vmatpush3.bf16.msra.mxu0 %v4596_v38  ;;  %10180 = vmatpush3.bf16.msra.mxu1 %v4596_v38 }
0x15d1   : > { %10161 = vmatprep.subr.bf16.mxu0 %v4595_v53  ;;  %10181 = vmatprep.subr.bf16.mxu1 %v4595_v53  ;;  %v4851_v5 = vpop.permute.xlu1 %4850 }
0x15d3   : > { %v12730_v46 = vpop.permute.xlu0 %4664 }
0x15d4   : > { %10162 = vmatpush3.bf16.msra.mxu0 %v4595_v53  ;;  %10182 = vmatpush3.bf16.msra.mxu1 %v4595_v53 }
0x15d7   : > { %10164 = vmatmul.mubr.msk.bf16.vlgmr.msra.gmra.mxu0 %vm1030_vm1, %v10641_v45  ;;  %10184 = vmatmul.mubr.msk.bf16.vlgmr.msra.gmra.mxu1 %vm1030_vm1, %v10642_v34 }
0x15d8   : > { %10167 = vmatprep.mubr.msk.bf16.mxu0 %vm1030_vm1, %v10643_v61  ;;  %10187 = vmatprep.mubr.msk.bf16.mxu1 %vm1030_vm1, %v10644_v4  ;;  %v4856_v4 = vpop.permute.xlu0 %4855 }
0x15df   : > { %10168 = vmatmul.mubr.msk.bf16.gmra.mxu0 %vm1030_vm1, %v10645_v36  ;;  %10188 = vmatmul.mubr.msk.bf16.gmra.mxu1 %vm1030_vm1, %v10646_v35 }
0x15e0   : > { %10171 = vmatprep.mubr.msk.bf16.mxu0 %vm1030_vm1, %v10647_v49  ;;  %10191 = vmatprep.mubr.msk.bf16.mxu1 %vm1030_vm1, %v10648_v23 }
0x15e7   : > { %10172 = vmatmul.mubr.msk.bf16.gmra.mxu0 %vm1030_vm1, %v10649_v0  ;;  %10192 = vmatmul.mubr.msk.bf16.gmra.mxu1 %vm1030_vm1, %v10650_v31  ;;  %v12746_v31 = vpop.permute.xlu1 %4649 }
0x15e8   : > { %10175 = vmatprep.mubr.msk.bf16.mxu0 %vm1030_vm1, %v10651_v57  ;;  %10195 = vmatprep.mubr.msk.bf16.mxu1 %vm1030_vm1, %v10652_v62 }
0x15ef   : > { %10176 = vmatmul.mubr.msk.bf16.gmra.mxu0 %vm1030_vm1, %v10653_v15  ;;  %10196 = vmatmul.mubr.msk.bf16.gmra.mxu1 %vm1030_vm1, %v10654_v28 }
0x15f0   : > { %10215 = vmatprep.mubr.bf16.mxu0 %v10655_v51 }
0x1697   : > { %v12702_v27 = vpop.f32.mrf.mxu0  ;;  %v10185_v47 = vpop.f32.mrf.mxu1 }
0x1699   : > { %v12704_v39 = vpop.f32.mrf.mxu0  ;;  %v12706_v1 = vpop.f32.mrf.mxu1 }
0x169b   : > { %v12708_v52 = vpop.f32.mrf.mxu0  ;;  %v12710_v40 = vpop.f32.mrf.mxu1 }
0x169d   : > { %v12714_v13 = vpop.f32.mrf.mxu0  ;;  %v12716_v60 = vpop.f32.mrf.mxu1 }
0x169f   : > { %v12718_v41 = vpop.f32.mrf.mxu0  ;;  %v10189_v32 = vpop.f32.mrf.mxu1 }
0x16a1   : > { %v12722_v59 = vpop.f32.mrf.mxu0  ;;  %v5032_v7 = vpop.f32.mrf.mxu1 }
0x16a3   : > { %v10190_v22 = vpop.f32.mrf.mxu1  ;;  %v12724_v33 = vpop.f32.mrf.mxu0 }
0x16a5   : > { %v5035_v18 = vpop.f32.mrf.mxu1  ;;  %v12728_v12 = vpop.f32.mrf.mxu0 }
0x16a7   : > { %v10193_v21 = vpop.f32.mrf.mxu1  ;;  %v12732_v19 = vpop.f32.mrf.mxu0 }
0x16a8   : > { %v12734_v30 = vadd.f32 %v10193_v21, %v4891_v55 }
0x16a9   : > { %v5048_v63 = vpop.f32.mrf.mxu1  ;;  %v12739_v45 = vpop.f32.mrf.mxu0 }
0x16aa   : > { %v5105_v53 = vmul.f32 0.70710677, %v12734_v30  ;;  %v12748_v57 = vadd.f32 %v5048_v63, %v4881_v48  ;;  %v12760_v48 = vadd.f32 %v10189_v32, %v4871_v6  ;;  %v12765_v63 = vadd.f32 %v10185_v47, %v4851_v5 }
0x16ab   : > { %v10194_v16 = vpop.f32.mrf.mxu1  ;;  %v12750_v62 = vpop.f32.mrf.mxu0  ;;  %v12775_v32 = vadd.f32 %v5032_v7, %v4861_v26  ;;  %v12779_v5 = vadd.f32 %v12710_v40, %v4856_v4 }
0x16ac   : > { %v12736_v44 = vadd.f32 %v10194_v16, %v4896_v25  ;;  %10963 = verf.f32 %v5105_v53  ;;  %v5103_v21 = vmul.f32 0.70710677, %v12748_v57  ;;  %v5101_v6 = vmul.f32 0.70710677, %v12760_v48 }
0x16ad   : > { %v5051_v50 = vpop.f32.mrf.mxu1  ;;  %v5097_v47 = vmul.f32 0.70710677, %v12765_v63  ;;  %v5099_v7 = vmul.f32 0.70710677, %v12775_v32 }
0x16ae   : > { %v5106_v36 = vmul.f32 0.70710677, %v12736_v44  ;;  %v12742_v35 = vadd.f32 %v5051_v50, %v4886_v42  ;;  %v12758_v42 = vpop.permute.xlu0 %4654  ;;  %v12769_v50 = vadd.f32 %v5035_v18, %v4866_v3 }
0x16af   : > { %v10197_v38 = vpop.f32.mrf.mxu1 }
0x16b0   : > { %v5073_v34 = vadd.f32 %v10197_v38, %v4911_v8  ;;  %v12753_v8 = vadd.f32 %v10190_v22, %v4876_v37  ;;  %v5104_v55 = vmul.f32 0.70710677, %v12742_v35  ;;  %v4841_v22 = vpop.permute.xlu1 %4840  ;;  %v5100_v18 = vmul.f32 0.70710677, %v12769_v50 }
0x16b1   : > { %v5064_v61 = vpop.f32.mrf.mxu1 }
0x16b2   : > { %v5109_v49 = vmul.f32 0.70710677, %v5073_v34  ;;  %v12744_v23 = vadd.f32 %v5064_v61, %v4901_v11  ;;  %v5102_v16 = vmul.f32 0.70710677, %v12753_v8  ;;  %v4846_v53 = vpop.permute.xlu0 %4845 }
0x16b3   : > { %v10198_v0 = vpop.f32.mrf.mxu1 }
0x16b4   : > { %v5076_v15 = vadd.f32 %v10198_v0, %v4916_v24  ;;  %10965 = verf.f32 %v5109_v49  ;;  %v5107_v28 = vmul.f32 0.70710677, %v12744_v23  ;;  %v12763_v24 = vpop.f32.mrf.mxu0 }
0x16b5   : > { %v5067_v51 = vpop.f32.mrf.mxu1  ;;  %10967 = verf.f32 %v5106_v36  ;;  %v5098_v36 = vmul.f32 0.70710677, %v12779_v5 }
0x16b6   : > { %v5110_v11 = vmul.f32 0.70710677, %v5076_v15  ;;  %10969 = verf.f32 %v5107_v28  ;;  %v12756_v25 = vadd.f32 %v5067_v51, %v4906_v54  ;;  %v12772_v54 = vadd.f32 %v12706_v1, %v4841_v22  ;;  %v10177_v38 = vpop.f32.mrf.mxu0 }
0x16b7   : > { %v12784_v1 = vadd.f32 %v12716_v60, %v4846_v53  ;;  %v5093_v51 = vmul.f32 0.5, %v5073_v34  ;;  %v5094_v22 = vmul.f32 0.5, %v5076_v15  ;;  %v5090_v53 = vmul.f32 0.5, %v12736_v44 }
0x16b8   : > { %10971 = verf.f32 %v5110_v11  ;;  %v5108_v37 = vmul.f32 0.70710677, %v12756_v25  ;;  %v5095_v3 = vmul.f32 0.70710677, %v12772_v54  ;;  %v4823_v26 = vpop.f32.mrf.mxu0  ;;  %v5089_v15 = vmul.f32 0.5, %v12734_v30 }
0x16b9   : > { %10973 = verf.f32 %v5104_v55  ;;  %v10964_v61 = vpop.eup %10963  ;;  %v5096_v4 = vmul.f32 0.70710677, %v12784_v1  ;;  %v5088_v30 = vmul.f32 0.5, %v12742_v35 }
0x16ba   : > { %10975 = verf.f32 %v5108_v37  ;;  %v10178_v60 = vpop.f32.mrf.mxu0 }
0x16bb   : > { %10977 = verf.f32 %v5103_v21  ;;  %v4835_v34 = vadd.f32 %v10178_v60, %v12720_v43  ;;  %v4824_v43 = vadd.f32 %v4823_v26, %v12726_v56 }
0x16bc   : > { %10979 = verf.f32 %v5102_v16 }
0x16bd   : > { %10981 = verf.f32 %v5101_v6 }
0x16be   : > { %10983 = verf.f32 %v5097_v47  ;;  %v4645_v47 = vpop.permute.xlu0 %4644 }
0x16bf   : > { %10985 = verf.f32 %v5100_v18  ;;  %v5091_v18 = vmul.f32 0.5, %v12744_v23 }
0x16c0   : > { %10987 = verf.f32 %v5095_v3 }
0x16c1   : > { %v10966_v49 = vpop.eup %10965  ;;  %10989 = verf.f32 %v5099_v7  ;;  %v4832_v7 = vadd.f32 %v10177_v38, %v12712_v17  ;;  %v4819_v17 = vadd.f32 %v12750_v62, %v12758_v42  ;;  %v5087_v62 = vmul.f32 0.5, %v12748_v57 }
0x16c2   : > { %v10968_v40 = vpop.eup %10967  ;;  %v5141_v0 = vadd.f32 1.0, %v10966_v49  ;;  %10991 = verf.f32 %v5098_v36  ;;  %v5137_v49 = vadd.f32 1.0, %v10964_v61  ;;  %v4826_v36 = vpop.f32.mrf.mxu0 }
0x16c3   : > { %v10970_v28 = vpop.eup %10969  ;;  %v5138_v21 = vadd.f32 1.0, %v10968_v40  ;;  %10993 = verf.f32 %v5096_v4  ;;  %v4640_v40 = vpop.permute.xlu1 %4639  ;;  %v4827_v38 = vadd.f32 %v4826_v36, %v12730_v46 }
0x16c4   : > { %v5139_v11 = vadd.f32 1.0, %v10970_v28  ;;  %v5157_v37 = vmul.f32 %v5141_v0, %v5093_v51  ;;  %v5092_v51 = vmul.f32 0.5, %v12756_v25  ;;  %v5153_v60 = vmul.f32 %v5137_v49, %v5089_v15 }
0x16c5   : > { %v10972_v55 = vpop.eup %10971  ;;  %v4808_v57 = vadd.f32 %v12739_v45, %v4640_v40  ;;  %v5083_v40 = vmul.f32 0.5, %v12775_v32 }
0x16c6   : > { %v5142_v16 = vadd.f32 1.0, %v10972_v55  ;;  %v10974_v6 = vpop.eup %10973  ;;  %v5155_v0 = vmul.f32 %v5139_v11, %v5091_v18  ;;  %v5154_v55 = vmul.f32 %v5138_v21, %v5090_v53  ;;  %v5173_v2 = vmul.f32 %v5157_v37, %v4832_v7 }
0x16c7   : > { %v10976_v3 = vpop.eup %10975  ;;  %v5136_v44 = vadd.f32 1.0, %v10974_v6  ;;  %v4816_v21 = vadd.f32 %v12732_v19, %v12746_v31  ;;  %v4630_v26 = vpop.permute.xlu1 %4629  ;;  %v5086_v18 = vmul.f32 0.5, %v12753_v8  ;;  %v4811_v19 = vadd.f32 %v12763_v24, %v4645_v47 }
0x16c8   : > { %v5158_v29 = vmul.f32 %v5142_v16, %v5094_v22  ;;  %v10978_v28 = vpop.eup %10977  ;;  %v5140_v4 = vadd.f32 1.0, %v10976_v3  ;;  %v4635_v16 = vpop.permute.xlu0 %4634  ;;  %v5170_v46 = vmul.f32 %v5154_v55, %v4819_v17  ;;  %v5084_v24 = vmul.f32 0.5, %v12769_v50 }
0x16c9   : > { %v10980_v20 = vpop.eup %10979  ;;  %v5135_v22 = vadd.f32 1.0, %v10978_v28  ;;  %v5152_v56 = vmul.f32 %v5136_v44, %v5088_v30  ;;  %v5169_v31 = vmul.f32 %v5153_v60, %v4816_v21  ;;  %v4800_v45 = vadd.f32 %v12718_v41, %v4630_v26 }
0x16ca   : > { %v5174_v23 = vmul.f32 %v5158_v29, %v4835_v34  ;;  %v5156_v61 = vmul.f32 %v5140_v4, %v5092_v51  ;;  %v10982_v25 = vpop.eup %10981  ;;  %v5171_v29 = vmul.f32 %v5155_v0, %v4824_v43  ;;  %v5134_v53 = vadd.f32 1.0, %v10980_v20 }
0x16cb   : > { %v10984_v6 = vpop.eup %10983  ;;  %v5133_v3 = vadd.f32 1.0, %v10982_v25  ;;  %v5151_v49 = vmul.f32 %v5135_v22, %v5087_v62  ;;  %v5085_v20 = vmul.f32 0.5, %v12760_v48  ;;  %v5180_v15 = vpack.c.bf16 %v5170_v46, %v5169_v31  ;;  %v4620_v48 = vpop.permute.xlu1 %4619 }
0x16cc   : > { %v5182_v11 = vpack.c.bf16 %v5174_v23, %v5173_v2  ;;  %v5172_v37 = vmul.f32 %v5156_v61, %v4827_v38  ;;  %v10986_v42 = vpop.eup %10985  ;;  %v5150_v36 = vmul.f32 %v5134_v53, %v5086_v18  ;;  %v5168_v0 = vmul.f32 %v5152_v56, %v4811_v19  ;;  %v4625_v8 = vpop.permute.xlu0 %4624  ;;  %v10657_v19 = vld [vmem:[%s11461_s30 + $0x10] sm:$0xff]  }
0x16cd   : > { %v10988_v35 = vpop.eup %10987  ;;  %v5132_v28 = vadd.f32 1.0, %v10986_v42  ;;  %v4803_v51 = vadd.f32 %v12724_v33, %v4635_v16  ;;  %v5149_v55 = vmul.f32 %v5133_v3, %v5085_v20  ;;  %v5167_v47 = vmul.f32 %v5151_v49, %v4808_v57  ;;  %v10656_v49 = vld [vmem:[%s14029_s8 + $0x8] sm:$0xff]  }
0x16ce   : > { %10199 = vmatprep.subr.bf16.mxu0 %v5182_v11  ;;  %v5181_v2 = vpack.c.bf16 %v5172_v37, %v5171_v29  ;;  %v10990_v7 = vpop.eup %10989  ;;  %v5082_v61 = vmul.f32 0.5, %v12779_v5  ;;  %v5129_v33 = vadd.f32 1.0, %v10984_v6  ;;  %v4795_v22 = vadd.f32 %v12728_v12, %v4625_v8 }
0x16cf   : > { %10200 = vmatpush3.bf16.msra.mxu0 %v5182_v11  ;;  %v10992_v34 = vpop.eup %10991  ;;  %v5131_v44 = vadd.f32 1.0, %v10990_v7  ;;  %v5148_v17 = vmul.f32 %v5132_v28, %v5084_v24  ;;  %v5179_v43 = vpack.c.bf16 %v5168_v0, %v5167_v47  ;;  %v5166_v38 = vmul.f32 %v5150_v36, %v4803_v51  ;;  %v4610_v29 = vpop.permute.xlu1 %4609 }
0x16d0   : > { %10201 = vmatprep.subr.bf16.mxu0 %v5181_v2  ;;  %v10994_v4 = vpop.eup %10993  ;;  %v5130_v23 = vadd.f32 1.0, %v10992_v34  ;;  %v5165_v50 = vmul.f32 %v5149_v55, %v4800_v45  ;;  %v4615_v30 = vpop.permute.xlu0 %4614  ;;  %v5081_v11 = vmul.f32 0.5, %v12765_v63  ;;  %v4792_v41 = vadd.f32 %v12722_v59, %v4620_v48 }
0x16d1   : > { %v5147_v60 = vmul.f32 %v5131_v44, %v5083_v40  ;;  %v5128_v32 = vadd.f32 1.0, %v10994_v4  ;;  %v5164_v21 = vmul.f32 %v5148_v17, %v4795_v22  ;;  %v4787_v37 = vadd.f32 %v12708_v52, %v4615_v30 }
0x16d2   : > { %v5146_v25 = vmul.f32 %v5130_v23, %v5082_v61  ;;  %v5178_v16 = vpack.c.bf16 %v5166_v38, %v5165_v50  ;;  %v5145_v5 = vmul.f32 %v5129_v33, %v5081_v11  ;;  %v5127_v6 = vadd.f32 1.0, %v10988_v35 }
0x16d3   : > { %10202 = vmatpush3.bf16.msra.mxu0 %v5181_v2  ;;  %v5080_v53 = vmul.f32 0.5, %v12784_v1  ;;  %v5163_v12 = vmul.f32 %v5147_v60, %v4792_v41  ;;  %v4784_v62 = vadd.f32 %v12702_v27, %v4610_v29  ;;  %v5079_v63 = vmul.f32 0.5, %v12772_v54  ;;  %v4600_v1 = vpop.permute.xlu1 %4599 }
0x16d4   : > { %10203 = vmatprep.subr.bf16.mxu0 %v5180_v15  ;;  %v5162_v46 = vmul.f32 %v5146_v25, %v4787_v37  ;;  %v4605_v42 = vpop.permute.xlu0 %4604  ;;  %v4776_v2 = vadd.f32 %v12704_v39, %v4600_v1 }
0x16d5   : > { %v5144_v56 = vmul.f32 %v5128_v32, %v5080_v53  ;;  %v5177_v59 = vpack.c.bf16 %v5164_v21, %v5163_v12  ;;  %v5143_v26 = vmul.f32 %v5127_v6, %v5079_v63  ;;  %v4779_v52 = vadd.f32 %v12714_v13, %v4605_v42  ;;  %v10659_v13 = vld [vmem:[%s14030_s6 + $0x10] sm:$0xff]  }
0x16d6   : > { %v5161_v18 = vmul.f32 %v5145_v5, %v4784_v62  ;;  %10231 = vmatprep.mubr.msk.bf16.mxu1 %vm1030_vm1, %v10659_v13 }
0x16d7   : > { %10204 = vmatpush3.bf16.msra.mxu0 %v5180_v15  ;;  %v5160_v27 = vmul.f32 %v5144_v56, %v4779_v52  ;;  %v5159_v54 = vmul.f32 %v5143_v26, %v4776_v2  ;;  %v5251_v7 = vpop.permute.xlu1 %5250 }
0x16d8   : > { %10205 = vmatprep.subr.bf16.mxu0 %v5179_v43  ;;  %v5176_v35 = vpack.c.bf16 %v5162_v46, %v5161_v18  ;;  %v5256_v57 = vpop.permute.xlu0 %5255 }
0x16d9   : > { %v5175_v3 = vpack.c.bf16 %v5160_v27, %v5159_v54 }
0x16db   : > { %10206 = vmatpush3.bf16.msra.mxu0 %v5179_v43  ;;  %v5261_v51 = vpop.permute.xlu1 %5260 }
0x16dc   : > { %10207 = vmatprep.subr.bf16.mxu0 %v5178_v16  ;;  %v5266_v44 = vpop.permute.xlu0 %5265 }
0x16df   : > { %10208 = vmatpush3.bf16.msra.mxu0 %v5178_v16  ;;  %v5362_v18 = vpop.permute.xlu1 %5361 }
0x16e0   : > { %10209 = vmatprep.subr.bf16.mxu0 %v5177_v59  ;;  %v5367_v52 = vpop.permute.xlu0 %5366 }
0x16e3   : > { %10210 = vmatpush3.bf16.msra.mxu0 %v5177_v59  ;;  %v5386_v2 = vpop.permute.xlu1 %5385 }
0x16e4   : > { %10211 = vmatprep.subr.bf16.mxu0 %v5176_v35  ;;  %v5391_v1 = vpop.permute.xlu0 %5390 }
0x16e7   : > { %10212 = vmatpush3.bf16.msra.mxu0 %v5176_v35  ;;  %v5352_v27 = vpop.permute.xlu1 %5351 }
0x16e8   : > { %10213 = vmatprep.subr.bf16.mxu0 %v5175_v3  ;;  %v5357_v35 = vpop.permute.xlu0 %5356 }
0x16eb   : > { %10214 = vmatpush3.bf16.msra.mxu0 %v5175_v3 }
0x16ee   : > { %10216 = vmatmul.mubr.bf16.vlgmr.msra.gmra.mxu0 %v10656_v49 }
0x16ef   : > { %10223 = vmatprep.mubr.msk.bf16.mxu0 %vm1030_vm1, %v10657_v19 }
0x17ae   : > { %v10217_v31 = vpop.f32.mrf.mxu0 }
0x17af   : > { %v5246_v36 = vadd.f32 %v10217_v31, %v12651_v10 }
0x17b0   : > { %v5229_v39 = vpop.f32.mrf.mxu0 }
0x17b1   : > { %v5244_v20 = vadd.f32 %v5229_v39, %v12648_v58  ;;  %v12832_v4 = vadd.f32 %v5261_v51, %v5246_v36 }
0x17b2   : > { %v10218_v34 = vpop.f32.mrf.mxu0 }
0x17b3   : > { %v12828_v15 = vadd.f32 %v5251_v7, %v5244_v20  ;;  %v5247_v0 = vadd.f32 %v10218_v34, %v12657_v9  ;;  %v5310_v9 = vsel %vm1017_vm0, %v12832_v4, 0.0  ;;  %v5376_v34 = vpop.permute.xlu1 %5375 }
0x17b4   : > { %v5232_v28 = vpop.f32.mrf.mxu0 }
0x17b5   : > { %v5245_v8 = vadd.f32 %v5232_v28, %v12653_v14  ;;  %v5307_v58 = vsel %vm1017_vm0, %v12828_v15, 0.0  ;;  %v12838_v24 = vadd.f32 %v5266_v44, %v5247_v0 }
0x17b7   : > { %v12834_v55 = vadd.f32 %v5256_v57, %v5245_v8  ;;  %v5312_v14 = vsel %vm1017_vm0, %v12838_v24, 0.0  ;;  %v5381_v57 = vpop.permute.xlu0 %5380 }
0x17b9   : > { %v5308_v10 = vsel %vm1017_vm0, %v12834_v55, 0.0 }
0x17ba   : > { %v5309_v47 = vadd.f32 %v5308_v10, %v5307_v58  ;;  %v10658_v58 = vld [vmem:[%s11461_s30 + $0x18] sm:$0xff]  }
0x17bb   : > { %v10660_v10 = vld [vmem:[%s14030_s6 + $0x18] sm:$0xff]  }
0x17bc   : > { %v5311_v48 = vadd.f32 %v5310_v9, %v5309_v47  ;;  %v14058_v47 = vmov 0.0  }
0x17be   : > { %v5313_v45 = vadd.f32 %v5312_v14, %v5311_v48 }
0x17c0   : > { %v5314_v40 = vrot.slane %v5313_v45, 4 }
0x17c2   : > { %v5315_v23 = vadd.f32 %v5314_v40, %v5313_v45 }
0x17c4   : > { %v5316_v17 = vrot.slane %v5315_v23, 2 }
0x17c6   : > { %v5317_v43 = vadd.f32 %v5316_v17, %v5315_v23 }
0x17c8   : > { %v5318_v38 = vrot.slane %v5317_v43, 1 }
0x17ca   : > { %v5319_v61 = vadd.f32 %v5318_v38, %v5317_v43 }
0x17cc   : > { %v5320_v33 = vmul.f32 0.03125, %v5319_v61 }
0x17ce   : > { %v5321_v60 = vsub.f32 %v12828_v15, %v5320_v33  ;;  %v5322_v22 = vsub.f32 %v12834_v55, %v5320_v33  ;;  %v5323_v50 = vsub.f32 %v12832_v4, %v5320_v33  ;;  %v5324_v30 = vsub.f32 %v12838_v24, %v5320_v33 }
0x17d0   : > { %v5325_v11 = vmul.f32 %v5321_v60, %v5321_v60  ;;  %v5326_v41 = vmul.f32 %v5322_v22, %v5322_v22  ;;  %v5327_v25 = vmul.f32 %v5323_v50, %v5323_v50  ;;  %v5328_v32 = vmul.f32 %v5324_v30, %v5324_v30 }
0x17d2   : > { %v5329_v16 = vsel %vm1017_vm0, %v5325_v11, 0.0  ;;  %v5330_v21 = vsel %vm1017_vm0, %v5326_v41, 0.0  ;;  %v5332_v37 = vsel %vm1017_vm0, %v5327_v25, 0.0  ;;  %v5334_v6 = vsel %vm1017_vm0, %v5328_v32, 0.0 }
0x17d3   : > { %v5331_v29 = vadd.f32 %v5330_v21, %v5329_v16 }
0x17d5   : > { %v5333_v5 = vadd.f32 %v5332_v37, %v5331_v29 }
0x17d7   : > { %v5335_v53 = vadd.f32 %v5334_v6, %v5333_v5 }
0x17d9   : > { %v5336_v12 = vrot.slane %v5335_v53, 4 }
0x17db   : > { %v5337_v62 = vadd.f32 %v5336_v12, %v5335_v53 }
0x17dd   : > { %v5338_v63 = vrot.slane %v5337_v62, 2 }
0x17df   : > { %v5339_v56 = vadd.f32 %v5338_v63, %v5337_v62 }
0x17e1   : > { %v5340_v59 = vrot.slane %v5339_v56, 1 }
0x17e3   : > { %v5341_v46 = vadd.f32 %v5340_v59, %v5339_v56 }
0x17e5   : > { %v5342_v42 = vmul.f32 0.03125, %v5341_v46 }
0x17e7   : > { %v5343_v26 = vadd.f32 1e-05, %v5342_v42 }
0x17e9   : > { %10995 = vrsqrt.f32 %v5343_v26 }
0x17f6   : > { %v10996_v54 = vpop.eup %10995 }
0x17f7   : > { %v5345_v3 = vmul.f32 %v10996_v54, %v5321_v60  ;;  %v5346_v49 = vmul.f32 %v10996_v54, %v5322_v22  ;;  %v5347_v19 = vmul.f32 %v10996_v54, %v5323_v50  ;;  %v5348_v13 = vmul.f32 %v10996_v54, %v5324_v30 }
0x17f9   : > { %v5369_v31 = vmul.f32 %v5352_v27, %v5345_v3  ;;  %v5370_v7 = vmul.f32 %v5357_v35, %v5346_v49  ;;  %v5371_v39 = vmul.f32 %v5362_v18, %v5347_v19  ;;  %v5372_v20 = vmul.f32 %v5367_v52, %v5348_v13 }
0x17fb   : > { %v5393_v36 = vadd.f32 %v5376_v34, %v5369_v31  ;;  %v5394_v28 = vadd.f32 %v5381_v57, %v5370_v7  ;;  %v5395_v0 = vadd.f32 %v5386_v2, %v5371_v39  ;;  %v5396_v8 = vadd.f32 %v5391_v1, %v5372_v20  ;;  %v10661_v39 = vld [vmem:[%s14028_s12 + $0x10] sm:$0xff]   ;;  %v10662_v34 = vld [vmem:[%s14028_s12 + $0x18] sm:$0xff]  }
0x17fd   : > { %v5398_v51 = vpack.c.bf16 %v5396_v8, %v5395_v0  ;;  %v5397_v44 = vpack.c.bf16 %v5394_v28, %v5393_v36 }
0x17ff   : > { %10219 = vmatprep.subr.bf16.mxu0 %v5398_v51  ;;  %10227 = vmatprep.subr.bf16.mxu1 %v5398_v51 }
0x1800   : > { %10220 = vmatpush3.bf16.msra.mxu0 %v5398_v51  ;;  %10228 = vmatpush3.bf16.msra.mxu1 %v5398_v51 }
0x1801   : > { %10221 = vmatprep.subr.bf16.mxu0 %v5397_v44  ;;  %10229 = vmatprep.subr.bf16.mxu1 %v5397_v44 }
0x1804   : > { %10222 = vmatpush3.bf16.msra.mxu0 %v5397_v44  ;;  %10230 = vmatpush3.bf16.msra.mxu1 %v5397_v44 }
0x1805   : > { %10235 = vmatprep.subr.bf16.mxu0 %v5398_v51 }
0x1807   : > { %10224 = vmatmul.mubr.msk.bf16.vlgmr.msra.gmra.mxu0 %vm1030_vm1, %v10658_v58  ;;  %10232 = vmatmul.mubr.msk.bf16.vlgmr.msra.gmra.mxu1 %vm1030_vm1, %v10660_v10 }
0x1808   : > { %10236 = vmatpush3.bf16.msra.mxu0 %v5398_v51  ;;  %10239 = vmatprep.mubr.msk.bf16.mxu0 %vm1030_vm1, %v10661_v39 }
0x1809   : > { %10237 = vmatprep.subr.bf16.mxu0 %v5397_v44 }
0x180c   : > { %10238 = vmatpush3.bf16.msra.mxu0 %v5397_v44 }
0x180d   : > { %10253 = vmatprep.subr.bf16.mxu0 %v14058_v47 }
0x180f   : > { %10240 = vmatmul.mubr.msk.bf16.vlgmr.msra.gmra.mxu0 %vm1030_vm1, %v10662_v34 }
0x1810   : > { %10261 = vmatprep.mubr.msk.bf16.mxu0 %vm11389_vm4, %v14058_v47 }
0x18c7   : > { %v12859_v9 = vpop.f32.mrf.mxu0  ;;  %v12861_v48 = vpop.f32.mrf.mxu1 }
0x18c9   : > { %v5449_v14 = vpop.f32.mrf.mxu0  ;;  %v5514_v45 = vpop.f32.mrf.mxu1 }
0x18ca   : > { %v5594_v40 = vpack.c.bf16 %v5449_v14, %v5449_v14  ;;  %v5595_v23 = vpack.c.bf16 %v5514_v45, %v5514_v45 }
0x18cb   : > { %v12863_v17 = vpop.f32.mrf.mxu0  ;;  %v12865_v43 = vpop.f32.mrf.mxu1 }
0x18cc   : > { %5597 = vxpose.xlu1.c.b16.start.end [1/1] (short) (narrow) %v5594_v40, 64  ;;  %v5626_v38 = vsel %vm1978_vm2, %v5595_v23, 0  ;;  %10533 = vmatprep.subr.msk.bf16.mxu1 %vm1978_vm2, %v5595_v23 }
0x18cd   : > { %v5452_v61 = vpop.f32.mrf.mxu0  ;;  %v5517_v33 = vpop.f32.mrf.mxu1  ;;  %10244 = vmatpush3.bf16.msra.mxu1 %v5626_v38 }
0x18ce   : > { %v5840_v60 = vpack.c.bf16 %v5452_v61, %v5452_v61  ;;  %v5841_v22 = vpack.c.bf16 %v5517_v33, %v5517_v33 }
0x18d0   : > { %5843 = vxpose.xlu0.c.b16.start.end [1/1] (short) (narrow) %v5840_v60, 64  ;;  %10534 = vmatprep.subr.msk.bf16.mxu1 %vm1978_vm2, %v5841_v22  ;;  %v5872_v11 = vsel %vm1978_vm2, %v5841_v22, 0 }
0x192e   : > { %v5605_v50 = vpop.trf.xlu1 }
0x192f   : > { %10245 = vmatprep.mubr.msk.bf16.mxu1 %vm1965_vm3, %v5605_v50 }
0x1932   : > { %v5606_v30 = vpop.trf.xlu1  ;;  %v5851_v41 = vpop.trf.xlu0 }
0x1933   : > { %10246 = vmatmul.mubr.msk.bf16.vlgmr.msra.gmra.mxu1 %vm1965_vm3, %v5606_v30 }
0x1934   : > { %10266 = vmatpush3.bf16.msra.mxu1 %v5872_v11 }
0x1935   : > { %10275 = vmatprep.subr.bf16.mxu1 %v14058_v47 }
0x1936   : > { %v5607_v25 = vpop.trf.xlu1  ;;  %v5852_v16 = vpop.trf.xlu0 }
0x1937   : > { %10249 = vmatprep.mubr.msk.bf16.mxu1 %vm1965_vm3, %v5607_v25 }
0x193a   : > { %v5608_v32 = vpop.trf.xlu1  ;;  %v5853_v21 = vpop.trf.xlu0 }
0x193b   : > { %10250 = vmatmul.mubr.msk.bf16.gmra.mxu1 %vm1965_vm3, %v5608_v32 }
0x193c   : > { %10267 = vmatprep.mubr.msk.bf16.mxu1 %vm1965_vm3, %v5851_v41 }
0x193e   : > { %v5854_v29 = vpop.trf.xlu0 }
0x1943   : > { %10268 = vmatmul.mubr.msk.bf16.vlgmr.msra.gmra.mxu1 %vm1965_vm3, %v5852_v16 }
0x1944   : > { %10271 = vmatprep.mubr.msk.bf16.mxu1 %vm1965_vm3, %v5853_v21 }
0x194b   : > { %10272 = vmatmul.mubr.msk.bf16.gmra.mxu1 %vm1965_vm3, %v5854_v29 }
0x194c   : > { %10283 = vmatprep.mubr.msk.bf16.mxu1 %vm11389_vm4, %v14058_v47 }
0x19f3   : > { %v12882_v37 = vpop.f32.mrf.mxu1 }
0x19f4   : > { %v5699_v31 = vsel %vm1017_vm0, %v12882_v37, -inf }
0x19f5   : > { %v12884_v5 = vpop.f32.mrf.mxu1 }
0x19f6   : > { %v5693_v36 = vsel %vm1017_vm0, %v12884_v5, -inf }
0x19f7   : > { %v12886_v6 = vpop.f32.mrf.mxu1 }
0x19f8   : > { %v5702_v57 = vsel %vm1017_vm0, %v12886_v6, -inf }
0x19f9   : > { %v12888_v53 = vpop.f32.mrf.mxu1 }
0x19fa   : > { %v5696_v8 = vsel %vm1017_vm0, %v12888_v53, -inf }
0x19fb   : > { %v10251_v12 = vpop.f32.mrf.mxu1 }
0x19fc   : > { %v5711_v62 = vsel %vm1017_vm0, %v10251_v12, -inf }
0x19fd   : > { %v12891_v63 = vpop.f32.mrf.mxu1  ;;  %5712 = vmax.xlane.f32.xlu0 %v5711_v62 }
0x19fe   : > { %v5705_v54 = vsel %vm1017_vm0, %v12891_v63, -inf }
0x19ff   : > { %v10252_v56 = vpop.f32.mrf.mxu1 }
0x1a00   : > { %v5714_v59 = vsel %vm1017_vm0, %v10252_v56, -inf }
0x1a01   : > { %5715 = vmax.xlane.f32.xlu1 %v5714_v59  ;;  %v12894_v46 = vpop.f32.mrf.mxu1 }
0x1a02   : > { %v5708_v19 = vsel %vm1017_vm0, %v12894_v46, -inf }
0x1a03   : > { %v12896_v42 = vpop.f32.mrf.mxu1 }
0x1a04   : > { %v5945_v20 = vsel %vm1017_vm0, %v12896_v42, -inf }
0x1a05   : > { %v12898_v26 = vpop.f32.mrf.mxu1 }
0x1a06   : > { %v5939_v0 = vsel %vm1017_vm0, %v12898_v26, -inf }
0x1a07   : > { %v12900_v52 = vpop.f32.mrf.mxu1 }
0x1a08   : > { %v5948_v28 = vsel %vm1017_vm0, %v12900_v52, -inf }
0x1a09   : > { %v12902_v18 = vpop.f32.mrf.mxu1 }
0x1a0a   : > { %v5942_v51 = vsel %vm1017_vm0, %v12902_v18, -inf }
0x1a0b   : > { %v10273_v1 = vpop.f32.mrf.mxu1 }
0x1a0c   : > { %v5957_v2 = vsel %vm1017_vm0, %v10273_v1, -inf }
0x1a0d   : > { %5958 = vmax.xlane.f32.xlu0 %v5957_v2  ;;  %v12905_v35 = vpop.f32.mrf.mxu1 }
0x1a0e   : > { %v5951_v49 = vsel %vm1017_vm0, %v12905_v35, -inf }
0x1a0f   : > { %v10274_v27 = vpop.f32.mrf.mxu1 }
0x1a10   : > { %v5960_v3 = vsel %vm1017_vm0, %v10274_v27, -inf }
0x1a11   : > { %5706 = vmax.xlane.f32.xlu0 %v5705_v54  ;;  %5961 = vmax.xlane.f32.xlu1 %v5960_v3  ;;  %v12914_v13 = vpop.f32.mrf.mxu1 }
0x1a12   : > { %v5954_v7 = vsel %vm1017_vm0, %v12914_v13, -inf }
0x1a15   : > { %5952 = vmax.xlane.f32.xlu0 %v5951_v49  ;;  %5709 = vmax.xlane.f32.xlu1 %v5708_v19 }
0x1a19   : > { %5700 = vmax.xlane.f32.xlu0 %v5699_v31  ;;  %5955 = vmax.xlane.f32.xlu1 %v5954_v7 }
0x1a1d   : > { %5946 = vmax.xlane.f32.xlu0 %v5945_v20  ;;  %5703 = vmax.xlane.f32.xlu1 %v5702_v57 }
0x1a21   : > { %5694 = vmax.xlane.f32.xlu0 %v5693_v36  ;;  %5949 = vmax.xlane.f32.xlu1 %v5948_v28 }
0x1a25   : > { %5940 = vmax.xlane.f32.xlu0 %v5939_v0  ;;  %5697 = vmax.xlane.f32.xlu1 %v5696_v8 }
0x1a29   : > { %5943 = vmax.xlane.f32.xlu1 %v5942_v51 }
0x1a86   : > { %v5713_v44 = vpop.xlane.xlu0 %5712 }
0x1a87   : > { %v5723_v58 = vsub.f32 %v10251_v12, %v5713_v44 }
0x1a89   : > { %v5737_v10 = vmul.f32 1.442695, %v5723_v58 }
0x1a8a   : > { %v5716_v14 = vpop.xlane.xlu1 %5715 }
0x1a8b   : > { %10997 = vpow2.f32 %v5737_v10  ;;  %v5724_v45 = vsub.f32 %v10252_v56, %v5716_v14 }
0x1a8d   : > { %v5739_v40 = vmul.f32 1.442695, %v5724_v45 }
0x1a8f   : > { %10999 = vpow2.f32 %v5739_v40 }
0x1a96   : > { %v5959_v23 = vpop.xlane.xlu0 %5958 }
0x1a97   : > { %v5969_v38 = vsub.f32 %v10273_v1, %v5959_v23 }
0x1a98   : > { %v12940_v61 = vpop.eup %10997 }
0x1a99   : > { %v5983_v33 = vmul.f32 1.442695, %v5969_v38  ;;  %v5759_v60 = vsel %vm1017_vm0, %v12940_v61, 0.0 }
0x1a9a   : > { %v5962_v22 = vpop.xlane.xlu1 %5961  ;;  %5760 = vadd.xlane.f32.xlu0 %v5759_v60  ;;  %v5707_v50 = vpop.xlane.xlu0 %5706 }
0x1a9b   : > { %11001 = vpow2.f32 %v5983_v33  ;;  %v5970_v30 = vsub.f32 %v10274_v27, %v5962_v22  ;;  %v5721_v11 = vsub.f32 %v12891_v63, %v5707_v50 }
0x1a9c   : > { %v12945_v41 = vpop.eup %10999 }
0x1a9d   : > { %v5985_v25 = vmul.f32 1.442695, %v5970_v30  ;;  %v5733_v32 = vmul.f32 1.442695, %v5721_v11  ;;  %v5762_v16 = vsel %vm1017_vm0, %v12945_v41, 0.0 }
0x1a9e   : > { %v5710_v21 = vpop.xlane.xlu1 %5709  ;;  %5763 = vadd.xlane.f32.xlu1 %v5762_v16  ;;  %v5953_v29 = vpop.xlane.xlu0 %5952 }
0x1a9f   : > { %11003 = vpow2.f32 %v5985_v25  ;;  %v5722_v12 = vsub.f32 %v12894_v46, %v5710_v21  ;;  %v5967_v62 = vsub.f32 %v12905_v35, %v5953_v29 }
0x1aa0   : > { %11005 = vpow2.f32 %v5733_v32 }
0x1aa1   : > { %v5735_v56 = vmul.f32 1.442695, %v5722_v12  ;;  %v5979_v59 = vmul.f32 1.442695, %v5967_v62 }
0x1aa2   : > { %v5956_v1 = vpop.xlane.xlu1 %5955  ;;  %v5701_v63 = vpop.xlane.xlu0 %5700 }
0x1aa3   : > { %11007 = vpow2.f32 %v5735_v56  ;;  %v5968_v2 = vsub.f32 %v12914_v13, %v5956_v1  ;;  %v5719_v27 = vsub.f32 %v12882_v37, %v5701_v63 }
0x1aa4   : > { %11009 = vpow2.f32 %v5979_v59 }
0x1aa5   : > { %v5981_v54 = vmul.f32 1.442695, %v5968_v2  ;;  %v5729_v3 = vmul.f32 1.442695, %v5719_v27  ;;  %v6086_v2 = vpack.c.bf16 %v12859_v9, %v12859_v9  ;;  %v6332_v27 = vpack.c.bf16 %v12863_v17, %v12863_v17 }
0x1aa6   : > { %v5704_v49 = vpop.xlane.xlu1 %5703  ;;  %v5947_v19 = vpop.xlane.xlu0 %5946 }
0x1aa7   : > { %11011 = vpow2.f32 %v5981_v54  ;;  %v5720_v46 = vsub.f32 %v12886_v6, %v5704_v49  ;;  %v5965_v35 = vsub.f32 %v12896_v42, %v5947_v19 }
0x1aa8   : > { %v12955_v31 = vpop.eup %11001  ;;  %11013 = vpow2.f32 %v5729_v3 }
0x1aa9   : > { %v5731_v7 = vmul.f32 1.442695, %v5720_v46  ;;  %v5975_v39 = vmul.f32 1.442695, %v5965_v35  ;;  %v6005_v13 = vsel %vm1017_vm0, %v12955_v31, 0.0 }
0x1aaa   : > { %v5950_v20 = vpop.xlane.xlu1 %5949  ;;  %6006 = vadd.xlane.f32.xlu0 %v6005_v13  ;;  %v5695_v37 = vpop.xlane.xlu0 %5694 }
0x1aab   : > { %11015 = vpow2.f32 %v5731_v7  ;;  %v5966_v57 = vsub.f32 %v12900_v52, %v5950_v20  ;;  %v5717_v34 = vsub.f32 %v12884_v5, %v5695_v37 }
0x1aac   : > { %v12961_v36 = vpop.eup %11003  ;;  %11017 = vpow2.f32 %v5975_v39 }
0x1aad   : > { %v12963_v6 = vpop.eup %11005  ;;  %v5977_v42 = vmul.f32 1.442695, %v5966_v57  ;;  %v5725_v28 = vmul.f32 1.442695, %v5717_v34  ;;  %v6008_v0 = vsel %vm1017_vm0, %v12961_v36, 0.0 }
0x1aae   : > { %6009 = vadd.xlane.f32.xlu1 %v6008_v0  ;;  %v5698_v8 = vpop.xlane.xlu1 %5697  ;;  %v5753_v51 = vsel %vm1017_vm0, %v12963_v6, 0.0  ;;  %v5941_v44 = vpop.xlane.xlu0 %5940 }
0x1aaf   : > { %11019 = vpow2.f32 %v5977_v42  ;;  %v5718_v52 = vsub.f32 %v12888_v53, %v5698_v8  ;;  %5754 = vadd.xlane.f32.xlu0 %v5753_v51  ;;  %v5963_v5 = vsub.f32 %v12898_v26, %v5941_v44 }
0x1ab0   : > { %v12971_v58 = vpop.eup %11007  ;;  %11021 = vpow2.f32 %v5725_v28 }
0x1ab1   : > { %v12973_v10 = vpop.eup %11009  ;;  %v5727_v14 = vmul.f32 1.442695, %v5718_v52  ;;  %v5971_v45 = vmul.f32 1.442695, %v5963_v5  ;;  %v5756_v40 = vsel %vm1017_vm0, %v12971_v58, 0.0 }
0x1ab2   : > { %5757 = vadd.xlane.f32.xlu1 %v5756_v40  ;;  %v5944_v23 = vpop.xlane.xlu1 %5943  ;;  %v5999_v38 = vsel %vm1017_vm0, %v12973_v10, 0.0 }
0x1ab3   : > { %11023 = vpow2.f32 %v5727_v14  ;;  %v5964_v53 = vsub.f32 %v12902_v18, %v5944_v23  ;;  %6000 = vadd.xlane.f32.xlu0 %v5999_v38 }
0x1ab4   : > { %v12980_v26 = vpop.eup %11011  ;;  %11025 = vpow2.f32 %v5971_v45 }
0x1ab5   : > { %v12982_v33 = vpop.eup %11013  ;;  %v5973_v60 = vmul.f32 1.442695, %v5964_v53  ;;  %v6002_v22 = vsel %vm1017_vm0, %v12980_v26, 0.0 }
0x1ab6   : > { %6003 = vadd.xlane.f32.xlu1 %v6002_v22  ;;  %v5747_v50 = vsel %vm1017_vm0, %v12982_v33, 0.0 }
0x1ab7   : > { %11027 = vpow2.f32 %v5973_v60  ;;  %5748 = vadd.xlane.f32.xlu0 %v5747_v50 }
0x1ab8   : > { %v12988_v30 = vpop.eup %11015 }
0x1ab9   : > { %v12990_v11 = vpop.eup %11017  ;;  %v5750_v18 = vsel %vm1017_vm0, %v12988_v30, 0.0 }
0x1aba   : > { %5751 = vadd.xlane.f32.xlu1 %v5750_v18  ;;  %v5993_v25 = vsel %vm1017_vm0, %v12990_v11, 0.0 }
0x1abb   : > { %5994 = vadd.xlane.f32.xlu0 %v5993_v25 }
0x1abc   : > { %v12996_v32 = vpop.eup %11019 }
0x1abd   : > { %v12998_v16 = vpop.eup %11021  ;;  %v5996_v21 = vsel %vm1017_vm0, %v12996_v32, 0.0 }
0x1abe   : > { %5997 = vadd.xlane.f32.xlu1 %v5996_v21  ;;  %v5741_v29 = vsel %vm1017_vm0, %v12998_v16, 0.0 }
0x1abf   : > { %5742 = vadd.xlane.f32.xlu0 %v5741_v29 }
0x1ac0   : > { %v13004_v12 = vpop.eup %11023 }
0x1ac1   : > { %v13006_v62 = vpop.eup %11025  ;;  %v5744_v56 = vsel %vm1017_vm0, %v13004_v12, 0.0 }
0x1ac2   : > { %5745 = vadd.xlane.f32.xlu1 %v5744_v56  ;;  %v5987_v59 = vsel %vm1017_vm0, %v13006_v62, 0.0 }
0x1ac3   : > { %5988 = vadd.xlane.f32.xlu0 %v5987_v59 }
0x1ac4   : > { %v13012_v1 = vpop.eup %11027 }
0x1ac5   : > { %v5990_v63 = vsel %vm1017_vm0, %v13012_v1, 0.0 }
0x1ac6   : > { %5991 = vadd.xlane.f32.xlu1 %v5990_v63 }
0x1af0   : > { %6089 = vxpose.xlu0.c.b16.start.end [1/1] (short) (narrow) %v6086_v2, 64 }
0x1af3   : > { %6335 = vxpose.xlu1.c.b16.start.end [1/1] (short) (narrow) %v6332_v27, 64 }
0x1b23   : > { %v5761_v54 = vpop.xlane.xlu0 %5760 }
0x1b24   : > { %11029 = vrcp.f32 %v5761_v54 }
0x1b27   : > { %v5764_v3 = vpop.xlane.xlu1 %5763 }
0x1b28   : > { %11031 = vrcp.f32 %v5764_v3 }
0x1b31   : > { %v11030_v49 = vpop.eup %11029 }
0x1b32   : > { %v5779_v35 = vmul.f32 %v11030_v49, %v12940_v61 }
0x1b33   : > { %v6007_v19 = vpop.xlane.xlu0 %6006 }
0x1b34   : > { %11033 = vrcp.f32 %v6007_v19  ;;  %v13042_v19 = vpop.f32.mrf.mxu0 }
0x1b35   : > { %v11032_v46 = vpop.eup %11031 }
0x1b36   : > { %v5780_v7 = vmul.f32 %v11032_v46, %v12945_v41 }
0x1b37   : > { %v6010_v39 = vpop.xlane.xlu1 %6009 }
0x1b38   : > { %11035 = vrcp.f32 %v6010_v39  ;;  %v5755_v9 = vpop.xlane.xlu0 %5754  ;;  %v5784_v13 = vpack.c.bf16 %v5780_v7, %v5779_v35 }
0x1b39   : > { %11037 = vrcp.f32 %v5755_v9  ;;  %v6087_v9 = vpack.c.bf16 %v12861_v48, %v12861_v48 }
0x1b3a   : > { %v5798_v17 = vsel %vm1017_vm0, %v5784_v13, 0 }
0x1b3b   : > { %v5758_v20 = vpop.xlane.xlu1 %5757  ;;  %10254 = vmatpush3.bf16.xpose.msra.mxu0 %v5798_v17 }
0x1b3c   : > { %11039 = vrcp.f32 %v5758_v20  ;;  %v6001_v37 = vpop.xlane.xlu0 %6000  ;;  %10255 = vmatprep.subr.bf16.mxu0 %v14058_v47 }
0x1b3d   : > { %11041 = vrcp.f32 %v6001_v37 }
0x1b3f   : > { %v6004_v57 = vpop.xlane.xlu1 %6003 }
0x1b40   : > { %11043 = vrcp.f32 %v6004_v57  ;;  %v5749_v34 = vpop.xlane.xlu0 %5748  ;;  %v6333_v57 = vpack.c.bf16 %v12865_v43, %v12865_v43 }
0x1b41   : > { %11045 = vrcp.f32 %v5749_v34  ;;  %v11034_v61 = vpop.eup %11033 }
0x1b42   : > { %v6025_v0 = vmul.f32 %v11034_v61, %v12955_v31  ;;  %v6364_v43 = vsel %vm1978_vm2, %v6333_v57, 0 }
0x1b43   : > { %v5752_v41 = vpop.xlane.xlu1 %5751 }
0x1b44   : > { %11047 = vrcp.f32 %v5752_v41  ;;  %v5995_v42 = vpop.xlane.xlu0 %5994 }
0x1b45   : > { %v11036_v28 = vpop.eup %11035  ;;  %11049 = vrcp.f32 %v5995_v42 }
0x1b46   : > { %v6026_v8 = vmul.f32 %v11036_v28, %v12961_v36  ;;  %v11038_v51 = vpop.eup %11037 }
0x1b47   : > { %v5998_v44 = vpop.xlane.xlu1 %5997  ;;  %v5777_v40 = vmul.f32 %v11038_v51, %v12963_v6 }
0x1b48   : > { %11051 = vrcp.f32 %v5998_v44  ;;  %v5743_v52 = vpop.xlane.xlu0 %5742  ;;  %v6030_v5 = vpack.c.bf16 %v6026_v8, %v6025_v0 }
0x1b49   : > { %v11040_v14 = vpop.eup %11039  ;;  %11053 = vrcp.f32 %v5743_v52 }
0x1b4a   : > { %v6044_v45 = vsel %vm1017_vm0, %v6030_v5, 0  ;;  %v5778_v23 = vmul.f32 %v11040_v14, %v12971_v58  ;;  %v11042_v38 = vpop.eup %11041 }
0x1b4b   : > { %v5746_v53 = vpop.xlane.xlu1 %5745  ;;  %10276 = vmatpush3.bf16.xpose.msra.mxu1 %v6044_v45  ;;  %v6023_v50 = vmul.f32 %v11042_v38, %v12973_v10 }
0x1b4c   : > { %11055 = vrcp.f32 %v5746_v53  ;;  %v5989_v31 = vpop.xlane.xlu0 %5988  ;;  %v5783_v60 = vpack.c.bf16 %v5778_v23, %v5777_v40  ;;  %10277 = vmatprep.subr.bf16.mxu1 %v14058_v47 }
0x1b4d   : > { %v11044_v36 = vpop.eup %11043  ;;  %11057 = vrcp.f32 %v5989_v31 }
0x1b4e   : > { %v5795_v22 = vsel %vm1017_vm0, %v5783_v60, 0  ;;  %v6024_v18 = vmul.f32 %v11044_v36, %v12980_v26  ;;  %v11046_v25 = vpop.eup %11045 }
0x1b4f   : > { %v5992_v6 = vpop.xlane.xlu1 %5991  ;;  %10256 = vmatpush3.bf16.xpose.msra.mxu0 %v5795_v22  ;;  %v5775_v56 = vmul.f32 %v11046_v25, %v12982_v33 }
0x1b50   : > { %11059 = vrcp.f32 %v5992_v6  ;;  %v6029_v58 = vpack.c.bf16 %v6024_v18, %v6023_v50  ;;  %10257 = vmatprep.subr.bf16.mxu0 %v14058_v47 }
0x1b51   : > { %v11048_v21 = vpop.eup %11047 }
0x1b52   : > { %v6041_v29 = vsel %vm1017_vm0, %v6029_v58, 0  ;;  %v5776_v59 = vmul.f32 %v11048_v21, %v12988_v30  ;;  %v11050_v63 = vpop.eup %11049 }
0x1b53   : > { %10278 = vmatpush3.bf16.xpose.msra.mxu1 %v6041_v29  ;;  %v6021_v27 = vmul.f32 %v11050_v63, %v12990_v11 }
0x1b54   : > { %v5782_v2 = vpack.c.bf16 %v5776_v59, %v5775_v56  ;;  %10279 = vmatprep.subr.bf16.mxu1 %v14058_v47 }
0x1b55   : > { %v11052_v10 = vpop.eup %11051  ;;  %v6343_v61 = vpop.trf.xlu1 }
0x1b56   : > { %v5792_v26 = vsel %vm1017_vm0, %v5782_v2, 0  ;;  %v6022_v54 = vmul.f32 %v11052_v10, %v12996_v32  ;;  %v11054_v3 = vpop.eup %11053  ;;  %v5579_v32 = vpop.f32.mrf.mxu0 }
0x1b57   : > { %10258 = vmatpush3.bf16.xpose.msra.mxu0 %v5792_v26  ;;  %v5773_v46 = vmul.f32 %v11054_v3, %v12998_v16  ;;  %v5596_v48 = vpack.c.bf16 %v5579_v32, %v5579_v32 }
0x1b58   : > { %v6028_v49 = vpack.c.bf16 %v6022_v54, %v6021_v27  ;;  %10259 = vmatprep.subr.bf16.mxu0 %v14058_v47  ;;  %v13054_v37 = vpop.f32.mrf.mxu0 }
0x1b59   : > { %v11056_v33 = vpop.eup %11055  ;;  %v6344_v28 = vpop.trf.xlu1 }
0x1b5a   : > { %v6038_v30 = vsel %vm1017_vm0, %v6028_v49, 0  ;;  %v5774_v35 = vmul.f32 %v11056_v33, %v13004_v12  ;;  %v11058_v7 = vpop.eup %11057  ;;  %v6097_v12 = vpop.trf.xlu0 }
0x1b5b   : > { %10280 = vmatpush3.bf16.xpose.msra.mxu1 %v6038_v30  ;;  %v6019_v17 = vmul.f32 %v11058_v7, %v13006_v62  ;;  %v5582_v62 = vpop.f32.mrf.mxu0 }
0x1b5c   : > { %v5781_v39 = vpack.c.bf16 %v5774_v35, %v5773_v46  ;;  %10281 = vmatprep.subr.bf16.mxu1 %v14058_v47  ;;  %v5842_v42 = vpack.c.bf16 %v5582_v62, %v5582_v62 }
0x1b5d   : > { %v11060_v11 = vpop.eup %11059  ;;  %v6345_v8 = vpop.trf.xlu1 }
0x1b5e   : > { %v5789_v13 = vsel %vm1017_vm0, %v5781_v39, 0  ;;  %v6020_v20 = vmul.f32 %v11060_v11, %v13012_v1  ;;  %v6118_v1 = vsel %vm1978_vm2, %v6087_v9, 0  ;;  %v6098_v41 = vpop.trf.xlu0 }
0x1b5f   : > { %10260 = vmatpush3.bf16.xpose.msra.mxu0 %v5789_v13 }
0x1b60   : > { %10535 = vmatprep.subr.msk.bf16.mxu0 %vm1978_vm2, %v6087_v9  ;;  %v6027_v16 = vpack.c.bf16 %v6020_v20, %v6019_v17 }
0x1b61   : > { %v6346_v44 = vpop.trf.xlu1 }
0x1b62   : > { %v6035_v34 = vsel %vm1017_vm0, %v6027_v16, 0  ;;  %v6099_v0 = vpop.trf.xlu0 }
0x1b63   : > { %10282 = vmatpush3.bf16.xpose.msra.mxu1 %v6035_v34 }
0x1b64   : > { %10536 = vmatprep.subr.msk.bf16.mxu1 %vm1978_vm2, %v6333_v57 }
0x1b66   : > { %10262 = vmatmul.mubr.msk.bf16.vlgmr.msra.gmra.mxu0 %vm1017_vm0, %v5596_v48  ;;  %v6100_v51 = vpop.trf.xlu0 }
0x1b67   : > { %10288 = vmatpush3.bf16.msra.mxu0 %v6118_v1  ;;  %10289 = vmatprep.mubr.msk.bf16.mxu0 %vm1965_vm3, %v6097_v12 }
0x1b68   : > { %10297 = vmatprep.subr.bf16.mxu0 %v14058_v47 }
0x1b6a   : > { %10284 = vmatmul.mubr.msk.bf16.vlgmr.msra.gmra.mxu1 %vm1017_vm0, %v5842_v42 }
0x1b6b   : > { %10310 = vmatpush3.bf16.msra.mxu1 %v6364_v43  ;;  %10311 = vmatprep.mubr.msk.bf16.mxu1 %vm1965_vm3, %v6343_v61 }
0x1b6c   : > { %10319 = vmatprep.subr.bf16.mxu1 %v14058_v47 }
0x1b6e   : > { %10290 = vmatmul.mubr.msk.bf16.vlgmr.msra.gmra.mxu0 %vm1965_vm3, %v6098_v41 }
0x1b6f   : > { %10293 = vmatprep.mubr.msk.bf16.mxu0 %vm1965_vm3, %v6099_v0 }
0x1b72   : > { %10312 = vmatmul.mubr.msk.bf16.vlgmr.msra.gmra.mxu1 %vm1965_vm3, %v6344_v28 }
0x1b73   : > { %10315 = vmatprep.mubr.msk.bf16.mxu1 %vm1965_vm3, %v6345_v8 }
0x1b76   : > { %10294 = vmatmul.mubr.msk.bf16.gmra.mxu0 %vm1965_vm3, %v6100_v51 }
0x1b77   : > { %10305 = vmatprep.mubr.msk.bf16.mxu0 %vm11389_vm4, %v14058_v47 }
0x1b7a   : > { %10316 = vmatmul.mubr.msk.bf16.gmra.mxu1 %vm1965_vm3, %v6346_v44 }
0x1b7b   : > { %10327 = vmatprep.mubr.msk.bf16.mxu1 %vm11389_vm4, %v14058_v47 }
0x1c26   : > { %v5834_v52 = vpop.f32.mrf.mxu0 }
0x1c28   : > { %v10263_v5 = vpop.f32.mrf.mxu0 }
0x1c2a   : > { %v5837_v14 = vpop.f32.mrf.mxu0  ;;  %v6080_v45 = vpop.f32.mrf.mxu1 }
0x1c2b   : > { %v13078_v40 = vpack.c.bf16 %v6080_v45, %v5834_v52 }
0x1c2c   : > { %v10264_v23 = vpop.f32.mrf.mxu0  ;;  %v10285_v38 = vpop.f32.mrf.mxu1 }
0x1c2e   : > { %v6083_v53 = vpop.f32.mrf.mxu1  ;;  %v13080_v31 = vpop.f32.mrf.mxu0 }
0x1c2f   : > { %v6191_v35 = vsel %vm1017_vm0, %v13080_v31, -inf }
0x1c30   : > { %v10286_v60 = vpop.f32.mrf.mxu1  ;;  %v13082_v36 = vpop.f32.mrf.mxu0 }
0x1c31   : > { %v6185_v32 = vsel %vm1017_vm0, %v13082_v36, -inf }
0x1c32   : > { %v13084_v22 = vpop.f32.mrf.mxu0  ;;  %v13086_v50 = vpop.f32.mrf.mxu1 }
0x1c33   : > { %v6437_v39 = vsel %vm1017_vm0, %v13086_v50, -inf  ;;  %v6194_v11 = vsel %vm1017_vm0, %v13084_v22, -inf }
0x1c34   : > { %v13088_v18 = vpop.f32.mrf.mxu0  ;;  %v13090_v25 = vpop.f32.mrf.mxu1 }
0x1c35   : > { %v6431_v13 = vsel %vm1017_vm0, %v13090_v25, -inf  ;;  %v6188_v17 = vsel %vm1017_vm0, %v13088_v18, -inf }
0x1c36   : > { %v10295_v6 = vpop.f32.mrf.mxu0  ;;  %v13092_v58 = vpop.f32.mrf.mxu1 }
0x1c37   : > { %v6203_v21 = vsel %vm1017_vm0, %v10295_v6, -inf  ;;  %v6440_v9 = vsel %vm1017_vm0, %v13092_v58, -inf }
0x1c38   : > { %v13095_v29 = vpop.f32.mrf.mxu1  ;;  %6204 = vmax.xlane.f32.xlu0 %v6203_v21  ;;  %v6170_v56 = vpop.f32.mrf.mxu0 }
0x1c39   : > { %v6197_v54 = vsel %vm1017_vm0, %v6170_v56, -inf  ;;  %v6434_v20 = vsel %vm1017_vm0, %v13095_v29, -inf }
0x1c3a   : > { %v10296_v59 = vpop.f32.mrf.mxu0  ;;  %v10317_v63 = vpop.f32.mrf.mxu1 }
0x1c3b   : > { %v6449_v2 = vsel %vm1017_vm0, %v10317_v63, -inf  ;;  %v6206_v10 = vsel %vm1017_vm0, %v10296_v59, -inf }
0x1c3c   : > { %v6416_v26 = vpop.f32.mrf.mxu1  ;;  %6450 = vmax.xlane.f32.xlu0 %v6449_v2  ;;  %6207 = vmax.xlane.f32.xlu1 %v6206_v10  ;;  %v6173_v49 = vpop.f32.mrf.mxu0 }
0x1c3d   : > { %v6443_v33 = vsel %vm1017_vm0, %v6416_v26, -inf  ;;  %v6200_v30 = vsel %vm1017_vm0, %v6173_v49, -inf }
0x1c3e   : > { %v10318_v27 = vpop.f32.mrf.mxu1 }
0x1c3f   : > { %v6452_v3 = vsel %vm1017_vm0, %v10318_v27, -inf }
0x1c40   : > { %6198 = vmax.xlane.f32.xlu0 %v6197_v54  ;;  %6453 = vmax.xlane.f32.xlu1 %v6452_v3  ;;  %v6419_v46 = vpop.f32.mrf.mxu1 }
0x1c41   : > { %v6446_v7 = vsel %vm1017_vm0, %v6419_v46, -inf }
0x1c44   : > { %6444 = vmax.xlane.f32.xlu0 %v6443_v33  ;;  %6201 = vmax.xlane.f32.xlu1 %v6200_v30 }
0x1c48   : > { %6192 = vmax.xlane.f32.xlu0 %v6191_v35  ;;  %6447 = vmax.xlane.f32.xlu1 %v6446_v7 }
0x1c4c   : > { %6438 = vmax.xlane.f32.xlu0 %v6437_v39  ;;  %6195 = vmax.xlane.f32.xlu1 %v6194_v11 }
0x1c50   : > { %6186 = vmax.xlane.f32.xlu0 %v6185_v32  ;;  %6441 = vmax.xlane.f32.xlu1 %v6440_v9 }
0x1c54   : > { %6432 = vmax.xlane.f32.xlu0 %v6431_v13  ;;  %6189 = vmax.xlane.f32.xlu1 %v6188_v17 }
0x1c58   : > { %6435 = vmax.xlane.f32.xlu1 %v6434_v20 }
0x1cc1   : > { %v6205_v16 = vpop.xlane.xlu0 %6204 }
0x1cc2   : > { %v6215_v12 = vsub.f32 %v10295_v6, %v6205_v16 }
0x1cc4   : > { %v6229_v57 = vmul.f32 1.442695, %v6215_v12 }
0x1cc5   : > { %v6451_v34 = vpop.xlane.xlu0 %6450  ;;  %v6208_v48 = vpop.xlane.xlu1 %6207 }
0x1cc6   : > { %11061 = vpow2.f32 %v6229_v57  ;;  %v6461_v61 = vsub.f32 %v10317_v63, %v6451_v34  ;;  %v6216_v62 = vsub.f32 %v10296_v59, %v6208_v48 }
0x1cc8   : > { %v6475_v1 = vmul.f32 1.442695, %v6461_v61  ;;  %v6231_v41 = vmul.f32 1.442695, %v6216_v62 }
0x1cc9   : > { %v6199_v42 = vpop.xlane.xlu0 %6198  ;;  %v6454_v43 = vpop.xlane.xlu1 %6453 }
0x1cca   : > { %11063 = vpow2.f32 %v6475_v1  ;;  %v6213_v28 = vsub.f32 %v6170_v56, %v6199_v42  ;;  %v6462_v0 = vsub.f32 %v10318_v27, %v6454_v43 }
0x1ccb   : > { %11065 = vpow2.f32 %v6231_v41 }
0x1ccc   : > { %v6225_v8 = vmul.f32 1.442695, %v6213_v28  ;;  %v6477_v51 = vmul.f32 1.442695, %v6462_v0 }
0x1ccd   : > { %v6445_v44 = vpop.xlane.xlu0 %6444  ;;  %v6202_v52 = vpop.xlane.xlu1 %6201 }
0x1cce   : > { %11067 = vpow2.f32 %v6225_v8  ;;  %v6459_v5 = vsub.f32 %v6416_v26, %v6445_v44  ;;  %v6214_v14 = vsub.f32 %v6173_v49, %v6202_v52 }
0x1ccf   : > { %11069 = vpow2.f32 %v6477_v51 }
0x1cd0   : > { %v6471_v45 = vmul.f32 1.442695, %v6459_v5  ;;  %v6227_v23 = vmul.f32 1.442695, %v6214_v14 }
0x1cd1   : > { %v6193_v38 = vpop.xlane.xlu0 %6192  ;;  %v6448_v53 = vpop.xlane.xlu1 %6447 }
0x1cd2   : > { %11071 = vpow2.f32 %v6471_v45  ;;  %v6211_v60 = vsub.f32 %v13080_v31, %v6193_v38  ;;  %v6460_v6 = vsub.f32 %v6419_v46, %v6448_v53 }
0x1cd3   : > { %v13121_v21 = vpop.eup %11061  ;;  %11073 = vpow2.f32 %v6227_v23 }
0x1cd4   : > { %v6221_v56 = vmul.f32 1.442695, %v6211_v60  ;;  %v6473_v59 = vmul.f32 1.442695, %v6460_v6  ;;  %v6251_v63 = vsel %vm1017_vm0, %v13121_v21, 0.0  ;;  %v9303_v6 = vld [vmem:[%s11481_s27 + $0x28] sm:$0xff] }
0x1cd5   : > { %6252 = vadd.xlane.f32.xlu0 %v6251_v63  ;;  %v6439_v2 = vpop.xlane.xlu0 %6438  ;;  %v6196_v10 = vpop.xlane.xlu1 %6195  ;;  %v9305_v63 = vld [vmem:[%s11481_s27 + $0x38] sm:$0xff] }
0x1cd6   : > { %11075 = vpow2.f32 %v6221_v56  ;;  %v6457_v26 = vsub.f32 %v13086_v50, %v6439_v2  ;;  %v6212_v27 = vsub.f32 %v13084_v22, %v6196_v10  ;;  %v9302_v56 = vld [vmem:[%s11481_s27 + $0x20] sm:$0xff]  ;;  %v9372_v2 = vld [vmem:[%s14031_s4 + $0x30] sm:$0xff]  ;;  %v9373_v10 = vld [vmem:[%s14031_s4 + $0x38] sm:$0xff] }
0x1cd7   : > { %v13127_v54 = vpop.eup %11063  ;;  %11077 = vpow2.f32 %v6473_v59  ;;  %v9304_v59 = vld [vmem:[%s11481_s27 + $0x30] sm:$0xff] }
0x1cd8   : > { %v13129_v31 = vpop.eup %11065  ;;  %v6467_v3 = vmul.f32 1.442695, %v6457_v26  ;;  %v6223_v49 = vmul.f32 1.442695, %v6212_v27  ;;  %v6497_v33 = vsel %vm1017_vm0, %v13127_v54, 0.0  ;;  %v9376_v26 = vld [vmem:[%s14043_s16 + $0x30] sm:$0xff] }
0x1cd9   : > { %6498 = vadd.xlane.f32.xlu0 %v6497_v33  ;;  %v6187_v30 = vpop.xlane.xlu0 %6186  ;;  %v6254_v46 = vsel %vm1017_vm0, %v13129_v31, 0.0  ;;  %v6442_v35 = vpop.xlane.xlu1 %6441  ;;  %v9377_v27 = vld [vmem:[%s14043_s16 + $0x38] sm:$0xff]  ;;  %v9374_v33 = vld [vmem:[%s14043_s16 + $0x20] sm:$0xff] }
0x1cda   : > { %11079 = vpow2.f32 %v6467_v3  ;;  %v6209_v50 = vsub.f32 %v13082_v36, %v6187_v30  ;;  %6255 = vadd.xlane.f32.xlu1 %v6254_v46  ;;  %v6458_v22 = vsub.f32 %v13092_v58, %v6442_v35  ;;  %v9370_v3 = vld [vmem:[%s14031_s4 + $0x20] sm:$0xff]  ;;  %v9375_v30 = vld [vmem:[%s14043_s16 + $0x28] sm:$0xff] }
0x1cdb   : > { %v13137_v7 = vpop.eup %11067  ;;  %11081 = vpow2.f32 %v6223_v49  ;;  %v9371_v49 = vld [vmem:[%s14031_s4 + $0x28] sm:$0xff]  ;;  %s13995_s4 = sand.u32 1, %s11345_s1  }
0x1cdc   : > { %v13139_v39 = vpop.eup %11069  ;;  %v6217_v11 = vmul.f32 1.442695, %v6209_v50  ;;  %v6469_v32 = vmul.f32 1.442695, %v6458_v22  ;;  %v6245_v9 = vsel %vm1017_vm0, %v13137_v7, 0.0 }
0x1cdd   : > { %6246 = vadd.xlane.f32.xlu0 %v6245_v9  ;;  %v6433_v13 = vpop.xlane.xlu0 %6432  ;;  %v6500_v17 = vsel %vm1017_vm0, %v13139_v39, 0.0  ;;  %v6190_v20 = vpop.xlane.xlu1 %6189 }
0x1cde   : > { %11083 = vpow2.f32 %v6217_v11  ;;  %v6455_v36 = vsub.f32 %v13090_v25, %v6433_v13  ;;  %6501 = vadd.xlane.f32.xlu1 %v6500_v17  ;;  %v6210_v58 = vsub.f32 %v13088_v18, %v6190_v20 }
0x1cdf   : > { %v13147_v16 = vpop.eup %11071  ;;  %11085 = vpow2.f32 %v6469_v32 }
0x1ce0   : > { %v13149_v12 = vpop.eup %11073  ;;  %v6463_v57 = vmul.f32 1.442695, %v6455_v36  ;;  %v6219_v34 = vmul.f32 1.442695, %v6210_v58  ;;  %v6491_v48 = vsel %vm1017_vm0, %v13147_v16, 0.0 }
0x1ce1   : > { %6492 = vadd.xlane.f32.xlu0 %v6491_v48  ;;  %v6248_v61 = vsel %vm1017_vm0, %v13149_v12, 0.0  ;;  %v6436_v62 = vpop.xlane.xlu1 %6435 }
0x1ce2   : > { %11087 = vpow2.f32 %v6463_v57  ;;  %6249 = vadd.xlane.f32.xlu1 %v6248_v61  ;;  %v6456_v25 = vsub.f32 %v13095_v29, %v6436_v62 }
0x1ce3   : > { %v13156_v18 = vpop.eup %11075  ;;  %11089 = vpow2.f32 %v6219_v34 }
0x1ce4   : > { %v13158_v1 = vpop.eup %11077  ;;  %v6465_v41 = vmul.f32 1.442695, %v6456_v25  ;;  %v6239_v42 = vsel %vm1017_vm0, %v13156_v18, 0.0 }
0x1ce5   : > { %6240 = vadd.xlane.f32.xlu0 %v6239_v42  ;;  %v6494_v43 = vsel %vm1017_vm0, %v13158_v1, 0.0 }
0x1ce6   : > { %11091 = vpow2.f32 %v6465_v41  ;;  %6495 = vadd.xlane.f32.xlu1 %v6494_v43 }
0x1ce7   : > { %v13164_v28 = vpop.eup %11079 }
0x1ce8   : > { %v13166_v0 = vpop.eup %11081  ;;  %v6485_v29 = vsel %vm1017_vm0, %v13164_v28, 0.0 }
0x1ce9   : > { %6486 = vadd.xlane.f32.xlu0 %v6485_v29  ;;  %v6242_v8 = vsel %vm1017_vm0, %v13166_v0, 0.0 }
0x1cea   : > { %6243 = vadd.xlane.f32.xlu1 %v6242_v8 }
0x1ceb   : > { %v13172_v51 = vpop.eup %11083 }
0x1cec   : > { %v13174_v44 = vpop.eup %11085  ;;  %v6233_v52 = vsel %vm1017_vm0, %v13172_v51, 0.0 }
0x1ced   : > { %6234 = vadd.xlane.f32.xlu0 %v6233_v52  ;;  %v6488_v5 = vsel %vm1017_vm0, %v13174_v44, 0.0 }
0x1cee   : > { %6489 = vadd.xlane.f32.xlu1 %v6488_v5 }
0x1cef   : > { %v13180_v14 = vpop.eup %11087 }
0x1cf0   : > { %v13182_v45 = vpop.eup %11089  ;;  %v6479_v23 = vsel %vm1017_vm0, %v13180_v14, 0.0 }
0x1cf1   : > { %6480 = vadd.xlane.f32.xlu0 %v6479_v23  ;;  %v6236_v38 = vsel %vm1017_vm0, %v13182_v45, 0.0 }
0x1cf2   : > { %6237 = vadd.xlane.f32.xlu1 %v6236_v38 }
0x1cf3   : > { %v13188_v53 = vpop.eup %11091 }
0x1cf4   : > { %v6482_v60 = vsel %vm1017_vm0, %v13188_v53, 0.0 }
0x1cf6   : > { %6483 = vadd.xlane.f32.xlu1 %v6482_v60 }
0x1d07   : > { %6585 = vperm.xlu1 %10620, %v9303_v6   ;;  %6580 = vperm.xlu0 %10619, %v9302_v56  }
0x1d0b   : > { %6590 = vperm.xlu1 %10620, %v9304_v59   ;;  %6595 = vperm.xlu0 %10619, %v9305_v63  }
0x1d0f   : > { %6762 = vperm.xlu1 %10620, %v9372_v2   ;;  %6767 = vperm.xlu0 %10619, %v9373_v10  }
0x1d13   : > { %6786 = vperm.xlu1 %10620, %v9376_v26   ;;  %6791 = vperm.xlu0 %10619, %v9377_v27  }
0x1d17   : > { %6752 = vperm.xlu1 %10620, %v9370_v3   ;;  %6757 = vperm.xlu0 %10619, %v9371_v49  }
0x1d1b   : > { %6776 = vperm.xlu1 %10620, %v9374_v33   ;;  %6781 = vperm.xlu0 %10619, %v9375_v30  }
0x1d5e   : > { %v6253_v46 = vpop.xlane.xlu0 %6252 }
0x1d5f   : > { %11093 = vrcp.f32 %v6253_v46 }
0x1d62   : > { %v6499_v35 = vpop.xlane.xlu0 %6498 }
0x1d63   : > { %v6256_v50 = vpop.xlane.xlu1 %6255 }
0x1d64   : > { %11095 = vrcp.f32 %v6256_v50 }
0x1d65   : > { %11097 = vrcp.f32 %v6499_v35 }
0x1d66   : > { %v6247_v22 = vpop.xlane.xlu0 %6246 }
0x1d67   : > { %v6502_v11 = vpop.xlane.xlu1 %6501 }
0x1d68   : > { %11099 = vrcp.f32 %v6502_v11 }
0x1d69   : > { %11101 = vrcp.f32 %v6247_v22 }
0x1d6a   : > { %v6493_v32 = vpop.xlane.xlu0 %6492 }
0x1d6b   : > { %v6250_v9 = vpop.xlane.xlu1 %6249 }
0x1d6c   : > { %11103 = vrcp.f32 %v6250_v9  ;;  %v11094_v17 = vpop.eup %11093 }
0x1d6d   : > { %11105 = vrcp.f32 %v6493_v32  ;;  %v6271_v57 = vmul.f32 %v11094_v17, %v13121_v21 }
0x1d6e   : > { %v6241_v13 = vpop.xlane.xlu0 %6240 }
0x1d6f   : > { %v6496_v20 = vpop.xlane.xlu1 %6495 }
0x1d70   : > { %11107 = vrcp.f32 %v6496_v20 }
0x1d71   : > { %v11096_v36 = vpop.eup %11095  ;;  %11109 = vrcp.f32 %v6241_v13 }
0x1d72   : > { %v6487_v58 = vpop.xlane.xlu0 %6486  ;;  %v6272_v34 = vmul.f32 %v11096_v36, %v13129_v31  ;;  %v11098_v48 = vpop.eup %11097 }
0x1d73   : > { %v6244_v61 = vpop.xlane.xlu1 %6243  ;;  %v6517_v43 = vmul.f32 %v11098_v48, %v13127_v54 }
0x1d74   : > { %11111 = vrcp.f32 %v6244_v61  ;;  %v6276_v62 = vpack.c.bf16 %v6272_v34, %v6271_v57  ;;  %v6334_v57 = vpack.c.bf16 %v13054_v37, %v13054_v37 }
0x1d75   : > { %v11100_v25 = vpop.eup %11099  ;;  %11113 = vrcp.f32 %v6487_v58 }
0x1d76   : > { %v6235_v41 = vpop.xlane.xlu0 %6234  ;;  %v6290_v42 = vsel %vm1017_vm0, %v6276_v62, 0  ;;  %v6518_v29 = vmul.f32 %v11100_v25, %v13139_v39  ;;  %v11102_v8 = vpop.eup %11101 }
0x1d77   : > { %10298 = vmatpush3.bf16.xpose.msra.mxu0 %v6290_v42  ;;  %v6490_v52 = vpop.xlane.xlu1 %6489  ;;  %v6269_v23 = vmul.f32 %v11102_v8, %v13137_v7 }
0x1d78   : > { %11115 = vrcp.f32 %v6490_v52  ;;  %v6522_v21 = vpack.c.bf16 %v6518_v29, %v6517_v43  ;;  %10299 = vmatprep.subr.bf16.mxu0 %v14058_v47  ;;  %v10664_v43 = vld [vmem:[%s14044_s10 + $0x18] sm:$0xff]   ;;  %v10665_v29 = vld [vmem:[%s14046_s5 + $0x10] sm:$0xff]  }
0x1d79   : > { %v11104_v31 = vpop.eup %11103  ;;  %11117 = vrcp.f32 %v6235_v41 }
0x1d7a   : > { %v6536_v5 = vsel %vm1017_vm0, %v6522_v21, 0  ;;  %v6270_v38 = vmul.f32 %v11104_v31, %v13149_v12  ;;  %v11106_v60 = vpop.eup %11105  ;;  %v6481_v6 = vpop.xlane.xlu0 %6480 }
0x1d7b   : > { %10320 = vmatpush3.bf16.xpose.msra.mxu1 %v6536_v5  ;;  %v6238_v54 = vpop.xlane.xlu1 %6237  ;;  %v6515_v63 = vmul.f32 %v11106_v60, %v13147_v16 }
0x1d7c   : > { %11119 = vrcp.f32 %v6238_v54  ;;  %v6275_v39 = vpack.c.bf16 %v6270_v38, %v6269_v23  ;;  %10321 = vmatprep.subr.bf16.mxu1 %v14058_v47 }
0x1d7d   : > { %v11108_v56 = vpop.eup %11107  ;;  %11121 = vrcp.f32 %v6481_v6 }
0x1d7e   : > { %v6287_v59 = vsel %vm1017_vm0, %v6275_v39, 0  ;;  %v6516_v2 = vmul.f32 %v11108_v56, %v13158_v1  ;;  %v11110_v10 = vpop.eup %11109 }
0x1d7f   : > { %10300 = vmatpush3.bf16.xpose.msra.mxu0 %v6287_v59  ;;  %v6484_v7 = vpop.xlane.xlu1 %6483  ;;  %v6267_v3 = vmul.f32 %v11110_v10, %v13156_v18 }
0x1d80   : > { %11123 = vrcp.f32 %v6484_v7  ;;  %v6521_v12 = vpack.c.bf16 %v6516_v2, %v6515_v63  ;;  %10301 = vmatprep.subr.bf16.mxu0 %v14058_v47 }
0x1d81   : > { %v11112_v26 = vpop.eup %11111 }
0x1d82   : > { %v6533_v27 = vsel %vm1017_vm0, %v6521_v12, 0  ;;  %v6268_v49 = vmul.f32 %v11112_v26, %v13166_v0  ;;  %v11114_v33 = vpop.eup %11113  ;;  %v6581_v52 = vpop.permute.xlu0 %6580 }
0x1d83   : > { %10322 = vmatpush3.bf16.xpose.msra.mxu1 %v6533_v27  ;;  %v6513_v46 = vmul.f32 %v11114_v33, %v13164_v28  ;;  %v6586_v8 = vpop.permute.xlu1 %6585  ;;  %v6598_v23 = vadd.f32 %v6581_v52, %v12828_v15 }
0x1d84   : > { %v6274_v30 = vpack.c.bf16 %v6268_v49, %v6267_v3  ;;  %10323 = vmatprep.subr.bf16.mxu1 %v14058_v47  ;;  %v6599_v6 = vadd.f32 %v6586_v8, %v12834_v55 }
0x1d85   : > { %v11116_v16 = vpop.eup %11115 }
0x1d86   : > { %v6284_v1 = vsel %vm1017_vm0, %v6274_v30, 0  ;;  %v6514_v35 = vmul.f32 %v11116_v16, %v13174_v44  ;;  %v11118_v50 = vpop.eup %11117  ;;  %v6596_v38 = vpop.permute.xlu0 %6595 }
0x1d87   : > { %10302 = vmatpush3.bf16.xpose.msra.mxu0 %v6284_v1  ;;  %v6265_v11 = vmul.f32 %v11118_v50, %v13172_v51  ;;  %v6088_v51 = vpack.c.bf16 %v13042_v19, %v13042_v19  ;;  %v6591_v31 = vpop.permute.xlu1 %6590  ;;  %v6601_v56 = vadd.f32 %v6596_v38, %v12838_v24 }
0x1d88   : > { %v6520_v22 = vpack.c.bf16 %v6514_v35, %v6513_v46  ;;  %10303 = vmatprep.subr.bf16.mxu0 %v14058_v47  ;;  %v6600_v54 = vadd.f32 %v6591_v31, %v12832_v4 }
0x1d89   : > { %v11120_v18 = vpop.eup %11119 }
0x1d8a   : > { %v6530_v0 = vsel %vm1017_vm0, %v6520_v22, 0  ;;  %v6266_v32 = vmul.f32 %v11120_v18, %v13182_v45  ;;  %v11122_v9 = vpop.eup %11121  ;;  %v14059_v45 = vld [vmem:[#allocation33_spill] sm:$0xff] }
0x1d8b   : > { %10324 = vmatpush3.bf16.xpose.msra.mxu1 %v6530_v0  ;;  %v6511_v17 = vmul.f32 %v11122_v9, %v13180_v14  ;;  %v14060_v14 = vld [vmem:[#allocation34_spill] sm:$0xff] }
0x1d8c   : > { %v6273_v13 = vpack.c.bf16 %v6266_v32, %v6265_v11  ;;  %10325 = vmatprep.subr.bf16.mxu1 %v14058_v47 }
0x1d8d   : > { %v11124_v28 = vpop.eup %11123 }
0x1d8e   : > { %v6281_v44 = vsel %vm1017_vm0, %v6273_v13, 0  ;;  %v6512_v20 = vmul.f32 %v11124_v28, %v13188_v53  ;;  %v10663_v53 = vld [vmem:[%s14044_s10 + $0x10] sm:$0xff]  }
0x1d8f   : > { %10304 = vmatpush3.bf16.xpose.msra.mxu0 %v6281_v44 }
0x1d90   : > { %v6519_v36 = vpack.c.bf16 %v6512_v20, %v6511_v17 }
0x1d92   : > { %v6527_v58 = vsel %vm1017_vm0, %v6519_v36, 0 }
0x1d93   : > { %10326 = vmatpush3.bf16.xpose.msra.mxu1 %v6527_v58 }
0x1d94   : > { %10538 = vmatprep.subr.msk.bf16.mxu1 %vm3222_vm5, %v14059_v45 }
0x1d96   : > { %10306 = vmatmul.mubr.msk.bf16.vlgmr.msra.gmra.mxu0 %vm1017_vm0, %v6088_v51 }
0x1d97   : > { %10335 = vmatprep.mubr.msk.bf16.mxu0 %vm1030_vm1, %v10663_v53 }
0x1d9a   : > { %10328 = vmatmul.mubr.msk.bf16.vlgmr.msra.gmra.mxu1 %vm1017_vm0, %v6334_v57 }
0x1d9b   : > { %10354 = vmatpush3.bf16.xpose.msra.mxu1 %v14060_v14 }
0x1d9c   : > { %10369 = vmatprep.subr.bf16.mxu1 %v14058_v47 }
0x1e56   : > { %v6326_v19 = vpop.f32.mrf.mxu0 }
0x1e58   : > { %v10307_v34 = vpop.f32.mrf.mxu0 }
0x1e5a   : > { %v6329_v48 = vpop.f32.mrf.mxu0  ;;  %v6572_v61 = vpop.f32.mrf.mxu1 }
0x1e5b   : > { %v6603_v62 = vpack.c.bf16 %v6572_v61, %v6326_v19  ;;  %v6768_v61 = vpop.permute.xlu0 %6767 }
0x1e5c   : > { %v10308_v25 = vpop.f32.mrf.mxu0  ;;  %v10329_v41 = vpop.f32.mrf.mxu1 }
0x1e5d   : > { %10331 = vmatprep.subr.bf16.mxu0 %v6603_v62 }
0x1e5e   : > { %v6575_v37 = vpop.f32.mrf.mxu1  ;;  %10332 = vmatpush3.bf16.msra.mxu0 %v6603_v62  ;;  %v6763_v62 = vpop.permute.xlu1 %6762 }
0x1e5f   : > { %10333 = vmatprep.subr.bf16.mxu0 %v13078_v40  ;;  %v6792_v25 = vpop.permute.xlu0 %6791 }
0x1e60   : > { %v10330_v42 = vpop.f32.mrf.mxu1 }
0x1e62   : > { %10334 = vmatpush3.bf16.msra.mxu0 %v13078_v40  ;;  %v6787_v41 = vpop.permute.xlu1 %6786 }
0x1e63   : > { %v6758_v37 = vpop.permute.xlu0 %6757 }
0x1e65   : > { %10336 = vmatmul.mubr.msk.bf16.vlgmr.msra.gmra.mxu0 %vm1030_vm1, %v10664_v43 }
0x1e66   : > { %10343 = vmatprep.mubr.msk.bf16.mxu0 %vm1030_vm1, %v10665_v29  ;;  %v6753_v42 = vpop.permute.xlu1 %6752 }
0x1f25   : > { %v10337_v21 = vpop.f32.mrf.mxu0 }
0x1f26   : > { %v13258_v59 = vadd.f32 %v10337_v21, %v6600_v54 }
0x1f27   : > { %v6654_v5 = vpop.f32.mrf.mxu0 }
0x1f28   : > { %v13255_v39 = vadd.f32 %v6654_v5, %v6598_v23  ;;  %v6711_v4 = vsel %vm1017_vm0, %v13258_v59, 0.0 }
0x1f29   : > { %v10338_v60 = vpop.f32.mrf.mxu0 }
0x1f2a   : > { %v6708_v2 = vsel %vm1017_vm0, %v13255_v39, 0.0  ;;  %v13264_v10 = vadd.f32 %v10338_v60, %v6601_v56  ;;  %v6782_v60 = vpop.permute.xlu0 %6781 }
0x1f2b   : > { %v6657_v40 = vpop.f32.mrf.mxu0 }
0x1f2c   : > { %v13260_v63 = vadd.f32 %v6657_v40, %v6599_v6  ;;  %v6713_v24 = vsel %vm1017_vm0, %v13264_v10, 0.0  ;;  %v6777_v6 = vpop.permute.xlu1 %6776 }
0x1f2e   : > { %v6709_v15 = vsel %vm1017_vm0, %v13260_v63, 0.0 }
0x1f2f   : > { %v6710_v55 = vadd.f32 %v6709_v15, %v6708_v2 }
0x1f31   : > { %v6712_v7 = vadd.f32 %v6711_v4, %v6710_v55  ;;  %v10666_v4 = vld [vmem:[%s14046_s5 + $0x18] sm:$0xff]   ;;  %s9156_s5 = sshll.u32 %s13995_s4, 5  ;;  %s9538_s4 = sshll.u32 %s11584_s0, 9 }
0x1f33   : > { %v6714_v12 = vadd.f32 %v6713_v24, %v6712_v7  ;;  %v10667_v7 = vld [vmem:[%s14049_s13 + $0x10] sm:$0xff]   ;;  %v10668_v24 = vld [vmem:[%s14049_s13 + $0x18] sm:$0xff]  }
0x1f35   : > { %v6715_v26 = vrot.slane %v6714_v12, 4 }
0x1f37   : > { %v6716_v27 = vadd.f32 %v6715_v26, %v6714_v12 }
0x1f39   : > { %v6717_v3 = vrot.slane %v6716_v27, 2 }
0x1f3b   : > { %v6718_v49 = vadd.f32 %v6717_v3, %v6716_v27 }
0x1f3d   : > { %v6719_v33 = vrot.slane %v6718_v49, 1 }
0x1f3f   : > { %v6720_v30 = vadd.f32 %v6719_v33, %v6718_v49 }
0x1f41   : > { %v6721_v16 = vmul.f32 0.03125, %v6720_v30 }
0x1f43   : > { %v6722_v1 = vsub.f32 %v13255_v39, %v6721_v16  ;;  %v6723_v46 = vsub.f32 %v13260_v63, %v6721_v16  ;;  %v6724_v35 = vsub.f32 %v13258_v59, %v6721_v16  ;;  %v6725_v50 = vsub.f32 %v13264_v10, %v6721_v16 }
0x1f45   : > { %v6726_v22 = vmul.f32 %v6722_v1, %v6722_v1  ;;  %v6727_v18 = vmul.f32 %v6723_v46, %v6723_v46  ;;  %v6728_v0 = vmul.f32 %v6724_v35, %v6724_v35  ;;  %v6729_v11 = vmul.f32 %v6725_v50, %v6725_v50 }
0x1f47   : > { %v6730_v32 = vsel %vm1017_vm0, %v6726_v22, 0.0  ;;  %v6731_v9 = vsel %vm1017_vm0, %v6727_v18, 0.0  ;;  %v6733_v28 = vsel %vm1017_vm0, %v6728_v0, 0.0  ;;  %v6735_v17 = vsel %vm1017_vm0, %v6729_v11, 0.0 }
0x1f48   : > { %v6732_v13 = vadd.f32 %v6731_v9, %v6730_v32 }
0x1f4a   : > { %v6734_v44 = vadd.f32 %v6733_v28, %v6732_v13 }
0x1f4c   : > { %v6736_v20 = vadd.f32 %v6735_v17, %v6734_v44 }
0x1f4e   : > { %v6737_v36 = vrot.slane %v6736_v20, 4 }
0x1f50   : > { %v6738_v58 = vadd.f32 %v6737_v36, %v6736_v20 }
0x1f52   : > { %v6739_v51 = vrot.slane %v6738_v58, 2 }
0x1f54   : > { %v6740_v57 = vadd.f32 %v6739_v51, %v6738_v58 }
0x1f56   : > { %v6741_v53 = vrot.slane %v6740_v57, 1 }
0x1f58   : > { %v6742_v19 = vadd.f32 %v6741_v53, %v6740_v57 }
0x1f5a   : > { %v6743_v34 = vmul.f32 0.03125, %v6742_v19 }
0x1f5c   : > { %v6744_v48 = vadd.f32 1e-05, %v6743_v34 }
0x1f5e   : > { %11125 = vrsqrt.f32 %v6744_v48 }
0x1f6b   : > { %v11126_v43 = vpop.eup %11125 }
0x1f6c   : > { %v6747_v29 = vmul.f32 %v11126_v43, %v6723_v46  ;;  %v6748_v8 = vmul.f32 %v11126_v43, %v6724_v35  ;;  %v6749_v52 = vmul.f32 %v11126_v43, %v6725_v50  ;;  %v6746_v21 = vmul.f32 %v11126_v43, %v6722_v1 }
0x1f6e   : > { %v6772_v31 = vmul.f32 %v6763_v62, %v6748_v8  ;;  %v6773_v5 = vmul.f32 %v6768_v61, %v6749_v52  ;;  %v6770_v23 = vmul.f32 %v6753_v42, %v6746_v21  ;;  %v6771_v38 = vmul.f32 %v6758_v37, %v6747_v29 }
0x1f70   : > { %v6796_v54 = vadd.f32 %v6787_v41, %v6772_v31  ;;  %v6797_v40 = vadd.f32 %v6792_v25, %v6773_v5  ;;  %v6794_v56 = vadd.f32 %v6777_v6, %v6770_v23  ;;  %v6795_v2 = vadd.f32 %v6782_v60, %v6771_v38  ;;  %v10669_v38 = vld [vmem:[%s14050_s17 + $0x10] sm:$0xff]  }
0x1f71   : > { %10355 = vmatprep.mubr.msk.bf16.mxu1 %vm3222_vm5, %v10669_v38 }
0x1f72   : > { %v6799_v15 = vpack.c.bf16 %v6797_v40, %v6796_v54  ;;  %v6798_v55 = vpack.c.bf16 %v6795_v2, %v6794_v56  ;;  %v10670_v54 = vld [vmem:[%s14050_s17 + $0x18] sm:$0xff]  }
0x1f73   : > { %10356 = vmatmul.mubr.msk.bf16.vlgmr.msra.gmra.mxu1 %vm3222_vm5, %v10670_v54 }
0x1f74   : > { %10339 = vmatprep.subr.bf16.mxu0 %v6799_v15  ;;  %10377 = vmatprep.mubr.msk.bf16.mxu1 %vm11389_vm4, %v14058_v47 }
0x1f75   : > { %10340 = vmatpush3.bf16.msra.mxu0 %v6799_v15 }
0x1f76   : > { %10341 = vmatprep.subr.bf16.mxu0 %v6798_v55 }
0x1f79   : > { %10342 = vmatpush3.bf16.msra.mxu0 %v6798_v55 }
0x1f7a   : > { %10537 = vmatprep.subr.msk.bf16.mxu0 %vm3222_vm5, %v14059_v45 }
0x1f7c   : > { %10344 = vmatmul.mubr.msk.bf16.vlgmr.msra.gmra.mxu0 %vm1030_vm1, %v10666_v4 }
0x1f7d   : > { %10348 = vmatpush3.bf16.xpose.msra.mxu0 %v14060_v14  ;;  %10349 = vmatprep.mubr.msk.bf16.mxu0 %vm3222_vm5, %v10667_v7 }
0x1f84   : > { %10350 = vmatmul.mubr.msk.bf16.vlgmr.msra.gmra.mxu0 %vm3222_vm5, %v10668_v24 }
0x203c   : > { %v13289_v12 = vpop.f32.mrf.mxu0 }
0x203e   : > { %v6850_v26 = vpop.f32.mrf.mxu0 }
0x203f   : > { %v6995_v27 = vpack.c.bf16 %v6850_v26, %v6850_v26 }
0x2040   : > { %v13291_v3 = vpop.f32.mrf.mxu0 }
0x2041   : > { %6998 = vxpose.xlu1.c.b16.start.end [1/1] (short) (narrow) %v6995_v27, 64 }
0x2042   : > { %v6853_v49 = vpop.f32.mrf.mxu0 }
0x2043   : > { %v7241_v33 = vpack.c.bf16 %v6853_v49, %v6853_v49 }
0x2044   : > { %v13293_v30 = vpop.f32.mrf.mxu0 }
0x2045   : > { %7244 = vxpose.xlu0.c.b16.start.end [1/1] (short) (narrow) %v7241_v33, 64 }
0x2046   : > { %v6915_v45 = vpop.f32.mrf.mxu0 }
0x2047   : > { %v6996_v16 = vpack.c.bf16 %v6915_v45, %v6915_v45 }
0x2048   : > { %v13295_v14 = vpop.f32.mrf.mxu0 }
0x2049   : > { %v7027_v1 = vsel %vm1978_vm2, %v6996_v16, 0  ;;  %10539 = vmatprep.subr.msk.bf16.mxu0 %vm1978_vm2, %v6996_v16 }
0x204a   : > { %v6918_v46 = vpop.f32.mrf.mxu0  ;;  %10360 = vmatpush3.bf16.msra.mxu0 %v7027_v1 }
0x204b   : > { %v7242_v35 = vpack.c.bf16 %v6918_v46, %v6918_v46 }
0x204d   : > { %10540 = vmatprep.subr.msk.bf16.mxu0 %vm1978_vm2, %v7242_v35  ;;  %v7273_v18 = vsel %vm1978_vm2, %v7242_v35, 0 }
0x20a3   : > { %v7006_v50 = vpop.trf.xlu1 }
0x20a4   : > { %10361 = vmatprep.mubr.msk.bf16.mxu0 %vm1965_vm3, %v7006_v50 }
0x20a7   : > { %v7007_v22 = vpop.trf.xlu1  ;;  %v7252_v0 = vpop.trf.xlu0 }
0x20a8   : > { %10362 = vmatmul.mubr.msk.bf16.vlgmr.msra.gmra.mxu0 %vm1965_vm3, %v7007_v22 }
0x20a9   : > { %10382 = vmatpush3.bf16.msra.mxu0 %v7273_v18 }
0x20aa   : > { %10391 = vmatprep.subr.bf16.mxu0 %v14058_v47 }
0x20ab   : > { %v7008_v11 = vpop.trf.xlu1  ;;  %v7253_v9 = vpop.trf.xlu0 }
0x20ac   : > { %10365 = vmatprep.mubr.msk.bf16.mxu0 %vm1965_vm3, %v7008_v11 }
0x20af   : > { %v7009_v32 = vpop.trf.xlu1  ;;  %v7254_v13 = vpop.trf.xlu0 }
0x20b0   : > { %10366 = vmatmul.mubr.msk.bf16.gmra.mxu0 %vm1965_vm3, %v7009_v32 }
0x20b1   : > { %10383 = vmatprep.mubr.msk.bf16.mxu0 %vm1965_vm3, %v7252_v0 }
0x20b3   : > { %v7255_v28 = vpop.trf.xlu0 }
0x20b8   : > { %10384 = vmatmul.mubr.msk.bf16.vlgmr.msra.gmra.mxu0 %vm1965_vm3, %v7253_v9 }
0x20b9   : > { %10387 = vmatprep.mubr.msk.bf16.mxu0 %vm1965_vm3, %v7254_v13 }
0x20c0   : > { %10388 = vmatmul.mubr.msk.bf16.gmra.mxu0 %vm1965_vm3, %v7255_v28 }
0x20c1   : > { %10399 = vmatprep.mubr.msk.bf16.mxu0 %vm11389_vm4, %v14058_v47 }
0x2168   : > { %v13312_v44 = vpop.f32.mrf.mxu0 }
0x2169   : > { %v7100_v5 = vsel %vm1965_vm3, %v13312_v44, -inf }
0x216a   : > { %v13314_v17 = vpop.f32.mrf.mxu0 }
0x216b   : > { %v7094_v40 = vsel %vm1965_vm3, %v13314_v17, -inf }
0x216c   : > { %v13316_v20 = vpop.f32.mrf.mxu0 }
0x216d   : > { %v7103_v6 = vsel %vm1965_vm3, %v13316_v20, -inf }
0x216e   : > { %v13318_v36 = vpop.f32.mrf.mxu0 }
0x216f   : > { %v7097_v15 = vsel %vm1965_vm3, %v13318_v36, -inf }
0x2170   : > { %v10367_v58 = vpop.f32.mrf.mxu0 }
0x2171   : > { %v7112_v51 = vsel %vm1965_vm3, %v10367_v58, -inf }
0x2172   : > { %7113 = vmax.xlane.f32.xlu0 %v7112_v51  ;;  %v13321_v57 = vpop.f32.mrf.mxu0 }
0x2173   : > { %v7106_v29 = vsel %vm1965_vm3, %v13321_v57, -inf }
0x2174   : > { %v10368_v53 = vpop.f32.mrf.mxu0 }
0x2175   : > { %v7115_v19 = vsel %vm1965_vm3, %v10368_v53, -inf }
0x2176   : > { %7116 = vmax.xlane.f32.xlu1 %v7115_v19  ;;  %v13324_v34 = vpop.f32.mrf.mxu0 }
0x2177   : > { %v7109_v21 = vsel %vm1965_vm3, %v13324_v34, -inf }
0x2178   : > { %v13326_v48 = vpop.f32.mrf.mxu0 }
0x2179   : > { %v7346_v60 = vsel %vm1965_vm3, %v13326_v48, -inf }
0x217a   : > { %v13328_v61 = vpop.f32.mrf.mxu0 }
0x217b   : > { %v7340_v2 = vsel %vm1965_vm3, %v13328_v61, -inf }
0x217c   : > { %v13330_v62 = vpop.f32.mrf.mxu0 }
0x217d   : > { %v7349_v56 = vsel %vm1965_vm3, %v13330_v62, -inf }
0x217e   : > { %v13332_v25 = vpop.f32.mrf.mxu0 }
0x217f   : > { %v7343_v55 = vsel %vm1965_vm3, %v13332_v25, -inf }
0x2180   : > { %v10389_v41 = vpop.f32.mrf.mxu0 }
0x2181   : > { %v7358_v37 = vsel %vm1965_vm3, %v10389_v41, -inf }
0x2182   : > { %7359 = vmax.xlane.f32.xlu0 %v7358_v37  ;;  %v13335_v42 = vpop.f32.mrf.mxu0 }
0x2183   : > { %v7352_v52 = vsel %vm1965_vm3, %v13335_v42, -inf }
0x2184   : > { %v10390_v43 = vpop.f32.mrf.mxu0 }
0x2185   : > { %v7361_v8 = vsel %vm1965_vm3, %v10390_v43, -inf }
0x2186   : > { %7107 = vmax.xlane.f32.xlu0 %v7106_v29  ;;  %7362 = vmax.xlane.f32.xlu1 %v7361_v8  ;;  %v13344_v31 = vpop.f32.mrf.mxu0 }
0x2187   : > { %v7355_v23 = vsel %vm1965_vm3, %v13344_v31, -inf }
0x218a   : > { %7353 = vmax.xlane.f32.xlu0 %v7352_v52  ;;  %7110 = vmax.xlane.f32.xlu1 %v7109_v21 }
0x218e   : > { %7101 = vmax.xlane.f32.xlu0 %v7100_v5  ;;  %7356 = vmax.xlane.f32.xlu1 %v7355_v23 }
0x2192   : > { %7347 = vmax.xlane.f32.xlu0 %v7346_v60  ;;  %7104 = vmax.xlane.f32.xlu1 %v7103_v6 }
0x2196   : > { %7095 = vmax.xlane.f32.xlu0 %v7094_v40  ;;  %7350 = vmax.xlane.f32.xlu1 %v7349_v56 }
0x219a   : > { %7341 = vmax.xlane.f32.xlu0 %v7340_v2  ;;  %7098 = vmax.xlane.f32.xlu1 %v7097_v15 }
0x219e   : > { %7344 = vmax.xlane.f32.xlu1 %v7343_v55 }
0x21fb   : > { %v7114_v4 = vpop.xlane.xlu0 %7113 }
0x21fc   : > { %v7124_v7 = vsub.f32 %v10367_v58, %v7114_v4 }
0x21fe   : > { %v7138_v24 = vmul.f32 1.442695, %v7124_v7 }
0x21ff   : > { %v7117_v26 = vpop.xlane.xlu1 %7116 }
0x2200   : > { %11127 = vpow2.f32 %v7138_v24  ;;  %v7125_v27 = vsub.f32 %v10368_v53, %v7117_v26 }
0x2202   : > { %v7140_v49 = vmul.f32 1.442695, %v7125_v27 }
0x2204   : > { %11129 = vpow2.f32 %v7140_v49 }
0x220b   : > { %v7360_v33 = vpop.xlane.xlu0 %7359 }
0x220c   : > { %v7370_v45 = vsub.f32 %v10389_v41, %v7360_v33 }
0x220d   : > { %v13370_v16 = vpop.eup %11127 }
0x220e   : > { %v7384_v1 = vmul.f32 1.442695, %v7370_v45  ;;  %v7160_v46 = vsel %vm1965_vm3, %v13370_v16, 0.0 }
0x220f   : > { %v7108_v35 = vpop.xlane.xlu0 %7107  ;;  %7161 = vadd.xlane.f32.xlu0 %v7160_v46  ;;  %v7363_v50 = vpop.xlane.xlu1 %7362 }
0x2210   : > { %11131 = vpow2.f32 %v7384_v1  ;;  %v7122_v22 = vsub.f32 %v13321_v57, %v7108_v35  ;;  %v7371_v18 = vsub.f32 %v10390_v43, %v7363_v50 }
0x2211   : > { %v13375_v0 = vpop.eup %11129 }
0x2212   : > { %v7134_v11 = vmul.f32 1.442695, %v7122_v22  ;;  %v7386_v32 = vmul.f32 1.442695, %v7371_v18  ;;  %v7163_v9 = vsel %vm1965_vm3, %v13375_v0, 0.0 }
0x2213   : > { %v7354_v13 = vpop.xlane.xlu0 %7353  ;;  %7164 = vadd.xlane.f32.xlu1 %v7163_v9  ;;  %v7111_v28 = vpop.xlane.xlu1 %7110 }
0x2214   : > { %11133 = vpow2.f32 %v7134_v11  ;;  %v7368_v58 = vsub.f32 %v13335_v42, %v7354_v13  ;;  %v7123_v51 = vsub.f32 %v13324_v34, %v7111_v28 }
0x2215   : > { %11135 = vpow2.f32 %v7386_v32 }
0x2216   : > { %v7380_v53 = vmul.f32 1.442695, %v7368_v58  ;;  %v7136_v19 = vmul.f32 1.442695, %v7123_v51 }
0x2217   : > { %v7102_v57 = vpop.xlane.xlu0 %7101  ;;  %v7357_v41 = vpop.xlane.xlu1 %7356 }
0x2218   : > { %11137 = vpow2.f32 %v7380_v53  ;;  %v7120_v37 = vsub.f32 %v13312_v44, %v7102_v57  ;;  %v7369_v43 = vsub.f32 %v13344_v31, %v7357_v41 }
0x2219   : > { %11139 = vpow2.f32 %v7136_v19 }
0x221a   : > { %v7130_v29 = vmul.f32 1.442695, %v7120_v37  ;;  %v7382_v8 = vmul.f32 1.442695, %v7369_v43  ;;  %v7487_v37 = vpack.c.bf16 %v13289_v12, %v13289_v12  ;;  %v7733_v43 = vpack.c.bf16 %v13291_v3, %v13291_v3 }
0x221b   : > { %v7348_v52 = vpop.xlane.xlu0 %7347  ;;  %v7105_v21 = vpop.xlane.xlu1 %7104 }
0x221c   : > { %11141 = vpow2.f32 %v7130_v29  ;;  %v7366_v42 = vsub.f32 %v13326_v48, %v7348_v52  ;;  %v7121_v34 = vsub.f32 %v13316_v20, %v7105_v21 }
0x221d   : > { %v13385_v5 = vpop.eup %11131  ;;  %11143 = vpow2.f32 %v7382_v8 }
0x221e   : > { %v7376_v23 = vmul.f32 1.442695, %v7366_v42  ;;  %v7132_v38 = vmul.f32 1.442695, %v7121_v34  ;;  %v7406_v44 = vsel %vm1965_vm3, %v13385_v5, 0.0 }
0x221f   : > { %7407 = vadd.xlane.f32.xlu0 %v7406_v44  ;;  %v7096_v31 = vpop.xlane.xlu0 %7095  ;;  %v7351_v60 = vpop.xlane.xlu1 %7350 }
0x2220   : > { %11145 = vpow2.f32 %v7376_v23  ;;  %v7118_v6 = vsub.f32 %v13314_v17, %v7096_v31  ;;  %v7367_v54 = vsub.f32 %v13330_v62, %v7351_v60 }
0x2221   : > { %v13391_v40 = vpop.eup %11133  ;;  %11147 = vpow2.f32 %v7132_v38 }
0x2222   : > { %v13393_v20 = vpop.eup %11135  ;;  %v7126_v48 = vmul.f32 1.442695, %v7118_v6  ;;  %v7378_v56 = vmul.f32 1.442695, %v7367_v54  ;;  %v7154_v2 = vsel %vm1965_vm3, %v13391_v40, 0.0 }
0x2223   : > { %7155 = vadd.xlane.f32.xlu0 %v7154_v2  ;;  %v7342_v15 = vpop.xlane.xlu0 %7341  ;;  %v7409_v55 = vsel %vm1965_vm3, %v13393_v20, 0.0  ;;  %v7099_v4 = vpop.xlane.xlu1 %7098 }
0x2224   : > { %11149 = vpow2.f32 %v7126_v48  ;;  %v7364_v17 = vsub.f32 %v13328_v61, %v7342_v15  ;;  %7410 = vadd.xlane.f32.xlu1 %v7409_v55  ;;  %v7119_v62 = vsub.f32 %v13318_v36, %v7099_v4 }
0x2225   : > { %v13401_v7 = vpop.eup %11137  ;;  %11151 = vpow2.f32 %v7378_v56 }
0x2226   : > { %v13403_v24 = vpop.eup %11139  ;;  %v7372_v26 = vmul.f32 1.442695, %v7364_v17  ;;  %v7128_v27 = vmul.f32 1.442695, %v7119_v62  ;;  %v7400_v49 = vsel %vm1965_vm3, %v13401_v7, 0.0 }
0x2227   : > { %7401 = vadd.xlane.f32.xlu0 %v7400_v49  ;;  %v7157_v33 = vsel %vm1965_vm3, %v13403_v24, 0.0  ;;  %v7345_v45 = vpop.xlane.xlu1 %7344 }
0x2228   : > { %11153 = vpow2.f32 %v7372_v26  ;;  %7158 = vadd.xlane.f32.xlu1 %v7157_v33  ;;  %v7365_v61 = vsub.f32 %v13332_v25, %v7345_v45 }
0x2229   : > { %v13410_v36 = vpop.eup %11141  ;;  %11155 = vpow2.f32 %v7128_v27 }
0x222a   : > { %v13412_v1 = vpop.eup %11143  ;;  %v7374_v46 = vmul.f32 1.442695, %v7365_v61  ;;  %v7148_v35 = vsel %vm1965_vm3, %v13410_v36, 0.0 }
0x222b   : > { %7149 = vadd.xlane.f32.xlu0 %v7148_v35  ;;  %v7403_v50 = vsel %vm1965_vm3, %v13412_v1, 0.0 }
0x222c   : > { %11157 = vpow2.f32 %v7374_v46  ;;  %7404 = vadd.xlane.f32.xlu1 %v7403_v50 }
0x222d   : > { %v13418_v22 = vpop.eup %11145 }
0x222e   : > { %v13420_v18 = vpop.eup %11147  ;;  %v7394_v25 = vsel %vm1965_vm3, %v13418_v22, 0.0 }
0x222f   : > { %7395 = vadd.xlane.f32.xlu0 %v7394_v25  ;;  %v7151_v11 = vsel %vm1965_vm3, %v13420_v18, 0.0 }
0x2230   : > { %7152 = vadd.xlane.f32.xlu1 %v7151_v11 }
0x2231   : > { %v13426_v32 = vpop.eup %11149 }
0x2232   : > { %v13428_v9 = vpop.eup %11151  ;;  %v7142_v13 = vsel %vm1965_vm3, %v13426_v32, 0.0 }
0x2233   : > { %7143 = vadd.xlane.f32.xlu0 %v7142_v13  ;;  %v7397_v28 = vsel %vm1965_vm3, %v13428_v9, 0.0 }
0x2234   : > { %7398 = vadd.xlane.f32.xlu1 %v7397_v28 }
0x2235   : > { %v13434_v58 = vpop.eup %11153 }
0x2236   : > { %v13436_v51 = vpop.eup %11155  ;;  %v7388_v53 = vsel %vm1965_vm3, %v13434_v58, 0.0 }
0x2237   : > { %7389 = vadd.xlane.f32.xlu0 %v7388_v53  ;;  %v7145_v19 = vsel %vm1965_vm3, %v13436_v51, 0.0 }
0x2238   : > { %7146 = vadd.xlane.f32.xlu1 %v7145_v19 }
0x2239   : > { %v13442_v57 = vpop.eup %11157 }
0x223a   : > { %v7391_v41 = vsel %vm1965_vm3, %v13442_v57, 0.0 }
0x223c   : > { %7392 = vadd.xlane.f32.xlu1 %v7391_v41 }
0x2264   : > { %7490 = vxpose.xlu0.c.b16.start.end [1/1] (short) (narrow) %v7487_v37, 64 }
0x2269   : > { %7736 = vxpose.xlu1.c.b16.start.end [1/1] (short) (narrow) %v7733_v43, 64 }
0x2298   : > { %v7162_v29 = vpop.xlane.xlu0 %7161 }
0x2299   : > { %11159 = vrcp.f32 %v7162_v29 }
0x229c   : > { %v7165_v8 = vpop.xlane.xlu1 %7164 }
0x229d   : > { %11161 = vrcp.f32 %v7165_v8 }
0x22a6   : > { %v11160_v52 = vpop.eup %11159 }
0x22a7   : > { %v7180_v34 = vmul.f32 %v11160_v52, %v13370_v16 }
0x22a8   : > { %v7408_v21 = vpop.xlane.xlu0 %7407 }
0x22a9   : > { %11163 = vrcp.f32 %v7408_v21  ;;  %v13472_v21 = vpop.f32.mrf.mxu1 }
0x22aa   : > { %v11162_v42 = vpop.eup %11161 }
0x22ab   : > { %v7181_v23 = vmul.f32 %v11162_v42, %v13375_v0 }
0x22ac   : > { %v7156_v38 = vpop.xlane.xlu0 %7155 }
0x22ad   : > { %v7411_v44 = vpop.xlane.xlu1 %7410  ;;  %v7185_v12 = vpack.c.bf16 %v7181_v23, %v7180_v34 }
0x22ae   : > { %11165 = vrcp.f32 %v7411_v44  ;;  %v7488_v44 = vpack.c.bf16 %v13293_v30, %v13293_v30 }
0x22af   : > { %v7199_v31 = vsel %vm1965_vm3, %v7185_v12, 0  ;;  %11167 = vrcp.f32 %v7156_v38 }
0x22b0   : > { %v7402_v3 = vpop.xlane.xlu0 %7401  ;;  %10370 = vmatpush3.bf16.xpose.msra.mxu1 %v7199_v31 }
0x22b1   : > { %v7159_v60 = vpop.xlane.xlu1 %7158  ;;  %10371 = vmatprep.subr.bf16.mxu1 %v14058_v47 }
0x22b2   : > { %11169 = vrcp.f32 %v7159_v60 }
0x22b3   : > { %11171 = vrcp.f32 %v7402_v3 }
0x22b4   : > { %v7150_v6 = vpop.xlane.xlu0 %7149 }
0x22b5   : > { %v7405_v54 = vpop.xlane.xlu1 %7404 }
0x22b6   : > { %11173 = vrcp.f32 %v7405_v54  ;;  %v11164_v0 = vpop.eup %11163 }
0x22b7   : > { %11175 = vrcp.f32 %v7150_v6  ;;  %v7426_v15 = vmul.f32 %v11164_v0, %v13385_v5  ;;  %v7734_v6 = vpack.c.bf16 %v13295_v14, %v13295_v14 }
0x22b8   : > { %v7396_v16 = vpop.xlane.xlu0 %7395 }
0x22b9   : > { %v7153_v48 = vpop.xlane.xlu1 %7152  ;;  %v7765_v14 = vsel %vm1978_vm2, %v7734_v6, 0 }
0x22ba   : > { %11177 = vrcp.f32 %v7153_v48 }
0x22bb   : > { %v11166_v56 = vpop.eup %11165  ;;  %11179 = vrcp.f32 %v7396_v16 }
0x22bc   : > { %v7144_v2 = vpop.xlane.xlu0 %7143  ;;  %v7427_v55 = vmul.f32 %v11166_v56, %v13393_v20  ;;  %v11168_v4 = vpop.eup %11167 }
0x22bd   : > { %v7399_v17 = vpop.xlane.xlu1 %7398  ;;  %v7178_v49 = vmul.f32 %v11168_v4, %v13391_v40 }
0x22be   : > { %11181 = vrcp.f32 %v7399_v17  ;;  %v7431_v62 = vpack.c.bf16 %v7427_v55, %v7426_v15 }
0x22bf   : > { %v11170_v26 = vpop.eup %11169  ;;  %11183 = vrcp.f32 %v7144_v2 }
0x22c0   : > { %v7445_v27 = vsel %vm1965_vm3, %v7431_v62, 0  ;;  %v7179_v33 = vmul.f32 %v11170_v26, %v13403_v24  ;;  %v11172_v45 = vpop.eup %11171  ;;  %v7390_v61 = vpop.xlane.xlu0 %7389 }
0x22c1   : > { %10392 = vmatpush3.bf16.xpose.msra.mxu0 %v7445_v27  ;;  %v7147_v46 = vpop.xlane.xlu1 %7146  ;;  %v7424_v50 = vmul.f32 %v11172_v45, %v13401_v7 }
0x22c2   : > { %11185 = vrcp.f32 %v7147_v46  ;;  %v7184_v5 = vpack.c.bf16 %v7179_v33, %v7178_v49  ;;  %10393 = vmatprep.subr.bf16.mxu0 %v14058_v47 }
0x22c3   : > { %v11174_v20 = vpop.eup %11173  ;;  %11187 = vrcp.f32 %v7390_v61 }
0x22c4   : > { %v7196_v35 = vsel %vm1965_vm3, %v7184_v5, 0  ;;  %v7425_v25 = vmul.f32 %v11174_v20, %v13412_v1  ;;  %v11176_v11 = vpop.eup %11175 }
0x22c5   : > { %10372 = vmatpush3.bf16.xpose.msra.mxu1 %v7196_v35  ;;  %v7393_v40 = vpop.xlane.xlu1 %7392  ;;  %v7176_v53 = vmul.f32 %v11176_v11, %v13410_v36 }
0x22c6   : > { %11189 = vrcp.f32 %v7393_v40  ;;  %v7430_v24 = vpack.c.bf16 %v7425_v25, %v7424_v50  ;;  %10373 = vmatprep.subr.bf16.mxu1 %v14058_v47 }
0x22c7   : > { %v11178_v13 = vpop.eup %11177 }
0x22c8   : > { %v7442_v28 = vsel %vm1965_vm3, %v7430_v24, 0  ;;  %v7177_v19 = vmul.f32 %v11178_v13, %v13420_v18  ;;  %v11180_v41 = vpop.eup %11179 }
0x22c9   : > { %10394 = vmatpush3.bf16.xpose.msra.mxu0 %v7442_v28  ;;  %v7422_v43 = vmul.f32 %v11180_v41, %v13418_v22 }
0x22ca   : > { %v7183_v37 = vpack.c.bf16 %v7177_v19, %v7176_v53  ;;  %10395 = vmatprep.subr.bf16.mxu0 %v14058_v47 }
0x22cb   : > { %v11182_v7 = vpop.eup %11181  ;;  %v7744_v16 = vpop.trf.xlu1 }
0x22cc   : > { %v7193_v1 = vsel %vm1965_vm3, %v7183_v37, 0  ;;  %v7423_v29 = vmul.f32 %v11182_v7, %v13428_v9  ;;  %v11184_v8 = vpop.eup %11183  ;;  %v6980_v9 = vpop.f32.mrf.mxu1 }
0x22cd   : > { %10374 = vmatpush3.bf16.xpose.msra.mxu1 %v7193_v1  ;;  %v7174_v42 = vmul.f32 %v11184_v8, %v13426_v32  ;;  %v6997_v30 = vpack.c.bf16 %v6980_v9, %v6980_v9 }
0x22ce   : > { %v7429_v52 = vpack.c.bf16 %v7423_v29, %v7422_v43  ;;  %10375 = vmatprep.subr.bf16.mxu1 %v14058_v47  ;;  %v13484_v60 = vpop.f32.mrf.mxu1 }
0x22cf   : > { %v11186_v36 = vpop.eup %11185  ;;  %v7745_v56 = vpop.trf.xlu1 }
0x22d0   : > { %v7439_v18 = vsel %vm1965_vm3, %v7429_v52, 0  ;;  %v7175_v34 = vmul.f32 %v11186_v36, %v13436_v51  ;;  %v11188_v23 = vpop.eup %11187  ;;  %v7498_v51 = vpop.trf.xlu0 }
0x22d1   : > { %10396 = vmatpush3.bf16.xpose.msra.mxu0 %v7439_v18  ;;  %v7420_v31 = vmul.f32 %v11188_v23, %v13434_v58  ;;  %v6983_v58 = vpop.f32.mrf.mxu1 }
0x22d2   : > { %v7182_v38 = vpack.c.bf16 %v7175_v34, %v7174_v42  ;;  %10397 = vmatprep.subr.bf16.mxu0 %v14058_v47  ;;  %v7243_v48 = vpack.c.bf16 %v6983_v58, %v6983_v58 }
0x22d3   : > { %v11190_v22 = vpop.eup %11189  ;;  %v7746_v15 = vpop.trf.xlu1 }
0x22d4   : > { %v7190_v12 = vsel %vm1965_vm3, %v7182_v38, 0  ;;  %v7421_v3 = vmul.f32 %v11190_v22, %v13442_v57  ;;  %v7519_v57 = vsel %vm1978_vm2, %v7488_v44, 0  ;;  %v7499_v0 = vpop.trf.xlu0 }
0x22d5   : > { %10376 = vmatpush3.bf16.xpose.msra.mxu1 %v7190_v12 }
0x22d6   : > { %10541 = vmatprep.subr.msk.bf16.mxu1 %vm1978_vm2, %v7488_v44  ;;  %v7428_v32 = vpack.c.bf16 %v7421_v3, %v7420_v31 }
0x22d7   : > { %v7747_v4 = vpop.trf.xlu1 }
0x22d8   : > { %v7436_v54 = vsel %vm1965_vm3, %v7428_v32, 0  ;;  %v7500_v2 = vpop.trf.xlu0 }
0x22d9   : > { %10398 = vmatpush3.bf16.xpose.msra.mxu0 %v7436_v54 }
0x22da   : > { %10542 = vmatprep.subr.msk.bf16.mxu0 %vm1978_vm2, %v7734_v6 }
0x22dc   : > { %10378 = vmatmul.mubr.msk.bf16.vlgmr.msra.gmra.mxu1 %vm1965_vm3, %v6997_v30  ;;  %v7501_v55 = vpop.trf.xlu0 }
0x22dd   : > { %10404 = vmatpush3.bf16.msra.mxu1 %v7519_v57  ;;  %10405 = vmatprep.mubr.msk.bf16.mxu1 %vm1965_vm3, %v7498_v51 }
0x22de   : > { %10413 = vmatprep.subr.bf16.mxu1 %v14058_v47 }
0x22e0   : > { %10400 = vmatmul.mubr.msk.bf16.vlgmr.msra.gmra.mxu0 %vm1965_vm3, %v7243_v48 }
0x22e1   : > { %10426 = vmatpush3.bf16.msra.mxu0 %v7765_v14  ;;  %10427 = vmatprep.mubr.msk.bf16.mxu0 %vm1965_vm3, %v7744_v16 }
0x22e2   : > { %10435 = vmatprep.subr.bf16.mxu0 %v14058_v47 }
0x22e4   : > { %10406 = vmatmul.mubr.msk.bf16.vlgmr.msra.gmra.mxu1 %vm1965_vm3, %v7499_v0 }
0x22e5   : > { %10409 = vmatprep.mubr.msk.bf16.mxu1 %vm1965_vm3, %v7500_v2 }
0x22e8   : > { %10428 = vmatmul.mubr.msk.bf16.vlgmr.msra.gmra.mxu0 %vm1965_vm3, %v7745_v56 }
0x22e9   : > { %10431 = vmatprep.mubr.msk.bf16.mxu0 %vm1965_vm3, %v7746_v15 }
0x22ec   : > { %10410 = vmatmul.mubr.msk.bf16.gmra.mxu1 %vm1965_vm3, %v7501_v55 }
0x22ed   : > { %10421 = vmatprep.mubr.msk.bf16.mxu1 %vm11389_vm4, %v14058_v47 }
0x22f0   : > { %10432 = vmatmul.mubr.msk.bf16.gmra.mxu0 %vm1965_vm3, %v7747_v4 }
0x22f1   : > { %10443 = vmatprep.mubr.msk.bf16.mxu0 %vm11389_vm4, %v14058_v47 }
0x239c   : > { %v7235_v17 = vpop.f32.mrf.mxu1 }
0x239e   : > { %v10379_v62 = vpop.f32.mrf.mxu1 }
0x23a0   : > { %v7238_v26 = vpop.f32.mrf.mxu1  ;;  %v7481_v27 = vpop.f32.mrf.mxu0 }
0x23a1   : > { %v13508_v49 = vpack.c.bf16 %v7481_v27, %v7235_v17 }
0x23a2   : > { %v10380_v33 = vpop.f32.mrf.mxu1  ;;  %v10401_v45 = vpop.f32.mrf.mxu0 }
0x23a4   : > { %v7484_v61 = vpop.f32.mrf.mxu0  ;;  %v13510_v46 = vpop.f32.mrf.mxu1 }
0x23a5   : > { %v7592_v34 = vsel %vm1965_vm3, %v13510_v46, -inf }
0x23a6   : > { %v10402_v5 = vpop.f32.mrf.mxu0  ;;  %v13512_v20 = vpop.f32.mrf.mxu1 }
0x23a7   : > { %v7586_v9 = vsel %vm1965_vm3, %v13512_v20, -inf }
0x23a8   : > { %v13514_v35 = vpop.f32.mrf.mxu1  ;;  %v13516_v50 = vpop.f32.mrf.mxu0 }
0x23a9   : > { %v7838_v38 = vsel %vm1965_vm3, %v13516_v50, -inf  ;;  %v7595_v22 = vsel %vm1965_vm3, %v13514_v35, -inf }
0x23aa   : > { %v13518_v25 = vpop.f32.mrf.mxu1  ;;  %v13520_v11 = vpop.f32.mrf.mxu0 }
0x23ab   : > { %v7832_v12 = vsel %vm1965_vm3, %v13520_v11, -inf  ;;  %v7589_v31 = vsel %vm1965_vm3, %v13518_v25, -inf }
0x23ac   : > { %v10411_v40 = vpop.f32.mrf.mxu1  ;;  %v13522_v24 = vpop.f32.mrf.mxu0 }
0x23ad   : > { %v7604_v13 = vsel %vm1965_vm3, %v10411_v40, -inf  ;;  %v7841_v44 = vsel %vm1965_vm3, %v13522_v24, -inf }
0x23ae   : > { %7605 = vmax.xlane.f32.xlu0 %v7604_v13  ;;  %v7571_v28 = vpop.f32.mrf.mxu1  ;;  %v13525_v53 = vpop.f32.mrf.mxu0 }
0x23af   : > { %v7598_v29 = vsel %vm1965_vm3, %v7571_v28, -inf  ;;  %v7835_v3 = vsel %vm1965_vm3, %v13525_v53, -inf }
0x23b0   : > { %v10412_v19 = vpop.f32.mrf.mxu1  ;;  %v10433_v41 = vpop.f32.mrf.mxu0 }
0x23b1   : > { %v7607_v37 = vsel %vm1965_vm3, %v10412_v19, -inf  ;;  %v7850_v7 = vsel %vm1965_vm3, %v10433_v41, -inf }
0x23b2   : > { %7608 = vmax.xlane.f32.xlu1 %v7607_v37  ;;  %7851 = vmax.xlane.f32.xlu0 %v7850_v7  ;;  %v7817_v1 = vpop.f32.mrf.mxu0  ;;  %v7574_v52 = vpop.f32.mrf.mxu1 }
0x23b3   : > { %v7844_v36 = vsel %vm1965_vm3, %v7817_v1, -inf  ;;  %v7601_v18 = vsel %vm1965_vm3, %v7574_v52, -inf }
0x23b4   : > { %v10434_v43 = vpop.f32.mrf.mxu0 }
0x23b5   : > { %v7853_v8 = vsel %vm1965_vm3, %v10434_v43, -inf }
0x23b6   : > { %7599 = vmax.xlane.f32.xlu0 %v7598_v29  ;;  %7854 = vmax.xlane.f32.xlu1 %v7853_v8  ;;  %v7820_v42 = vpop.f32.mrf.mxu0 }
0x23b7   : > { %v7847_v23 = vsel %vm1965_vm3, %v7820_v42, -inf }
0x23ba   : > { %7845 = vmax.xlane.f32.xlu0 %v7844_v36  ;;  %7602 = vmax.xlane.f32.xlu1 %v7601_v18 }
0x23be   : > { %7593 = vmax.xlane.f32.xlu0 %v7592_v34  ;;  %7848 = vmax.xlane.f32.xlu1 %v7847_v23 }
0x23c2   : > { %7839 = vmax.xlane.f32.xlu0 %v7838_v38  ;;  %7596 = vmax.xlane.f32.xlu1 %v7595_v22 }
0x23c6   : > { %7587 = vmax.xlane.f32.xlu0 %v7586_v9  ;;  %7842 = vmax.xlane.f32.xlu1 %v7841_v44 }
0x23ca   : > { %7833 = vmax.xlane.f32.xlu0 %v7832_v12  ;;  %7590 = vmax.xlane.f32.xlu1 %v7589_v31 }
0x23ce   : > { %7836 = vmax.xlane.f32.xlu1 %v7835_v3 }
0x2437   : > { %v7606_v32 = vpop.xlane.xlu0 %7605 }
0x2438   : > { %v7616_v51 = vsub.f32 %v10411_v40, %v7606_v32 }
0x243a   : > { %v7630_v6 = vmul.f32 1.442695, %v7616_v51 }
0x243b   : > { %v7852_v54 = vpop.xlane.xlu0 %7851  ;;  %v7609_v30 = vpop.xlane.xlu1 %7608 }
0x243c   : > { %11191 = vpow2.f32 %v7630_v6  ;;  %v7862_v16 = vsub.f32 %v10433_v41, %v7852_v54  ;;  %v7617_v58 = vsub.f32 %v10412_v19, %v7609_v30 }
0x243e   : > { %v7876_v57 = vmul.f32 1.442695, %v7862_v16  ;;  %v7632_v0 = vmul.f32 1.442695, %v7617_v58 }
0x243f   : > { %v7600_v48 = vpop.xlane.xlu0 %7599  ;;  %v7855_v14 = vpop.xlane.xlu1 %7854 }
0x2440   : > { %11193 = vpow2.f32 %v7876_v57  ;;  %v7614_v56 = vsub.f32 %v7571_v28, %v7600_v48  ;;  %v7863_v2 = vsub.f32 %v10434_v43, %v7855_v14 }
0x2441   : > { %11195 = vpow2.f32 %v7632_v0 }
0x2442   : > { %v7626_v15 = vmul.f32 1.442695, %v7614_v56  ;;  %v7878_v55 = vmul.f32 1.442695, %v7863_v2 }
0x2443   : > { %v7846_v4 = vpop.xlane.xlu0 %7845  ;;  %v7603_v17 = vpop.xlane.xlu1 %7602 }
0x2444   : > { %11197 = vpow2.f32 %v7626_v15  ;;  %v7860_v62 = vsub.f32 %v7817_v1, %v7846_v4  ;;  %v7615_v26 = vsub.f32 %v7574_v52, %v7603_v17 }
0x2445   : > { %11199 = vpow2.f32 %v7878_v55 }
0x2446   : > { %v7872_v27 = vmul.f32 1.442695, %v7860_v62  ;;  %v7628_v33 = vmul.f32 1.442695, %v7615_v26 }
0x2447   : > { %v7594_v45 = vpop.xlane.xlu0 %7593  ;;  %v7849_v61 = vpop.xlane.xlu1 %7848 }
0x2448   : > { %11201 = vpow2.f32 %v7872_v27  ;;  %v7612_v5 = vsub.f32 %v13510_v46, %v7594_v45  ;;  %v7861_v40 = vsub.f32 %v7820_v42, %v7849_v61 }
0x2449   : > { %v13551_v13 = vpop.eup %11191  ;;  %11203 = vpow2.f32 %v7628_v33 }
0x244a   : > { %v7622_v28 = vmul.f32 1.442695, %v7612_v5  ;;  %v7874_v19 = vmul.f32 1.442695, %v7861_v40  ;;  %v7652_v41 = vsel %vm1965_vm3, %v13551_v13, 0.0  ;;  %v9367_v40 = vld [vmem:[%s14051_s3 + $0x28] sm:$0xff] }
0x244b   : > { %7653 = vadd.xlane.f32.xlu0 %v7652_v41  ;;  %v7840_v37 = vpop.xlane.xlu0 %7839  ;;  %v7597_v7 = vpop.xlane.xlu1 %7596  ;;  %v9369_v41 = vld [vmem:[%s14051_s3 + $0x38] sm:$0xff] }
0x244c   : > { %11205 = vpow2.f32 %v7622_v28  ;;  %v7858_v1 = vsub.f32 %v13516_v50, %v7840_v37  ;;  %v7613_v43 = vsub.f32 %v13514_v35, %v7597_v7  ;;  %v9366_v28 = vld [vmem:[%s14051_s3 + $0x20] sm:$0xff]  ;;  %v9488_v37 = vld [vmem:[%s14052_s26 + $0x30] sm:$0xff]  ;;  %v9489_v7 = vld [vmem:[%s14052_s26 + $0x38] sm:$0xff] }
0x244d   : > { %v13557_v29 = vpop.eup %11193  ;;  %11207 = vpow2.f32 %v7874_v19  ;;  %v9368_v19 = vld [vmem:[%s14051_s3 + $0x30] sm:$0xff]  ;;  %s14061_s3 = sld [smem:[#allocation14_spill]] }
0x244e   : > { %v13559_v46 = vpop.eup %11195  ;;  %v7868_v8 = vmul.f32 1.442695, %v7858_v1  ;;  %v7624_v52 = vmul.f32 1.442695, %v7613_v43  ;;  %v7898_v36 = vsel %vm1965_vm3, %v13557_v29, 0.0  ;;  %v9492_v1 = vld [vmem:[%s14053_s21 + $0x30] sm:$0xff] }
0x244f   : > { %7899 = vadd.xlane.f32.xlu0 %v7898_v36  ;;  %v7588_v18 = vpop.xlane.xlu0 %7587  ;;  %v7655_v42 = vsel %vm1965_vm3, %v13559_v46, 0.0  ;;  %v7843_v34 = vpop.xlane.xlu1 %7842  ;;  %v9493_v43 = vld [vmem:[%s14053_s21 + $0x38] sm:$0xff]  ;;  %v9490_v36 = vld [vmem:[%s14053_s21 + $0x20] sm:$0xff] }
0x2450   : > { %11209 = vpow2.f32 %v7868_v8  ;;  %v7610_v50 = vsub.f32 %v13512_v20, %v7588_v18  ;;  %7656 = vadd.xlane.f32.xlu1 %v7655_v42  ;;  %v7859_v35 = vsub.f32 %v13522_v24, %v7843_v34  ;;  %v9486_v8 = vld [vmem:[%s14052_s26 + $0x20] sm:$0xff]  ;;  %v9491_v18 = vld [vmem:[%s14053_s21 + $0x28] sm:$0xff]  ;;  %v9476_v42 = vld [vmem:[%s11546_s20 + $0xf0] sm:$0xff] }
0x2451   : > { %v13567_v23 = vpop.eup %11197  ;;  %11211 = vpow2.f32 %v7624_v52  ;;  %v9487_v52 = vld [vmem:[%s14052_s26 + $0x28] sm:$0xff]  ;;  %v9477_v34 = vld [vmem:[%s11546_s20 + $0xf8] sm:$0xff] }
0x2452   : > { %v13569_v38 = vpop.eup %11199  ;;  %v7618_v22 = vmul.f32 1.442695, %v7610_v50  ;;  %v7870_v9 = vmul.f32 1.442695, %v7859_v35  ;;  %v7646_v44 = vsel %vm1965_vm3, %v13567_v23, 0.0  ;;  %v9474_v50 = vld [vmem:[%s11546_s20 + $0xe0] sm:$0xff] }
0x2453   : > { %7647 = vadd.xlane.f32.xlu0 %v7646_v44  ;;  %v7834_v12 = vpop.xlane.xlu0 %7833  ;;  %v7901_v31 = vsel %vm1965_vm3, %v13569_v38, 0.0  ;;  %v7591_v3 = vpop.xlane.xlu1 %7590  ;;  %v9475_v35 = vld [vmem:[%s11546_s20 + $0xe8] sm:$0xff]  ;;  %v9470_v44 = vld [vmem:[%s11546_s20 + $0xc0] sm:$0xff] }
0x2454   : > { %11213 = vpow2.f32 %v7618_v22  ;;  %v7856_v20 = vsub.f32 %v13520_v11, %v7834_v12  ;;  %7902 = vadd.xlane.f32.xlu1 %v7901_v31  ;;  %v7611_v24 = vsub.f32 %v13518_v25, %v7591_v3  ;;  %v9472_v22 = vld [vmem:[%s11546_s20 + $0xd0] sm:$0xff]  ;;  %v9471_v12 = vld [vmem:[%s11546_s20 + $0xc8] sm:$0xff]  ;;  %v9469_v3 = vld [vmem:[%s11546_s20 + $0xb8] sm:$0xff] }
0x2455   : > { %v13577_v32 = vpop.eup %11201  ;;  %11215 = vpow2.f32 %v7870_v9  ;;  %v9473_v9 = vld [vmem:[%s11546_s20 + $0xd8] sm:$0xff]  ;;  %v9468_v31 = vld [vmem:[%s11546_s20 + $0xb0] sm:$0xff] }
0x2456   : > { %v13579_v51 = vpop.eup %11203  ;;  %v7864_v6 = vmul.f32 1.442695, %v7856_v20  ;;  %v7620_v54 = vmul.f32 1.442695, %v7611_v24  ;;  %v7892_v30 = vsel %vm1965_vm3, %v13577_v32, 0.0  ;;  %v9460_v20 = vld [vmem:[%s14054_s25 + $0xf0] sm:$0xff] }
0x2457   : > { %7893 = vadd.xlane.f32.xlu0 %v7892_v30  ;;  %v7649_v16 = vsel %vm1965_vm3, %v13579_v51, 0.0  ;;  %v7837_v58 = vpop.xlane.xlu1 %7836  ;;  %v9461_v24 = vld [vmem:[%s14054_s25 + $0xf8] sm:$0xff]  ;;  %v9458_v30 = vld [vmem:[%s14054_s25 + $0xe0] sm:$0xff] }
0x2458   : > { %11217 = vpow2.f32 %v7864_v6  ;;  %7650 = vadd.xlane.f32.xlu1 %v7649_v16  ;;  %v7857_v11 = vsub.f32 %v13525_v53, %v7837_v58  ;;  %v9466_v6 = vld [vmem:[%s11546_s20 + $0xa0] sm:$0xff]  ;;  %v9459_v16 = vld [vmem:[%s14054_s25 + $0xe8] sm:$0xff]  ;;  %v9464_v58 = vld [vmem:[%s11546_s20 + $0x90] sm:$0xff] }
0x2459   : > { %v13586_v25 = vpop.eup %11205  ;;  %11219 = vpow2.f32 %v7620_v54  ;;  %v9467_v54 = vld [vmem:[%s11546_s20 + $0xa8] sm:$0xff] }
0x245a   : > { %v13588_v57 = vpop.eup %11207  ;;  %v7866_v0 = vmul.f32 1.442695, %v7857_v11  ;;  %v7640_v48 = vsel %vm1965_vm3, %v13586_v25, 0.0  ;;  %v9465_v11 = vld [vmem:[%s11546_s20 + $0x98] sm:$0xff] }
0x245b   : > { %7641 = vadd.xlane.f32.xlu0 %v7640_v48  ;;  %v7895_v14 = vsel %vm1965_vm3, %v13588_v57, 0.0  ;;  %v9457_v48 = vld [vmem:[%s14054_s25 + $0xd8] sm:$0xff] }
0x245c   : > { %11221 = vpow2.f32 %v7866_v0  ;;  %7896 = vadd.xlane.f32.xlu1 %v7895_v14  ;;  %v9456_v0 = vld [vmem:[%s14054_s25 + $0xd0] sm:$0xff]  ;;  %v9462_v14 = vld [vmem:[%s11546_s20 + $0x80] sm:$0xff] }
0x245d   : > { %v13594_v56 = vpop.eup %11209 }
0x245e   : > { %v13596_v2 = vpop.eup %11211  ;;  %v7886_v53 = vsel %vm1965_vm3, %v13594_v56, 0.0 }
0x245f   : > { %7887 = vadd.xlane.f32.xlu0 %v7886_v53  ;;  %v7643_v15 = vsel %vm1965_vm3, %v13596_v2, 0.0  ;;  %v9463_v53 = vld [vmem:[%s11546_s20 + $0x88] sm:$0xff] }
0x2460   : > { %7644 = vadd.xlane.f32.xlu1 %v7643_v15  ;;  %v9454_v15 = vld [vmem:[%s14054_s25 + $0xc0] sm:$0xff] }
0x2461   : > { %v13602_v55 = vpop.eup %11213 }
0x2462   : > { %v13604_v4 = vpop.eup %11215  ;;  %v7634_v17 = vsel %vm1965_vm3, %v13602_v55, 0.0 }
0x2463   : > { %7635 = vadd.xlane.f32.xlu0 %v7634_v17  ;;  %v7889_v62 = vsel %vm1965_vm3, %v13604_v4, 0.0  ;;  %v9455_v17 = vld [vmem:[%s14054_s25 + $0xc8] sm:$0xff] }
0x2464   : > { %7890 = vadd.xlane.f32.xlu1 %v7889_v62  ;;  %v9452_v62 = vld [vmem:[%s14054_s25 + $0xb0] sm:$0xff] }
0x2465   : > { %v13610_v26 = vpop.eup %11217 }
0x2466   : > { %v13612_v27 = vpop.eup %11219  ;;  %v7880_v33 = vsel %vm1965_vm3, %v13610_v26, 0.0 }
0x2467   : > { %7881 = vadd.xlane.f32.xlu0 %v7880_v33  ;;  %v7637_v45 = vsel %vm1965_vm3, %v13612_v27, 0.0  ;;  %v9453_v33 = vld [vmem:[%s14054_s25 + $0xb8] sm:$0xff] }
0x2468   : > { %7638 = vadd.xlane.f32.xlu1 %v7637_v45  ;;  %v9450_v45 = vld [vmem:[%s14054_s25 + $0xa0] sm:$0xff] }
0x2469   : > { %v13618_v61 = vpop.eup %11221 }
0x246a   : > { %v7883_v5 = vsel %vm1965_vm3, %v13618_v61, 0.0 }
0x246c   : > { %7884 = vadd.xlane.f32.xlu1 %v7883_v5  ;;  %v9451_v5 = vld [vmem:[%s14054_s25 + $0xa8] sm:$0xff] }
0x247d   : > { %7986 = vperm.xlu1 %10620, %v9367_v40   ;;  %7981 = vperm.xlu0 %10619, %v9366_v28   ;;  %v9448_v40 = vld [vmem:[%s14054_s25 + $0x90] sm:$0xff]  ;;  %v9449_v28 = vld [vmem:[%s14054_s25 + $0x98] sm:$0xff] }
0x2481   : > { %7991 = vperm.xlu1 %10620, %v9368_v19   ;;  %7996 = vperm.xlu0 %10619, %v9369_v41   ;;  %v9446_v19 = vld [vmem:[%s14054_s25 + $0x80] sm:$0xff]  ;;  %v9447_v41 = vld [vmem:[%s14054_s25 + $0x88] sm:$0xff] }
0x2485   : > { %8216 = vperm.xlu1 %10620, %v9488_v37   ;;  %8221 = vperm.xlu0 %10619, %v9489_v7   ;;  %v9484_v37 = vld [vmem:[%s11556_s14 + $0x30] sm:$0xff]  ;;  %v9485_v7 = vld [vmem:[%s11556_s14 + $0x38] sm:$0xff] }
0x2489   : > { %8240 = vperm.xlu1 %10620, %v9492_v1   ;;  %8245 = vperm.xlu0 %10619, %v9493_v43   ;;  %v9482_v43 = vld [vmem:[%s11556_s14 + $0x20] sm:$0xff] }
0x248d   : > { %8206 = vperm.xlu1 %10620, %v9486_v8   ;;  %8211 = vperm.xlu0 %10619, %v9487_v52   ;;  %v9483_v8 = vld [vmem:[%s11556_s14 + $0x28] sm:$0xff] }
0x2491   : > { %8230 = vperm.xlu1 %10620, %v9490_v36   ;;  %8235 = vperm.xlu0 %10619, %v9491_v18   ;;  %v8935_v18 = vld [vmem:[%s14061_s3] sm:$0xff] }
0x2495   : > { %8567 = vperm.xlu1 %10620, %v9476_v42   ;;  %8572 = vperm.xlu0 %10619, %v9477_v34   ;;  %v8936_v42 = vld [vmem:[%s14061_s3 + $0x8] sm:$0xff] }
0x2499   : > { %8557 = vperm.xlu1 %10620, %v9474_v50   ;;  %8562 = vperm.xlu0 %10619, %v9475_v35   ;;  %v8937_v35 = vld [vmem:[%s14061_s3 + $0x10] sm:$0xff] }
0x249d   : > { %8547 = vperm.xlu1 %10620, %v9472_v22   ;;  %8552 = vperm.xlu0 %10619, %v9473_v9   ;;  %v8938_v22 = vld [vmem:[%s14061_s3 + $0x18] sm:$0xff]  ;;  %s14062_s3 = sld [smem:[#allocation13_spill]] }
0x24a1   : > { %8537 = vperm.xlu1 %10620, %v9470_v44   ;;  %8542 = vperm.xlu0 %10619, %v9471_v12  }
0x24a5   : > { %8527 = vperm.xlu1 %10620, %v9468_v31   ;;  %8532 = vperm.xlu0 %10619, %v9469_v3  }
0x24a9   : > { %8326 = vperm.xlu1 %10620, %v9460_v20   ;;  %8331 = vperm.xlu0 %10619, %v9461_v24  }
0x24ad   : > { %8517 = vperm.xlu1 %10620, %v9466_v6   ;;  %8522 = vperm.xlu0 %10619, %v9467_v54  }
0x24b1   : > { %8316 = vperm.xlu1 %10620, %v9458_v30   ;;  %8321 = vperm.xlu0 %10619, %v9459_v16  }
0x24b5   : > { %8507 = vperm.xlu1 %10620, %v9464_v58   ;;  %8512 = vperm.xlu0 %10619, %v9465_v11  }
0x24b9   : > { %8306 = vperm.xlu1 %10620, %v9456_v0   ;;  %8311 = vperm.xlu0 %10619, %v9457_v48  }
0x24bd   : > { %8497 = vperm.xlu1 %10620, %v9462_v14   ;;  %8502 = vperm.xlu0 %10619, %v9463_v53  }
0x24c1   : > { %8296 = vperm.xlu1 %10620, %v9454_v15   ;;  %8301 = vperm.xlu0 %10619, %v9455_v17  }
0x24c5   : > { %8286 = vperm.xlu1 %10620, %v9452_v62   ;;  %8291 = vperm.xlu0 %10619, %v9453_v33  }
0x24c9   : > { %8276 = vperm.xlu1 %10620, %v9450_v45   ;;  %8281 = vperm.xlu0 %10619, %v9451_v5  }
0x24cd   : > { %8266 = vperm.xlu1 %10620, %v9448_v40   ;;  %8271 = vperm.xlu0 %10619, %v9449_v28  }
0x24d1   : > { %8256 = vperm.xlu1 %10620, %v9446_v19   ;;  %8261 = vperm.xlu0 %10619, %v9447_v41  }
0x24d4   : > { %v7654_v1 = vpop.xlane.xlu0 %7653 }
0x24d5   : > { %8917 = vperm.xlu1 %10620, %v9484_v37   ;;  %8922 = vperm.xlu0 %10619, %v9485_v7   ;;  %11223 = vrcp.f32 %v7654_v1 }
0x24d8   : > { %v7900_v52 = vpop.xlane.xlu0 %7899 }
0x24d9   : > { %8907 = vperm.xlu1 %10620, %v9482_v43   ;;  %v7657_v36 = vpop.xlane.xlu1 %7656  ;;  %8912 = vperm.xlu0 %10619, %v9483_v8  }
0x24da   : > { %11225 = vrcp.f32 %v7657_v36 }
0x24db   : > { %11227 = vrcp.f32 %v7900_v52 }
0x24dc   : > { %v7648_v34 = vpop.xlane.xlu0 %7647 }
0x24dd   : > { %8941 = vperm.xlu1 %10620, %v8935_v18   ;;  %v7903_v50 = vpop.xlane.xlu1 %7902  ;;  %8946 = vperm.xlu0 %10619, %v8936_v42  }
0x24de   : > { %11229 = vrcp.f32 %v7903_v50 }
0x24df   : > { %11231 = vrcp.f32 %v7648_v34 }
0x24e0   : > { %v7894_v9 = vpop.xlane.xlu0 %7893 }
0x24e1   : > { %8951 = vperm.xlu1 %10620, %v8937_v35   ;;  %v7651_v44 = vpop.xlane.xlu1 %7650  ;;  %8956 = vperm.xlu0 %10619, %v8938_v22  }
0x24e2   : > { %11233 = vrcp.f32 %v7651_v44  ;;  %v11224_v31 = vpop.eup %11223 }
0x24e3   : > { %11235 = vrcp.f32 %v7894_v9  ;;  %v7672_v6 = vmul.f32 %v11224_v31, %v13551_v13 }
0x24e4   : > { %v7642_v12 = vpop.xlane.xlu0 %7641 }
0x24e5   : > { %v7897_v3 = vpop.xlane.xlu1 %7896 }
0x24e6   : > { %11237 = vrcp.f32 %v7897_v3 }
0x24e7   : > { %v11226_v20 = vpop.eup %11225  ;;  %11239 = vrcp.f32 %v7642_v12 }
0x24e8   : > { %v7888_v24 = vpop.xlane.xlu0 %7887  ;;  %v7673_v54 = vmul.f32 %v11226_v20, %v13559_v46  ;;  %v11228_v30 = vpop.eup %11227 }
0x24e9   : > { %v7645_v16 = vpop.xlane.xlu1 %7644  ;;  %v7918_v14 = vmul.f32 %v11228_v30, %v13557_v29 }
0x24ea   : > { %11241 = vrcp.f32 %v7645_v16  ;;  %v7677_v58 = vpack.c.bf16 %v7673_v54, %v7672_v6 }
0x24eb   : > { %v11230_v11 = vpop.eup %11229  ;;  %11243 = vrcp.f32 %v7888_v24 }
0x24ec   : > { %v7636_v0 = vpop.xlane.xlu0 %7635  ;;  %v7691_v48 = vsel %vm1965_vm3, %v7677_v58, 0  ;;  %v7919_v53 = vmul.f32 %v11230_v11, %v13569_v38  ;;  %v11232_v15 = vpop.eup %11231  ;;  %v10672_v11 = vld [vmem:[%s14055_s19 + $0x18] sm:$0xff]  }
0x24ed   : > { %10414 = vmatpush3.bf16.xpose.msra.mxu1 %v7691_v48  ;;  %v7891_v17 = vpop.xlane.xlu1 %7890  ;;  %v7670_v33 = vmul.f32 %v11232_v15, %v13567_v23  ;;  %v10674_v48 = vld [vmem:[%s14057_s29 + $0x40] sm:$0xff]  }
0x24ee   : > { %11245 = vrcp.f32 %v7891_v17  ;;  %v7923_v13 = vpack.c.bf16 %v7919_v53, %v7918_v14  ;;  %10415 = vmatprep.subr.bf16.mxu1 %v14058_v47 }
0x24ef   : > { %v11234_v46 = vpop.eup %11233  ;;  %11247 = vrcp.f32 %v7636_v0  ;;  %v10673_v0 = vld [vmem:[%s14056_s24 + $0x40] sm:$0xff]  }
0x24f0   : > { %v7937_v62 = vsel %vm1965_vm3, %v7923_v13, 0  ;;  %v7671_v45 = vmul.f32 %v11234_v46, %v13579_v51  ;;  %v11236_v5 = vpop.eup %11235  ;;  %v7882_v40 = vpop.xlane.xlu0 %7881 }
0x24f1   : > { %10436 = vmatpush3.bf16.xpose.msra.mxu0 %v7937_v62  ;;  %v7639_v29 = vpop.xlane.xlu1 %7638  ;;  %v7916_v41 = vmul.f32 %v11236_v5, %v13577_v32 }
0x24f2   : > { %11249 = vrcp.f32 %v7639_v29  ;;  %v7676_v38 = vpack.c.bf16 %v7671_v45, %v7670_v33  ;;  %10437 = vmatprep.subr.bf16.mxu0 %v14058_v47 }
0x24f3   : > { %v11238_v28 = vpop.eup %11237  ;;  %11251 = vrcp.f32 %v7882_v40 }
0x24f4   : > { %v7688_v19 = vsel %vm1965_vm3, %v7676_v38, 0  ;;  %v7917_v37 = vmul.f32 %v11238_v28, %v13588_v57  ;;  %v11240_v7 = vpop.eup %11239 }
0x24f5   : > { %10416 = vmatpush3.bf16.xpose.msra.mxu1 %v7688_v19  ;;  %v7885_v23 = vpop.xlane.xlu1 %7884  ;;  %v7668_v8 = vmul.f32 %v11240_v7, %v13586_v25 }
0x24f6   : > { %11253 = vrcp.f32 %v7885_v23  ;;  %v7922_v51 = vpack.c.bf16 %v7917_v37, %v7916_v41  ;;  %10417 = vmatprep.subr.bf16.mxu1 %v14058_v47 }
0x24f7   : > { %v11242_v1 = vpop.eup %11241 }
0x24f8   : > { %v7934_v43 = vsel %vm1965_vm3, %v7922_v51, 0  ;;  %v7669_v52 = vmul.f32 %v11242_v1, %v13596_v2  ;;  %v11244_v36 = vpop.eup %11243  ;;  %v7982_v53 = vpop.permute.xlu0 %7981 }
0x24f9   : > { %10438 = vmatpush3.bf16.xpose.msra.mxu0 %v7934_v43  ;;  %v7914_v42 = vmul.f32 %v11244_v36, %v13594_v56  ;;  %v7987_v14 = vpop.permute.xlu1 %7986  ;;  %v7999_v46 = vadd.f32 %v7982_v53, %v13255_v39 }
0x24fa   : > { %v7675_v18 = vpack.c.bf16 %v7669_v52, %v7668_v8  ;;  %10439 = vmatprep.subr.bf16.mxu0 %v14058_v47  ;;  %v8000_v45 = vadd.f32 %v7987_v14, %v13260_v63 }
0x24fb   : > { %v11246_v32 = vpop.eup %11245 }
0x24fc   : > { %v7685_v57 = vsel %vm1965_vm3, %v7675_v18, 0  ;;  %v7915_v34 = vmul.f32 %v11246_v32, %v13604_v4  ;;  %v11248_v50 = vpop.eup %11247  ;;  %v7997_v62 = vpop.permute.xlu0 %7996 }
0x24fd   : > { %10418 = vmatpush3.bf16.xpose.msra.mxu1 %v7685_v57  ;;  %v7666_v22 = vmul.f32 %v11248_v50, %v13602_v55  ;;  %v7489_v55 = vpack.c.bf16 %v13472_v21, %v13472_v21  ;;  %v7992_v17 = vpop.permute.xlu1 %7991  ;;  %v8002_v29 = vadd.f32 %v7997_v62, %v13264_v10 }
0x24fe   : > { %v7921_v35 = vpack.c.bf16 %v7915_v34, %v7914_v42  ;;  %10419 = vmatprep.subr.bf16.mxu1 %v14058_v47 }
0x24ff   : > { %v11250_v25 = vpop.eup %11249 }
0x2500   : > { %v7931_v2 = vsel %vm1965_vm3, %v7921_v35, 0  ;;  %v7667_v9 = vmul.f32 %v11250_v25, %v13612_v27  ;;  %v11252_v44 = vpop.eup %11251  ;;  %v10671_v27 = vld [vmem:[%s14055_s19 + $0x10] sm:$0xff]  }
0x2501   : > { %10440 = vmatpush3.bf16.xpose.msra.mxu0 %v7931_v2  ;;  %v7912_v31 = vmul.f32 %v11252_v44, %v13610_v26 }
0x2502   : > { %v7674_v12 = vpack.c.bf16 %v7667_v9, %v7666_v22  ;;  %10441 = vmatprep.subr.bf16.mxu0 %v14058_v47  ;;  %v7735_v47 = vpack.c.bf16 %v13484_v60, %v13484_v60 }
0x2503   : > { %v11254_v56 = vpop.eup %11253 }
0x2504   : > { %v7682_v4 = vsel %vm1965_vm3, %v7674_v12, 0  ;;  %v7913_v3 = vmul.f32 %v11254_v56, %v13618_v61 }
0x2505   : > { %10420 = vmatpush3.bf16.xpose.msra.mxu1 %v7682_v4 }
0x2506   : > { %v7920_v20 = vpack.c.bf16 %v7913_v3, %v7912_v31 }
0x2508   : > { %v7928_v24 = vsel %vm1965_vm3, %v7920_v20, 0 }
0x2509   : > { %10442 = vmatpush3.bf16.xpose.msra.mxu0 %v7928_v24 }
0x250c   : > { %10422 = vmatmul.mubr.msk.bf16.vlgmr.msra.gmra.mxu1 %vm1965_vm3, %v7489_v55 }
0x250d   : > { %10451 = vmatprep.mubr.msk.bf16.mxu1 %vm1030_vm1, %v10671_v27 }
0x2510   : > { %10444 = vmatmul.mubr.msk.bf16.vlgmr.msra.gmra.mxu0 %vm1965_vm3, %v7735_v47 }
0x2511   : > { %10479 = vmatprep.mubr.msk.bf16.mxu0 %vm1030_vm1, %v10674_v48 }
0x25cc   : > { %v7727_v26 = vpop.f32.mrf.mxu1 }
0x25ce   : > { %v10423_v61 = vpop.f32.mrf.mxu1 }
0x25cf   : > { %v8222_v61 = vpop.permute.xlu0 %8221 }
0x25d0   : > { %v7730_v6 = vpop.f32.mrf.mxu1  ;;  %v7973_v54 = vpop.f32.mrf.mxu0 }
0x25d1   : > { %v8004_v30 = vpack.c.bf16 %v7973_v54, %v7727_v26  ;;  %v8217_v6 = vpop.permute.xlu1 %8216 }
0x25d2   : > { %v10424_v16 = vpop.f32.mrf.mxu1  ;;  %v10445_v21 = vpop.f32.mrf.mxu0 }
0x25d3   : > { %10447 = vmatprep.subr.bf16.mxu1 %v8004_v30  ;;  %v8246_v54 = vpop.permute.xlu0 %8245 }
0x25d4   : > { %v7976_v58 = vpop.f32.mrf.mxu0  ;;  %10448 = vmatpush3.bf16.msra.mxu1 %v8004_v30 }
0x25d5   : > { %10449 = vmatprep.subr.bf16.mxu1 %v13508_v49  ;;  %v8241_v30 = vpop.permute.xlu1 %8240 }
0x25d6   : > { %v10446_v60 = vpop.f32.mrf.mxu0 }
0x25d7   : > { %v8212_v16 = vpop.permute.xlu0 %8211 }
0x25d8   : > { %10450 = vmatpush3.bf16.msra.mxu1 %v13508_v49  ;;  %v8001_v49 = vadd.f32 %v7992_v17, %v13258_v59 }
0x25d9   : > { %v8207_v21 = vpop.permute.xlu1 %8206 }
0x25db   : > { %10452 = vmatmul.mubr.msk.bf16.vlgmr.msra.gmra.mxu1 %vm1030_vm1, %v10672_v11 }
0x25dc   : > { %10459 = vmatprep.mubr.msk.bf16.mxu1 %vm1030_vm1, %v10673_v0 }
0x269b   : > { %v10453_v15 = vpop.f32.mrf.mxu1 }
0x269c   : > { %v13726_v38 = vadd.f32 %v10453_v15, %v8001_v49 }
0x269d   : > { %v8055_v13 = vpop.f32.mrf.mxu1 }
0x269e   : > { %v13723_v5 = vadd.f32 %v8055_v13, %v7999_v46  ;;  %v8165_v59 = vsel %vm1017_vm0, %v13726_v38, 0.0  ;;  %v8236_v13 = vpop.permute.xlu0 %8235  ;;  %v8231_v46 = vpop.permute.xlu1 %8230 }
0x269f   : > { %v10454_v33 = vpop.f32.mrf.mxu1 }
0x26a0   : > { %v8162_v19 = vsel %vm1017_vm0, %v13723_v5, 0.0  ;;  %v13732_v41 = vadd.f32 %v10454_v33, %v8002_v29 }
0x26a1   : > { %v8058_v40 = vpop.f32.mrf.mxu1 }
0x26a2   : > { %v13728_v28 = vadd.f32 %v8058_v40, %v8000_v45  ;;  %v8167_v10 = vsel %vm1017_vm0, %v13732_v41, 0.0 }
0x26a4   : > { %v8163_v39 = vsel %vm1017_vm0, %v13728_v28, 0.0 }
0x26a5   : > { %v8164_v63 = vadd.f32 %v8163_v39, %v8162_v19  ;;  %v10675_v19 = vld [vmem:[%s14056_s24 + $0x48] sm:$0xff]  }
0x26a6   : > { %v10676_v39 = vld [vmem:[%s14057_s29 + $0x48] sm:$0xff]  }
0x26a7   : > { %v8166_v37 = vadd.f32 %v8165_v59, %v8164_v63  ;;  %v10677_v63 = vld [vmem:[%s14056_s24 + $0x50] sm:$0xff]  }
0x26a8   : > { %v10678_v59 = vld [vmem:[%s14057_s29 + $0x50] sm:$0xff]  }
0x26a9   : > { %v8168_v7 = vadd.f32 %v8167_v10, %v8166_v37  ;;  %v10679_v37 = vld [vmem:[%s14056_s24 + $0x58] sm:$0xff]  }
0x26aa   : > { %v10680_v10 = vld [vmem:[%s14057_s29 + $0x58] sm:$0xff]  }
0x26ab   : > { %v8169_v23 = vrot.slane %v8168_v7, 4 }
0x26ad   : > { %v8170_v51 = vadd.f32 %v8169_v23, %v8168_v7  ;;  %v10681_v7 = vld [vmem:[%s14056_s24 + $0x60] sm:$0xff]  }
0x26ae   : > { %v10682_v23 = vld [vmem:[%s14057_s29 + $0x60] sm:$0xff]  }
0x26af   : > { %v8171_v1 = vrot.slane %v8170_v51, 2 }
0x26b1   : > { %v8172_v43 = vadd.f32 %v8171_v1, %v8170_v51  ;;  %v10683_v51 = vld [vmem:[%s14056_s24 + $0x68] sm:$0xff]  }
0x26b2   : > { %v10684_v1 = vld [vmem:[%s14057_s29 + $0x68] sm:$0xff]  }
0x26b3   : > { %v8173_v8 = vrot.slane %v8172_v43, 1 }
0x26b5   : > { %v8174_v52 = vadd.f32 %v8173_v8, %v8172_v43  ;;  %v10685_v43 = vld [vmem:[%s14056_s24 + $0x70] sm:$0xff]  }
0x26b6   : > { %v10686_v8 = vld [vmem:[%s14057_s29 + $0x70] sm:$0xff]  }
0x26b7   : > { %v8175_v36 = vmul.f32 0.03125, %v8174_v52  ;;  %v10687_v52 = vld [vmem:[%s14056_s24 + $0x78] sm:$0xff]  }
0x26b9   : > { %v8176_v18 = vsub.f32 %v13723_v5, %v8175_v36  ;;  %v8177_v32 = vsub.f32 %v13728_v28, %v8175_v36  ;;  %v8178_v57 = vsub.f32 %v13726_v38, %v8175_v36  ;;  %v8179_v42 = vsub.f32 %v13732_v41, %v8175_v36  ;;  %v10688_v36 = vld [vmem:[%s14057_s29 + $0x78] sm:$0xff]  }
0x26bb   : > { %v8180_v34 = vmul.f32 %v8176_v18, %v8176_v18  ;;  %v8181_v50 = vmul.f32 %v8177_v32, %v8177_v32  ;;  %v8182_v35 = vmul.f32 %v8178_v57, %v8178_v57  ;;  %v8183_v25 = vmul.f32 %v8179_v42, %v8179_v42 }
0x26bd   : > { %v8184_v2 = vsel %vm1017_vm0, %v8180_v34, 0.0  ;;  %v8185_v22 = vsel %vm1017_vm0, %v8181_v50, 0.0  ;;  %v8187_v44 = vsel %vm1017_vm0, %v8182_v35, 0.0  ;;  %v8189_v56 = vsel %vm1017_vm0, %v8183_v25, 0.0 }
0x26be   : > { %v8186_v9 = vadd.f32 %v8185_v22, %v8184_v2 }
0x26c0   : > { %v8188_v12 = vadd.f32 %v8187_v44, %v8186_v9 }
0x26c2   : > { %v8190_v4 = vadd.f32 %v8189_v56, %v8188_v12 }
0x26c4   : > { %v8191_v31 = vrot.slane %v8190_v4, 4 }
0x26c6   : > { %v8192_v3 = vadd.f32 %v8191_v31, %v8190_v4 }
0x26c8   : > { %v8193_v20 = vrot.slane %v8192_v3, 2 }
0x26ca   : > { %v8194_v24 = vadd.f32 %v8193_v20, %v8192_v3 }
0x26cc   : > { %v8195_v55 = vrot.slane %v8194_v24, 1 }
0x26ce   : > { %v8196_v47 = vadd.f32 %v8195_v55, %v8194_v24 }
0x26d0   : > { %v8197_v27 = vmul.f32 0.03125, %v8196_v47 }
0x26d2   : > { %v8198_v26 = vadd.f32 1e-05, %v8197_v27 }
0x26d4   : > { %11255 = vrsqrt.f32 %v8198_v26 }
0x26e1   : > { %v11256_v58 = vpop.eup %11255 }
0x26e2   : > { %v8201_v60 = vmul.f32 %v11256_v58, %v8177_v32  ;;  %v8202_v11 = vmul.f32 %v11256_v58, %v8178_v57  ;;  %v8203_v0 = vmul.f32 %v11256_v58, %v8179_v42  ;;  %v8200_v48 = vmul.f32 %v11256_v58, %v8176_v18  ;;  %v10689_v18 = vld [vmem:[%s14029_s8 + $0x10] sm:$0xff]   ;;  %v8568_v32 = vpop.permute.xlu1 %8567  ;;  %v8573_v57 = vpop.permute.xlu0 %8572 }
0x26e4   : > { %v8225_v14 = vmul.f32 %v8212_v16, %v8201_v60  ;;  %v8226_v53 = vmul.f32 %v8217_v6, %v8202_v11  ;;  %v8227_v15 = vmul.f32 %v8222_v61, %v8203_v0  ;;  %v8224_v17 = vmul.f32 %v8207_v21, %v8200_v48 }
0x26e6   : > { %v8250_v62 = vadd.f32 %v8241_v30, %v8226_v53  ;;  %v8251_v33 = vadd.f32 %v8246_v54, %v8227_v15  ;;  %v8248_v45 = vadd.f32 %v8231_v46, %v8224_v17  ;;  %v8249_v49 = vadd.f32 %v8236_v13, %v8225_v14  ;;  %v8558_v42 = vpop.permute.xlu1 %8557  ;;  %v8563_v34 = vpop.permute.xlu0 %8562 }
0x26e8   : > { %v8253_v40 = vpack.c.bf16 %v8251_v33, %v8250_v62  ;;  %v8252_v29 = vpack.c.bf16 %v8249_v49, %v8248_v45 }
0x26ea   : > { %10455 = vmatprep.subr.bf16.mxu1 %v8253_v40  ;;  %10475 = vmatprep.subr.bf16.mxu0 %v8253_v40  ;;  %v8548_v50 = vpop.permute.xlu1 %8547  ;;  %v8553_v35 = vpop.permute.xlu0 %8552 }
0x26eb   : > { %10456 = vmatpush3.bf16.msra.mxu1 %v8253_v40  ;;  %10476 = vmatpush3.bf16.msra.mxu0 %v8253_v40 }
0x26ec   : > { %10457 = vmatprep.subr.bf16.mxu1 %v8252_v29  ;;  %10477 = vmatprep.subr.bf16.mxu0 %v8252_v29 }
0x26ee   : > { %v8538_v25 = vpop.permute.xlu1 %8537  ;;  %v8543_v2 = vpop.permute.xlu0 %8542 }
0x26ef   : > { %10458 = vmatpush3.bf16.msra.mxu1 %v8252_v29  ;;  %10478 = vmatpush3.bf16.msra.mxu0 %v8252_v29 }
0x26f2   : > { %10460 = vmatmul.mubr.msk.bf16.vlgmr.msra.gmra.mxu1 %vm1030_vm1, %v10675_v19  ;;  %10480 = vmatmul.mubr.msk.bf16.vlgmr.msra.gmra.mxu0 %vm1030_vm1, %v10676_v39  ;;  %v8528_v22 = vpop.permute.xlu1 %8527  ;;  %v8533_v4 = vpop.permute.xlu0 %8532 }
0x26f3   : > { %10463 = vmatprep.mubr.msk.bf16.mxu1 %vm1030_vm1, %v10677_v63  ;;  %10483 = vmatprep.mubr.msk.bf16.mxu0 %vm1030_vm1, %v10678_v59 }
0x26f6   : > { %v13787_v20 = vpop.permute.xlu1 %8326  ;;  %v13795_v26 = vpop.permute.xlu0 %8331 }
0x26fa   : > { %10464 = vmatmul.mubr.msk.bf16.gmra.mxu1 %vm1030_vm1, %v10679_v37  ;;  %10484 = vmatmul.mubr.msk.bf16.gmra.mxu0 %vm1030_vm1, %v10680_v10  ;;  %v8518_v54 = vpop.permute.xlu1 %8517  ;;  %v8523_v58 = vpop.permute.xlu0 %8522 }
0x26fb   : > { %10467 = vmatprep.mubr.msk.bf16.mxu1 %vm1030_vm1, %v10681_v7  ;;  %10487 = vmatprep.mubr.msk.bf16.mxu0 %vm1030_vm1, %v10682_v23 }
0x26fe   : > { %v13801_v11 = vpop.permute.xlu1 %8316  ;;  %v13805_v53 = vpop.permute.xlu0 %8321 }
0x2702   : > { %10468 = vmatmul.mubr.msk.bf16.gmra.mxu1 %vm1030_vm1, %v10683_v51  ;;  %10488 = vmatmul.mubr.msk.bf16.gmra.mxu0 %vm1030_vm1, %v10684_v1  ;;  %v8508_v46 = vpop.permute.xlu1 %8507  ;;  %v8513_v19 = vpop.permute.xlu0 %8512 }
0x2703   : > { %10471 = vmatprep.mubr.msk.bf16.mxu1 %vm1030_vm1, %v10685_v43  ;;  %10491 = vmatprep.mubr.msk.bf16.mxu0 %vm1030_vm1, %v10686_v8 }
0x2706   : > { %v13821_v7 = vpop.permute.xlu1 %8306 }
0x270a   : > { %10472 = vmatmul.mubr.msk.bf16.gmra.mxu1 %vm1030_vm1, %v10687_v52  ;;  %10492 = vmatmul.mubr.msk.bf16.gmra.mxu0 %vm1030_vm1, %v10688_v36 }
0x270b   : > { %10511 = vmatprep.mubr.bf16.mxu1 %v10689_v18 }
0x27b2   : > { %v13777_v9 = vpop.f32.mrf.mxu1  ;;  %v10481_v44 = vpop.f32.mrf.mxu0 }
0x27b4   : > { %v13779_v12 = vpop.f32.mrf.mxu1  ;;  %v13781_v56 = vpop.f32.mrf.mxu0 }
0x27b6   : > { %v13783_v31 = vpop.f32.mrf.mxu1  ;;  %v13785_v3 = vpop.f32.mrf.mxu0 }
0x27b8   : > { %v13789_v24 = vpop.f32.mrf.mxu1  ;;  %v13791_v55 = vpop.f32.mrf.mxu0 }
0x27ba   : > { %v13793_v47 = vpop.f32.mrf.mxu1  ;;  %v10485_v27 = vpop.f32.mrf.mxu0 }
0x27bc   : > { %v13797_v61 = vpop.f32.mrf.mxu1  ;;  %v8689_v6 = vpop.f32.mrf.mxu0 }
0x27be   : > { %v10486_v30 = vpop.f32.mrf.mxu0  ;;  %v13799_v16 = vpop.f32.mrf.mxu1 }
0x27bf   : > { %v13828_v52 = vadd.f32 %v10486_v30, %v8533_v4  ;;  %v8498_v4 = vpop.permute.xlu1 %8497 }
0x27c0   : > { %v8692_v21 = vpop.f32.mrf.mxu0  ;;  %v13803_v0 = vpop.f32.mrf.mxu1 }
0x27c1   : > { %v8759_v30 = vmul.f32 0.70710677, %v13828_v52 }
0x27c2   : > { %v10489_v60 = vpop.f32.mrf.mxu0  ;;  %v13807_v15 = vpop.f32.mrf.mxu1 }
0x27c3   : > { %v13809_v17 = vadd.f32 %v10489_v60, %v8548_v50  ;;  %v13835_v50 = vadd.f32 %v10485_v27, %v8528_v22  ;;  %v13844_v60 = vadd.f32 %v8692_v21, %v8523_v58  ;;  %v13850_v27 = vadd.f32 %v8689_v6, %v8518_v54 }
0x27c4   : > { %v8705_v48 = vpop.f32.mrf.mxu0  ;;  %v13814_v49 = vpop.f32.mrf.mxu1 }
0x27c5   : > { %v8762_v45 = vmul.f32 0.70710677, %v13809_v17  ;;  %v13823_v23 = vadd.f32 %v8705_v48, %v8538_v25  ;;  %v13840_v25 = vadd.f32 %v10481_v44, %v8508_v46  ;;  %v8758_v22 = vmul.f32 0.70710677, %v13835_v50 }
0x27c6   : > { %v10490_v14 = vpop.f32.mrf.mxu0  ;;  %v13825_v51 = vpop.f32.mrf.mxu1  ;;  %v8757_v21 = vmul.f32 0.70710677, %v13844_v60  ;;  %v8756_v6 = vmul.f32 0.70710677, %v13850_v27 }
0x27c7   : > { %v13811_v62 = vadd.f32 %v10490_v14, %v8553_v35  ;;  %11257 = verf.f32 %v8762_v45  ;;  %v8760_v35 = vmul.f32 0.70710677, %v13823_v23  ;;  %v8754_v44 = vmul.f32 0.70710677, %v13840_v25 }
0x27c8   : > { %v8708_v13 = vpop.f32.mrf.mxu0  ;;  %v13854_v14 = vadd.f32 %v13785_v3, %v8513_v19 }
0x27c9   : > { %v8763_v39 = vmul.f32 0.70710677, %v13811_v62  ;;  %v13817_v63 = vadd.f32 %v8708_v13, %v8543_v2 }
0x27ca   : > { %v10493_v33 = vpop.f32.mrf.mxu0 }
0x27cb   : > { %v8730_v40 = vadd.f32 %v10493_v33, %v8568_v32  ;;  %v8761_v36 = vmul.f32 0.70710677, %v13817_v63  ;;  %v8755_v33 = vmul.f32 0.70710677, %v13854_v14 }
0x27cc   : > { %v8721_v29 = vpop.f32.mrf.mxu0 }
0x27cd   : > { %v8766_v59 = vmul.f32 0.70710677, %v8730_v40  ;;  %v13819_v37 = vadd.f32 %v8721_v29, %v8558_v42  ;;  %v13833_v42 = vpop.permute.xlu0 %8311 }
0x27ce   : > { %v10494_v10 = vpop.f32.mrf.mxu0 }
0x27cf   : > { %v8733_v1 = vadd.f32 %v10494_v10, %v8573_v57  ;;  %11259 = verf.f32 %v8766_v59  ;;  %v8764_v43 = vmul.f32 0.70710677, %v13819_v37  ;;  %v13838_v57 = vpop.f32.mrf.mxu1  ;;  %v8750_v59 = vmul.f32 0.5, %v8730_v40 }
0x27d0   : > { %v8724_v8 = vpop.f32.mrf.mxu0  ;;  %11261 = verf.f32 %v8763_v39 }
0x27d1   : > { %v8767_v18 = vmul.f32 0.70710677, %v8733_v1  ;;  %11263 = verf.f32 %v8764_v43  ;;  %v13831_v32 = vadd.f32 %v8724_v8, %v8563_v34  ;;  %v13847_v34 = vadd.f32 %v13781_v56, %v8498_v4  ;;  %v10473_v48 = vpop.f32.mrf.mxu1  ;;  %v8503_v13 = vpop.permute.xlu0 %8502 }
0x27d2   : > { %v13859_v56 = vadd.f32 %v13791_v55, %v8503_v13 }
0x27d3   : > { %11265 = verf.f32 %v8767_v18  ;;  %v8765_v2 = vmul.f32 0.70710677, %v13831_v32  ;;  %v8752_v58 = vmul.f32 0.70710677, %v13847_v34  ;;  %v8480_v54 = vpop.f32.mrf.mxu1  ;;  %v8751_v18 = vmul.f32 0.5, %v8733_v1 }
0x27d4   : > { %11267 = verf.f32 %v8761_v36  ;;  %v11258_v46 = vpop.eup %11257  ;;  %v8753_v29 = vmul.f32 0.70710677, %v13859_v56  ;;  %v8746_v1 = vmul.f32 0.5, %v13809_v17  ;;  %v8745_v17 = vmul.f32 0.5, %v13817_v63 }
0x27d5   : > { %11269 = verf.f32 %v8765_v2  ;;  %v10474_v55 = vpop.f32.mrf.mxu1  ;;  %v8302_v4 = vpop.permute.xlu0 %8301  ;;  %v8794_v13 = vadd.f32 1.0, %v11258_v46 }
0x27d6   : > { %11271 = verf.f32 %v8760_v35  ;;  %v8492_v40 = vadd.f32 %v10474_v55, %v13795_v26  ;;  %v8481_v26 = vadd.f32 %v8480_v54, %v13801_v11 }
0x27d7   : > { %11273 = verf.f32 %v8759_v30  ;;  %v8747_v30 = vmul.f32 0.5, %v13811_v62  ;;  %v8810_v55 = vmul.f32 %v8794_v13, %v8746_v1 }
0x27d8   : > { %11275 = verf.f32 %v8758_v22  ;;  %v8748_v22 = vmul.f32 0.5, %v13819_v37 }
0x27d9   : > { %11277 = verf.f32 %v8754_v44 }
0x27da   : > { %11279 = verf.f32 %v8757_v21  ;;  %v8489_v21 = vadd.f32 %v10473_v48, %v13787_v20  ;;  %v8476_v20 = vadd.f32 %v13825_v51, %v13833_v42  ;;  %v8744_v51 = vmul.f32 0.5, %v13823_v23 }
0x27db   : > { %11281 = verf.f32 %v8752_v58 }
0x27dc   : > { %v11260_v45 = vpop.eup %11259  ;;  %11283 = verf.f32 %v8756_v6  ;;  %v8483_v6 = vpop.f32.mrf.mxu1 }
0x27dd   : > { %v11262_v3 = vpop.eup %11261  ;;  %v8798_v19 = vadd.f32 1.0, %v11260_v45  ;;  %11285 = verf.f32 %v8755_v33  ;;  %v8297_v45 = vpop.permute.xlu1 %8296  ;;  %v8484_v48 = vadd.f32 %v8483_v6, %v13805_v53  ;;  %v8742_v6 = vmul.f32 0.5, %v13835_v50 }
0x27de   : > { %v11264_v39 = vpop.eup %11263  ;;  %v8795_v8 = vadd.f32 1.0, %v11262_v3  ;;  %11287 = verf.f32 %v8753_v29  ;;  %v8465_v23 = vadd.f32 %v13814_v49, %v8297_v45  ;;  %v8740_v45 = vmul.f32 0.5, %v13850_v27 }
0x27df   : > { %v8796_v43 = vadd.f32 1.0, %v11264_v39  ;;  %v8814_v36 = vmul.f32 %v8798_v19, %v8750_v59  ;;  %v8749_v19 = vmul.f32 0.5, %v13831_v32 }
0x27e0   : > { %v11266_v10 = vpop.eup %11265  ;;  %v8811_v39 = vmul.f32 %v8795_v8, %v8747_v30  ;;  %v8473_v8 = vadd.f32 %v13807_v15, %v13821_v7  ;;  %v8468_v15 = vadd.f32 %v13838_v57, %v8302_v4  ;;  %v8741_v57 = vmul.f32 0.5, %v13844_v60 }
0x27e1   : > { %v8799_v35 = vadd.f32 1.0, %v11266_v10  ;;  %v11268_v2 = vpop.eup %11267  ;;  %v8812_v3 = vmul.f32 %v8796_v43, %v8748_v22  ;;  %v8830_v59 = vmul.f32 %v8814_v36, %v8489_v21  ;;  %v8287_v54 = vpop.permute.xlu1 %8286 }
0x27e2   : > { %v11270_v44 = vpop.eup %11269  ;;  %v8793_v62 = vadd.f32 1.0, %v11268_v2  ;;  %v8827_v53 = vmul.f32 %v8811_v39, %v8476_v20  ;;  %v8826_v7 = vmul.f32 %v8810_v55, %v8473_v8  ;;  %v8457_v49 = vadd.f32 %v13793_v47, %v8287_v54 }
0x27e3   : > { %v8815_v58 = vmul.f32 %v8799_v35, %v8751_v18  ;;  %v11272_v33 = vpop.eup %11271  ;;  %v8797_v29 = vadd.f32 1.0, %v11270_v44  ;;  %v8292_v35 = vpop.permute.xlu0 %8291  ;;  %v8828_v36 = vmul.f32 %v8812_v3, %v8481_v26  ;;  %v8743_v44 = vmul.f32 0.5, %v13828_v52 }
0x27e4   : > { %v11274_v10 = vpop.eup %11273  ;;  %v8792_v18 = vadd.f32 1.0, %v11272_v33  ;;  %v8809_v11 = vmul.f32 %v8793_v62, %v8745_v17  ;;  %v8460_v39 = vadd.f32 %v13799_v16, %v8292_v35 }
0x27e5   : > { %v8831_v37 = vmul.f32 %v8815_v58, %v8492_v40  ;;  %v8813_v46 = vmul.f32 %v8797_v29, %v8749_v19  ;;  %v11276_v32 = vpop.eup %11275  ;;  %v8791_v22 = vadd.f32 1.0, %v11274_v10  ;;  %v8837_v19 = vpack.c.bf16 %v8827_v53, %v8826_v7  ;;  %v8277_v50 = vpop.permute.xlu1 %8276 }
0x27e6   : > { %v11278_v30 = vpop.eup %11277  ;;  %v8790_v21 = vadd.f32 1.0, %v11276_v32  ;;  %v8808_v40 = vmul.f32 %v8792_v18, %v8744_v51  ;;  %v8825_v29 = vmul.f32 %v8809_v11, %v8468_v15  ;;  %v8449_v47 = vadd.f32 %v13797_v61, %v8277_v50  ;;  %v10691_v15 = vld [vmem:[%s14062_s3] sm:$0xff]  }
0x27e7   : > { %v8839_v43 = vpack.c.bf16 %v8831_v37, %v8830_v59  ;;  %v8829_v2 = vmul.f32 %v8813_v46, %v8484_v48  ;;  %v11280_v42 = vpop.eup %11279  ;;  %v8807_v1 = vmul.f32 %v8791_v22, %v8743_v44  ;;  %v8282_v52 = vpop.permute.xlu0 %8281  ;;  %v8739_v46 = vmul.f32 0.5, %v13854_v14 }
0x27e8   : > { %v11282_v13 = vpop.eup %11281  ;;  %v8789_v3 = vadd.f32 1.0, %v11280_v42  ;;  %v8806_v59 = vmul.f32 %v8790_v21, %v8742_v6  ;;  %v8824_v4 = vmul.f32 %v8808_v40, %v8465_v23  ;;  %v8786_v16 = vadd.f32 1.0, %v11278_v30  ;;  %v10690_v40 = vld [vmem:[%s14029_s8 + $0x18] sm:$0xff]   ;;  %s13915_s8 = scalar_lea.hbm %s11561_s9, %s9538_s4  ;;  %s11390_s4 = smov [#allocation2]  }
0x27e9   : > { %10495 = vmatprep.subr.bf16.mxu1 %v8839_v43  ;;  %v8838_v63 = vpack.c.bf16 %v8829_v2, %v8828_v36  ;;  %v11284_v58 = vpop.eup %11283  ;;  %v8823_v48 = vmul.f32 %v8807_v1, %v8460_v39  ;;  %v8452_v18 = vadd.f32 %v13803_v0, %v8282_v52  ;;  %v8267_v36 = vpop.permute.xlu1 %8266  ;;  %v8784_v30 = vadd.f32 1.0, %v11282_v13  ;;  %s11297_s12 = sshll.u32 %s11390_s4, 4  ;;  %s11298_s12 = int_to_ptr.vmem [resolvable:$false] %s11297_s12 }
0x27ea   : > { %10496 = vmatpush3.bf16.msra.mxu1 %v8839_v43  ;;  %v11286_v33 = vpop.eup %11285  ;;  %v8788_v37 = vadd.f32 1.0, %v11284_v58  ;;  %v8805_v20 = vmul.f32 %v8789_v3, %v8741_v57  ;;  %v8836_v26 = vpack.c.bf16 %v8825_v29, %v8824_v4  ;;  %v8822_v60 = vmul.f32 %v8806_v59, %v8457_v49  ;;  %s11299_s13 = scalar_lea.vmem %s11298_s12, 1024 }
0x27eb   : > { %10497 = vmatprep.subr.bf16.mxu1 %v8838_v63  ;;  %v11288_v62 = vpop.eup %11287  ;;  %v8787_v10 = vadd.f32 1.0, %v11286_v33  ;;  %v8272_v17 = vpop.permute.xlu0 %8271  ;;  %v8738_v43 = vmul.f32 0.5, %v13840_v25  ;;  %v8737_v22 = vmul.f32 0.5, %v13859_v56  ;;  %v8441_v51 = vadd.f32 %v13777_v9, %v8267_v36 }
0x27ec   : > { %v8804_v55 = vmul.f32 %v8788_v37, %v8740_v45  ;;  %v8785_v27 = vadd.f32 1.0, %v11288_v62  ;;  %v8835_v35 = vpack.c.bf16 %v8823_v48, %v8822_v60  ;;  %v8821_v8 = vmul.f32 %v8805_v20, %v8452_v18 }
0x27ed   : > { %v8803_v32 = vmul.f32 %v8787_v10, %v8739_v46  ;;  %v8444_v2 = vadd.f32 %v13783_v31, %v8272_v17  ;;  %v8802_v14 = vmul.f32 %v8786_v16, %v8738_v43  ;;  %v8736_v25 = vmul.f32 0.5, %v13847_v34  ;;  %v11289_v10 = vld [vmem:[%s11617_s15 + $0x10] sm:$0xff]  ;;  %v11290_v16 = vld [vmem:[%s11617_s15] sm:$0xff]  ;;  %v11291_v17 = vld [vmem:[%s11617_s15 + $0x18] sm:$0xff] }
0x27ee   : > { %10498 = vmatpush3.bf16.msra.mxu1 %v8838_v63  ;;  %v8820_v0 = vmul.f32 %v8804_v55, %v8449_v47  ;;  %v8801_v11 = vmul.f32 %v8785_v27, %v8737_v22  ;;  %v8257_v63 = vpop.permute.xlu1 %8256 }
0x27ef   : > { %10499 = vmatprep.subr.bf16.mxu1 %v8837_v19  ;;  %v8819_v53 = vmul.f32 %v8803_v32, %v8444_v2  ;;  %v8262_v42 = vpop.permute.xlu0 %8261  ;;  %v8800_v54 = vmul.f32 %v8784_v30, %v8736_v25  ;;  %v8818_v44 = vmul.f32 %v8802_v14, %v8441_v51  ;;  %v8433_v56 = vadd.f32 %v13779_v12, %v8257_v63  ;;  %v11292_v32 = vld [vmem:[%s11617_s15 + $0x8] sm:$0xff] }
0x27f0   : > { %v8834_v61 = vpack.c.bf16 %v8821_v8, %v8820_v0  ;;  %v8436_v31 = vadd.f32 %v13789_v24, %v8262_v42 }
0x27f1   : > { %v8833_v13 = vpack.c.bf16 %v8819_v53, %v8818_v44  ;;  %v8816_v9 = vmul.f32 %v8800_v54, %v8433_v56 }
0x27f2   : > { %10500 = vmatpush3.bf16.msra.mxu1 %v8837_v19  ;;  %v8817_v21 = vmul.f32 %v8801_v11, %v8436_v31  ;;  %v8918_v58 = vpop.permute.xlu1 %8917 }
0x27f3   : > { %10501 = vmatprep.subr.bf16.mxu1 %v8836_v26  ;;  %v8923_v7 = vpop.permute.xlu0 %8922 }
0x27f4   : > { %v8832_v34 = vpack.c.bf16 %v8817_v21, %v8816_v9 }
0x27f6   : > { %10502 = vmatpush3.bf16.msra.mxu1 %v8836_v26  ;;  %v8908_v62 = vpop.permute.xlu1 %8907 }
0x27f7   : > { %10503 = vmatprep.subr.bf16.mxu1 %v8835_v35  ;;  %v8913_v39 = vpop.permute.xlu0 %8912 }
0x27fa   : > { %10504 = vmatpush3.bf16.msra.mxu1 %v8835_v35 }
0x27fb   : > { %10505 = vmatprep.subr.bf16.mxu1 %v8834_v61  ;;  %v8947_v4 = vpop.permute.xlu0 %8946 }
0x27fe   : > { %10506 = vmatpush3.bf16.msra.mxu1 %v8834_v61 }
0x27ff   : > { %10507 = vmatprep.subr.bf16.mxu1 %v8833_v13  ;;  %v8957_v48 = vpop.permute.xlu0 %8956 }
0x2802   : > { %10508 = vmatpush3.bf16.msra.mxu1 %v8833_v13 }
0x2803   : > { %10509 = vmatprep.subr.bf16.mxu1 %v8832_v34 }
0x2806   : > { %10510 = vmatpush3.bf16.msra.mxu1 %v8832_v34 }
0x2809   : > { %10512 = vmatmul.mubr.bf16.vlgmr.msra.gmra.mxu1 %v10690_v40 }
0x280a   : > { %10519 = vmatprep.mubr.msk.bf16.mxu1 %vm1030_vm1, %v10691_v15 }
0x28c9   : > { %v10513_v24 = vpop.f32.mrf.mxu1 }
0x28ca   : > { %v8903_v12 = vadd.f32 %v10513_v24, %v13726_v38 }
0x28cb   : > { %v8886_v6 = vpop.f32.mrf.mxu1 }
0x28cc   : > { %v8901_v33 = vadd.f32 %v8886_v6, %v13723_v5  ;;  %v8927_v19 = vadd.f32 %v8918_v58, %v8903_v12  ;;  %v10692_v5 = vld [vmem:[%s14062_s3 + $0x8] sm:$0xff]   ;;  %s992_s3 = scalar_lea.vmem [#allocation2], %s9156_s5  ;;  %s14063_s5 = sand.u32 1, %s11345_s1  }
0x28cd   : > { %v10514_v23 = vpop.f32.mrf.mxu1  ;;  %s9046_s6 = sshll.u32 %s992_s3, 4  ;;  %s13924_s0 = scalar_lea.sflag [#allocation3], %s14063_s5  ;;  %s13917_s6 = int_to_ptr.vmem [resolvable:$true] %s9046_s6 }
0x28ce   : > { %v8904_v1 = vadd.f32 %v10514_v23, %v13732_v41  ;;  %v8925_v59 = vadd.f32 %v8908_v62, %v8901_v33  ;;  %v8942_v41 = vpop.permute.xlu1 %8941  ;;  %s11293_s10 = scalar_lea.vmem %s13917_s6, 512  ;;  %p11300_p0 = scmp.lt.s32.totalorder %s13917_s6, %s11298_s12 }
0x28cf   : > { %v8889_v3 = vpop.f32.mrf.mxu1  ;;  %p11294_p11 = scmp.ne.s32.totalorder %s13917_s6, %s11293_s10  ;;  %p11301_p1 = scmp.lt.s32.totalorder %s11299_s13, %s11293_s10 }
0x28d0   : > { %v8928_v29 = vadd.f32 %v8923_v7, %v8904_v1  ;;  %v8902_v52 = vadd.f32 %v8889_v3, %v13728_v28 }
0x28d1   : > { %p11295_p12 = pnand %p11294_p11, %p11601_p5  ;;  %p11302_p2 = por %p11301_p1, %p11300_p0 }
0x28d2   : > { %v8926_v37 = vadd.f32 %v8913_v39, %v8902_v52  ;;  %v8934_v57 = vpack.c.bf16 %v8928_v29, %v8927_v19  ;;  %v8952_v28 = vpop.permute.xlu1 %8951 }
0x28d3   : > { %p11296_p13 = pneg %p11295_p12 }
0x28d4   : > { %10515 = vmatprep.subr.bf16.mxu1 %v8934_v57  ;;  %v8933_v38 = vpack.c.bf16 %v8926_v37, %v8925_v59 }
0x28d5   : > { %10516 = vmatpush3.bf16.msra.mxu1 %v8934_v57  ;;  %p11303_p3 = pnand %p11302_p2, %p11296_p13 }
0x28d6   : > { %10517 = vmatprep.subr.bf16.mxu1 %v8933_v38 }
0x28d9   : > { %10518 = vmatpush3.bf16.msra.mxu1 %v8933_v38 }
0x28dc   : > { %10520 = vmatmul.mubr.msk.bf16.vlgmr.msra.gmra.mxu1 %vm1030_vm1, %v10692_v5 }
0x299c   : > { %v10521_v50 = vpop.f32.mrf.mxu1 }
0x299d   : > { %v9018_v49 = vadd.f32 %v10521_v50, %v8952_v28 }
0x299e   : > { %v9009_v45 = vpop.f32.mrf.mxu1 }
0x299f   : > { %v9026_v20 = vadd.f32 %v11289_v10, %v9018_v49  ;;  %v9010_v26 = vadd.f32 %v9009_v45, %v8942_v41 }
0x29a0   : > { %v10522_v46 = vpop.f32.mrf.mxu1 }
0x29a1   : > { %9030 = vst.msk [vmem:[%s992_s3 + $0x10] sm:$0xff] %vm1017_vm0, %v9026_v20  ;;  %v9024_v55 = vadd.f32 %v11290_v16, %v9010_v26  ;;  %v9021_v18 = vadd.f32 %v10522_v46, %v8957_v48 }
0x29a2   : > { %v9012_v60 = vpop.f32.mrf.mxu1 }
0x29a3   : > { %9028 = vst.msk [vmem:[%s992_s3] sm:$0xff] %vm1017_vm0, %v9024_v55  ;;  %v9027_v43 = vadd.f32 %v11291_v17, %v9021_v18  ;;  %v9013_v47 = vadd.f32 %v9012_v60, %v8947_v4 }
0x29a5   : > { %9031 = vst.msk [vmem:[%s992_s3 + $0x18] sm:$0xff] %vm1017_vm0, %v9027_v43  ;;  %v9025_v27 = vadd.f32 %v11292_v32, %v9013_v47 }
0x29a7   : > { %9029 = vst.msk [vmem:[%s992_s3 + $0x8] sm:$0xff] %vm1017_vm0, %v9025_v27 }
0x29a8   : > { %11306 = shalt.err (!%p11303_p3)
}
0x29a9   : > { %s11307_s15 = scalar_lea.hbm %s13915_s8, 512  ;;  %s11311_s3 = scalar_lea.hbm %s11561_s9, 1024 }
0x29aa   : > { %p11308_p4 = scmp.ne.s32.totalorder %s13915_s8, %s11307_s15  ;;  %p11312_p9 = scmp.lt.s32.totalorder %s13915_s8, %s11561_s9 }
0x29ab   : > { %p11313_p10 = scmp.lt.s32.totalorder %s11311_s3, %s11307_s15 }
0x29ac   : > { %p11309_p7 = pnand %p11308_p4, %p11601_p5 }
0x29ad   : > { %p11314_p11 = por %p11313_p10, %p11312_p9 }
0x29ae   : > { %p11310_p8 = pneg %p11309_p7 }
0x29b0   : > { %p11315_p12 = pnand %p11314_p11, %p11310_p8 }
0x29b2   : > { %11318 = shalt.err (!%p11315_p12)
}
0x29b3   : > { %s11391_s12 = smov 128   ;;  %s11392_s10 = smov 8  }
0x29b4   : > { %10543 = dma.vmem_to_hbm [thread:$0]  (%p11601_p5), %s13917_s6, 512, %s13915_s8, %s13924_s0, %s11391_s12, %s11391_s12, %s11392_s10  }
0x29b5 PF: > { %p10549_p13 = scmp.ge.s32.totalorder %s11353_s7, 2  ;;  %s9061_s13 = sand.u32 1, %s11341_s28  }
0x29b6   : > { %s9062_s5 = scalar_lea.sflag [#allocation3], %s9061_s13 }
0x29b7   : > { %p10546_p0 = pnand %p10549_p13, %p11605_p6 }
0x29b9   : > { %p10547_p1 = pneg %p10546_p0 }
0x29bb   : > { %11336 = dma.done.wait (%p10547_p1), %s9062_s5, 512  }
0x29bc   : > { %11338 = vsyncadd (%p10547_p1), %s9062_s5, 4294966784  ;;  %p75_p2 = scmp.ge.s32.totalorder %s11588_s11, 4   ;;  %s14064_s28 = smov %s11345_s1 }
0x29bd   : > { %s14065_s1 = smov %s11349_s2  ;;  %s14066_s2 = smov %s11599_s18 }
0x29be   : > { %s14067_s7 = smov %s11588_s11  ;;  %77 = sbr.rel (!%p75_p2) target bundleno = 69 (0x45), region = 240 }
0x29c3   :  { %9067 = vsyncpa [#allocation3], 1 }
0x29c4   :  { %9069 = vsyncpa [#allocation3 + $0x1], 1 }

</bundles_post_ra>
